<compile_context>
chip_gen: v7x
topology: tpu7x:2x2x1
jax: 0.10.0
libtpu: 0.0.40
codegen_flags: <defaults>
</compile_context>

<pallas_src>
import functools

import jax
import jax.numpy as jnp
from jax.experimental import pallas as pl
from jax.experimental.pallas import tpu as pltpu

_SLOPE = 0.2
_EPS = 1e-5
_VMEM_LIMIT = 32 << 20      # portable: above v5e default, leaves headroom on v7x
_TILE_M_TARGET = 512        # rows / grid step (amortizes ~600-cycle step overhead)


def _choose_tile(m, target=_TILE_M_TARGET):
    """Pick an M tile and the zero-padded M that makes the grid exact."""
    if m <= target:
        return m, m
    m_pad = ((m + target - 1) // target) * target
    return target, m_pad


# ----------------------------------------------------------------------------
# Pallas kernels
# ----------------------------------------------------------------------------
def _matmul_act_kernel(p_ref, w_ref, o_ref, *, use_act):
    # bf16 x bf16 -> f32 accumulate on the MXU.
    y = jnp.dot(p_ref[...], w_ref[...], preferred_element_type=jnp.float32)
    if use_act:
        y = jnp.where(y >= 0, y, _SLOPE * y)      # leaky_relu(0.2) in f32 (VPU)
    o_ref[...] = y.astype(o_ref.dtype)


def _matmul_stats_kernel(p_ref, w_ref, y_ref, st_ref, *, valid_m, tile_m):
    i = pl.program_id(0)
    y = jnp.dot(p_ref[...], w_ref[...], preferred_element_type=jnp.float32)
    y_ref[...] = y.astype(y_ref.dtype)
    # Mask zero-padded rows so they do not pollute the batch statistics.
    rows = jax.lax.broadcasted_iota(jnp.int32, y.shape, 0) + i * tile_m
    ym = jnp.where(rows < valid_m, y, 0.0)
    s = jnp.sum(ym, axis=0, keepdims=True)         # (1, Cout)
    ss = jnp.sum(ym * ym, axis=0, keepdims=True)   # (1, Cout)
    st_ref[...] = jnp.concatenate([s, ss], axis=0)[None]   # (1, 2, Cout)


def _bn_act_kernel(y_ref, sc_ref, bi_ref, o_ref):
    # Normalization / activation math stays in f32 on the VPU (v5e: no bf16 VPU).
    z = y_ref[...].astype(jnp.float32) * sc_ref[...] + bi_ref[...]
    o_ref[...] = jnp.where(z >= 0, z, _SLOPE * z).astype(o_ref.dtype)


# ----------------------------------------------------------------------------
# pallas_call wrappers (M-tiled grids, resident weights)
# ----------------------------------------------------------------------------
def matmul_act_pallas(patches, w2, *, use_act):
    """patches: (M, K) bf16, w2: (K, Cout) bf16 -> (M, Cout) bf16."""
    M, K = patches.shape
    _, Cout = w2.shape
    tile_m, m_pad = _choose_tile(M)
    if m_pad != M:
        patches = jnp.pad(patches, ((0, m_pad - M), (0, 0)))
    grid_m = m_pad // tile_m
    out = pl.pallas_call(
        functools.partial(_matmul_act_kernel, use_act=use_act),
        out_shape=jax.ShapeDtypeStruct((m_pad, Cout), jnp.bfloat16),
        grid=(grid_m,),
        in_specs=[
            pl.BlockSpec((tile_m, K), lambda i: (i, 0)),
            pl.BlockSpec((K, Cout), lambda i: (0, 0)),     # weights resident
        ],
        out_specs=pl.BlockSpec((tile_m, Cout), lambda i: (i, 0)),
        compiler_params=pltpu.CompilerParams(
            dimension_semantics=("parallel",),
            vmem_limit_bytes=_VMEM_LIMIT,
        ),
    )(patches, w2)
    return out[:M] if m_pad != M else out


def conv_bn_act_pallas(patches, w2):
    """Fused conv-matmul + BatchNorm(batch stats, affine=False) + leaky_relu.

    Pass 1: tiled matmul + per-tile partial sum / sumsq.
    Pass 2: tiny per-channel reduction in XLA, then a tiled elementwise kernel.
    """
    M, K = patches.shape
    _, Cout = w2.shape
    tile_m, m_pad = _choose_tile(M)
    if m_pad != M:
        patches = jnp.pad(patches, ((0, m_pad - M), (0, 0)))
    grid_m = m_pad // tile_m

    y, stats = pl.pallas_call(
        functools.partial(_matmul_stats_kernel, valid_m=M, tile_m=tile_m),
        out_shape=(
            jax.ShapeDtypeStruct((m_pad, Cout), jnp.bfloat16),
            jax.ShapeDtypeStruct((grid_m, 2, Cout), jnp.float32),
        ),
        grid=(grid_m,),
        in_specs=[
            pl.BlockSpec((tile_m, K), lambda i: (i, 0)),
            pl.BlockSpec((K, Cout), lambda i: (0, 0)),     # weights resident
        ],
        out_specs=(
            pl.BlockSpec((tile_m, Cout), lambda i: (i, 0)),
            pl.BlockSpec((1, 2, Cout), lambda i: (i, 0, 0)),
        ),
        compiler_params=pltpu.CompilerParams(
            dimension_semantics=("parallel",),
            vmem_limit_bytes=_VMEM_LIMIT,
        ),
    )(patches, w2)

    # Finalize batch stats (tiny per-channel math — leave to XLA).
    tot = jnp.sum(stats, axis=0)                           # (2, Cout)
    mean = tot[0] / M
    var = jnp.maximum(tot[1] / M - mean * mean, 0.0)       # biased variance (torch train mode)
    inv = jax.lax.rsqrt(var + _EPS)
    scale = inv[None, :].astype(jnp.float32)               # (1, Cout)
    bias = (-mean * inv)[None, :].astype(jnp.float32)      # (1, Cout)

    out = pl.pallas_call(
        _bn_act_kernel,
        out_shape=jax.ShapeDtypeStruct((m_pad, Cout), jnp.bfloat16),
        grid=(grid_m,),
        in_specs=[
            pl.BlockSpec((tile_m, Cout), lambda i: (i, 0)),
            pl.BlockSpec((1, Cout), lambda i: (0, 0)),
            pl.BlockSpec((1, Cout), lambda i: (0, 0)),
        ],
        out_specs=pl.BlockSpec((tile_m, Cout), lambda i: (i, 0)),
        compiler_params=pltpu.CompilerParams(
            dimension_semantics=("parallel",),
            vmem_limit_bytes=_VMEM_LIMIT,
        ),
    )(y, scale, bias)
    return out[:M] if m_pad != M else out


# ----------------------------------------------------------------------------
# Plain-JAX glue: NHWC im2col (data movement only) + weight reshaping
# ----------------------------------------------------------------------------
# TODO(synk): an in-kernel patch gather (scalar-prefetch / Element index_map)
# would avoid materializing the k*k/stride^2-duplicated patches in HBM.
def im2col_nhwc(x, k, stride, pad):
    """x: (N, H, W, C) -> patches (N*OH*OW, k*k*C), K ordered (kh, kw, c)."""
    N, H, W, C = x.shape
    if pad:
        x = jnp.pad(x, ((0, 0), (pad, pad), (pad, pad), (0, 0)))
    OH = (H + 2 * pad - k) // stride + 1
    OW = (W + 2 * pad - k) // stride + 1
    cols = []
    for ki in range(k):
        for kj in range(k):
            cols.append(
                x[:, ki: ki + stride * (OH - 1) + 1: stride,
                     kj: kj + stride * (OW - 1) + 1: stride, :]
            )  # (N, OH, OW, C)
    pat = jnp.stack(cols, axis=3)                 # (N, OH, OW, k*k, C)
    pat = pat.reshape(N * OH * OW, k * k * C)
    return pat, OH, OW


def w_to_matrix(w):
    """(Cout, Cin, kh, kw) torch layout -> (kh*kw*Cin, Cout) matching im2col order."""
    co, ci, kh, kw = w.shape
    return jnp.transpose(w, (2, 3, 1, 0)).reshape(kh * kw * ci, co)


# ----------------------------------------------------------------------------
# NetD forward
# ----------------------------------------------------------------------------
def init_params(key):
    ks = jax.random.split(key, 5)
    scale = 0.02
    return {
        "conv1": scale * jax.random.normal(ks[0], (64, 3, 4, 4), jnp.float32),
        "conv2": scale * jax.random.normal(ks[1], (128, 64, 4, 4), jnp.float32),
        "conv3": scale * jax.random.normal(ks[2], (256, 128, 4, 4), jnp.float32),
        "conv4": scale * jax.random.normal(ks[3], (512, 256, 4, 4), jnp.float32),
        "conv5": scale * jax.random.normal(ks[4], (1, 512, 3, 3), jnp.float32),
    }


@jax.jit
def netd_forward(x_nchw, params):
    N = x_nchw.shape[0]
    x = jnp.transpose(x_nchw, (0, 2, 3, 1))        # single NCHW->NHWC at entry

    # conv1 (3->64, k4 s2 p1) + leaky_relu; Cout padded 64->128 for lane-dense stores
    w1 = w_to_matrix(params["conv1"])              # (48, 64)
    w1 = jnp.pad(w1, ((0, 0), (0, 128 - w1.shape[1]))).astype(jnp.bfloat16)
    p, OH, OW = im2col_nhwc(x, 4, 2, 1)
    y = matmul_act_pallas(p.astype(jnp.bfloat16), w1, use_act=True)
    x = y[:, :64].reshape(N, OH, OW, 64)

    # conv2/3/4 (k4 s2 p1) + BatchNorm(batch stats, affine=False) + leaky_relu
    for name, cout in (("conv2", 128), ("conv3", 256), ("conv4", 512)):
        w = w_to_matrix(params[name]).astype(jnp.bfloat16)
        p, OH, OW = im2col_nhwc(x, 4, 2, 1)
        y = conv_bn_act_pallas(p.astype(jnp.bfloat16), w)
        x = y.reshape(N, OH, OW, cout)

    # conv5 (512->1, k3 s2 p0): M=N, Cout=1 — tiny GEMV, done as plain jnp.dot.
    w5 = w_to_matrix(params["conv5"]).astype(jnp.bfloat16)   # (4608, 1)
    p, OH, OW = im2col_nhwc(x, 3, 2, 0)
    y = jnp.dot(p.astype(jnp.bfloat16), w5, preferred_element_type=jnp.float32)
    y = y.reshape(N, OH, OW, 1).transpose(0, 3, 1, 2)        # NCHW, matches torch
    return jnp.squeeze(y)                                    # (N,1,1,1) -> (N,)


if __name__ == "__main__":
    key = jax.random.PRNGKey(0)
    k_in, k_par = jax.random.split(key)
    # Smallest spatial size keeping all strided convs valid: 48->24->12->6->3->1
    x = jax.random.normal(k_in, (2, 3, 48, 48), jnp.float32)
    params = init_params(k_par)

    out = netd_forward(x, params)
    out = jax.block_until_ready(out)
    assert out.shape == (2,), out.shape
    assert jnp.all(jnp.isfinite(out))
    print("KERNEL_OK")
</pallas_src>

<mosaic_0001>
module attributes {stable_mosaic.version = 11 : i64} {
  func.func @_matmul_act_kernel(%arg0: i32, %arg1: memref<512x48xbf16, #tpu.memory_space<vmem>>, %arg2: memref<48x128xbf16, #tpu.memory_space<vmem>>, %arg3: memref<512x128xbf16, #tpu.memory_space<vmem>>) attributes {dimension_semantics = [#tpu.dimension_semantics<parallel>], iteration_bounds = array<i64: 3>, scalar_prefetch = 0 : i64, scratch_operands = 0 : i64, tpu.core_type = #tpu.core_type<tc>, window_params = [{transform_indices = @transform_0, window_bounds = array<i64: 512, 48>}, {pipeline_mode = #tpu.pipeline_mode<synchronous>, transform_indices = @transform_1, window_bounds = array<i64: 48, 128>}, {transform_indices = @transform_2, window_bounds = array<i64: 512, 128>}]} {
    %c0 = arith.constant 0 : index
    %c0_0 = arith.constant 0 : index
    %0 = vector.load %arg1[%c0, %c0_0] : memref<512x48xbf16, #tpu.memory_space<vmem>>, vector<512x48xbf16>
    %c0_1 = arith.constant 0 : index
    %c0_2 = arith.constant 0 : index
    %1 = vector.load %arg2[%c0_1, %c0_2] : memref<48x128xbf16, #tpu.memory_space<vmem>>, vector<48x128xbf16>
    %cst = arith.constant dense<0.000000e+00> : vector<512x128xf32>
    %2 = tpu.matmul %0, %1, %cst {dimension_numbers = #tpu.dot_dimension_numbers<[1], [0], [0], [1], [0, 0, 1, 1], [], []>} : vector<512x48xbf16>, vector<48x128xbf16>, vector<512x128xf32> -> vector<512x128xf32>
    %cst_3 = arith.constant 0.000000e+00 : f32
    %3 = vector.broadcast %cst_3 : f32 to vector<512x128xf32>
    %4 = arith.cmpf oge, %2, %3 : vector<512x128xf32>
    %cst_4 = arith.constant 2.000000e-01 : f32
    %5 = vector.broadcast %cst_4 : f32 to vector<512x128xf32>
    %6 = arith.mulf %5, %2 : vector<512x128xf32>
    %7 = arith.select %4, %2, %6 : vector<512x128xi1>, vector<512x128xf32>
    %8 = arith.truncf %7 : vector<512x128xf32> to vector<512x128xbf16>
    %c0_5 = arith.constant 0 : index
    %c0_6 = arith.constant 0 : index
    %9 = vector.load %arg3[%c0_5, %c0_6] : memref<512x128xbf16, #tpu.memory_space<vmem>>, vector<512x128xbf16>
    tpu.vector_store %arg3[%c0_5, %c0_6], %8 {strides = array<i32>} : memref<512x128xbf16, #tpu.memory_space<vmem>>, vector<512x128xbf16>,
    return
  }
  func.func @transform_0(%arg0: i32) -> (i32, i32) {
    %c0_i32 = arith.constant 0 : i32
    %c0_i32_0 = arith.constant 0 : i32
    return %arg0, %c0_i32 : i32, i32
  }
  func.func @transform_1(%arg0: i32) -> (i32, i32) {
    %c0_i32 = arith.constant 0 : i32
    %c0_i32_0 = arith.constant 0 : i32
    %c0_i32_1 = arith.constant 0 : i32
    return %c0_i32, %c0_i32_0 : i32, i32
  }
  func.func @transform_2(%arg0: i32) -> (i32, i32) {
    %c0_i32 = arith.constant 0 : i32
    %c0_i32_0 = arith.constant 0 : i32
    return %arg0, %c0_i32 : i32, i32
  }
}

module attributes {stable_mosaic.version = 11 : i64} {
  func.func @_matmul_stats_kernel(%arg0: i32, %arg1: memref<288x1024xbf16, #tpu.memory_space<vmem>>, %arg2: memref<1024x128xbf16, #tpu.memory_space<vmem>>, %arg3: memref<288x128xbf16, #tpu.memory_space<vmem>>, %arg4: memref<1x2x128xf32, #tpu.memory_space<vmem>>) attributes {dimension_semantics = [#tpu.dimension_semantics<parallel>], iteration_bounds = array<i64: 1>, scalar_prefetch = 0 : i64, scratch_operands = 0 : i64, tpu.core_type = #tpu.core_type<tc>, window_params = [{transform_indices = @transform_0, window_bounds = array<i64: 288, 1024>}, {pipeline_mode = #tpu.pipeline_mode<synchronous>, transform_indices = @transform_1, window_bounds = array<i64: 1024, 128>}, {transform_indices = @transform_2, window_bounds = array<i64: 288, 128>}, {transform_indices = @transform_3, window_bounds = array<i64: 1, 2, 128>}]} {
    %c0 = arith.constant 0 : index
    %c0_0 = arith.constant 0 : index
    %0 = vector.load %arg1[%c0, %c0_0] : memref<288x1024xbf16, #tpu.memory_space<vmem>>, vector<288x1024xbf16>
    %c0_1 = arith.constant 0 : index
    %c0_2 = arith.constant 0 : index
    %1 = vector.load %arg2[%c0_1, %c0_2] : memref<1024x128xbf16, #tpu.memory_space<vmem>>, vector<1024x128xbf16>
    %cst = arith.constant dense<0.000000e+00> : vector<288x128xf32>
    %2 = tpu.matmul %0, %1, %cst {dimension_numbers = #tpu.dot_dimension_numbers<[1], [0], [0], [1], [0, 0, 1, 1], [], []>} : vector<288x1024xbf16>, vector<1024x128xbf16>, vector<288x128xf32> -> vector<288x128xf32>
    %3 = arith.truncf %2 : vector<288x128xf32> to vector<288x128xbf16>
    %c0_3 = arith.constant 0 : index
    %c0_4 = arith.constant 0 : index
    %4 = vector.load %arg3[%c0_3, %c0_4] : memref<288x128xbf16, #tpu.memory_space<vmem>>, vector<288x128xbf16>
    tpu.vector_store %arg3[%c0_3, %c0_4], %3 {strides = array<i32>} : memref<288x128xbf16, #tpu.memory_space<vmem>>, vector<288x128xbf16>,
    %5 = tpu.iota {dimensions = array<i32: 0>} : vector<288x128xi32>
    %c288_i32 = arith.constant 288 : i32
    %6 = arith.muli %arg0, %c288_i32 : i32
    %7 = vector.broadcast %6 : i32 to vector<288x128xi32>
    %8 = arith.addi %5, %7 : vector<288x128xi32>
    %c288_i32_5 = arith.constant 288 : i32
    %9 = vector.broadcast %c288_i32_5 : i32 to vector<288x128xi32>
    %10 = arith.cmpi slt, %8, %9 : vector<288x128xi32>
    %cst_6 = arith.constant 0.000000e+00 : f32
    %11 = vector.broadcast %cst_6 : f32 to vector<288x128xf32>
    %12 = arith.select %10, %2, %11 : vector<288x128xi1>, vector<288x128xf32>
    %cst_7 = arith.constant dense<0.000000e+00> : vector<128xf32>
    %13 = vector.multi_reduction <add>, %12, %cst_7 [0] : vector<288x128xf32> to vector<128xf32>
    %14 = vector.shape_cast %13 : vector<128xf32> to vector<1x128xf32>
    %15 = arith.mulf %12, %12 : vector<288x128xf32>
    %cst_8 = arith.constant dense<0.000000e+00> : vector<128xf32>
    %16 = vector.multi_reduction <add>, %15, %cst_8 [0] : vector<288x128xf32> to vector<128xf32>
    %17 = vector.shape_cast %16 : vector<128xf32> to vector<1x128xf32>
    %18 = tpu.concatenate %14, %17 in 0 : vector<1x128xf32>, vector<1x128xf32> -> vector<2x128xf32>
    %19 = vector.shape_cast %18 : vector<2x128xf32> to vector<1x2x128xf32>
    %c0_9 = arith.constant 0 : index
    %c0_10 = arith.constant 0 : index
    %c0_11 = arith.constant 0 : index
    %20 = vector.load %arg4[%c0_9, %c0_10, %c0_11] : memref<1x2x128xf32, #tpu.memory_space<vmem>>, vector<1x2x128xf32>
    tpu.vector_store %arg4[%c0_9, %c0_10, %c0_11], %19 {strides = array<i32>} : memref<1x2x128xf32, #tpu.memory_space<vmem>>, vector<1x2x128xf32>,
    return
  }
  func.func @transform_0(%arg0: i32) -> (i32, i32) {
    %c0_i32 = arith.constant 0 : i32
    %c0_i32_0 = arith.constant 0 : i32
    return %arg0, %c0_i32 : i32, i32
  }
  func.func @transform_1(%arg0: i32) -> (i32, i32) {
    %c0_i32 = arith.constant 0 : i32
    %c0_i32_0 = arith.constant 0 : i32
    %c0_i32_1 = arith.constant 0 : i32
    return %c0_i32, %c0_i32_0 : i32, i32
  }
  func.func @transform_2(%arg0: i32) -> (i32, i32) {
    %c0_i32 = arith.constant 0 : i32
    %c0_i32_0 = arith.constant 0 : i32
    return %arg0, %c0_i32 : i32, i32
  }
  func.func @transform_3(%arg0: i32) -> (i32, i32, i32) {
    %c0_i32 = arith.constant 0 : i32
    %c0_i32_0 = arith.constant 0 : i32
    %c0_i32_1 = arith.constant 0 : i32
    return %arg0, %c0_i32, %c0_i32_0 : i32, i32, i32
  }
}

module attributes {stable_mosaic.version = 11 : i64} {
  func.func @_bn_act_kernel(%arg0: i32, %arg1: memref<288x128xbf16, #tpu.memory_space<vmem>>, %arg2: memref<1x128xf32, #tpu.memory_space<vmem>>, %arg3: memref<1x128xf32, #tpu.memory_space<vmem>>, %arg4: memref<288x128xbf16, #tpu.memory_space<vmem>>) attributes {dimension_semantics = [#tpu.dimension_semantics<parallel>], iteration_bounds = array<i64: 1>, scalar_prefetch = 0 : i64, scratch_operands = 0 : i64, tpu.core_type = #tpu.core_type<tc>, window_params = [{transform_indices = @transform_0, window_bounds = array<i64: 288, 128>}, {pipeline_mode = #tpu.pipeline_mode<synchronous>, transform_indices = @transform_1, window_bounds = array<i64: 1, 128>}, {pipeline_mode = #tpu.pipeline_mode<synchronous>, transform_indices = @transform_2, window_bounds = array<i64: 1, 128>}, {transform_indices = @transform_3, window_bounds = array<i64: 288, 128>}]} {
    %c0 = arith.constant 0 : index
    %c0_0 = arith.constant 0 : index
    %0 = vector.load %arg1[%c0, %c0_0] : memref<288x128xbf16, #tpu.memory_space<vmem>>, vector<288x128xbf16>
    %1 = arith.extf %0 : vector<288x128xbf16> to vector<288x128xf32>
    %c0_1 = arith.constant 0 : index
    %c0_2 = arith.constant 0 : index
    %2 = vector.load %arg2[%c0_1, %c0_2] : memref<1x128xf32, #tpu.memory_space<vmem>>, vector<1x128xf32>
    %3 = vector.broadcast %2 : vector<1x128xf32> to vector<288x128xf32>
    %4 = arith.mulf %1, %3 : vector<288x128xf32>
    %c0_3 = arith.constant 0 : index
    %c0_4 = arith.constant 0 : index
    %5 = vector.load %arg3[%c0_3, %c0_4] : memref<1x128xf32, #tpu.memory_space<vmem>>, vector<1x128xf32>
    %6 = vector.broadcast %5 : vector<1x128xf32> to vector<288x128xf32>
    %7 = arith.addf %4, %6 : vector<288x128xf32>
    %cst = arith.constant 0.000000e+00 : f32
    %8 = vector.broadcast %cst : f32 to vector<288x128xf32>
    %9 = arith.cmpf oge, %7, %8 : vector<288x128xf32>
    %cst_5 = arith.constant 2.000000e-01 : f32
    %10 = vector.broadcast %cst_5 : f32 to vector<288x128xf32>
    %11 = arith.mulf %10, %7 : vector<288x128xf32>
    %12 = arith.select %9, %7, %11 : vector<288x128xi1>, vector<288x128xf32>
    %13 = arith.truncf %12 : vector<288x128xf32> to vector<288x128xbf16>
    %c0_6 = arith.constant 0 : index
    %c0_7 = arith.constant 0 : index
    %14 = vector.load %arg4[%c0_6, %c0_7] : memref<288x128xbf16, #tpu.memory_space<vmem>>, vector<288x128xbf16>
    tpu.vector_store %arg4[%c0_6, %c0_7], %13 {strides = array<i32>} : memref<288x128xbf16, #tpu.memory_space<vmem>>, vector<288x128xbf16>,
    return
  }
  func.func @transform_0(%arg0: i32) -> (i32, i32) {
    %c0_i32 = arith.constant 0 : i32
    %c0_i32_0 = arith.constant 0 : i32
    return %arg0, %c0_i32 : i32, i32
  }
  func.func @transform_1(%arg0: i32) -> (i32, i32) {
    %c0_i32 = arith.constant 0 : i32
    %c0_i32_0 = arith.constant 0 : i32
    %c0_i32_1 = arith.constant 0 : i32
    return %c0_i32, %c0_i32_0 : i32, i32
  }
  func.func @transform_2(%arg0: i32) -> (i32, i32) {
    %c0_i32 = arith.constant 0 : i32
    %c0_i32_0 = arith.constant 0 : i32
    %c0_i32_1 = arith.constant 0 : i32
    return %c0_i32, %c0_i32_0 : i32, i32
  }
  func.func @transform_3(%arg0: i32) -> (i32, i32) {
    %c0_i32 = arith.constant 0 : i32
    %c0_i32_0 = arith.constant 0 : i32
    return %arg0, %c0_i32 : i32, i32
  }
}

module attributes {stable_mosaic.version = 11 : i64} {
  func.func @_matmul_stats_kernel(%arg0: i32, %arg1: memref<72x2048xbf16, #tpu.memory_space<vmem>>, %arg2: memref<2048x256xbf16, #tpu.memory_space<vmem>>, %arg3: memref<72x256xbf16, #tpu.memory_space<vmem>>, %arg4: memref<1x2x256xf32, #tpu.memory_space<vmem>>) attributes {dimension_semantics = [#tpu.dimension_semantics<parallel>], iteration_bounds = array<i64: 1>, scalar_prefetch = 0 : i64, scratch_operands = 0 : i64, tpu.core_type = #tpu.core_type<tc>, window_params = [{transform_indices = @transform_0, window_bounds = array<i64: 72, 2048>}, {pipeline_mode = #tpu.pipeline_mode<synchronous>, transform_indices = @transform_1, window_bounds = array<i64: 2048, 256>}, {transform_indices = @transform_2, window_bounds = array<i64: 72, 256>}, {transform_indices = @transform_3, window_bounds = array<i64: 1, 2, 256>}]} {
    %c0 = arith.constant 0 : index
    %c0_0 = arith.constant 0 : index
    %0 = vector.load %arg1[%c0, %c0_0] : memref<72x2048xbf16, #tpu.memory_space<vmem>>, vector<72x2048xbf16>
    %c0_1 = arith.constant 0 : index
    %c0_2 = arith.constant 0 : index
    %1 = vector.load %arg2[%c0_1, %c0_2] : memref<2048x256xbf16, #tpu.memory_space<vmem>>, vector<2048x256xbf16>
    %cst = arith.constant dense<0.000000e+00> : vector<72x256xf32>
    %2 = tpu.matmul %0, %1, %cst {dimension_numbers = #tpu.dot_dimension_numbers<[1], [0], [0], [1], [0, 0, 1, 1], [], []>} : vector<72x2048xbf16>, vector<2048x256xbf16>, vector<72x256xf32> -> vector<72x256xf32>
    %3 = arith.truncf %2 : vector<72x256xf32> to vector<72x256xbf16>
    %c0_3 = arith.constant 0 : index
    %c0_4 = arith.constant 0 : index
    %4 = vector.load %arg3[%c0_3, %c0_4] : memref<72x256xbf16, #tpu.memory_space<vmem>>, vector<72x256xbf16>
    tpu.vector_store %arg3[%c0_3, %c0_4], %3 {strides = array<i32>} : memref<72x256xbf16, #tpu.memory_space<vmem>>, vector<72x256xbf16>,
    %5 = tpu.iota {dimensions = array<i32: 0>} : vector<72x256xi32>
    %c72_i32 = arith.constant 72 : i32
    %6 = arith.muli %arg0, %c72_i32 : i32
    %7 = vector.broadcast %6 : i32 to vector<72x256xi32>
    %8 = arith.addi %5, %7 : vector<72x256xi32>
    %c72_i32_5 = arith.constant 72 : i32
    %9 = vector.broadcast %c72_i32_5 : i32 to vector<72x256xi32>
    %10 = arith.cmpi slt, %8, %9 : vector<72x256xi32>
    %cst_6 = arith.constant 0.000000e+00 : f32
    %11 = vector.broadcast %cst_6 : f32 to vector<72x256xf32>
    %12 = arith.select %10, %2, %11 : vector<72x256xi1>, vector<72x256xf32>
    %cst_7 = arith.constant dense<0.000000e+00> : vector<256xf32>
    %13 = vector.multi_reduction <add>, %12, %cst_7 [0] : vector<72x256xf32> to vector<256xf32>
    %14 = vector.shape_cast %13 : vector<256xf32> to vector<1x256xf32>
    %15 = arith.mulf %12, %12 : vector<72x256xf32>
    %cst_8 = arith.constant dense<0.000000e+00> : vector<256xf32>
    %16 = vector.multi_reduction <add>, %15, %cst_8 [0] : vector<72x256xf32> to vector<256xf32>
    %17 = vector.shape_cast %16 : vector<256xf32> to vector<1x256xf32>
    %18 = tpu.concatenate %14, %17 in 0 : vector<1x256xf32>, vector<1x256xf32> -> vector<2x256xf32>
    %19 = vector.shape_cast %18 : vector<2x256xf32> to vector<1x2x256xf32>
    %c0_9 = arith.constant 0 : index
    %c0_10 = arith.constant 0 : index
    %c0_11 = arith.constant 0 : index
    %20 = vector.load %arg4[%c0_9, %c0_10, %c0_11] : memref<1x2x256xf32, #tpu.memory_space<vmem>>, vector<1x2x256xf32>
    tpu.vector_store %arg4[%c0_9, %c0_10, %c0_11], %19 {strides = array<i32>} : memref<1x2x256xf32, #tpu.memory_space<vmem>>, vector<1x2x256xf32>,
    return
  }
  func.func @transform_0(%arg0: i32) -> (i32, i32) {
    %c0_i32 = arith.constant 0 : i32
    %c0_i32_0 = arith.constant 0 : i32
    return %arg0, %c0_i32 : i32, i32
  }
  func.func @transform_1(%arg0: i32) -> (i32, i32) {
    %c0_i32 = arith.constant 0 : i32
    %c0_i32_0 = arith.constant 0 : i32
    %c0_i32_1 = arith.constant 0 : i32
    return %c0_i32, %c0_i32_0 : i32, i32
  }
  func.func @transform_2(%arg0: i32) -> (i32, i32) {
    %c0_i32 = arith.constant 0 : i32
    %c0_i32_0 = arith.constant 0 : i32
    return %arg0, %c0_i32 : i32, i32
  }
  func.func @transform_3(%arg0: i32) -> (i32, i32, i32) {
    %c0_i32 = arith.constant 0 : i32
    %c0_i32_0 = arith.constant 0 : i32
    %c0_i32_1 = arith.constant 0 : i32
    return %arg0, %c0_i32, %c0_i32_0 : i32, i32, i32
  }
}

module attributes {stable_mosaic.version = 11 : i64} {
  func.func @_bn_act_kernel(%arg0: i32, %arg1: memref<72x256xbf16, #tpu.memory_space<vmem>>, %arg2: memref<1x256xf32, #tpu.memory_space<vmem>>, %arg3: memref<1x256xf32, #tpu.memory_space<vmem>>, %arg4: memref<72x256xbf16, #tpu.memory_space<vmem>>) attributes {dimension_semantics = [#tpu.dimension_semantics<parallel>], iteration_bounds = array<i64: 1>, scalar_prefetch = 0 : i64, scratch_operands = 0 : i64, tpu.core_type = #tpu.core_type<tc>, window_params = [{transform_indices = @transform_0, window_bounds = array<i64: 72, 256>}, {pipeline_mode = #tpu.pipeline_mode<synchronous>, transform_indices = @transform_1, window_bounds = array<i64: 1, 256>}, {pipeline_mode = #tpu.pipeline_mode<synchronous>, transform_indices = @transform_2, window_bounds = array<i64: 1, 256>}, {transform_indices = @transform_3, window_bounds = array<i64: 72, 256>}]} {
    %c0 = arith.constant 0 : index
    %c0_0 = arith.constant 0 : index
    %0 = vector.load %arg1[%c0, %c0_0] : memref<72x256xbf16, #tpu.memory_space<vmem>>, vector<72x256xbf16>
    %1 = arith.extf %0 : vector<72x256xbf16> to vector<72x256xf32>
    %c0_1 = arith.constant 0 : index
    %c0_2 = arith.constant 0 : index
    %2 = vector.load %arg2[%c0_1, %c0_2] : memref<1x256xf32, #tpu.memory_space<vmem>>, vector<1x256xf32>
    %3 = vector.broadcast %2 : vector<1x256xf32> to vector<72x256xf32>
    %4 = arith.mulf %1, %3 : vector<72x256xf32>
    %c0_3 = arith.constant 0 : index
    %c0_4 = arith.constant 0 : index
    %5 = vector.load %arg3[%c0_3, %c0_4] : memref<1x256xf32, #tpu.memory_space<vmem>>, vector<1x256xf32>
    %6 = vector.broadcast %5 : vector<1x256xf32> to vector<72x256xf32>
    %7 = arith.addf %4, %6 : vector<72x256xf32>
    %cst = arith.constant 0.000000e+00 : f32
    %8 = vector.broadcast %cst : f32 to vector<72x256xf32>
    %9 = arith.cmpf oge, %7, %8 : vector<72x256xf32>
    %cst_5 = arith.constant 2.000000e-01 : f32
    %10 = vector.broadcast %cst_5 : f32 to vector<72x256xf32>
    %11 = arith.mulf %10, %7 : vector<72x256xf32>
    %12 = arith.select %9, %7, %11 : vector<72x256xi1>, vector<72x256xf32>
    %13 = arith.truncf %12 : vector<72x256xf32> to vector<72x256xbf16>
    %c0_6 = arith.constant 0 : index
    %c0_7 = arith.constant 0 : index
    %14 = vector.load %arg4[%c0_6, %c0_7] : memref<72x256xbf16, #tpu.memory_space<vmem>>, vector<72x256xbf16>
    tpu.vector_store %arg4[%c0_6, %c0_7], %13 {strides = array<i32>} : memref<72x256xbf16, #tpu.memory_space<vmem>>, vector<72x256xbf16>,
    return
  }
  func.func @transform_0(%arg0: i32) -> (i32, i32) {
    %c0_i32 = arith.constant 0 : i32
    %c0_i32_0 = arith.constant 0 : i32
    return %arg0, %c0_i32 : i32, i32
  }
  func.func @transform_1(%arg0: i32) -> (i32, i32) {
    %c0_i32 = arith.constant 0 : i32
    %c0_i32_0 = arith.constant 0 : i32
    %c0_i32_1 = arith.constant 0 : i32
    return %c0_i32, %c0_i32_0 : i32, i32
  }
  func.func @transform_2(%arg0: i32) -> (i32, i32) {
    %c0_i32 = arith.constant 0 : i32
    %c0_i32_0 = arith.constant 0 : i32
    %c0_i32_1 = arith.constant 0 : i32
    return %c0_i32, %c0_i32_0 : i32, i32
  }
  func.func @transform_3(%arg0: i32) -> (i32, i32) {
    %c0_i32 = arith.constant 0 : i32
    %c0_i32_0 = arith.constant 0 : i32
    return %arg0, %c0_i32 : i32, i32
  }
}

module attributes {stable_mosaic.version = 11 : i64} {
  func.func @_matmul_stats_kernel(%arg0: i32, %arg1: memref<18x4096xbf16, #tpu.memory_space<vmem>>, %arg2: memref<4096x512xbf16, #tpu.memory_space<vmem>>, %arg3: memref<18x512xbf16, #tpu.memory_space<vmem>>, %arg4: memref<1x2x512xf32, #tpu.memory_space<vmem>>) attributes {dimension_semantics = [#tpu.dimension_semantics<parallel>], iteration_bounds = array<i64: 1>, scalar_prefetch = 0 : i64, scratch_operands = 0 : i64, tpu.core_type = #tpu.core_type<tc>, window_params = [{transform_indices = @transform_0, window_bounds = array<i64: 18, 4096>}, {pipeline_mode = #tpu.pipeline_mode<synchronous>, transform_indices = @transform_1, window_bounds = array<i64: 4096, 512>}, {transform_indices = @transform_2, window_bounds = array<i64: 18, 512>}, {transform_indices = @transform_3, window_bounds = array<i64: 1, 2, 512>}]} {
    %c0 = arith.constant 0 : index
    %c0_0 = arith.constant 0 : index
    %0 = vector.load %arg1[%c0, %c0_0] : memref<18x4096xbf16, #tpu.memory_space<vmem>>, vector<18x4096xbf16>
    %c0_1 = arith.constant 0 : index
    %c0_2 = arith.constant 0 : index
    %1 = vector.load %arg2[%c0_1, %c0_2] : memref<4096x512xbf16, #tpu.memory_space<vmem>>, vector<4096x512xbf16>
    %cst = arith.constant dense<0.000000e+00> : vector<18x512xf32>
    %2 = tpu.matmul %0, %1, %cst {dimension_numbers = #tpu.dot_dimension_numbers<[1], [0], [0], [1], [0, 0, 1, 1], [], []>} : vector<18x4096xbf16>, vector<4096x512xbf16>, vector<18x512xf32> -> vector<18x512xf32>
    %3 = arith.truncf %2 : vector<18x512xf32> to vector<18x512xbf16>
    %c0_3 = arith.constant 0 : index
    %c0_4 = arith.constant 0 : index
    %4 = vector.load %arg3[%c0_3, %c0_4] : memref<18x512xbf16, #tpu.memory_space<vmem>>, vector<18x512xbf16>
    tpu.vector_store %arg3[%c0_3, %c0_4], %3 {strides = array<i32>} : memref<18x512xbf16, #tpu.memory_space<vmem>>, vector<18x512xbf16>,
    %5 = tpu.iota {dimensions = array<i32: 0>} : vector<18x512xi32>
    %c18_i32 = arith.constant 18 : i32
    %6 = arith.muli %arg0, %c18_i32 : i32
    %7 = vector.broadcast %6 : i32 to vector<18x512xi32>
    %8 = arith.addi %5, %7 : vector<18x512xi32>
    %c18_i32_5 = arith.constant 18 : i32
    %9 = vector.broadcast %c18_i32_5 : i32 to vector<18x512xi32>
    %10 = arith.cmpi slt, %8, %9 : vector<18x512xi32>
    %cst_6 = arith.constant 0.000000e+00 : f32
    %11 = vector.broadcast %cst_6 : f32 to vector<18x512xf32>
    %12 = arith.select %10, %2, %11 : vector<18x512xi1>, vector<18x512xf32>
    %cst_7 = arith.constant dense<0.000000e+00> : vector<512xf32>
    %13 = vector.multi_reduction <add>, %12, %cst_7 [0] : vector<18x512xf32> to vector<512xf32>
    %14 = vector.shape_cast %13 : vector<512xf32> to vector<1x512xf32>
    %15 = arith.mulf %12, %12 : vector<18x512xf32>
    %cst_8 = arith.constant dense<0.000000e+00> : vector<512xf32>
    %16 = vector.multi_reduction <add>, %15, %cst_8 [0] : vector<18x512xf32> to vector<512xf32>
    %17 = vector.shape_cast %16 : vector<512xf32> to vector<1x512xf32>
    %18 = tpu.concatenate %14, %17 in 0 : vector<1x512xf32>, vector<1x512xf32> -> vector<2x512xf32>
    %19 = vector.shape_cast %18 : vector<2x512xf32> to vector<1x2x512xf32>
    %c0_9 = arith.constant 0 : index
    %c0_10 = arith.constant 0 : index
    %c0_11 = arith.constant 0 : index
    %20 = vector.load %arg4[%c0_9, %c0_10, %c0_11] : memref<1x2x512xf32, #tpu.memory_space<vmem>>, vector<1x2x512xf32>
    tpu.vector_store %arg4[%c0_9, %c0_10, %c0_11], %19 {strides = array<i32>} : memref<1x2x512xf32, #tpu.memory_space<vmem>>, vector<1x2x512xf32>,
    return
  }
  func.func @transform_0(%arg0: i32) -> (i32, i32) {
    %c0_i32 = arith.constant 0 : i32
    %c0_i32_0 = arith.constant 0 : i32
    return %arg0, %c0_i32 : i32, i32
  }
  func.func @transform_1(%arg0: i32) -> (i32, i32) {
    %c0_i32 = arith.constant 0 : i32
    %c0_i32_0 = arith.constant 0 : i32
    %c0_i32_1 = arith.constant 0 : i32
    return %c0_i32, %c0_i32_0 : i32, i32
  }
  func.func @transform_2(%arg0: i32) -> (i32, i32) {
    %c0_i32 = arith.constant 0 : i32
    %c0_i32_0 = arith.constant 0 : i32
    return %arg0, %c0_i32 : i32, i32
  }
  func.func @transform_3(%arg0: i32) -> (i32, i32, i32) {
    %c0_i32 = arith.constant 0 : i32
    %c0_i32_0 = arith.constant 0 : i32
    %c0_i32_1 = arith.constant 0 : i32
    return %arg0, %c0_i32, %c0_i32_0 : i32, i32, i32
  }
}

module attributes {stable_mosaic.version = 11 : i64} {
  func.func @_bn_act_kernel(%arg0: i32, %arg1: memref<18x512xbf16, #tpu.memory_space<vmem>>, %arg2: memref<1x512xf32, #tpu.memory_space<vmem>>, %arg3: memref<1x512xf32, #tpu.memory_space<vmem>>, %arg4: memref<18x512xbf16, #tpu.memory_space<vmem>>) attributes {dimension_semantics = [#tpu.dimension_semantics<parallel>], iteration_bounds = array<i64: 1>, scalar_prefetch = 0 : i64, scratch_operands = 0 : i64, tpu.core_type = #tpu.core_type<tc>, window_params = [{transform_indices = @transform_0, window_bounds = array<i64: 18, 512>}, {pipeline_mode = #tpu.pipeline_mode<synchronous>, transform_indices = @transform_1, window_bounds = array<i64: 1, 512>}, {pipeline_mode = #tpu.pipeline_mode<synchronous>, transform_indices = @transform_2, window_bounds = array<i64: 1, 512>}, {transform_indices = @transform_3, window_bounds = array<i64: 18, 512>}]} {
    %c0 = arith.constant 0 : index
    %c0_0 = arith.constant 0 : index
    %0 = vector.load %arg1[%c0, %c0_0] : memref<18x512xbf16, #tpu.memory_space<vmem>>, vector<18x512xbf16>
    %1 = arith.extf %0 : vector<18x512xbf16> to vector<18x512xf32>
    %c0_1 = arith.constant 0 : index
    %c0_2 = arith.constant 0 : index
    %2 = vector.load %arg2[%c0_1, %c0_2] : memref<1x512xf32, #tpu.memory_space<vmem>>, vector<1x512xf32>
    %3 = vector.broadcast %2 : vector<1x512xf32> to vector<18x512xf32>
    %4 = arith.mulf %1, %3 : vector<18x512xf32>
    %c0_3 = arith.constant 0 : index
    %c0_4 = arith.constant 0 : index
    %5 = vector.load %arg3[%c0_3, %c0_4] : memref<1x512xf32, #tpu.memory_space<vmem>>, vector<1x512xf32>
    %6 = vector.broadcast %5 : vector<1x512xf32> to vector<18x512xf32>
    %7 = arith.addf %4, %6 : vector<18x512xf32>
    %cst = arith.constant 0.000000e+00 : f32
    %8 = vector.broadcast %cst : f32 to vector<18x512xf32>
    %9 = arith.cmpf oge, %7, %8 : vector<18x512xf32>
    %cst_5 = arith.constant 2.000000e-01 : f32
    %10 = vector.broadcast %cst_5 : f32 to vector<18x512xf32>
    %11 = arith.mulf %10, %7 : vector<18x512xf32>
    %12 = arith.select %9, %7, %11 : vector<18x512xi1>, vector<18x512xf32>
    %13 = arith.truncf %12 : vector<18x512xf32> to vector<18x512xbf16>
    %c0_6 = arith.constant 0 : index
    %c0_7 = arith.constant 0 : index
    %14 = vector.load %arg4[%c0_6, %c0_7] : memref<18x512xbf16, #tpu.memory_space<vmem>>, vector<18x512xbf16>
    tpu.vector_store %arg4[%c0_6, %c0_7], %13 {strides = array<i32>} : memref<18x512xbf16, #tpu.memory_space<vmem>>, vector<18x512xbf16>,
    return
  }
  func.func @transform_0(%arg0: i32) -> (i32, i32) {
    %c0_i32 = arith.constant 0 : i32
    %c0_i32_0 = arith.constant 0 : i32
    return %arg0, %c0_i32 : i32, i32
  }
  func.func @transform_1(%arg0: i32) -> (i32, i32) {
    %c0_i32 = arith.constant 0 : i32
    %c0_i32_0 = arith.constant 0 : i32
    %c0_i32_1 = arith.constant 0 : i32
    return %c0_i32, %c0_i32_0 : i32, i32
  }
  func.func @transform_2(%arg0: i32) -> (i32, i32) {
    %c0_i32 = arith.constant 0 : i32
    %c0_i32_0 = arith.constant 0 : i32
    %c0_i32_1 = arith.constant 0 : i32
    return %c0_i32, %c0_i32_0 : i32, i32
  }
  func.func @transform_3(%arg0: i32) -> (i32, i32) {
    %c0_i32 = arith.constant 0 : i32
    %c0_i32_0 = arith.constant 0 : i32
    return %arg0, %c0_i32 : i32, i32
  }
}

</mosaic_0001>

<bundles_post_ra>
// kernel: netd_forward.7
= control target key start
LH: loop header
LB: loop body
LE: loop exit
PB: predicated region body
PF: predicated region fallthrough
CT: control target
= control target key end

     0   :  { %s1924_s9 = smov 0   ;;  %s2064_s0 = inlined_call_operand.vmem [shape: bf16[1536,48], index: 0, kind: input, shape index: {}]   ;;  %s2065_s1 = inlined_call_operand.vmem [shape: bf16[48,128], index: 1, kind: input, shape index: {}]   ;;  %s2066_s2 = inlined_call_operand.vmem [shape: bf16[1536,128], index: 2, kind: output, shape index: {}]  }
   0x1 LB: > { %s1350_s10 = sadd.s32 4294967295, %s1907_s9   ;;  %p1354_p0 = scmp.ge.s32.totalorder %s1907_s9, 1  ;;  %s1907_s9 = sphi %s1924_s9, %s12_s9  }
   0x2   : > { %p113_p1 = scmp.lt.s32.totalorder %s1907_s9, 4 }
   0x4   : > { %p114_p2 = pnand %p1354_p0, %p113_p1 }
   0x5   : > { %v1866_v0 = vld [vmem:[%s2065_s1] sm:$0xff] (!%p114_p2)   ;;  %s1355_s13 = sshll.u32 (!%p114_p2), %s1350_s10, 6  ;;  %v1867_v1 = vld [vmem:[%s2065_s1 + $0x8] sm:$0xff] (!%p114_p2)   ;;  %v1868_v2 = vld [vmem:[%s2065_s1 + $0x10] sm:$0xff] (!%p114_p2)   ;;  %vm396_vm0 = vcmask (!%p114_p2), 392192  }
   0x6   : > { %117 = sbr.rel (%p114_p2) target bundleno = 297 (0x129), region = 28  ;;  %p136_p3 = scmp.lt.s32.totalorder (!%p114_p2), %s1355_s13, 191  ;;  %1782 = vmatprep.subr.bf16.mxu0 (!%p114_p2), %v1866_v0  ;;  %1852 = vmatprep.subr.bf16.mxu1 (!%p114_p2), %v1866_v0 }
   0x7   : > { %1783 = vmatpush3.bf16.msra.mxu0 (!%p114_p2), %v1866_v0  ;;  %1855 = vmatpush3.bf16.msra.mxu1 (!%p114_p2), %v1866_v0 }
   0x8   : > { %1784 = vmatprep.subr.bf16.mxu0 (!%p114_p2), %v1867_v1  ;;  %1853 = vmatprep.subr.bf16.mxu1 (!%p114_p2), %v1867_v1 }
   0xb   : > { %1785 = vmatpush3.bf16.msra.mxu0 (!%p114_p2), %v1867_v1  ;;  %1856 = vmatpush3.bf16.msra.mxu1 (!%p114_p2), %v1867_v1 }
   0xc   : > { %1786 = vmatprep.subr.bf16.mxu0 (!%p114_p2), %v1868_v2  ;;  %1854 = vmatprep.subr.bf16.mxu1 (!%p114_p2), %v1868_v2 }
   0xd   : > { %s2068_s13 = smov (!%p136_p3, %s1355_s13), 191 }
   0xe   : > { %s1356_s18 = sshll.u32 %s2068_s13, 2 }
   0xf   : > { %s1949_s21 = scalar_lea.vmem %s2064_s0, %s1356_s18  ;;  %1787 = vmatpush3.bf16.msra.mxu0 %v1868_v2  ;;  %1857 = vmatpush3.bf16.msra.mxu1 %v1868_v2  ;;  %s2020_s24 = scalar_lea.vmem %s2066_s2, %s1356_s18 }
  0x10   : > { %v1869_v3 = vld [vmem:[%s1949_s21] sm:$0xff]   ;;  %v1871_v5 = vld [vmem:[%s1949_s21 + $0x8] sm:$0xff]   ;;  %v1873_v7 = vld [vmem:[%s1949_s21 + $0x10] sm:$0xff]  }
  0x11   : > { %v1870_v4 = vld [vmem:[%s1949_s21 + $0x80] sm:$0xff]   ;;  %1788 = vmatprep.mubr.msk.bf16.mxu0 %vm396_vm0, %v1869_v3  ;;  %v1872_v6 = vld [vmem:[%s1949_s21 + $0x88] sm:$0xff]   ;;  %v1874_v8 = vld [vmem:[%s1949_s21 + $0x90] sm:$0xff]  }
  0x12   : > { %1820 = vmatprep.mubr.msk.bf16.mxu1 %vm396_vm0, %v1870_v4  ;;  %1789 = vmatmul.mubr.msk.bf16.vlgmr.msra.gmra.mrb[0].mxu0 %vm396_vm0, %v1871_v5  ;;  %v1875_v9 = vld [vmem:[%s1949_s21 + $0x18] sm:$0xff]   ;;  %v1877_v11 = vld [vmem:[%s1949_s21 + $0x20] sm:$0xff]   ;;  %v1879_v13 = vld [vmem:[%s1949_s21 + $0x28] sm:$0xff]  }
  0x13   : > { %1821 = vmatmul.mubr.msk.bf16.vlgmr.msra.gmra.mrb[0].mxu1 %vm396_vm0, %v1872_v6  ;;  %1792 = vmatprep.mubr.msk.bf16.mxu0 %vm396_vm0, %v1873_v7  ;;  %v1876_v10 = vld [vmem:[%s1949_s21 + $0x98] sm:$0xff]   ;;  %v1878_v12 = vld [vmem:[%s1949_s21 + $0xa0] sm:$0xff]   ;;  %v1880_v14 = vld [vmem:[%s1949_s21 + $0xa8] sm:$0xff]  }
  0x14   : > { %1824 = vmatprep.mubr.msk.bf16.mxu1 %vm396_vm0, %v1874_v8  ;;  %v1881_v15 = vld [vmem:[%s1949_s21 + $0x30] sm:$0xff]   ;;  %v1883_v17 = vld [vmem:[%s1949_s21 + $0x38] sm:$0xff]   ;;  %v1885_v19 = vld [vmem:[%s1949_s21 + $0x40] sm:$0xff]  }
  0x15   : > { %v1882_v16 = vld [vmem:[%s1949_s21 + $0xb0] sm:$0xff]   ;;  %v1884_v18 = vld [vmem:[%s1949_s21 + $0xb8] sm:$0xff]   ;;  %v1886_v20 = vld [vmem:[%s1949_s21 + $0xc0] sm:$0xff]  }
  0x16   : > { %v1887_v21 = vld [vmem:[%s1949_s21 + $0x48] sm:$0xff]   ;;  %v1889_v23 = vld [vmem:[%s1949_s21 + $0x50] sm:$0xff]   ;;  %v1891_v25 = vld [vmem:[%s1949_s21 + $0x58] sm:$0xff]  }
  0x17   : > { %v1888_v22 = vld [vmem:[%s1949_s21 + $0xc8] sm:$0xff]   ;;  %v1890_v24 = vld [vmem:[%s1949_s21 + $0xd0] sm:$0xff]   ;;  %v1892_v26 = vld [vmem:[%s1949_s21 + $0xd8] sm:$0xff]  }
  0x18   : > { %v1893_v27 = vld [vmem:[%s1949_s21 + $0x60] sm:$0xff]   ;;  %v1895_v29 = vld [vmem:[%s1949_s21 + $0x68] sm:$0xff]   ;;  %v1897_v31 = vld [vmem:[%s1949_s21 + $0x70] sm:$0xff]  }
  0x19   : > { %v1894_v28 = vld [vmem:[%s1949_s21 + $0xe0] sm:$0xff]   ;;  %v1896_v30 = vld [vmem:[%s1949_s21 + $0xe8] sm:$0xff]   ;;  %v1898_v32 = vld [vmem:[%s1949_s21 + $0xf0] sm:$0xff]  }
  0x1a   : > { %1793 = vmatmul.mubr.msk.bf16.gmra.mrb[4].mxu0 %vm396_vm0, %v1875_v9  ;;  %v1899_v33 = vld [vmem:[%s1949_s21 + $0x78] sm:$0xff]  }
  0x1b   : > { %1825 = vmatmul.mubr.msk.bf16.gmra.mrb[4].mxu1 %vm396_vm0, %v1876_v10  ;;  %1796 = vmatprep.mubr.msk.bf16.mxu0 %vm396_vm0, %v1877_v11  ;;  %v1900_v34 = vld [vmem:[%s1949_s21 + $0xf8] sm:$0xff]  }
  0x1c   : > { %1828 = vmatprep.mubr.msk.bf16.mxu1 %vm396_vm0, %v1878_v12 }
  0x22   : > { %1797 = vmatmul.mubr.msk.bf16.gmra.mrb[8].mxu0 %vm396_vm0, %v1879_v13 }
  0x23   : > { %1829 = vmatmul.mubr.msk.bf16.gmra.mrb[8].mxu1 %vm396_vm0, %v1880_v14  ;;  %1800 = vmatprep.mubr.msk.bf16.mxu0 %vm396_vm0, %v1881_v15 }
  0x24   : > { %1832 = vmatprep.mubr.msk.bf16.mxu1 %vm396_vm0, %v1882_v16 }
  0x2a   : > { %1801 = vmatmul.mubr.msk.bf16.gmra.mrb[12].mxu0 %vm396_vm0, %v1883_v17 }
  0x2b   : > { %1833 = vmatmul.mubr.msk.bf16.gmra.mrb[12].mxu1 %vm396_vm0, %v1884_v18  ;;  %1804 = vmatprep.mubr.msk.bf16.mxu0 %vm396_vm0, %v1885_v19 }
  0x2c   : > { %1836 = vmatprep.mubr.msk.bf16.mxu1 %vm396_vm0, %v1886_v20 }
  0x32   : > { %1805 = vmatmul.mubr.msk.bf16.gmra.mrb[16].mxu0 %vm396_vm0, %v1887_v21 }
  0x33   : > { %1837 = vmatmul.mubr.msk.bf16.gmra.mrb[16].mxu1 %vm396_vm0, %v1888_v22  ;;  %1808 = vmatprep.mubr.msk.bf16.mxu0 %vm396_vm0, %v1889_v23 }
  0x34   : > { %1840 = vmatprep.mubr.msk.bf16.mxu1 %vm396_vm0, %v1890_v24 }
  0x3a   : > { %1809 = vmatmul.mubr.msk.bf16.gmra.mrb[20].mxu0 %vm396_vm0, %v1891_v25 }
  0x3b   : > { %1841 = vmatmul.mubr.msk.bf16.gmra.mrb[20].mxu1 %vm396_vm0, %v1892_v26  ;;  %1812 = vmatprep.mubr.msk.bf16.mxu0 %vm396_vm0, %v1893_v27 }
  0x3c   : > { %1844 = vmatprep.mubr.msk.bf16.mxu1 %vm396_vm0, %v1894_v28 }
  0x42   : > { %1813 = vmatmul.mubr.msk.bf16.gmra.mrb[24].mxu0 %vm396_vm0, %v1895_v29 }
  0x43   : > { %1845 = vmatmul.mubr.msk.bf16.gmra.mrb[24].mxu1 %vm396_vm0, %v1896_v30  ;;  %1816 = vmatprep.mubr.msk.bf16.mxu0 %vm396_vm0, %v1897_v31 }
  0x44   : > { %1848 = vmatprep.mubr.msk.bf16.mxu1 %vm396_vm0, %v1898_v32 }
  0x4a   : > { %1817 = vmatmul.mubr.msk.bf16.gmra.mrb[28].mxu0 %vm396_vm0, %v1899_v33 }
  0x4b   : > { %1849 = vmatmul.mubr.msk.bf16.gmra.mrb[28].mxu1 %vm396_vm0, %v1900_v34 }
  0xe5   : > { %v1790_v35 = vpop.f32.mrb[0].mxu0 }
  0xe6   : > { %v1822_v36 = vpop.f32.mrb[0].mxu1  ;;  %vm784_vm1 = vcmp.ge.f32.partialorder %v1790_v35, 0.0  ;;  %v848_v37 = vmul.f32 0.2, %v1790_v35  ;;  %v527_v39 = vpop.f32.mrb[1].mxu0 }
  0xe7   : > { %v880_v38 = vmul.f32 0.2, %v1822_v36  ;;  %vm816_vm2 = vcmp.ge.f32.partialorder %v1822_v36, 0.0  ;;  %v655_v40 = vpop.f32.mrb[1].mxu1  ;;  %v846_v41 = vmul.f32 0.2, %v527_v39 }
  0xe8   : > { %v1791_v42 = vpop.f32.mrb[2].mxu0  ;;  %v1823_v43 = vpop.f32.mrb[2].mxu1  ;;  %v912_v44 = vsel %vm784_vm1, %v1790_v35, %v848_v37  ;;  %v878_v45 = vmul.f32 0.2, %v655_v40  ;;  %vm782_vm4 = vcmp.ge.f32.partialorder %v527_v39, 0.0  ;;  %vm814_vm6 = vcmp.ge.f32.partialorder %v655_v40, 0.0 }
  0xe9   : > { %vm785_vm3 = vcmp.ge.f32.partialorder %v1791_v42, 0.0  ;;  %v849_v46 = vmul.f32 0.2, %v1791_v42  ;;  %v944_v47 = vsel %vm816_vm2, %v1822_v36, %v880_v38  ;;  %vm817_vm5 = vcmp.ge.f32.partialorder %v1823_v43, 0.0  ;;  %v530_v49 = vpop.f32.mrb[3].mxu0  ;;  %v658_v50 = vpop.f32.mrb[3].mxu1 }
  0xea   : > { %v881_v48 = vmul.f32 0.2, %v1823_v43  ;;  %vm783_vm7 = vcmp.ge.f32.partialorder %v530_v49, 0.0  ;;  %v847_v52 = vmul.f32 0.2, %v530_v49  ;;  %vm815_vm8 = vcmp.ge.f32.partialorder %v658_v50, 0.0 }
  0xeb   : > { %v913_v51 = vsel %vm785_vm3, %v1791_v42, %v849_v46  ;;  %v879_v55 = vmul.f32 0.2, %v658_v50  ;;  %v910_v56 = vsel %vm782_vm4, %v527_v39, %v846_v41  ;;  %v942_v61 = vsel %vm814_vm6, %v655_v40, %v878_v45 }
  0xec   : > { %v1564_v53 = vpack.c.bf16 %v913_v51, %v912_v44  ;;  %v945_v54 = vsel %vm817_vm5, %v1823_v43, %v881_v48  ;;  %v911_v58 = vsel %vm783_vm7, %v530_v49, %v847_v52 }
  0xed   : > { %v1644_v57 = vpack.c.bf16 %v945_v54, %v944_v47  ;;  %v1794_v59 = vpop.f32.mrb[4].mxu0  ;;  %v1559_v62 = vpack.c.bf16 %v911_v58, %v910_v56  ;;  %v943_v63 = vsel %vm815_vm8, %v658_v50, %v879_v55 }
  0xee   : > { %v1826_v60 = vpop.f32.mrb[4].mxu1  ;;  %1716 = vst [vmem:[%s2020_s24 + $0x8] sm:$0xff] %v1564_v53   ;;  %v852_v0 = vmul.f32 0.2, %v1794_v59  ;;  %v543_v1 = vpop.f32.mrb[5].mxu0  ;;  %v1639_v3 = vpack.c.bf16 %v943_v63, %v942_v61  ;;  %vm788_vm9 = vcmp.ge.f32.partialorder %v1794_v59, 0.0 }
  0xef   : > { %v671_v2 = vpop.f32.mrb[5].mxu1  ;;  %1732 = vst [vmem:[%s2020_s24 + $0x88] sm:$0xff] %v1644_v57   ;;  %v884_v4 = vmul.f32 0.2, %v1826_v60  ;;  %v1795_v5 = vpop.f32.mrb[6].mxu0  ;;  %1560 = vst [vmem:[%s2020_s24] sm:$0xff] %v1559_v62   ;;  %vm820_vm10 = vcmp.ge.f32.partialorder %v1826_v60, 0.0 }
  0xf0   : > { %v1827_v6 = vpop.f32.mrb[6].mxu1  ;;  %v850_v7 = vmul.f32 0.2, %v543_v1  ;;  %v882_v8 = vmul.f32 0.2, %v671_v2  ;;  %v546_v9 = vpop.f32.mrb[7].mxu0  ;;  %v916_v12 = vsel %vm788_vm9, %v1794_v59, %v852_v0 }
  0xf1   : > { %1731 = vst [vmem:[%s2020_s24 + $0x80] sm:$0xff] %v1639_v3   ;;  %vm786_vm11 = vcmp.ge.f32.partialorder %v543_v1, 0.0  ;;  %vm789_vm12 = vcmp.ge.f32.partialorder %v1795_v5, 0.0  ;;  %v853_v10 = vmul.f32 0.2, %v1795_v5  ;;  %vm821_vm13 = vcmp.ge.f32.partialorder %v1827_v6, 0.0 }
  0xf2   : > { %v674_v11 = vpop.f32.mrb[7].mxu1  ;;  %vm818_vm14 = vcmp.ge.f32.partialorder %v671_v2, 0.0  ;;  %v885_v13 = vmul.f32 0.2, %v1827_v6  ;;  %vm787_vm15 = vcmp.ge.f32.partialorder %v546_v9, 0.0  ;;  %v948_v17 = vsel %vm820_vm10, %v1826_v60, %v884_v4 }
  0xf3   : > { %v917_v14 = vsel %vm789_vm12, %v1795_v5, %v853_v10  ;;  %v851_v15 = vmul.f32 0.2, %v546_v9  ;;  %vm819_vm0 = vcmp.ge.f32.partialorder %v674_v11, 0.0  ;;  %v883_v16 = vmul.f32 0.2, %v674_v11 }
  0xf4   : > { %v914_v18 = vsel %vm786_vm11, %v543_v1, %v850_v7  ;;  %v1574_v19 = vpack.c.bf16 %v917_v14, %v916_v12  ;;  %v949_v20 = vsel %vm821_vm13, %v1827_v6, %v885_v13  ;;  %v946_v21 = vsel %vm818_vm14, %v671_v2, %v882_v8 }
  0xf5   : > { %v1654_v22 = vpack.c.bf16 %v949_v20, %v948_v17  ;;  %v915_v23 = vsel %vm787_vm15, %v546_v9, %v851_v15  ;;  %v947_v24 = vsel %vm819_vm0, %v674_v11, %v883_v16  ;;  %v1798_v25 = vpop.f32.mrb[8].mxu0 }
  0xf6   : > { %v1830_v26 = vpop.f32.mrb[8].mxu1  ;;  %1718 = vst [vmem:[%s2020_s24 + $0x18] sm:$0xff] %v1574_v19   ;;  %v1569_v27 = vpack.c.bf16 %v915_v23, %v914_v18  ;;  %v1649_v28 = vpack.c.bf16 %v947_v24, %v946_v21  ;;  %vm792_vm1 = vcmp.ge.f32.partialorder %v1798_v25, 0.0  ;;  %v856_v29 = vmul.f32 0.2, %v1798_v25  ;;  %v559_v30 = vpop.f32.mrb[9].mxu0 }
  0xf7   : > { %v687_v31 = vpop.f32.mrb[9].mxu1  ;;  %1734 = vst [vmem:[%s2020_s24 + $0x98] sm:$0xff] %v1654_v22   ;;  %vm824_vm2 = vcmp.ge.f32.partialorder %v1830_v26, 0.0  ;;  %v888_v32 = vmul.f32 0.2, %v1830_v26  ;;  %v1799_v35 = vpop.f32.mrb[10].mxu0 }
  0xf8   : > { %1717 = vst [vmem:[%s2020_s24 + $0x10] sm:$0xff] %v1569_v27   ;;  %1733 = vst [vmem:[%s2020_s24 + $0x90] sm:$0xff] %v1649_v28   ;;  %v854_v33 = vmul.f32 0.2, %v559_v30  ;;  %v886_v34 = vmul.f32 0.2, %v687_v31  ;;  %v920_v37 = vsel %vm792_vm1, %v1798_v25, %v856_v29 }
  0xf9   : > { %v1831_v36 = vpop.f32.mrb[10].mxu1  ;;  %vm790_vm3 = vcmp.ge.f32.partialorder %v559_v30, 0.0  ;;  %vm793_vm4 = vcmp.ge.f32.partialorder %v1799_v35, 0.0  ;;  %v857_v38 = vmul.f32 0.2, %v1799_v35  ;;  %v562_v39 = vpop.f32.mrb[11].mxu0  ;;  %v952_v45 = vsel %vm824_vm2, %v1830_v26, %v888_v32 }
  0xfa   : > { %v690_v40 = vpop.f32.mrb[11].mxu1  ;;  %vm822_vm5 = vcmp.ge.f32.partialorder %v687_v31, 0.0  ;;  %vm825_vm6 = vcmp.ge.f32.partialorder %v1831_v36, 0.0  ;;  %v889_v41 = vmul.f32 0.2, %v1831_v36  ;;  %vm791_vm7 = vcmp.ge.f32.partialorder %v562_v39, 0.0 }
  0xfb   : > { %v921_v42 = vsel %vm793_vm4, %v1799_v35, %v857_v38  ;;  %v855_v43 = vmul.f32 0.2, %v562_v39  ;;  %vm823_vm8 = vcmp.ge.f32.partialorder %v690_v40, 0.0  ;;  %v887_v44 = vmul.f32 0.2, %v690_v40 }
  0xfc   : > { %v918_v46 = vsel %vm790_vm3, %v559_v30, %v854_v33  ;;  %v1584_v47 = vpack.c.bf16 %v921_v42, %v920_v37  ;;  %v953_v48 = vsel %vm825_vm6, %v1831_v36, %v889_v41  ;;  %v950_v49 = vsel %vm822_vm5, %v687_v31, %v886_v34 }
  0xfd   : > { %v1664_v50 = vpack.c.bf16 %v953_v48, %v952_v45  ;;  %v919_v51 = vsel %vm791_vm7, %v562_v39, %v855_v43  ;;  %v951_v52 = vsel %vm823_vm8, %v690_v40, %v887_v44  ;;  %v1802_v53 = vpop.f32.mrb[12].mxu0 }
  0xfe   : > { %v1834_v54 = vpop.f32.mrb[12].mxu1  ;;  %1720 = vst [vmem:[%s2020_s24 + $0x28] sm:$0xff] %v1584_v47   ;;  %v1579_v55 = vpack.c.bf16 %v919_v51, %v918_v46  ;;  %v1659_v56 = vpack.c.bf16 %v951_v52, %v950_v49  ;;  %vm796_vm9 = vcmp.ge.f32.partialorder %v1802_v53, 0.0  ;;  %v860_v57 = vmul.f32 0.2, %v1802_v53  ;;  %v575_v58 = vpop.f32.mrb[13].mxu0 }
  0xff   : > { %v703_v59 = vpop.f32.mrb[13].mxu1  ;;  %1736 = vst [vmem:[%s2020_s24 + $0xa8] sm:$0xff] %v1664_v50   ;;  %vm828_vm10 = vcmp.ge.f32.partialorder %v1834_v54, 0.0  ;;  %v892_v60 = vmul.f32 0.2, %v1834_v54  ;;  %v1803_v63 = vpop.f32.mrb[14].mxu0 }
 0x100   : > { %1719 = vst [vmem:[%s2020_s24 + $0x20] sm:$0xff] %v1579_v55   ;;  %1735 = vst [vmem:[%s2020_s24 + $0xa0] sm:$0xff] %v1659_v56   ;;  %v858_v61 = vmul.f32 0.2, %v575_v58  ;;  %v890_v62 = vmul.f32 0.2, %v703_v59  ;;  %v924_v1 = vsel %vm796_vm9, %v1802_v53, %v860_v57 }
 0x101   : > { %v1835_v0 = vpop.f32.mrb[14].mxu1  ;;  %vm794_vm11 = vcmp.ge.f32.partialorder %v575_v58, 0.0  ;;  %vm797_vm12 = vcmp.ge.f32.partialorder %v1803_v63, 0.0  ;;  %v861_v2 = vmul.f32 0.2, %v1803_v63  ;;  %v578_v3 = vpop.f32.mrb[15].mxu0  ;;  %v956_v9 = vsel %vm828_vm10, %v1834_v54, %v892_v60 }
 0x102   : > { %v706_v4 = vpop.f32.mrb[15].mxu1  ;;  %vm826_vm13 = vcmp.ge.f32.partialorder %v703_v59, 0.0  ;;  %vm829_vm14 = vcmp.ge.f32.partialorder %v1835_v0, 0.0  ;;  %v893_v5 = vmul.f32 0.2, %v1835_v0  ;;  %vm795_vm15 = vcmp.ge.f32.partialorder %v578_v3, 0.0 }
 0x103   : > { %v925_v6 = vsel %vm797_vm12, %v1803_v63, %v861_v2  ;;  %v859_v7 = vmul.f32 0.2, %v578_v3  ;;  %vm827_vm0 = vcmp.ge.f32.partialorder %v706_v4, 0.0  ;;  %v891_v8 = vmul.f32 0.2, %v706_v4 }
 0x104   : > { %v922_v10 = vsel %vm794_vm11, %v575_v58, %v858_v61  ;;  %v1594_v11 = vpack.c.bf16 %v925_v6, %v924_v1  ;;  %v957_v12 = vsel %vm829_vm14, %v1835_v0, %v893_v5  ;;  %v954_v13 = vsel %vm826_vm13, %v703_v59, %v890_v62 }
 0x105   : > { %v1674_v14 = vpack.c.bf16 %v957_v12, %v956_v9  ;;  %v923_v15 = vsel %vm795_vm15, %v578_v3, %v859_v7  ;;  %v955_v16 = vsel %vm827_vm0, %v706_v4, %v891_v8  ;;  %v1806_v17 = vpop.f32.mrb[16].mxu0 }
 0x106   : > { %v1838_v18 = vpop.f32.mrb[16].mxu1  ;;  %1722 = vst [vmem:[%s2020_s24 + $0x38] sm:$0xff] %v1594_v11   ;;  %v1589_v19 = vpack.c.bf16 %v923_v15, %v922_v10  ;;  %v1669_v20 = vpack.c.bf16 %v955_v16, %v954_v13  ;;  %vm800_vm1 = vcmp.ge.f32.partialorder %v1806_v17, 0.0  ;;  %v864_v21 = vmul.f32 0.2, %v1806_v17  ;;  %v591_v22 = vpop.f32.mrb[17].mxu0 }
 0x107   : > { %v719_v23 = vpop.f32.mrb[17].mxu1  ;;  %1738 = vst [vmem:[%s2020_s24 + $0xb8] sm:$0xff] %v1674_v14   ;;  %vm832_vm2 = vcmp.ge.f32.partialorder %v1838_v18, 0.0  ;;  %v896_v24 = vmul.f32 0.2, %v1838_v18  ;;  %v1807_v27 = vpop.f32.mrb[18].mxu0 }
 0x108   : > { %1721 = vst [vmem:[%s2020_s24 + $0x30] sm:$0xff] %v1589_v19   ;;  %1737 = vst [vmem:[%s2020_s24 + $0xb0] sm:$0xff] %v1669_v20   ;;  %v862_v25 = vmul.f32 0.2, %v591_v22  ;;  %v894_v26 = vmul.f32 0.2, %v719_v23  ;;  %v928_v29 = vsel %vm800_vm1, %v1806_v17, %v864_v21 }
 0x109   : > { %v1839_v28 = vpop.f32.mrb[18].mxu1  ;;  %vm798_vm3 = vcmp.ge.f32.partialorder %v591_v22, 0.0  ;;  %vm801_vm4 = vcmp.ge.f32.partialorder %v1807_v27, 0.0  ;;  %v865_v30 = vmul.f32 0.2, %v1807_v27  ;;  %v594_v31 = vpop.f32.mrb[19].mxu0  ;;  %v960_v37 = vsel %vm832_vm2, %v1838_v18, %v896_v24 }
 0x10a   : > { %v722_v32 = vpop.f32.mrb[19].mxu1  ;;  %vm830_vm5 = vcmp.ge.f32.partialorder %v719_v23, 0.0  ;;  %vm833_vm6 = vcmp.ge.f32.partialorder %v1839_v28, 0.0  ;;  %v897_v33 = vmul.f32 0.2, %v1839_v28  ;;  %vm799_vm7 = vcmp.ge.f32.partialorder %v594_v31, 0.0 }
 0x10b   : > { %v929_v34 = vsel %vm801_vm4, %v1807_v27, %v865_v30  ;;  %v863_v35 = vmul.f32 0.2, %v594_v31  ;;  %vm831_vm8 = vcmp.ge.f32.partialorder %v722_v32, 0.0  ;;  %v895_v36 = vmul.f32 0.2, %v722_v32 }
 0x10c   : > { %v926_v38 = vsel %vm798_vm3, %v591_v22, %v862_v25  ;;  %v1604_v39 = vpack.c.bf16 %v929_v34, %v928_v29  ;;  %v961_v40 = vsel %vm833_vm6, %v1839_v28, %v897_v33  ;;  %v958_v41 = vsel %vm830_vm5, %v719_v23, %v894_v26 }
 0x10d   : > { %v1684_v42 = vpack.c.bf16 %v961_v40, %v960_v37  ;;  %v927_v43 = vsel %vm799_vm7, %v594_v31, %v863_v35  ;;  %v959_v44 = vsel %vm831_vm8, %v722_v32, %v895_v36  ;;  %v1810_v45 = vpop.f32.mrb[20].mxu0 }
 0x10e   : > { %v1842_v46 = vpop.f32.mrb[20].mxu1  ;;  %1724 = vst [vmem:[%s2020_s24 + $0x48] sm:$0xff] %v1604_v39   ;;  %v1599_v47 = vpack.c.bf16 %v927_v43, %v926_v38  ;;  %v1679_v48 = vpack.c.bf16 %v959_v44, %v958_v41  ;;  %vm804_vm9 = vcmp.ge.f32.partialorder %v1810_v45, 0.0  ;;  %v868_v49 = vmul.f32 0.2, %v1810_v45  ;;  %v607_v50 = vpop.f32.mrb[21].mxu0 }
 0x10f   : > { %v735_v51 = vpop.f32.mrb[21].mxu1  ;;  %1740 = vst [vmem:[%s2020_s24 + $0xc8] sm:$0xff] %v1684_v42   ;;  %vm836_vm10 = vcmp.ge.f32.partialorder %v1842_v46, 0.0  ;;  %v900_v52 = vmul.f32 0.2, %v1842_v46  ;;  %v1811_v55 = vpop.f32.mrb[22].mxu0 }
 0x110   : > { %1723 = vst [vmem:[%s2020_s24 + $0x40] sm:$0xff] %v1599_v47   ;;  %1739 = vst [vmem:[%s2020_s24 + $0xc0] sm:$0xff] %v1679_v48   ;;  %v866_v53 = vmul.f32 0.2, %v607_v50  ;;  %v898_v54 = vmul.f32 0.2, %v735_v51  ;;  %v932_v57 = vsel %vm804_vm9, %v1810_v45, %v868_v49 }
 0x111   : > { %v1843_v56 = vpop.f32.mrb[22].mxu1  ;;  %vm802_vm11 = vcmp.ge.f32.partialorder %v607_v50, 0.0  ;;  %vm805_vm12 = vcmp.ge.f32.partialorder %v1811_v55, 0.0  ;;  %v869_v58 = vmul.f32 0.2, %v1811_v55  ;;  %v610_v59 = vpop.f32.mrb[23].mxu0  ;;  %v964_v1 = vsel %vm836_vm10, %v1842_v46, %v900_v52 }
 0x112   : > { %v738_v60 = vpop.f32.mrb[23].mxu1  ;;  %vm834_vm13 = vcmp.ge.f32.partialorder %v735_v51, 0.0  ;;  %vm837_vm14 = vcmp.ge.f32.partialorder %v1843_v56, 0.0  ;;  %v901_v61 = vmul.f32 0.2, %v1843_v56  ;;  %vm803_vm15 = vcmp.ge.f32.partialorder %v610_v59, 0.0 }
 0x113   : > { %v933_v62 = vsel %vm805_vm12, %v1811_v55, %v869_v58  ;;  %v867_v63 = vmul.f32 0.2, %v610_v59  ;;  %vm835_vm0 = vcmp.ge.f32.partialorder %v738_v60, 0.0  ;;  %v899_v0 = vmul.f32 0.2, %v738_v60 }
 0x114   : > { %v930_v2 = vsel %vm802_vm11, %v607_v50, %v866_v53  ;;  %v1614_v3 = vpack.c.bf16 %v933_v62, %v932_v57  ;;  %v965_v4 = vsel %vm837_vm14, %v1843_v56, %v901_v61  ;;  %v962_v5 = vsel %vm834_vm13, %v735_v51, %v898_v54 }
 0x115   : > { %v1694_v6 = vpack.c.bf16 %v965_v4, %v964_v1  ;;  %v931_v7 = vsel %vm803_vm15, %v610_v59, %v867_v63  ;;  %v963_v8 = vsel %vm835_vm0, %v738_v60, %v899_v0  ;;  %v1814_v9 = vpop.f32.mrb[24].mxu0 }
 0x116   : > { %v1846_v10 = vpop.f32.mrb[24].mxu1  ;;  %1726 = vst [vmem:[%s2020_s24 + $0x58] sm:$0xff] %v1614_v3   ;;  %v1609_v11 = vpack.c.bf16 %v931_v7, %v930_v2  ;;  %v1689_v12 = vpack.c.bf16 %v963_v8, %v962_v5  ;;  %vm808_vm1 = vcmp.ge.f32.partialorder %v1814_v9, 0.0  ;;  %v872_v13 = vmul.f32 0.2, %v1814_v9  ;;  %v623_v14 = vpop.f32.mrb[25].mxu0 }
 0x117   : > { %v751_v15 = vpop.f32.mrb[25].mxu1  ;;  %1742 = vst [vmem:[%s2020_s24 + $0xd8] sm:$0xff] %v1694_v6   ;;  %vm840_vm2 = vcmp.ge.f32.partialorder %v1846_v10, 0.0  ;;  %v904_v16 = vmul.f32 0.2, %v1846_v10  ;;  %v1815_v19 = vpop.f32.mrb[26].mxu0 }
 0x118   : > { %1725 = vst [vmem:[%s2020_s24 + $0x50] sm:$0xff] %v1609_v11   ;;  %1741 = vst [vmem:[%s2020_s24 + $0xd0] sm:$0xff] %v1689_v12   ;;  %v870_v17 = vmul.f32 0.2, %v623_v14  ;;  %v902_v18 = vmul.f32 0.2, %v751_v15  ;;  %v936_v21 = vsel %vm808_vm1, %v1814_v9, %v872_v13 }
 0x119   : > { %v1847_v20 = vpop.f32.mrb[26].mxu1  ;;  %vm806_vm3 = vcmp.ge.f32.partialorder %v623_v14, 0.0  ;;  %vm809_vm4 = vcmp.ge.f32.partialorder %v1815_v19, 0.0  ;;  %v873_v22 = vmul.f32 0.2, %v1815_v19  ;;  %v626_v23 = vpop.f32.mrb[27].mxu0  ;;  %v968_v29 = vsel %vm840_vm2, %v1846_v10, %v904_v16 }
 0x11a   : > { %v754_v24 = vpop.f32.mrb[27].mxu1  ;;  %vm838_vm5 = vcmp.ge.f32.partialorder %v751_v15, 0.0  ;;  %vm841_vm6 = vcmp.ge.f32.partialorder %v1847_v20, 0.0  ;;  %v905_v25 = vmul.f32 0.2, %v1847_v20  ;;  %vm807_vm7 = vcmp.ge.f32.partialorder %v626_v23, 0.0 }
 0x11b   : > { %v937_v26 = vsel %vm809_vm4, %v1815_v19, %v873_v22  ;;  %v871_v27 = vmul.f32 0.2, %v626_v23  ;;  %vm839_vm8 = vcmp.ge.f32.partialorder %v754_v24, 0.0  ;;  %v903_v28 = vmul.f32 0.2, %v754_v24 }
 0x11c   : > { %v934_v30 = vsel %vm806_vm3, %v623_v14, %v870_v17  ;;  %v1624_v31 = vpack.c.bf16 %v937_v26, %v936_v21  ;;  %v969_v32 = vsel %vm841_vm6, %v1847_v20, %v905_v25  ;;  %v966_v33 = vsel %vm838_vm5, %v751_v15, %v902_v18 }
 0x11d   : > { %v1704_v34 = vpack.c.bf16 %v969_v32, %v968_v29  ;;  %v935_v35 = vsel %vm807_vm7, %v626_v23, %v871_v27  ;;  %v967_v36 = vsel %vm839_vm8, %v754_v24, %v903_v28  ;;  %v1818_v37 = vpop.f32.mrb[28].mxu0 }
 0x11e   : > { %v1850_v38 = vpop.f32.mrb[28].mxu1  ;;  %1728 = vst [vmem:[%s2020_s24 + $0x68] sm:$0xff] %v1624_v31   ;;  %v1619_v39 = vpack.c.bf16 %v935_v35, %v934_v30  ;;  %v1699_v40 = vpack.c.bf16 %v967_v36, %v966_v33  ;;  %vm812_vm9 = vcmp.ge.f32.partialorder %v1818_v37, 0.0  ;;  %v876_v41 = vmul.f32 0.2, %v1818_v37  ;;  %v639_v42 = vpop.f32.mrb[29].mxu0 }
 0x11f   : > { %v767_v43 = vpop.f32.mrb[29].mxu1  ;;  %1744 = vst [vmem:[%s2020_s24 + $0xe8] sm:$0xff] %v1704_v34   ;;  %vm844_vm10 = vcmp.ge.f32.partialorder %v1850_v38, 0.0  ;;  %v908_v44 = vmul.f32 0.2, %v1850_v38  ;;  %v1819_v47 = vpop.f32.mrb[30].mxu0 }
 0x120   : > { %1727 = vst [vmem:[%s2020_s24 + $0x60] sm:$0xff] %v1619_v39   ;;  %1743 = vst [vmem:[%s2020_s24 + $0xe0] sm:$0xff] %v1699_v40   ;;  %v874_v45 = vmul.f32 0.2, %v639_v42  ;;  %v906_v46 = vmul.f32 0.2, %v767_v43  ;;  %v940_v49 = vsel %vm812_vm9, %v1818_v37, %v876_v41 }
 0x121   : > { %v1851_v48 = vpop.f32.mrb[30].mxu1  ;;  %vm810_vm11 = vcmp.ge.f32.partialorder %v639_v42, 0.0  ;;  %vm813_vm12 = vcmp.ge.f32.partialorder %v1819_v47, 0.0  ;;  %v877_v50 = vmul.f32 0.2, %v1819_v47  ;;  %v642_v51 = vpop.f32.mrb[31].mxu0  ;;  %v972_v57 = vsel %vm844_vm10, %v1850_v38, %v908_v44 }
 0x122   : > { %v770_v52 = vpop.f32.mrb[31].mxu1  ;;  %vm842_vm13 = vcmp.ge.f32.partialorder %v767_v43, 0.0  ;;  %vm845_vm14 = vcmp.ge.f32.partialorder %v1851_v48, 0.0  ;;  %v909_v53 = vmul.f32 0.2, %v1851_v48  ;;  %vm811_vm15 = vcmp.ge.f32.partialorder %v642_v51, 0.0 }
 0x123   : > { %v941_v54 = vsel %vm813_vm12, %v1819_v47, %v877_v50  ;;  %v875_v55 = vmul.f32 0.2, %v642_v51  ;;  %vm843_vm0 = vcmp.ge.f32.partialorder %v770_v52, 0.0  ;;  %v907_v56 = vmul.f32 0.2, %v770_v52 }
 0x124   : > { %v938_v58 = vsel %vm810_vm11, %v639_v42, %v874_v45  ;;  %v1634_v59 = vpack.c.bf16 %v941_v54, %v940_v49  ;;  %v973_v60 = vsel %vm845_vm14, %v1851_v48, %v909_v53  ;;  %v970_v61 = vsel %vm842_vm13, %v767_v43, %v906_v46 }
 0x125   : > { %v1714_v62 = vpack.c.bf16 %v973_v60, %v972_v57  ;;  %v939_v63 = vsel %vm811_vm15, %v642_v51, %v875_v55  ;;  %v971_v0 = vsel %vm843_vm0, %v770_v52, %v907_v56 }
 0x126   : > { %1730 = vst [vmem:[%s2020_s24 + $0x78] sm:$0xff] %v1634_v59   ;;  %v1629_v1 = vpack.c.bf16 %v939_v63, %v938_v58  ;;  %v1709_v2 = vpack.c.bf16 %v971_v0, %v970_v61 }
 0x127   : > { %1746 = vst [vmem:[%s2020_s24 + $0xf8] sm:$0xff] %v1714_v62  }
 0x128   : > { %1729 = vst [vmem:[%s2020_s24 + $0x70] sm:$0xff] %v1629_v1   ;;  %1745 = vst [vmem:[%s2020_s24 + $0xf0] sm:$0xff] %v1709_v2  }
 0x129 PF: > { %s12_s9 = sadd.s32 1, %s1907_s9  }
 0x12a   : > { %p9_p4 = scmp.ge.s32.totalorder %s12_s9, 5  }
 0x12c   :  { %11 = sbr.rel (!%p9_p4) target bundleno = 1 (0x1), region = 58 }

// kernel: netd_forward.9
= control target key start
LH: loop header
LB: loop body
LE: loop exit
PB: predicated region body
PF: predicated region fallthrough
CT: control target
= control target key end

     0   :  { %s945_s0 = inlined_call_operand.vmem [shape: bf16[288,128], index: 0, kind: input, shape index: {}]   ;;  %s946_s1 = inlined_call_operand.vmem [shape: f32[1,128], index: 1, kind: input, shape index: {}]   ;;  %s947_s2 = inlined_call_operand.vmem [shape: f32[1,128], index: 2, kind: input, shape index: {}]   ;;  %s948_s3 = inlined_call_operand.vmem [shape: bf16[288,128], index: 3, kind: output, shape index: {}]  }
   0x1   :  { %v539_v0 = vld [vmem:[%s945_s0] sm:$0xff]   ;;  %v700_v4 = vld [vmem:[%s945_s0 + $0x8] sm:$0xff]   ;;  %v701_v5 = vld [vmem:[%s945_s0 + $0x10] sm:$0xff]  }
   0x2   :  { %v760_v1 = vld [vmem:[%s946_s1] ss:$0 sm:$0xff]  ;;  %v540_v2 = vunpack.c.l.bf16 %v539_v0  ;;  %v541_v3 = vunpack.c.h.bf16 %v539_v0  ;;  %v702_v6 = vld [vmem:[%s945_s0 + $0x18] sm:$0xff]   ;;  %v544_v8 = vunpack.c.l.bf16 %v700_v4  ;;  %v545_v9 = vunpack.c.h.bf16 %v700_v4  ;;  %v704_v35 = vld [vmem:[%s945_s0 + $0x28] sm:$0xff]  }
   0x3   :  { %v774_v7 = vld [vmem:[%s947_s2] ss:$0 sm:$0xff]  ;;  %v548_v10 = vunpack.c.l.bf16 %v701_v5  ;;  %v549_v11 = vunpack.c.h.bf16 %v701_v5  ;;  %v552_v14 = vunpack.c.l.bf16 %v702_v6  ;;  %v553_v15 = vunpack.c.h.bf16 %v702_v6  ;;  %v705_v48 = vld [vmem:[%s945_s0 + $0x30] sm:$0xff]   ;;  %v706_v4 = vld [vmem:[%s945_s0 + $0x38] sm:$0xff]  }
   0x4   :  { %v93_v12 = vmul.f32 %v540_v2, %v760_v1  ;;  %v94_v13 = vmul.f32 %v541_v3, %v760_v1  ;;  %v95_v16 = vmul.f32 %v544_v8, %v760_v1  ;;  %v96_v17 = vmul.f32 %v545_v9, %v760_v1  ;;  %v703_v34 = vld [vmem:[%s945_s0 + $0x20] sm:$0xff]  }
   0x5   :  { %v97_v18 = vmul.f32 %v548_v10, %v760_v1  ;;  %v98_v19 = vmul.f32 %v549_v11, %v760_v1  ;;  %v99_v22 = vmul.f32 %v552_v14, %v760_v1  ;;  %v100_v23 = vmul.f32 %v553_v15, %v760_v1  ;;  %v707_v15 = vld [vmem:[%s945_s0 + $0x40] sm:$0xff]  }
   0x6   :  { %v136_v20 = vadd.f32 %v774_v7, %v93_v12  ;;  %v137_v21 = vadd.f32 %v774_v7, %v94_v13  ;;  %v138_v24 = vadd.f32 %v774_v7, %v95_v16  ;;  %v139_v25 = vadd.f32 %v774_v7, %v96_v17 }
   0x7   :  { %v140_v26 = vadd.f32 %v774_v7, %v97_v18  ;;  %v141_v27 = vadd.f32 %v774_v7, %v98_v19  ;;  %v142_v42 = vadd.f32 %v774_v7, %v99_v22  ;;  %v143_v43 = vadd.f32 %v774_v7, %v100_v23 }
   0x8   :  { %vm172_vm0 = vcmp.ge.f32.partialorder %v136_v20, 0.0  ;;  %vm173_vm1 = vcmp.ge.f32.partialorder %v137_v21, 0.0  ;;  %v208_v28 = vmul.f32 0.2, %v136_v20  ;;  %v209_v29 = vmul.f32 0.2, %v137_v21 }
   0x9   :  { %vm174_vm2 = vcmp.ge.f32.partialorder %v138_v24, 0.0  ;;  %vm175_vm3 = vcmp.ge.f32.partialorder %v139_v25, 0.0  ;;  %v210_v30 = vmul.f32 0.2, %v138_v24  ;;  %v211_v31 = vmul.f32 0.2, %v139_v25 }
   0xa   :  { %v244_v32 = vsel %vm172_vm0, %v136_v20, %v208_v28  ;;  %v245_v33 = vsel %vm173_vm1, %v137_v21, %v209_v29  ;;  %vm176_vm4 = vcmp.ge.f32.partialorder %v140_v26, 0.0  ;;  %vm177_vm5 = vcmp.ge.f32.partialorder %v141_v27, 0.0 }
   0xb   :  { %v613_v36 = vpack.c.bf16 %v245_v33, %v244_v32  ;;  %v246_v37 = vsel %vm174_vm2, %v138_v24, %v210_v30  ;;  %v247_v38 = vsel %vm175_vm3, %v139_v25, %v211_v31  ;;  %v212_v39 = vmul.f32 0.2, %v140_v26 }
   0xc   :  { %v618_v40 = vpack.c.bf16 %v247_v38, %v246_v37  ;;  %v213_v41 = vmul.f32 0.2, %v141_v27  ;;  %v556_v45 = vunpack.c.l.bf16 %v703_v34  ;;  %v557_v46 = vunpack.c.h.bf16 %v703_v34 }
   0xd   :  { %614 = vst [vmem:[%s948_s3] sm:$0xff] %v613_v36   ;;  %v248_v44 = vsel %vm176_vm4, %v140_v26, %v212_v39  ;;  %v560_v47 = vunpack.c.l.bf16 %v704_v35  ;;  %vm178_vm6 = vcmp.ge.f32.partialorder %v142_v42, 0.0  ;;  %vm179_vm7 = vcmp.ge.f32.partialorder %v143_v43, 0.0  ;;  %v708_v26 = vld [vmem:[%s945_s0 + $0x48] sm:$0xff]  }
   0xe   :  { %717 = vst [vmem:[%s948_s3 + $0x8] sm:$0xff] %v618_v40   ;;  %v249_v49 = vsel %vm177_vm5, %v141_v27, %v213_v41  ;;  %v214_v50 = vmul.f32 0.2, %v142_v42  ;;  %v215_v52 = vmul.f32 0.2, %v143_v43  ;;  %v101_v53 = vmul.f32 %v556_v45, %v760_v1  ;;  %v709_v27 = vld [vmem:[%s945_s0 + $0x50] sm:$0xff]  }
   0xf   :  { %v623_v51 = vpack.c.bf16 %v249_v49, %v248_v44  ;;  %v102_v54 = vmul.f32 %v557_v46, %v760_v1  ;;  %v561_v56 = vunpack.c.h.bf16 %v704_v35  ;;  %v103_v57 = vmul.f32 %v560_v47, %v760_v1 }
  0x10   :  { %v250_v55 = vsel %vm178_vm6, %v142_v42, %v214_v50  ;;  %v564_v58 = vunpack.c.l.bf16 %v705_v48  ;;  %v251_v59 = vsel %vm179_vm7, %v143_v43, %v215_v52  ;;  %v144_v60 = vadd.f32 %v774_v7, %v101_v53 }
  0x11   :  { %718 = vst [vmem:[%s948_s3 + $0x10] sm:$0xff] %v623_v51   ;;  %v145_v61 = vadd.f32 %v774_v7, %v102_v54  ;;  %v565_v62 = vunpack.c.h.bf16 %v705_v48  ;;  %v628_v63 = vpack.c.bf16 %v251_v59, %v250_v55  ;;  %v104_v0 = vmul.f32 %v561_v56, %v760_v1  ;;  %v710_v55 = vld [vmem:[%s945_s0 + $0x58] sm:$0xff]  }
  0x12   :  { %v146_v2 = vadd.f32 %v774_v7, %v103_v57  ;;  %v105_v3 = vmul.f32 %v564_v58, %v760_v1  ;;  %vm180_vm8 = vcmp.ge.f32.partialorder %v144_v60, 0.0  ;;  %v216_v5 = vmul.f32 0.2, %v144_v60 }
  0x13   :  { %vm181_vm9 = vcmp.ge.f32.partialorder %v145_v61, 0.0  ;;  %v217_v6 = vmul.f32 0.2, %v145_v61  ;;  %719 = vst [vmem:[%s948_s3 + $0x18] sm:$0xff] %v628_v63   ;;  %v147_v8 = vadd.f32 %v774_v7, %v104_v0  ;;  %v106_v10 = vmul.f32 %v565_v62, %v760_v1 }
  0x14   :  { %vm182_vm10 = vcmp.ge.f32.partialorder %v146_v2, 0.0  ;;  %v218_v9 = vmul.f32 0.2, %v146_v2  ;;  %v252_v11 = vsel %vm180_vm8, %v144_v60, %v216_v5  ;;  %v148_v13 = vadd.f32 %v774_v7, %v105_v3  ;;  %v711_v60 = vld [vmem:[%s945_s0 + $0x60] sm:$0xff]  }
  0x15   :  { %v253_v12 = vsel %vm181_vm9, %v145_v61, %v217_v6  ;;  %v568_v14 = vunpack.c.l.bf16 %v706_v4  ;;  %vm183_vm11 = vcmp.ge.f32.partialorder %v147_v8, 0.0  ;;  %v219_v17 = vmul.f32 0.2, %v147_v8 }
  0x16   :  { %v633_v16 = vpack.c.bf16 %v253_v12, %v252_v11  ;;  %v254_v18 = vsel %vm182_vm10, %v146_v2, %v218_v9  ;;  %v149_v19 = vadd.f32 %v774_v7, %v106_v10  ;;  %vm184_vm12 = vcmp.ge.f32.partialorder %v148_v13, 0.0  ;;  %v712_v9 = vld [vmem:[%s945_s0 + $0x68] sm:$0xff]  }
  0x17   :  { %v220_v20 = vmul.f32 0.2, %v148_v13  ;;  %v569_v21 = vunpack.c.h.bf16 %v706_v4  ;;  %v255_v22 = vsel %vm183_vm11, %v147_v8, %v219_v17  ;;  %v107_v23 = vmul.f32 %v568_v14, %v760_v1 }
  0x18   :  { %720 = vst [vmem:[%s948_s3 + $0x20] sm:$0xff] %v633_v16   ;;  %v572_v24 = vunpack.c.l.bf16 %v707_v15  ;;  %v573_v25 = vunpack.c.h.bf16 %v707_v15  ;;  %v638_v28 = vpack.c.bf16 %v255_v22, %v254_v18  ;;  %vm185_vm13 = vcmp.ge.f32.partialorder %v149_v19, 0.0 }
  0x19   :  { %v221_v29 = vmul.f32 0.2, %v149_v19  ;;  %v256_v30 = vsel %vm184_vm12, %v148_v13, %v220_v20  ;;  %v108_v31 = vmul.f32 %v569_v21, %v760_v1  ;;  %v150_v32 = vadd.f32 %v774_v7, %v107_v23 }
  0x1a   :  { %v109_v33 = vmul.f32 %v572_v24, %v760_v1  ;;  %v110_v34 = vmul.f32 %v573_v25, %v760_v1  ;;  %721 = vst [vmem:[%s948_s3 + $0x28] sm:$0xff] %v638_v28   ;;  %v576_v36 = vunpack.c.l.bf16 %v708_v26  ;;  %v577_v37 = vunpack.c.h.bf16 %v708_v26  ;;  %v713_v28 = vld [vmem:[%s945_s0 + $0x70] sm:$0xff]  }
  0x1b   :  { %v257_v35 = vsel %vm185_vm13, %v149_v19, %v221_v29  ;;  %v580_v38 = vunpack.c.l.bf16 %v709_v27  ;;  %v151_v40 = vadd.f32 %v774_v7, %v108_v31  ;;  %vm186_vm14 = vcmp.ge.f32.partialorder %v150_v32, 0.0 }
  0x1c   :  { %v643_v39 = vpack.c.bf16 %v257_v35, %v256_v30  ;;  %v222_v41 = vmul.f32 0.2, %v150_v32  ;;  %v152_v42 = vadd.f32 %v774_v7, %v109_v33  ;;  %v153_v43 = vadd.f32 %v774_v7, %v110_v34 }
  0x1d   :  { %v111_v44 = vmul.f32 %v576_v36, %v760_v1  ;;  %v112_v45 = vmul.f32 %v577_v37, %v760_v1  ;;  %vm187_vm15 = vcmp.ge.f32.partialorder %v151_v40, 0.0  ;;  %v223_v46 = vmul.f32 0.2, %v151_v40  ;;  %v714_v37 = vld [vmem:[%s945_s0 + $0x78] sm:$0xff]  }
  0x1e   :  { %722 = vst [vmem:[%s948_s3 + $0x30] sm:$0xff] %v643_v39   ;;  %v258_v47 = vsel %vm186_vm14, %v150_v32, %v222_v41  ;;  %v581_v48 = vunpack.c.h.bf16 %v709_v27  ;;  %vm188_vm0 = vcmp.ge.f32.partialorder %v152_v42, 0.0  ;;  %vm189_vm1 = vcmp.ge.f32.partialorder %v153_v43, 0.0 }
  0x1f   :  { %v224_v49 = vmul.f32 0.2, %v152_v42  ;;  %v225_v50 = vmul.f32 0.2, %v153_v43  ;;  %v259_v51 = vsel %vm187_vm15, %v151_v40, %v223_v46  ;;  %v154_v52 = vadd.f32 %v774_v7, %v111_v44 }
  0x20   :  { %v155_v53 = vadd.f32 %v774_v7, %v112_v45  ;;  %v113_v54 = vmul.f32 %v580_v38, %v760_v1  ;;  %v648_v56 = vpack.c.bf16 %v259_v51, %v258_v47  ;;  %v114_v59 = vmul.f32 %v581_v48, %v760_v1 }
  0x21   :  { %v260_v57 = vsel %vm188_vm0, %v152_v42, %v224_v49  ;;  %v261_v58 = vsel %vm189_vm1, %v153_v43, %v225_v50  ;;  %vm190_vm2 = vcmp.ge.f32.partialorder %v154_v52, 0.0  ;;  %v226_v62 = vmul.f32 0.2, %v154_v52  ;;  %v715_v42 = vld [vmem:[%s945_s0 + $0x80] sm:$0xff]   ;;  %v716_v50 = vld [vmem:[%s945_s0 + $0x88] sm:$0xff]  }
  0x22   :  { %v653_v61 = vpack.c.bf16 %v261_v58, %v260_v57  ;;  %vm191_vm3 = vcmp.ge.f32.partialorder %v155_v53, 0.0  ;;  %723 = vst [vmem:[%s948_s3 + $0x38] sm:$0xff] %v648_v56   ;;  %v227_v63 = vmul.f32 0.2, %v155_v53  ;;  %v156_v0 = vadd.f32 %v774_v7, %v113_v54 }
  0x23   :  { %v157_v2 = vadd.f32 %v774_v7, %v114_v59  ;;  %v584_v3 = vunpack.c.l.bf16 %v710_v55  ;;  %v262_v4 = vsel %vm190_vm2, %v154_v52, %v226_v62  ;;  %v585_v5 = vunpack.c.h.bf16 %v710_v55 }
  0x24   :  { %724 = vst [vmem:[%s948_s3 + $0x40] sm:$0xff] %v653_v61   ;;  %v588_v6 = vunpack.c.l.bf16 %v711_v60  ;;  %v589_v8 = vunpack.c.h.bf16 %v711_v60  ;;  %v263_v10 = vsel %vm191_vm3, %v155_v53, %v227_v63  ;;  %vm192_vm4 = vcmp.ge.f32.partialorder %v156_v0, 0.0 }
  0x25   :  { %vm193_vm5 = vcmp.ge.f32.partialorder %v157_v2, 0.0  ;;  %v228_v11 = vmul.f32 0.2, %v156_v0  ;;  %v658_v12 = vpack.c.bf16 %v263_v10, %v262_v4  ;;  %v229_v13 = vmul.f32 0.2, %v157_v2 }
  0x26   :  { %v115_v14 = vmul.f32 %v584_v3, %v760_v1  ;;  %v116_v15 = vmul.f32 %v585_v5, %v760_v1  ;;  %v117_v17 = vmul.f32 %v588_v6, %v760_v1  ;;  %v118_v18 = vmul.f32 %v589_v8, %v760_v1 }
  0x27   :  { %v264_v16 = vsel %vm192_vm4, %v156_v0, %v228_v11  ;;  %v592_v19 = vunpack.c.l.bf16 %v712_v9  ;;  %725 = vst [vmem:[%s948_s3 + $0x48] sm:$0xff] %v658_v12   ;;  %v265_v20 = vsel %vm193_vm5, %v157_v2, %v229_v13  ;;  %v593_v23 = vunpack.c.h.bf16 %v712_v9 }
  0x28   :  { %v158_v21 = vadd.f32 %v774_v7, %v115_v14  ;;  %v159_v22 = vadd.f32 %v774_v7, %v116_v15  ;;  %v663_v24 = vpack.c.bf16 %v265_v20, %v264_v16  ;;  %v160_v25 = vadd.f32 %v774_v7, %v117_v17 }
  0x29   :  { %v161_v26 = vadd.f32 %v774_v7, %v118_v18  ;;  %v119_v27 = vmul.f32 %v592_v19, %v760_v1  ;;  %v120_v35 = vmul.f32 %v593_v23, %v760_v1  ;;  %v596_v41 = vunpack.c.l.bf16 %v713_v28 }
  0x2a   :  { %vm194_vm6 = vcmp.ge.f32.partialorder %v158_v21, 0.0  ;;  %vm195_vm7 = vcmp.ge.f32.partialorder %v159_v22, 0.0  ;;  %v230_v29 = vmul.f32 0.2, %v158_v21  ;;  %v231_v30 = vmul.f32 0.2, %v159_v22 }
  0x2b   :  { %726 = vst [vmem:[%s948_s3 + $0x50] sm:$0xff] %v663_v24   ;;  %vm196_vm8 = vcmp.ge.f32.partialorder %v160_v25, 0.0  ;;  %vm197_vm9 = vcmp.ge.f32.partialorder %v161_v26, 0.0  ;;  %v232_v31 = vmul.f32 0.2, %v160_v25  ;;  %v162_v36 = vadd.f32 %v774_v7, %v119_v27 }
  0x2c   :  { %v233_v32 = vmul.f32 0.2, %v161_v26  ;;  %v266_v33 = vsel %vm194_vm6, %v158_v21, %v230_v29  ;;  %v267_v34 = vsel %vm195_vm7, %v159_v22, %v231_v30  ;;  %v163_v44 = vadd.f32 %v774_v7, %v120_v35 }
  0x2d   :  { %v668_v38 = vpack.c.bf16 %v267_v34, %v266_v33  ;;  %v268_v39 = vsel %vm196_vm8, %v160_v25, %v232_v31  ;;  %vm198_vm10 = vcmp.ge.f32.partialorder %v162_v36, 0.0  ;;  %v234_v45 = vmul.f32 0.2, %v162_v36 }
  0x2e   :  { %v269_v40 = vsel %vm197_vm9, %v161_v26, %v233_v32  ;;  %v597_v46 = vunpack.c.h.bf16 %v713_v28  ;;  %v121_v47 = vmul.f32 %v596_v41, %v760_v1  ;;  %v600_v48 = vunpack.c.l.bf16 %v714_v37 }
  0x2f   :  { %v673_v43 = vpack.c.bf16 %v269_v40, %v268_v39  ;;  %727 = vst [vmem:[%s948_s3 + $0x58] sm:$0xff] %v668_v38   ;;  %v601_v49 = vunpack.c.h.bf16 %v714_v37  ;;  %vm199_vm11 = vcmp.ge.f32.partialorder %v163_v44, 0.0  ;;  %v235_v51 = vmul.f32 0.2, %v163_v44 }
  0x30   :  { %v270_v52 = vsel %vm198_vm10, %v162_v36, %v234_v45  ;;  %v604_v53 = vunpack.c.l.bf16 %v715_v42  ;;  %v122_v54 = vmul.f32 %v597_v46, %v760_v1  ;;  %v164_v55 = vadd.f32 %v774_v7, %v121_v47 }
  0x31   :  { %728 = vst [vmem:[%s948_s3 + $0x60] sm:$0xff] %v673_v43   ;;  %v123_v56 = vmul.f32 %v600_v48, %v760_v1  ;;  %v124_v57 = vmul.f32 %v601_v49, %v760_v1  ;;  %v271_v58 = vsel %vm199_vm11, %v163_v44, %v235_v51  ;;  %v605_v59 = vunpack.c.h.bf16 %v715_v42 }
  0x32   :  { %v125_v60 = vmul.f32 %v604_v53, %v760_v1  ;;  %v608_v61 = vunpack.c.l.bf16 %v716_v50  ;;  %v678_v62 = vpack.c.bf16 %v271_v58, %v270_v52  ;;  %v165_v63 = vadd.f32 %v774_v7, %v122_v54 }
  0x33   :  { %vm200_vm12 = vcmp.ge.f32.partialorder %v164_v55, 0.0  ;;  %v236_v0 = vmul.f32 0.2, %v164_v55  ;;  %v166_v2 = vadd.f32 %v774_v7, %v123_v56  ;;  %v167_v3 = vadd.f32 %v774_v7, %v124_v57 }
  0x34   :  { %v126_v4 = vmul.f32 %v605_v59, %v760_v1  ;;  %v168_v5 = vadd.f32 %v774_v7, %v125_v60  ;;  %729 = vst [vmem:[%s948_s3 + $0x68] sm:$0xff] %v678_v62   ;;  %vm201_vm13 = vcmp.ge.f32.partialorder %v165_v63, 0.0  ;;  %v237_v6 = vmul.f32 0.2, %v165_v63 }
  0x35   :  { %v272_v8 = vsel %vm200_vm12, %v164_v55, %v236_v0  ;;  %v609_v9 = vunpack.c.h.bf16 %v716_v50  ;;  %vm202_vm14 = vcmp.ge.f32.partialorder %v166_v2, 0.0  ;;  %vm203_vm15 = vcmp.ge.f32.partialorder %v167_v3, 0.0 }
  0x36   :  { %v238_v10 = vmul.f32 0.2, %v166_v2  ;;  %v239_v11 = vmul.f32 0.2, %v167_v3  ;;  %v273_v12 = vsel %vm201_vm13, %v165_v63, %v237_v6  ;;  %v169_v13 = vadd.f32 %v774_v7, %v126_v4 }
  0x37   :  { %vm204_vm0 = vcmp.ge.f32.partialorder %v168_v5, 0.0  ;;  %v240_v14 = vmul.f32 0.2, %v168_v5  ;;  %v683_v15 = vpack.c.bf16 %v273_v12, %v272_v8  ;;  %v127_v18 = vmul.f32 %v608_v61, %v760_v1 }
  0x38   :  { %v274_v16 = vsel %vm202_vm14, %v166_v2, %v238_v10  ;;  %v275_v17 = vsel %vm203_vm15, %v167_v3, %v239_v11  ;;  %vm205_vm1 = vcmp.ge.f32.partialorder %v169_v13, 0.0  ;;  %v241_v20 = vmul.f32 0.2, %v169_v13 }
  0x39   :  { %v688_v19 = vpack.c.bf16 %v275_v17, %v274_v16  ;;  %v276_v21 = vsel %vm204_vm0, %v168_v5, %v240_v14  ;;  %730 = vst [vmem:[%s948_s3 + $0x70] sm:$0xff] %v683_v15   ;;  %v128_v22 = vmul.f32 %v609_v9, %v760_v1  ;;  %v170_v23 = vadd.f32 %v774_v7, %v127_v18 }
  0x3a   :  { %v277_v24 = vsel %vm205_vm1, %v169_v13, %v241_v20 }
  0x3b   :  { %731 = vst [vmem:[%s948_s3 + $0x78] sm:$0xff] %v688_v19   ;;  %v693_v25 = vpack.c.bf16 %v277_v24, %v276_v21  ;;  %v171_v26 = vadd.f32 %v774_v7, %v128_v22  ;;  %vm206_vm2 = vcmp.ge.f32.partialorder %v170_v23, 0.0  ;;  %v242_v27 = vmul.f32 0.2, %v170_v23 }
  0x3d   :  { %732 = vst [vmem:[%s948_s3 + $0x80] sm:$0xff] %v693_v25   ;;  %vm207_vm3 = vcmp.ge.f32.partialorder %v171_v26, 0.0  ;;  %v243_v28 = vmul.f32 0.2, %v171_v26  ;;  %v278_v29 = vsel %vm206_vm2, %v170_v23, %v242_v27 }
  0x3f   :  { %v279_v1 = vsel %vm207_vm3, %v171_v26, %v243_v28 }
  0x40   :  { %v698_v30 = vpack.c.bf16 %v279_v1, %v278_v29 }
  0x42   :  { %733 = vst [vmem:[%s948_s3 + $0x88] sm:$0xff] %v698_v30  }

// kernel: netd_forward.8
= control target key start
LH: loop header
LB: loop body
LE: loop exit
PB: predicated region body
PF: predicated region fallthrough
CT: control target
= control target key end

     0   :  { %v3186_v0 = vmov 0   ;;  %vm2543_vm0 = vcmask 1040384   ;;  %s3964_s1 = inlined_call_operand.vmem [shape: bf16[1024,128], index: 1, kind: input, shape index: {}]   ;;  %s3965_s0 = inlined_call_operand.vmem [shape: bf16[288,1024], index: 0, kind: input, shape index: {}]   ;;  %s3966_s2 = inlined_call_operand.vmem [shape: bf16[288,128], index: 2, kind: output, shape index: {0}]   ;;  %s3967_s3 = inlined_call_operand.vmem [shape: f32[1,2,128], index: 3, kind: output, shape index: {1}]  }
   0x1   :  { %1390 = vmatprep.subr.bf16.mxu1 %v3186_v0  ;;  %1744 = vmatprep.subr.bf16.mxu0 %v3186_v0  ;;  %v3122_v1 = vld [vmem:[%s3964_s1] sm:$0xff]   ;;  %v3124_v3 = vld [vmem:[%s3964_s1 + $0x8] sm:$0xff]   ;;  %v3126_v5 = vld [vmem:[%s3964_s1 + $0x10] sm:$0xff]  }
   0x2   :  { %v3123_v2 = vld [vmem:[%s3964_s1 + $0x100] sm:$0xff]   ;;  %1391 = vmatpush1.bf16.msra.mxu1 %v3122_v1  ;;  %v3125_v4 = vld [vmem:[%s3964_s1 + $0x108] sm:$0xff]   ;;  %v3127_v6 = vld [vmem:[%s3964_s1 + $0x110] sm:$0xff]  }
   0x3   :  { %1745 = vmatpush1.bf16.msra.mxu0 %v3123_v2  ;;  %1392 = vmatprep.subr.bf16.mxu1 %v3186_v0  ;;  %v3128_v7 = vld [vmem:[%s3964_s1 + $0x18] sm:$0xff]   ;;  %v3130_v9 = vld [vmem:[%s3964_s1 + $0x20] sm:$0xff]   ;;  %v3132_v11 = vld [vmem:[%s3964_s1 + $0x28] sm:$0xff]  }
   0x4   :  { %1746 = vmatprep.subr.bf16.mxu0 %v3186_v0  ;;  %v3129_v8 = vld [vmem:[%s3964_s1 + $0x118] sm:$0xff]   ;;  %v3131_v10 = vld [vmem:[%s3964_s1 + $0x120] sm:$0xff]   ;;  %v3133_v12 = vld [vmem:[%s3964_s1 + $0x128] sm:$0xff]  }
   0x5   :  { %v3134_v13 = vld [vmem:[%s3964_s1 + $0x30] sm:$0xff]   ;;  %v3136_v15 = vld [vmem:[%s3964_s1 + $0x38] sm:$0xff]   ;;  %v3138_v17 = vld [vmem:[%s3964_s1 + $0x40] sm:$0xff]  }
   0x6   :  { %1393 = vmatpush1.bf16.msra.mxu1 %v3124_v3  ;;  %v3135_v14 = vld [vmem:[%s3964_s1 + $0x130] sm:$0xff]   ;;  %v3137_v16 = vld [vmem:[%s3964_s1 + $0x138] sm:$0xff]   ;;  %v3139_v18 = vld [vmem:[%s3964_s1 + $0x140] sm:$0xff]  }
   0x7   :  { %1747 = vmatpush1.bf16.msra.mxu0 %v3125_v4  ;;  %1394 = vmatprep.subr.bf16.mxu1 %v3186_v0  ;;  %v3282_v19 = vld [vmem:[%s3965_s0] sm:$0xff]  ;;  %v3292_v21 = vld [vmem:[%s3965_s0 + $0x10] sm:$0xff]  ;;  %v3140_v24 = vld [vmem:[%s3964_s1 + $0x48] sm:$0xff]  }
   0x8   :  { %1748 = vmatprep.subr.bf16.mxu0 %v3186_v0  ;;  %v3287_v20 = vld [vmem:[%s3965_s0 + $0x20] sm:$0xff]  ;;  %v20_v23 = vld [vmem:[%s3965_s0 + $0x30] sm:$0xff]  ;;  %v3141_v26 = vld [vmem:[%s3964_s1 + $0x148] sm:$0xff]  }
   0x9   :  { %v2555_v22 = vcombine.high %v3282_v19, %v3287_v20  ;;  %v2559_v25 = vcombine.high %v3292_v21, %v20_v23  ;;  %v3142_v27 = vld [vmem:[%s3964_s1 + $0x50] sm:$0xff]   ;;  %v3144_v29 = vld [vmem:[%s3964_s1 + $0x58] sm:$0xff]   ;;  %v3146_v31 = vld [vmem:[%s3964_s1 + $0x60] sm:$0xff]   ;;  %v2554_v42 = vcombine.low %v3282_v19, %v3287_v20  ;;  %v2558_v44 = vcombine.low %v3292_v21, %v20_v23 }
   0xa   :  { %1395 = vmatpush1.bf16.msra.mxu1 %v3126_v5  ;;  %v3143_v28 = vld [vmem:[%s3964_s1 + $0x150] sm:$0xff]   ;;  %v3145_v30 = vld [vmem:[%s3964_s1 + $0x158] sm:$0xff]   ;;  %v3147_v32 = vld [vmem:[%s3964_s1 + $0x160] sm:$0xff]  }
   0xb   :  { %1749 = vmatpush1.bf16.msra.mxu0 %v3127_v6  ;;  %1396 = vmatprep.subr.bf16.mxu1 %v3186_v0  ;;  %v3148_v33 = vld [vmem:[%s3964_s1 + $0x68] sm:$0xff]   ;;  %v3150_v35 = vld [vmem:[%s3964_s1 + $0x70] sm:$0xff]   ;;  %v3152_v37 = vld [vmem:[%s3964_s1 + $0x78] sm:$0xff]  }
   0xc   :  { %1750 = vmatprep.subr.bf16.mxu0 %v3186_v0  ;;  %1422 = vmatprep.mubr.bf16.mxu1 %v2555_v22  ;;  %v3149_v34 = vld [vmem:[%s3964_s1 + $0x168] sm:$0xff]   ;;  %v3151_v36 = vld [vmem:[%s3964_s1 + $0x170] sm:$0xff]   ;;  %v3153_v38 = vld [vmem:[%s3964_s1 + $0x178] sm:$0xff]  }
   0xd   :  { %1776 = vmatprep.mubr.bf16.mxu0 %v2559_v25  ;;  %v22_v39 = vld [vmem:[%s3965_s0 + $0x40] sm:$0xff]  ;;  %v24_v41 = vld [vmem:[%s3965_s0 + $0x50] sm:$0xff]  ;;  %v3156_v49 = vld [vmem:[%s3964_s1 + $0x88] sm:$0xff]  }
   0xe   :  { %1397 = vmatpush1.bf16.msra.mxu1 %v3128_v7  ;;  %v26_v40 = vld [vmem:[%s3965_s0 + $0x60] sm:$0xff]  ;;  %v28_v43 = vld [vmem:[%s3965_s0 + $0x70] sm:$0xff]  ;;  %v3157_v50 = vld [vmem:[%s3964_s1 + $0x188] sm:$0xff]  }
   0xf   :  { %1751 = vmatpush1.bf16.msra.mxu0 %v3129_v8  ;;  %1398 = vmatprep.subr.bf16.mxu1 %v3186_v0  ;;  %v3154_v45 = vld [vmem:[%s3964_s1 + $0x80] sm:$0xff]   ;;  %v2563_v47 = vcombine.high %v22_v39, %v26_v40  ;;  %v2567_v48 = vcombine.high %v24_v41, %v28_v43  ;;  %v32_v53 = vld [vmem:[%s3965_s0 + $0x90] sm:$0xff]  ;;  %v2562_v55 = vcombine.low %v22_v39, %v26_v40  ;;  %v3160_v1 = vld [vmem:[%s3964_s1 + $0x98] sm:$0xff]  }
  0x10   :  { %1752 = vmatprep.subr.bf16.mxu0 %v3186_v0  ;;  %v3155_v46 = vld [vmem:[%s3964_s1 + $0x180] sm:$0xff]   ;;  %v36_v54 = vld [vmem:[%s3965_s0 + $0xb0] sm:$0xff]  ;;  %v2566_v56 = vcombine.low %v24_v41, %v28_v43  ;;  %v3161_v3 = vld [vmem:[%s3964_s1 + $0x198] sm:$0xff]  }
  0x11   :  { %v30_v51 = vld [vmem:[%s3965_s0 + $0x80] sm:$0xff]  ;;  %v2575_v58 = vcombine.high %v32_v53, %v36_v54  ;;  %v3158_v59 = vld [vmem:[%s3964_s1 + $0x90] sm:$0xff]   ;;  %v2574_v5 = vcombine.low %v32_v53, %v36_v54  ;;  %v3173_v39 = vld [vmem:[%s3964_s1 + $0x1c8] sm:$0xff]  }
  0x12   :  { %1399 = vmatpush1.bf16.msra.mxu1 %v3130_v9  ;;  %v34_v52 = vld [vmem:[%s3965_s0 + $0xa0] sm:$0xff]  ;;  %v3159_v60 = vld [vmem:[%s3964_s1 + $0x190] sm:$0xff]  }
  0x13   :  { %1753 = vmatpush1.bf16.msra.mxu0 %v3131_v10  ;;  %1400 = vmatprep.subr.bf16.mxu1 %v3186_v0  ;;  %v2571_v57 = vcombine.high %v30_v51, %v34_v52  ;;  %v38_v61 = vld [vmem:[%s3965_s0 + $0xc0] sm:$0xff]  ;;  %v40_v63 = vld [vmem:[%s3965_s0 + $0xd0] sm:$0xff]  ;;  %v2570_v4 = vcombine.low %v30_v51, %v34_v52  ;;  %v3177_v51 = vld [vmem:[%s3964_s1 + $0x1d8] sm:$0xff]  }
  0x14   :  { %1754 = vmatprep.subr.bf16.mxu0 %v3186_v0  ;;  %v42_v62 = vld [vmem:[%s3965_s0 + $0xe0] sm:$0xff]  ;;  %v44_v2 = vld [vmem:[%s3965_s0 + $0xf0] sm:$0xff] }
  0x15   :  { %v2579_v6 = vcombine.high %v38_v61, %v42_v62  ;;  %v2583_v7 = vcombine.high %v40_v63, %v44_v2  ;;  %v3162_v8 = vld [vmem:[%s3964_s1 + $0xa0] sm:$0xff]   ;;  %v3166_v20 = vld [vmem:[%s3964_s1 + $0xb0] sm:$0xff]  }
  0x16   :  { %1401 = vmatpush1.bf16.msra.mxu1 %v3132_v11  ;;  %v3163_v9 = vld [vmem:[%s3964_s1 + $0x1a0] sm:$0xff]   ;;  %v3167_v21 = vld [vmem:[%s3964_s1 + $0x1b0] sm:$0xff]  }
  0x17   :  { %1755 = vmatpush1.bf16.msra.mxu0 %v3133_v12  ;;  %1402 = vmatprep.subr.bf16.mxu1 %v3186_v0  ;;  %v46_v10 = vld [vmem:[%s3965_s0 + $0x100] sm:$0xff]  ;;  %v48_v12 = vld [vmem:[%s3965_s0 + $0x110] sm:$0xff] }
  0x18   :  { %1756 = vmatprep.subr.bf16.mxu0 %v3186_v0  ;;  %v50_v11 = vld [vmem:[%s3965_s0 + $0x120] sm:$0xff]  ;;  %v56_v25 = vld [vmem:[%s3965_s0 + $0x150] sm:$0xff] }
  0x19   :  { %v54_v22 = vld [vmem:[%s3965_s0 + $0x140] sm:$0xff] }
  0x1a   :  { %1403 = vmatpush1.bf16.msra.mxu1 %v3134_v13  ;;  %v3164_v13 = vld [vmem:[%s3964_s1 + $0xa8] sm:$0xff]   ;;  %v58_v23 = vld [vmem:[%s3965_s0 + $0x160] sm:$0xff] }
  0x1b   :  { %1757 = vmatpush1.bf16.msra.mxu0 %v3135_v14  ;;  %1404 = vmatprep.subr.bf16.mxu1 %v3186_v0  ;;  %v52_v14 = vld [vmem:[%s3965_s0 + $0x130] sm:$0xff]  ;;  %v2594_v40 = vcombine.low %v54_v22, %v58_v23 }
  0x1c   :  { %1758 = vmatprep.subr.bf16.mxu0 %v3186_v0  ;;  %v2591_v19 = vcombine.high %v48_v12, %v52_v14 }
  0x1e   :  { %1405 = vmatpush1.bf16.msra.mxu1 %v3136_v15  ;;  %v3165_v15 = vld [vmem:[%s3964_s1 + $0x1a8] sm:$0xff]  }
  0x1f   :  { %1759 = vmatpush1.bf16.msra.mxu0 %v3137_v16  ;;  %1406 = vmatprep.subr.bf16.mxu1 %v3186_v0  ;;  %v2578_v16 = vcombine.low %v38_v61, %v42_v62  ;;  %v80_v61 = vld [vmem:[%s3965_s0 + $0x210] sm:$0xff] }
  0x20   :  { %1760 = vmatprep.subr.bf16.mxu0 %v3186_v0  ;;  %v84_v62 = vld [vmem:[%s3965_s0 + $0x230] sm:$0xff] }
  0x22   :  { %1407 = vmatpush1.bf16.msra.mxu1 %v3138_v17  ;;  %v2582_v17 = vcombine.low %v40_v63, %v44_v2  ;;  %v3181_v63 = vld [vmem:[%s3964_s1 + $0x1e8] sm:$0xff]  }
  0x23   :  { %1761 = vmatpush1.bf16.msra.mxu0 %v3139_v18  ;;  %1408 = vmatprep.subr.bf16.mxu1 %v3186_v0  ;;  %v2587_v18 = vcombine.high %v46_v10, %v50_v11 }
  0x24   :  { %1762 = vmatprep.subr.bf16.mxu0 %v3186_v0 }
  0x26   :  { %1409 = vmatpush1.bf16.msra.mxu1 %v3140_v24  ;;  %v3168_v24 = vld [vmem:[%s3964_s1 + $0xb8] sm:$0xff]  }
  0x27   :  { %1763 = vmatpush1.bf16.msra.mxu0 %v3141_v26  ;;  %1410 = vmatprep.subr.bf16.mxu1 %v3186_v0  ;;  %v60_v26 = vld [vmem:[%s3965_s0 + $0x170] sm:$0xff] }
  0x28   :  { %1764 = vmatprep.subr.bf16.mxu0 %v3186_v0  ;;  %v2598_v41 = vcombine.low %v56_v25, %v60_v26 }
  0x2a   :  { %1411 = vmatpush1.bf16.msra.mxu1 %v3142_v27  ;;  %v3169_v27 = vld [vmem:[%s3964_s1 + $0x1b8] sm:$0xff]  }
  0x2b   :  { %1765 = vmatpush1.bf16.msra.mxu0 %v3143_v28  ;;  %1412 = vmatprep.subr.bf16.mxu1 %v3186_v0  ;;  %v2586_v28 = vcombine.low %v46_v10, %v50_v11  ;;  %v88_v10 = vld [vmem:[%s3965_s0 + $0x250] sm:$0xff] }
  0x2c   :  { %1766 = vmatprep.subr.bf16.mxu0 %v3186_v0  ;;  %v92_v11 = vld [vmem:[%s3965_s0 + $0x270] sm:$0xff] }
  0x2e   :  { %1413 = vmatpush1.bf16.msra.mxu1 %v3144_v29  ;;  %v2590_v29 = vcombine.low %v48_v12, %v52_v14  ;;  %v3185_v12 = vld [vmem:[%s3964_s1 + $0x1f8] sm:$0xff]   ;;  %v2622_v14 = vcombine.low %v80_v61, %v84_v62 }
  0x2f   :  { %1767 = vmatpush1.bf16.msra.mxu0 %v3145_v30  ;;  %1414 = vmatprep.subr.bf16.mxu1 %v3186_v0  ;;  %v2595_v30 = vcombine.high %v54_v22, %v58_v23 }
  0x30   :  { %1768 = vmatprep.subr.bf16.mxu0 %v3186_v0 }
  0x32   :  { %1415 = vmatpush1.bf16.msra.mxu1 %v3146_v31  ;;  %v2599_v31 = vcombine.high %v56_v25, %v60_v26  ;;  %v106_v25 = vld [vmem:[%s3965_s0 + $0x2e0] sm:$0xff]  ;;  %v104_v26 = vld [vmem:[%s3965_s0 + $0x2d0] sm:$0xff] }
  0x33   :  { %1769 = vmatpush1.bf16.msra.mxu0 %v3147_v32  ;;  %1416 = vmatprep.subr.bf16.mxu1 %v3186_v0  ;;  %v3170_v32 = vld [vmem:[%s3964_s1 + $0xc0] sm:$0xff]  }
  0x34   :  { %1770 = vmatprep.subr.bf16.mxu0 %v3186_v0 }
  0x36   :  { %1417 = vmatpush1.bf16.msra.mxu1 %v3148_v33  ;;  %v3171_v33 = vld [vmem:[%s3964_s1 + $0x1c0] sm:$0xff]  }
  0x37   :  { %1771 = vmatpush1.bf16.msra.mxu0 %v3149_v34  ;;  %1418 = vmatprep.subr.bf16.mxu1 %v3186_v0  ;;  %v62_v34 = vld [vmem:[%s3965_s0 + $0x180] sm:$0xff] }
  0x38   :  { %1772 = vmatprep.subr.bf16.mxu0 %v3186_v0 }
  0x3a   :  { %1419 = vmatpush1.bf16.msra.mxu1 %v3150_v35  ;;  %v66_v35 = vld [vmem:[%s3965_s0 + $0x1a0] sm:$0xff] }
  0x3b   :  { %1773 = vmatpush1.bf16.msra.mxu0 %v3151_v36  ;;  %1420 = vmatprep.subr.bf16.mxu1 %v3186_v0  ;;  %v3172_v36 = vld [vmem:[%s3964_s1 + $0xc8] sm:$0xff]   ;;  %v2602_v52 = vcombine.low %v62_v34, %v66_v35 }
  0x3c   :  { %1774 = vmatprep.subr.bf16.mxu0 %v3186_v0 }
  0x3e   :  { %1421 = vmatpush1.bf16.msra.mxu1 %v3152_v37  ;;  %v64_v37 = vld [vmem:[%s3965_s0 + $0x190] sm:$0xff] }
  0x3f   :  { %1775 = vmatpush1.bf16.msra.mxu0 %v3153_v38  ;;  %1567 = vmatprep.subr.bf16.mxu1 %v3186_v0  ;;  %v68_v38 = vld [vmem:[%s3965_s0 + $0x1b0] sm:$0xff] }
  0x40   :  { %1921 = vmatprep.subr.bf16.mxu0 %v3186_v0  ;;  %v2607_v43 = vcombine.high %v64_v37, %v68_v38  ;;  %v2606_v53 = vcombine.low %v64_v37, %v68_v38 }
  0x41   :  { %1423 = vmatmul.mubr.bf16.vlgmr.msra.gmra.mrb[0].mxu1 %v2554_v42  ;;  %v2603_v42 = vcombine.high %v62_v34, %v66_v35  ;;  %v112_v34 = vld [vmem:[%s3965_s0 + $0x310] sm:$0xff] }
  0x42   :  { %1777 = vmatmul.mubr.bf16.vlgmr.msra.gmra.mrb[0].mxu0 %v2558_v44  ;;  %1568 = vmatpush1.bf16.msra.mxu1 %v3154_v45  ;;  %v3174_v44 = vld [vmem:[%s3964_s1 + $0xd0] sm:$0xff]  }
  0x43   :  { %1922 = vmatpush1.bf16.msra.mxu0 %v3155_v46  ;;  %1430 = vmatprep.mubr.bf16.mxu1 %v2563_v47  ;;  %v3175_v45 = vld [vmem:[%s3964_s1 + $0x1d0] sm:$0xff]   ;;  %v70_v46 = vld [vmem:[%s3965_s0 + $0x1c0] sm:$0xff] }
  0x44   :  { %1784 = vmatprep.mubr.bf16.mxu0 %v2567_v48  ;;  %1569 = vmatprep.subr.bf16.mxu1 %v3186_v0  ;;  %v74_v47 = vld [vmem:[%s3965_s0 + $0x1e0] sm:$0xff]  ;;  %v3176_v48 = vld [vmem:[%s3964_s1 + $0xd8] sm:$0xff]   ;;  %v116_v35 = vld [vmem:[%s3965_s0 + $0x330] sm:$0xff] }
  0x45   :  { %1923 = vmatprep.subr.bf16.mxu0 %v3186_v0  ;;  %v2611_v54 = vcombine.high %v70_v46, %v74_v47 }
  0x46   :  { %1570 = vmatpush1.bf16.msra.mxu1 %v3156_v49  ;;  %v72_v49 = vld [vmem:[%s3965_s0 + $0x1d0] sm:$0xff] }
  0x47   :  { %1924 = vmatpush1.bf16.msra.mxu0 %v3157_v50  ;;  %1571 = vmatprep.subr.bf16.mxu1 %v3186_v0  ;;  %v76_v50 = vld [vmem:[%s3965_s0 + $0x1f0] sm:$0xff] }
  0x48   :  { %1925 = vmatprep.subr.bf16.mxu0 %v3186_v0  ;;  %v2614_v2 = vcombine.low %v72_v49, %v76_v50 }
  0x49   :  { %1431 = vmatmul.mubr.bf16.gmra.mrb[4].mxu1 %v2562_v55  ;;  %v2615_v55 = vcombine.high %v72_v49, %v76_v50  ;;  %v130_v49 = vld [vmem:[%s3965_s0 + $0x3a0] sm:$0xff]  ;;  %v128_v50 = vld [vmem:[%s3965_s0 + $0x390] sm:$0xff] }
  0x4a   :  { %1785 = vmatmul.mubr.bf16.gmra.mrb[4].mxu0 %v2566_v56  ;;  %1438 = vmatprep.mubr.bf16.mxu1 %v2571_v57  ;;  %v3178_v56 = vld [vmem:[%s3964_s1 + $0xe0] sm:$0xff]  }
  0x4b   :  { %1792 = vmatprep.mubr.bf16.mxu0 %v2575_v58  ;;  %1572 = vmatpush1.bf16.msra.mxu1 %v3158_v59  ;;  %v3179_v57 = vld [vmem:[%s3964_s1 + $0x1e0] sm:$0xff]  }
  0x4c   :  { %1926 = vmatpush1.bf16.msra.mxu0 %v3159_v60  ;;  %1573 = vmatprep.subr.bf16.mxu1 %v3186_v0  ;;  %v78_v58 = vld [vmem:[%s3965_s0 + $0x200] sm:$0xff]  ;;  %v3180_v60 = vld [vmem:[%s3964_s1 + $0xe8] sm:$0xff]  }
  0x4d   :  { %1927 = vmatprep.subr.bf16.mxu0 %v3186_v0  ;;  %v82_v59 = vld [vmem:[%s3965_s0 + $0x220] sm:$0xff] }
  0x4f   :  { %1574 = vmatpush1.bf16.msra.mxu1 %v3160_v1  ;;  %v2610_v1 = vcombine.low %v70_v46, %v74_v47 }
  0x50   :  { %1928 = vmatpush1.bf16.msra.mxu0 %v3161_v3  ;;  %1575 = vmatprep.subr.bf16.mxu1 %v3186_v0  ;;  %v2619_v3 = vcombine.high %v78_v58, %v82_v59 }
  0x51   :  { %1439 = vmatmul.mubr.bf16.gmra.mrb[8].mxu1 %v2570_v4  ;;  %1929 = vmatprep.subr.bf16.mxu0 %v3186_v0  ;;  %v2623_v4 = vcombine.high %v80_v61, %v84_v62 }
  0x52   :  { %1793 = vmatmul.mubr.bf16.gmra.mrb[8].mxu0 %v2574_v5  ;;  %1446 = vmatprep.mubr.bf16.mxu1 %v2579_v6  ;;  %v3182_v5 = vld [vmem:[%s3964_s1 + $0xf0] sm:$0xff]  }
  0x53   :  { %1800 = vmatprep.mubr.bf16.mxu0 %v2583_v7  ;;  %1576 = vmatpush1.bf16.msra.mxu1 %v3162_v8  ;;  %v3183_v6 = vld [vmem:[%s3964_s1 + $0x1f0] sm:$0xff]   ;;  %v86_v7 = vld [vmem:[%s3965_s0 + $0x240] sm:$0xff] }
  0x54   :  { %1930 = vmatpush1.bf16.msra.mxu0 %v3163_v9  ;;  %1577 = vmatprep.subr.bf16.mxu1 %v3186_v0  ;;  %v90_v8 = vld [vmem:[%s3965_s0 + $0x260] sm:$0xff]  ;;  %v3184_v9 = vld [vmem:[%s3964_s1 + $0xf8] sm:$0xff]  }
  0x55   :  { %1931 = vmatprep.subr.bf16.mxu0 %v3186_v0 }
  0x57   :  { %1578 = vmatpush1.bf16.msra.mxu1 %v3164_v13  ;;  %v2618_v13 = vcombine.low %v78_v58, %v82_v59  ;;  %v136_v58 = vld [vmem:[%s3965_s0 + $0x3d0] sm:$0xff] }
  0x58   :  { %1932 = vmatpush1.bf16.msra.mxu0 %v3165_v15  ;;  %1579 = vmatprep.subr.bf16.mxu1 %v3186_v0  ;;  %v2627_v15 = vcombine.high %v86_v7, %v90_v8  ;;  %v140_v59 = vld [vmem:[%s3965_s0 + $0x3f0] sm:$0xff] }
  0x59   :  { %1447 = vmatmul.mubr.bf16.gmra.mrb[12].mxu1 %v2578_v16  ;;  %1933 = vmatprep.subr.bf16.mxu0 %v3186_v0  ;;  %v2631_v16 = vcombine.high %v88_v10, %v92_v11 }
  0x5a   :  { %1801 = vmatmul.mubr.bf16.gmra.mrb[12].mxu0 %v2582_v17  ;;  %1454 = vmatprep.mubr.bf16.mxu1 %v2587_v18  ;;  %v94_v17 = vld [vmem:[%s3965_s0 + $0x280] sm:$0xff] }
  0x5b   :  { %1808 = vmatprep.mubr.bf16.mxu0 %v2591_v19  ;;  %1580 = vmatpush1.bf16.msra.mxu1 %v3166_v20  ;;  %v98_v18 = vld [vmem:[%s3965_s0 + $0x2a0] sm:$0xff]  ;;  %v100_v19 = vld [vmem:[%s3965_s0 + $0x2b0] sm:$0xff]  ;;  %v2626_v20 = vcombine.low %v86_v7, %v90_v8 }
  0x5c   :  { %1934 = vmatpush1.bf16.msra.mxu0 %v3167_v21  ;;  %1581 = vmatprep.subr.bf16.mxu1 %v3186_v0  ;;  %v2630_v21 = vcombine.low %v88_v10, %v92_v11  ;;  %v2635_v22 = vcombine.high %v94_v17, %v98_v18  ;;  %v154_v10 = vld [vmem:[%s3965_s0 + $0x460] sm:$0xff]  ;;  %v152_v11 = vld [vmem:[%s3965_s0 + $0x450] sm:$0xff] }
  0x5d   :  { %1935 = vmatprep.subr.bf16.mxu0 %v3186_v0 }
  0x5f   :  { %1582 = vmatpush1.bf16.msra.mxu1 %v3168_v24  ;;  %v102_v24 = vld [vmem:[%s3965_s0 + $0x2c0] sm:$0xff] }
  0x60   :  { %1936 = vmatpush1.bf16.msra.mxu0 %v3169_v27  ;;  %1583 = vmatprep.subr.bf16.mxu1 %v3186_v0  ;;  %v108_v27 = vld [vmem:[%s3965_s0 + $0x2f0] sm:$0xff] }
  0x61   :  { %1455 = vmatmul.mubr.bf16.gmra.mrb[16].mxu1 %v2586_v28  ;;  %1937 = vmatprep.subr.bf16.mxu0 %v3186_v0  ;;  %v2634_v28 = vcombine.low %v94_v17, %v98_v18  ;;  %v2646_v37 = vcombine.low %v104_v26, %v108_v27  ;;  %v15_v17 = vld [vmem:[%s3965_s0 + $0x8] sm:$0xff] }
  0x62   :  { %1809 = vmatmul.mubr.bf16.gmra.mrb[16].mxu0 %v2590_v29  ;;  %1462 = vmatprep.mubr.bf16.mxu1 %v2595_v30  ;;  %v2643_v30 = vcombine.high %v102_v24, %v106_v25  ;;  %v19_v18 = vld [vmem:[%s3965_s0 + $0x28] sm:$0xff] }
  0x63   :  { %1816 = vmatprep.mubr.bf16.mxu0 %v2599_v31  ;;  %1584 = vmatpush1.bf16.msra.mxu1 %v3170_v32  ;;  %v2647_v31 = vcombine.high %v104_v26, %v108_v27  ;;  %v110_v32 = vld [vmem:[%s3965_s0 + $0x300] sm:$0xff]  ;;  %v25_v26 = vld [vmem:[%s3965_s0 + $0x58] sm:$0xff] }
  0x64   :  { %1938 = vmatpush1.bf16.msra.mxu0 %v3171_v33  ;;  %1585 = vmatprep.subr.bf16.mxu1 %v3186_v0  ;;  %v114_v33 = vld [vmem:[%s3965_s0 + $0x320] sm:$0xff]  ;;  %v29_v27 = vld [vmem:[%s3965_s0 + $0x78] sm:$0xff] }
  0x65   :  { %1939 = vmatprep.subr.bf16.mxu0 %v3186_v0  ;;  %v2651_v38 = vcombine.high %v110_v32, %v114_v33 }
  0x67   :  { %1586 = vmatpush1.bf16.msra.mxu1 %v3172_v36  ;;  %v2642_v36 = vcombine.low %v102_v24, %v106_v25  ;;  %v23_v24 = vld [vmem:[%s3965_s0 + $0x48] sm:$0xff] }
  0x68   :  { %1940 = vmatpush1.bf16.msra.mxu0 %v3173_v39  ;;  %1587 = vmatprep.subr.bf16.mxu1 %v3186_v0  ;;  %v2655_v39 = vcombine.high %v112_v34, %v116_v35  ;;  %v27_v25 = vld [vmem:[%s3965_s0 + $0x68] sm:$0xff] }
  0x69   :  { %1463 = vmatmul.mubr.bf16.gmra.mrb[20].mxu1 %v2594_v40  ;;  %1941 = vmatprep.subr.bf16.mxu0 %v3186_v0  ;;  %v118_v40 = vld [vmem:[%s3965_s0 + $0x340] sm:$0xff] }
  0x6a   :  { %1817 = vmatmul.mubr.bf16.gmra.mrb[20].mxu0 %v2598_v41  ;;  %1470 = vmatprep.mubr.bf16.mxu1 %v2603_v42  ;;  %v122_v41 = vld [vmem:[%s3965_s0 + $0x360] sm:$0xff]  ;;  %v120_v42 = vld [vmem:[%s3965_s0 + $0x350] sm:$0xff] }
  0x6b   :  { %1824 = vmatprep.mubr.bf16.mxu0 %v2607_v43  ;;  %1588 = vmatpush1.bf16.msra.mxu1 %v3174_v44  ;;  %v124_v43 = vld [vmem:[%s3965_s0 + $0x370] sm:$0xff]  ;;  %v2650_v44 = vcombine.low %v110_v32, %v114_v33  ;;  %v2659_v46 = vcombine.high %v118_v40, %v122_v41  ;;  %v31_v32 = vld [vmem:[%s3965_s0 + $0x88] sm:$0xff] }
  0x6c   :  { %1942 = vmatpush1.bf16.msra.mxu0 %v3175_v45  ;;  %1589 = vmatprep.subr.bf16.mxu1 %v3186_v0  ;;  %v2654_v45 = vcombine.low %v112_v34, %v116_v35  ;;  %v2663_v47 = vcombine.high %v120_v42, %v124_v43  ;;  %v35_v33 = vld [vmem:[%s3965_s0 + $0xa8] sm:$0xff]  ;;  %v33_v34 = vld [vmem:[%s3965_s0 + $0x98] sm:$0xff] }
  0x6d   :  { %1943 = vmatprep.subr.bf16.mxu0 %v3186_v0  ;;  %v37_v35 = vld [vmem:[%s3965_s0 + $0xb8] sm:$0xff] }
  0x6f   :  { %1590 = vmatpush1.bf16.msra.mxu1 %v3176_v48  ;;  %v126_v48 = vld [vmem:[%s3965_s0 + $0x380] sm:$0xff] }
  0x70   :  { %1944 = vmatpush1.bf16.msra.mxu0 %v3177_v51  ;;  %1591 = vmatprep.subr.bf16.mxu1 %v3186_v0  ;;  %v132_v51 = vld [vmem:[%s3965_s0 + $0x3b0] sm:$0xff] }
  0x71   :  { %1471 = vmatmul.mubr.bf16.gmra.mrb[24].mxu1 %v2602_v52  ;;  %1945 = vmatprep.subr.bf16.mxu0 %v3186_v0  ;;  %v2658_v52 = vcombine.low %v118_v40, %v122_v41  ;;  %v2670_v61 = vcombine.low %v128_v50, %v132_v51  ;;  %v39_v40 = vld [vmem:[%s3965_s0 + $0xc8] sm:$0xff] }
  0x72   :  { %1825 = vmatmul.mubr.bf16.gmra.mrb[24].mxu0 %v2606_v53  ;;  %1478 = vmatprep.mubr.bf16.mxu1 %v2611_v54  ;;  %v2662_v53 = vcombine.low %v120_v42, %v124_v43  ;;  %v2667_v54 = vcombine.high %v126_v48, %v130_v49  ;;  %v43_v41 = vld [vmem:[%s3965_s0 + $0xe8] sm:$0xff]  ;;  %v41_v42 = vld [vmem:[%s3965_s0 + $0xd8] sm:$0xff] }
  0x73   :  { %1832 = vmatprep.mubr.bf16.mxu0 %v2615_v55  ;;  %1592 = vmatpush1.bf16.msra.mxu1 %v3178_v56  ;;  %v2671_v55 = vcombine.high %v128_v50, %v132_v51  ;;  %v134_v56 = vld [vmem:[%s3965_s0 + $0x3c0] sm:$0xff]  ;;  %v45_v43 = vld [vmem:[%s3965_s0 + $0xf8] sm:$0xff] }
  0x74   :  { %1946 = vmatpush1.bf16.msra.mxu0 %v3179_v57  ;;  %1593 = vmatprep.subr.bf16.mxu1 %v3186_v0  ;;  %v138_v57 = vld [vmem:[%s3965_s0 + $0x3e0] sm:$0xff]  ;;  %v49_v50 = vld [vmem:[%s3965_s0 + $0x118] sm:$0xff] }
  0x75   :  { %1947 = vmatprep.subr.bf16.mxu0 %v3186_v0  ;;  %v2675_v62 = vcombine.high %v134_v56, %v138_v57  ;;  %v53_v51 = vld [vmem:[%s3965_s0 + $0x138] sm:$0xff] }
  0x77   :  { %1594 = vmatpush1.bf16.msra.mxu1 %v3180_v60  ;;  %v2666_v60 = vcombine.low %v126_v48, %v130_v49  ;;  %v47_v48 = vld [vmem:[%s3965_s0 + $0x108] sm:$0xff] }
  0x78   :  { %1948 = vmatpush1.bf16.msra.mxu0 %v3181_v63  ;;  %1595 = vmatprep.subr.bf16.mxu1 %v3186_v0  ;;  %v2679_v63 = vcombine.high %v136_v58, %v140_v59  ;;  %v51_v49 = vld [vmem:[%s3965_s0 + $0x128] sm:$0xff] }
  0x79   :  { %1479 = vmatmul.mubr.bf16.gmra.mrb[28].mxu1 %v2610_v1  ;;  %1949 = vmatprep.subr.bf16.mxu0 %v3186_v0  ;;  %v142_v1 = vld [vmem:[%s3965_s0 + $0x400] sm:$0xff] }
  0x7a   :  { %1833 = vmatmul.mubr.bf16.gmra.mrb[28].mxu0 %v2614_v2  ;;  %1486 = vmatprep.mubr.bf16.mxu1 %v2619_v3  ;;  %v146_v2 = vld [vmem:[%s3965_s0 + $0x420] sm:$0xff]  ;;  %v144_v3 = vld [vmem:[%s3965_s0 + $0x410] sm:$0xff] }
  0x7b   :  { %1840 = vmatprep.mubr.bf16.mxu0 %v2623_v4  ;;  %1596 = vmatpush1.bf16.msra.mxu1 %v3182_v5  ;;  %v148_v4 = vld [vmem:[%s3965_s0 + $0x430] sm:$0xff]  ;;  %v2674_v5 = vcombine.low %v134_v56, %v138_v57  ;;  %v2683_v7 = vcombine.high %v142_v1, %v146_v2  ;;  %v55_v56 = vld [vmem:[%s3965_s0 + $0x148] sm:$0xff] }
  0x7c   :  { %1950 = vmatpush1.bf16.msra.mxu0 %v3183_v6  ;;  %1597 = vmatprep.subr.bf16.mxu1 %v3186_v0  ;;  %v2678_v6 = vcombine.low %v136_v58, %v140_v59  ;;  %v2687_v8 = vcombine.high %v144_v3, %v148_v4  ;;  %v59_v57 = vld [vmem:[%s3965_s0 + $0x168] sm:$0xff]  ;;  %v57_v58 = vld [vmem:[%s3965_s0 + $0x158] sm:$0xff] }
  0x7d   :  { %1951 = vmatprep.subr.bf16.mxu0 %v3186_v0  ;;  %v96_v0 = vld [vmem:[%s3965_s0 + $0x290] sm:$0xff]  ;;  %v61_v59 = vld [vmem:[%s3965_s0 + $0x178] sm:$0xff] }
  0x7e   :  { %v2639_v23 = vcombine.high %v96_v0, %v100_v19  ;;  %v2638_v29 = vcombine.low %v96_v0, %v100_v19  ;;  %v17_v0 = vld [vmem:[%s3965_s0 + $0x18] sm:$0xff] }
  0x7f   :  { %1598 = vmatpush1.bf16.msra.mxu1 %v3184_v9  ;;  %v150_v9 = vld [vmem:[%s3965_s0 + $0x440] sm:$0xff]  ;;  %v21_v19 = vld [vmem:[%s3965_s0 + $0x38] sm:$0xff] }
  0x80   :  { %1952 = vmatpush1.bf16.msra.mxu0 %v3185_v12  ;;  %v156_v12 = vld [vmem:[%s3965_s0 + $0x470] sm:$0xff] }
  0x81   :  { %1487 = vmatmul.mubr.bf16.gmra.mrb[32].mxu1 %v2618_v13  ;;  %v2682_v13 = vcombine.low %v142_v1, %v146_v2  ;;  %v63_v1 = vld [vmem:[%s3965_s0 + $0x188] sm:$0xff] }
  0x82   :  { %1841 = vmatmul.mubr.bf16.gmra.mrb[32].mxu0 %v2622_v14  ;;  %1494 = vmatprep.mubr.bf16.mxu1 %v2627_v15  ;;  %v2686_v14 = vcombine.low %v144_v3, %v148_v4  ;;  %v2691_v15 = vcombine.high %v150_v9, %v154_v10  ;;  %v67_v2 = vld [vmem:[%s3965_s0 + $0x1a8] sm:$0xff]  ;;  %v65_v3 = vld [vmem:[%s3965_s0 + $0x198] sm:$0xff] }
  0x83   :  { %1848 = vmatprep.mubr.bf16.mxu0 %v2631_v16  ;;  %v2695_v16 = vcombine.high %v152_v11, %v156_v12  ;;  %v69_v4 = vld [vmem:[%s3965_s0 + $0x1b8] sm:$0xff] }
  0x89   :  { %1495 = vmatmul.mubr.bf16.gmra.mrb[36].mxu1 %v2626_v20  ;;  %v2690_v20 = vcombine.low %v150_v9, %v154_v10  ;;  %v71_v9 = vld [vmem:[%s3965_s0 + $0x1c8] sm:$0xff] }
  0x8a   :  { %1849 = vmatmul.mubr.bf16.gmra.mrb[36].mxu0 %v2630_v21  ;;  %1502 = vmatprep.mubr.bf16.mxu1 %v2635_v22  ;;  %v2694_v21 = vcombine.low %v152_v11, %v156_v12  ;;  %v2557_v22 = vcombine.high %v15_v17, %v19_v18  ;;  %v75_v10 = vld [vmem:[%s3965_s0 + $0x1e8] sm:$0xff]  ;;  %v73_v11 = vld [vmem:[%s3965_s0 + $0x1d8] sm:$0xff] }
  0x8b   :  { %1856 = vmatprep.mubr.bf16.mxu0 %v2639_v23  ;;  %v2561_v23 = vcombine.high %v17_v0, %v21_v19  ;;  %v77_v12 = vld [vmem:[%s3965_s0 + $0x1f8] sm:$0xff] }
  0x91   :  { %1503 = vmatmul.mubr.bf16.gmra.mrb[40].mxu1 %v2634_v28  ;;  %v2556_v28 = vcombine.low %v15_v17, %v19_v18  ;;  %v79_v17 = vld [vmem:[%s3965_s0 + $0x208] sm:$0xff] }
  0x92   :  { %1857 = vmatmul.mubr.bf16.gmra.mrb[40].mxu0 %v2638_v29  ;;  %1510 = vmatprep.mubr.bf16.mxu1 %v2643_v30  ;;  %v2560_v29 = vcombine.low %v17_v0, %v21_v19  ;;  %v2565_v30 = vcombine.high %v23_v24, %v27_v25  ;;  %v83_v18 = vld [vmem:[%s3965_s0 + $0x228] sm:$0xff]  ;;  %v81_v0 = vld [vmem:[%s3965_s0 + $0x218] sm:$0xff] }
  0x93   :  { %1864 = vmatprep.mubr.bf16.mxu0 %v2647_v31  ;;  %v2569_v31 = vcombine.high %v25_v26, %v29_v27  ;;  %v85_v19 = vld [vmem:[%s3965_s0 + $0x238] sm:$0xff] }
  0x99   :  { %1511 = vmatmul.mubr.bf16.gmra.mrb[44].mxu1 %v2642_v36  ;;  %v2564_v36 = vcombine.low %v23_v24, %v27_v25  ;;  %v87_v24 = vld [vmem:[%s3965_s0 + $0x248] sm:$0xff] }
  0x9a   :  { %1865 = vmatmul.mubr.bf16.gmra.mrb[44].mxu0 %v2646_v37  ;;  %1518 = vmatprep.mubr.bf16.mxu1 %v2651_v38  ;;  %v2568_v37 = vcombine.low %v25_v26, %v29_v27  ;;  %v2573_v38 = vcombine.high %v31_v32, %v35_v33  ;;  %v91_v25 = vld [vmem:[%s3965_s0 + $0x268] sm:$0xff]  ;;  %v89_v26 = vld [vmem:[%s3965_s0 + $0x258] sm:$0xff] }
  0x9b   :  { %1872 = vmatprep.mubr.bf16.mxu0 %v2655_v39  ;;  %v2577_v39 = vcombine.high %v33_v34, %v37_v35  ;;  %v93_v27 = vld [vmem:[%s3965_s0 + $0x278] sm:$0xff] }
  0xa1   :  { %1519 = vmatmul.mubr.bf16.gmra.mrb[48].mxu1 %v2650_v44  ;;  %v2572_v44 = vcombine.low %v31_v32, %v35_v33  ;;  %v95_v32 = vld [vmem:[%s3965_s0 + $0x288] sm:$0xff] }
  0xa2   :  { %1873 = vmatmul.mubr.bf16.gmra.mrb[48].mxu0 %v2654_v45  ;;  %1526 = vmatprep.mubr.bf16.mxu1 %v2659_v46  ;;  %v2576_v45 = vcombine.low %v33_v34, %v37_v35  ;;  %v2581_v46 = vcombine.high %v39_v40, %v43_v41  ;;  %v99_v33 = vld [vmem:[%s3965_s0 + $0x2a8] sm:$0xff]  ;;  %v97_v34 = vld [vmem:[%s3965_s0 + $0x298] sm:$0xff] }
  0xa3   :  { %1880 = vmatprep.mubr.bf16.mxu0 %v2663_v47  ;;  %v2585_v47 = vcombine.high %v41_v42, %v45_v43  ;;  %v101_v35 = vld [vmem:[%s3965_s0 + $0x2b8] sm:$0xff] }
  0xa9   :  { %1527 = vmatmul.mubr.bf16.gmra.mrb[52].mxu1 %v2658_v52  ;;  %v2580_v52 = vcombine.low %v39_v40, %v43_v41  ;;  %v103_v40 = vld [vmem:[%s3965_s0 + $0x2c8] sm:$0xff] }
  0xaa   :  { %1881 = vmatmul.mubr.bf16.gmra.mrb[52].mxu0 %v2662_v53  ;;  %1534 = vmatprep.mubr.bf16.mxu1 %v2667_v54  ;;  %v2584_v53 = vcombine.low %v41_v42, %v45_v43  ;;  %v2589_v54 = vcombine.high %v47_v48, %v51_v49  ;;  %v107_v41 = vld [vmem:[%s3965_s0 + $0x2e8] sm:$0xff]  ;;  %v105_v42 = vld [vmem:[%s3965_s0 + $0x2d8] sm:$0xff] }
  0xab   :  { %1888 = vmatprep.mubr.bf16.mxu0 %v2671_v55  ;;  %v2593_v55 = vcombine.high %v49_v50, %v53_v51  ;;  %v109_v43 = vld [vmem:[%s3965_s0 + $0x2f8] sm:$0xff] }
  0xb1   :  { %1535 = vmatmul.mubr.bf16.gmra.mrb[56].mxu1 %v2666_v60  ;;  %v2588_v60 = vcombine.low %v47_v48, %v51_v49  ;;  %v111_v48 = vld [vmem:[%s3965_s0 + $0x308] sm:$0xff] }
  0xb2   :  { %1889 = vmatmul.mubr.bf16.gmra.mrb[56].mxu0 %v2670_v61  ;;  %1542 = vmatprep.mubr.bf16.mxu1 %v2675_v62  ;;  %v2592_v61 = vcombine.low %v49_v50, %v53_v51  ;;  %v2597_v62 = vcombine.high %v55_v56, %v59_v57  ;;  %v115_v49 = vld [vmem:[%s3965_s0 + $0x328] sm:$0xff]  ;;  %v113_v50 = vld [vmem:[%s3965_s0 + $0x318] sm:$0xff] }
  0xb3   :  { %1896 = vmatprep.mubr.bf16.mxu0 %v2679_v63  ;;  %v2601_v63 = vcombine.high %v57_v58, %v61_v59  ;;  %v117_v51 = vld [vmem:[%s3965_s0 + $0x338] sm:$0xff] }
  0xb9   :  { %1543 = vmatmul.mubr.bf16.gmra.mrb[60].mxu1 %v2674_v5  ;;  %v2596_v5 = vcombine.low %v55_v56, %v59_v57  ;;  %v119_v56 = vld [vmem:[%s3965_s0 + $0x348] sm:$0xff] }
  0xba   :  { %1897 = vmatmul.mubr.bf16.gmra.mrb[60].mxu0 %v2678_v6  ;;  %1550 = vmatprep.mubr.bf16.mxu1 %v2683_v7  ;;  %v2600_v6 = vcombine.low %v57_v58, %v61_v59  ;;  %v2605_v7 = vcombine.high %v63_v1, %v67_v2  ;;  %v123_v57 = vld [vmem:[%s3965_s0 + $0x368] sm:$0xff]  ;;  %v121_v58 = vld [vmem:[%s3965_s0 + $0x358] sm:$0xff] }
  0xbb   :  { %1904 = vmatprep.mubr.bf16.mxu0 %v2687_v8  ;;  %v2609_v8 = vcombine.high %v65_v3, %v69_v4  ;;  %v125_v59 = vld [vmem:[%s3965_s0 + $0x378] sm:$0xff] }
  0xc1   :  { %1551 = vmatmul.mubr.bf16.gmra.mrb[64].mxu1 %v2682_v13  ;;  %v2604_v13 = vcombine.low %v63_v1, %v67_v2  ;;  %v127_v1 = vld [vmem:[%s3965_s0 + $0x388] sm:$0xff] }
  0xc2   :  { %1905 = vmatmul.mubr.bf16.gmra.mrb[64].mxu0 %v2686_v14  ;;  %1558 = vmatprep.mubr.bf16.mxu1 %v2691_v15  ;;  %v2608_v14 = vcombine.low %v65_v3, %v69_v4  ;;  %v2613_v15 = vcombine.high %v71_v9, %v75_v10  ;;  %v131_v2 = vld [vmem:[%s3965_s0 + $0x3a8] sm:$0xff]  ;;  %v129_v3 = vld [vmem:[%s3965_s0 + $0x398] sm:$0xff] }
  0xc3   :  { %1912 = vmatprep.mubr.bf16.mxu0 %v2695_v16  ;;  %v2617_v16 = vcombine.high %v73_v11, %v77_v12  ;;  %v133_v4 = vld [vmem:[%s3965_s0 + $0x3b8] sm:$0xff] }
  0xc9   :  { %1559 = vmatmul.mubr.bf16.gmra.mrb[68].mxu1 %v2690_v20  ;;  %v2612_v20 = vcombine.low %v71_v9, %v75_v10  ;;  %v135_v9 = vld [vmem:[%s3965_s0 + $0x3c8] sm:$0xff] }
  0xca   :  { %1913 = vmatmul.mubr.bf16.gmra.mrb[68].mxu0 %v2694_v21  ;;  %1599 = vmatprep.mubr.bf16.mxu1 %v2557_v22  ;;  %v2616_v21 = vcombine.low %v73_v11, %v77_v12  ;;  %v2621_v22 = vcombine.high %v79_v17, %v83_v18  ;;  %v139_v10 = vld [vmem:[%s3965_s0 + $0x3e8] sm:$0xff]  ;;  %v137_v11 = vld [vmem:[%s3965_s0 + $0x3d8] sm:$0xff] }
  0xcb   :  { %1953 = vmatprep.mubr.bf16.mxu0 %v2561_v23  ;;  %v2625_v23 = vcombine.high %v81_v0, %v85_v19  ;;  %v141_v12 = vld [vmem:[%s3965_s0 + $0x3f8] sm:$0xff] }
  0xd1   :  { %1600 = vmatmul.mubr.bf16.vlgmr.msra.gmra.mrb[0].mxu1 %v2556_v28  ;;  %v2620_v28 = vcombine.low %v79_v17, %v83_v18  ;;  %v143_v17 = vld [vmem:[%s3965_s0 + $0x408] sm:$0xff] }
  0xd2   :  { %1954 = vmatmul.mubr.bf16.vlgmr.msra.gmra.mrb[0].mxu0 %v2560_v29  ;;  %1607 = vmatprep.mubr.bf16.mxu1 %v2565_v30  ;;  %v2624_v29 = vcombine.low %v81_v0, %v85_v19  ;;  %v2629_v30 = vcombine.high %v87_v24, %v91_v25  ;;  %v147_v18 = vld [vmem:[%s3965_s0 + $0x428] sm:$0xff]  ;;  %v145_v0 = vld [vmem:[%s3965_s0 + $0x418] sm:$0xff] }
  0xd3   :  { %1961 = vmatprep.mubr.bf16.mxu0 %v2569_v31  ;;  %v2633_v31 = vcombine.high %v89_v26, %v93_v27  ;;  %v149_v19 = vld [vmem:[%s3965_s0 + $0x438] sm:$0xff] }
  0xd9   :  { %1608 = vmatmul.mubr.bf16.gmra.mrb[4].mxu1 %v2564_v36  ;;  %v2628_v36 = vcombine.low %v87_v24, %v91_v25  ;;  %v151_v24 = vld [vmem:[%s3965_s0 + $0x448] sm:$0xff] }
  0xda   :  { %1962 = vmatmul.mubr.bf16.gmra.mrb[4].mxu0 %v2568_v37  ;;  %1615 = vmatprep.mubr.bf16.mxu1 %v2573_v38  ;;  %v2632_v37 = vcombine.low %v89_v26, %v93_v27  ;;  %v2637_v38 = vcombine.high %v95_v32, %v99_v33  ;;  %v155_v25 = vld [vmem:[%s3965_s0 + $0x468] sm:$0xff]  ;;  %v153_v26 = vld [vmem:[%s3965_s0 + $0x458] sm:$0xff] }
  0xdb   :  { %1969 = vmatprep.mubr.bf16.mxu0 %v2577_v39  ;;  %v2641_v39 = vcombine.high %v97_v34, %v101_v35  ;;  %v157_v27 = vld [vmem:[%s3965_s0 + $0x478] sm:$0xff] }
  0xe1   :  { %1616 = vmatmul.mubr.bf16.gmra.mrb[8].mxu1 %v2572_v44  ;;  %v2636_v44 = vcombine.low %v95_v32, %v99_v33  ;;  %v2692_v32 = vcombine.low %v151_v24, %v155_v25  ;;  %v2696_v33 = vcombine.low %v153_v26, %v157_v27 }
  0xe2   :  { %1970 = vmatmul.mubr.bf16.gmra.mrb[8].mxu0 %v2576_v45  ;;  %1623 = vmatprep.mubr.bf16.mxu1 %v2581_v46  ;;  %v2640_v45 = vcombine.low %v97_v34, %v101_v35  ;;  %v2645_v46 = vcombine.high %v103_v40, %v107_v41 }
  0xe3   :  { %1977 = vmatprep.mubr.bf16.mxu0 %v2585_v47  ;;  %v2649_v47 = vcombine.high %v105_v42, %v109_v43 }
  0xe9   :  { %1624 = vmatmul.mubr.bf16.gmra.mrb[12].mxu1 %v2580_v52  ;;  %v2644_v52 = vcombine.low %v103_v40, %v107_v41 }
  0xea   :  { %1978 = vmatmul.mubr.bf16.gmra.mrb[12].mxu0 %v2584_v53  ;;  %1631 = vmatprep.mubr.bf16.mxu1 %v2589_v54  ;;  %v2648_v53 = vcombine.low %v105_v42, %v109_v43  ;;  %v2653_v54 = vcombine.high %v111_v48, %v115_v49 }
  0xeb   :  { %1985 = vmatprep.mubr.bf16.mxu0 %v2593_v55  ;;  %v2657_v55 = vcombine.high %v113_v50, %v117_v51 }
  0xf1   :  { %1632 = vmatmul.mubr.bf16.gmra.mrb[16].mxu1 %v2588_v60  ;;  %v2652_v60 = vcombine.low %v111_v48, %v115_v49 }
  0xf2   :  { %1986 = vmatmul.mubr.bf16.gmra.mrb[16].mxu0 %v2592_v61  ;;  %1639 = vmatprep.mubr.bf16.mxu1 %v2597_v62  ;;  %v2656_v61 = vcombine.low %v113_v50, %v117_v51  ;;  %v2661_v62 = vcombine.high %v119_v56, %v123_v57 }
  0xf3   :  { %1993 = vmatprep.mubr.bf16.mxu0 %v2601_v63  ;;  %v2665_v63 = vcombine.high %v121_v58, %v125_v59 }
  0xf9   :  { %1640 = vmatmul.mubr.bf16.gmra.mrb[20].mxu1 %v2596_v5  ;;  %v2660_v5 = vcombine.low %v119_v56, %v123_v57 }
  0xfa   :  { %1994 = vmatmul.mubr.bf16.gmra.mrb[20].mxu0 %v2600_v6  ;;  %1647 = vmatprep.mubr.bf16.mxu1 %v2605_v7  ;;  %v2664_v6 = vcombine.low %v121_v58, %v125_v59  ;;  %v2669_v7 = vcombine.high %v127_v1, %v131_v2 }
  0xfb   :  { %2001 = vmatprep.mubr.bf16.mxu0 %v2609_v8  ;;  %v2673_v8 = vcombine.high %v129_v3, %v133_v4 }
 0x101   :  { %1648 = vmatmul.mubr.bf16.gmra.mrb[24].mxu1 %v2604_v13  ;;  %v2668_v13 = vcombine.low %v127_v1, %v131_v2 }
 0x102   :  { %2002 = vmatmul.mubr.bf16.gmra.mrb[24].mxu0 %v2608_v14  ;;  %1655 = vmatprep.mubr.bf16.mxu1 %v2613_v15  ;;  %v2672_v14 = vcombine.low %v129_v3, %v133_v4  ;;  %v2677_v15 = vcombine.high %v135_v9, %v139_v10 }
 0x103   :  { %2009 = vmatprep.mubr.bf16.mxu0 %v2617_v16  ;;  %v2681_v16 = vcombine.high %v137_v11, %v141_v12 }
 0x109   :  { %1656 = vmatmul.mubr.bf16.gmra.mrb[28].mxu1 %v2612_v20  ;;  %v2676_v20 = vcombine.low %v135_v9, %v139_v10 }
 0x10a   :  { %2010 = vmatmul.mubr.bf16.gmra.mrb[28].mxu0 %v2616_v21  ;;  %1663 = vmatprep.mubr.bf16.mxu1 %v2621_v22  ;;  %v2680_v21 = vcombine.low %v137_v11, %v141_v12  ;;  %v2685_v22 = vcombine.high %v143_v17, %v147_v18 }
 0x10b   :  { %2017 = vmatprep.mubr.bf16.mxu0 %v2625_v23  ;;  %v2689_v23 = vcombine.high %v145_v0, %v149_v19 }
 0x111   :  { %1664 = vmatmul.mubr.bf16.gmra.mrb[32].mxu1 %v2620_v28  ;;  %v2684_v28 = vcombine.low %v143_v17, %v147_v18 }
 0x112   :  { %2018 = vmatmul.mubr.bf16.gmra.mrb[32].mxu0 %v2624_v29  ;;  %1671 = vmatprep.mubr.bf16.mxu1 %v2629_v30  ;;  %v2688_v29 = vcombine.low %v145_v0, %v149_v19  ;;  %v2693_v30 = vcombine.high %v151_v24, %v155_v25 }
 0x113   :  { %2025 = vmatprep.mubr.bf16.mxu0 %v2633_v31  ;;  %v2697_v31 = vcombine.high %v153_v26, %v157_v27 }
 0x119   :  { %1672 = vmatmul.mubr.bf16.gmra.mrb[36].mxu1 %v2628_v36 }
 0x11a   :  { %2026 = vmatmul.mubr.bf16.gmra.mrb[36].mxu0 %v2632_v37  ;;  %1679 = vmatprep.mubr.bf16.mxu1 %v2637_v38 }
 0x11b   :  { %2033 = vmatprep.mubr.bf16.mxu0 %v2641_v39 }
 0x121   :  { %1680 = vmatmul.mubr.bf16.gmra.mrb[40].mxu1 %v2636_v44 }
 0x122   :  { %2034 = vmatmul.mubr.bf16.gmra.mrb[40].mxu0 %v2640_v45  ;;  %1687 = vmatprep.mubr.bf16.mxu1 %v2645_v46 }
 0x123   :  { %2041 = vmatprep.mubr.bf16.mxu0 %v2649_v47 }
 0x129   :  { %1688 = vmatmul.mubr.bf16.gmra.mrb[44].mxu1 %v2644_v52 }
 0x12a   :  { %2042 = vmatmul.mubr.bf16.gmra.mrb[44].mxu0 %v2648_v53  ;;  %1695 = vmatprep.mubr.bf16.mxu1 %v2653_v54 }
 0x12b   :  { %2049 = vmatprep.mubr.bf16.mxu0 %v2657_v55 }
 0x131   :  { %1696 = vmatmul.mubr.bf16.gmra.mrb[48].mxu1 %v2652_v60 }
 0x132   :  { %2050 = vmatmul.mubr.bf16.gmra.mrb[48].mxu0 %v2656_v61  ;;  %1703 = vmatprep.mubr.bf16.mxu1 %v2661_v62 }
 0x133   :  { %2057 = vmatprep.mubr.bf16.mxu0 %v2665_v63 }
 0x139   :  { %1704 = vmatmul.mubr.bf16.gmra.mrb[52].mxu1 %v2660_v5 }
 0x13a   :  { %2058 = vmatmul.mubr.bf16.gmra.mrb[52].mxu0 %v2664_v6  ;;  %1711 = vmatprep.mubr.bf16.mxu1 %v2669_v7 }
 0x13b   :  { %2065 = vmatprep.mubr.bf16.mxu0 %v2673_v8 }
 0x141   :  { %1712 = vmatmul.mubr.bf16.gmra.mrb[56].mxu1 %v2668_v13 }
 0x142   :  { %2066 = vmatmul.mubr.bf16.gmra.mrb[56].mxu0 %v2672_v14  ;;  %1719 = vmatprep.mubr.bf16.mxu1 %v2677_v15 }
 0x143   :  { %2073 = vmatprep.mubr.bf16.mxu0 %v2681_v16 }
 0x149   :  { %1720 = vmatmul.mubr.bf16.gmra.mrb[60].mxu1 %v2676_v20 }
 0x14a   :  { %2074 = vmatmul.mubr.bf16.gmra.mrb[60].mxu0 %v2680_v21  ;;  %1727 = vmatprep.mubr.bf16.mxu1 %v2685_v22 }
 0x14b   :  { %2081 = vmatprep.mubr.bf16.mxu0 %v2689_v23 }
 0x151   :  { %1728 = vmatmul.mubr.bf16.gmra.mrb[64].mxu1 %v2684_v28 }
 0x152   :  { %2082 = vmatmul.mubr.bf16.gmra.mrb[64].mxu0 %v2688_v29  ;;  %1735 = vmatprep.mubr.bf16.mxu1 %v2693_v30 }
 0x153   :  { %2089 = vmatprep.mubr.bf16.mxu0 %v2697_v31 }
 0x159   :  { %1736 = vmatmul.mubr.bf16.gmra.mrb[68].mxu1 %v2692_v32 }
 0x15a   :  { %2090 = vmatmul.mubr.bf16.gmra.mrb[68].mxu0 %v2696_v33 }
 0x1a4   :  { %v1601_v34 = vpop.f32.mrb[0].mxu1 }
 0x1a5   :  { %v1955_v35 = vpop.f32.mrb[0].mxu0  ;;  %v1603_v36 = vpop.f32.mrb[1].mxu1 }
 0x1a6   :  { %v2941_v37 = vadd.f32 %v1955_v35, %v1601_v34  ;;  %v1957_v38 = vpop.f32.mrb[1].mxu0  ;;  %v1604_v39 = vpop.f32.mrb[2].mxu1 }
 0x1a7   :  { %v1958_v40 = vpop.f32.mrb[2].mxu0  ;;  %v1606_v41 = vpop.f32.mrb[3].mxu1 }
 0x1a8   :  { %v2942_v42 = vadd.f32 %v1958_v40, %v1604_v39  ;;  %v1960_v43 = vpop.f32.mrb[3].mxu0  ;;  %v2466_v44 = vmul.f32 %v2941_v37, %v2941_v37 }
 0x1aa   :  { %v2837_v45 = vpack.c.bf16 %v2942_v42, %v2941_v37  ;;  %v2425_v46 = vadd.f32 %v2942_v42, %v2941_v37  ;;  %v2467_v47 = vmul.f32 %v2942_v42, %v2942_v42 }
 0x1ac   :  { %2838 = vst [vmem:[%s3966_s2] sm:$0xff] %v2837_v45   ;;  %v2502_v48 = vadd.f32 %v2467_v47, %v2466_v44  ;;  %v1609_v49 = vpop.f32.mrb[4].mxu1 }
 0x1ad   :  { %v1963_v50 = vpop.f32.mrb[4].mxu0  ;;  %v1611_v51 = vpop.f32.mrb[5].mxu1 }
 0x1ae   :  { %v2943_v52 = vadd.f32 %v1963_v50, %v1609_v49  ;;  %v1965_v53 = vpop.f32.mrb[5].mxu0  ;;  %v1612_v54 = vpop.f32.mrb[6].mxu1 }
 0x1af   :  { %v1966_v55 = vpop.f32.mrb[6].mxu0  ;;  %v1614_v56 = vpop.f32.mrb[7].mxu1 }
 0x1b0   :  { %v2426_v57 = vadd.f32 %v2943_v52, %v2425_v46  ;;  %v2468_v58 = vmul.f32 %v2943_v52, %v2943_v52  ;;  %v2944_v59 = vadd.f32 %v1966_v55, %v1612_v54  ;;  %v1968_v60 = vpop.f32.mrb[7].mxu0 }
 0x1b2   :  { %v2503_v61 = vadd.f32 %v2502_v48, %v2468_v58  ;;  %v2842_v62 = vpack.c.bf16 %v2944_v59, %v2943_v52  ;;  %v2427_v63 = vadd.f32 %v2944_v59, %v2426_v57  ;;  %v2469_v1 = vmul.f32 %v2944_v59, %v2944_v59 }
 0x1b4   :  { %2924 = vst [vmem:[%s3966_s2 + $0x8] sm:$0xff] %v2842_v62   ;;  %v2504_v2 = vadd.f32 %v2503_v61, %v2469_v1  ;;  %v1617_v3 = vpop.f32.mrb[8].mxu1 }
 0x1b5   :  { %v1971_v4 = vpop.f32.mrb[8].mxu0  ;;  %v1619_v5 = vpop.f32.mrb[9].mxu1 }
 0x1b6   :  { %v2945_v6 = vadd.f32 %v1971_v4, %v1617_v3  ;;  %v1973_v7 = vpop.f32.mrb[9].mxu0  ;;  %v1620_v8 = vpop.f32.mrb[10].mxu1 }
 0x1b7   :  { %v1974_v9 = vpop.f32.mrb[10].mxu0  ;;  %v1622_v10 = vpop.f32.mrb[11].mxu1 }
 0x1b8   :  { %v2428_v11 = vadd.f32 %v2945_v6, %v2427_v63  ;;  %v2470_v12 = vmul.f32 %v2945_v6, %v2945_v6  ;;  %v2946_v13 = vadd.f32 %v1974_v9, %v1620_v8  ;;  %v1976_v14 = vpop.f32.mrb[11].mxu0 }
 0x1ba   :  { %v2505_v15 = vadd.f32 %v2504_v2, %v2470_v12  ;;  %v2847_v16 = vpack.c.bf16 %v2946_v13, %v2945_v6  ;;  %v2429_v17 = vadd.f32 %v2946_v13, %v2428_v11  ;;  %v2471_v18 = vmul.f32 %v2946_v13, %v2946_v13 }
 0x1bc   :  { %2925 = vst [vmem:[%s3966_s2 + $0x10] sm:$0xff] %v2847_v16   ;;  %v2506_v0 = vadd.f32 %v2505_v15, %v2471_v18  ;;  %v1625_v19 = vpop.f32.mrb[12].mxu1 }
 0x1bd   :  { %v1979_v20 = vpop.f32.mrb[12].mxu0  ;;  %v1627_v21 = vpop.f32.mrb[13].mxu1 }
 0x1be   :  { %v2947_v22 = vadd.f32 %v1979_v20, %v1625_v19  ;;  %v1981_v23 = vpop.f32.mrb[13].mxu0  ;;  %v1628_v24 = vpop.f32.mrb[14].mxu1 }
 0x1bf   :  { %v1982_v25 = vpop.f32.mrb[14].mxu0  ;;  %v1630_v26 = vpop.f32.mrb[15].mxu1 }
 0x1c0   :  { %v2430_v27 = vadd.f32 %v2947_v22, %v2429_v17  ;;  %v2472_v28 = vmul.f32 %v2947_v22, %v2947_v22  ;;  %v2948_v29 = vadd.f32 %v1982_v25, %v1628_v24  ;;  %v1984_v30 = vpop.f32.mrb[15].mxu0 }
 0x1c2   :  { %v2507_v31 = vadd.f32 %v2506_v0, %v2472_v28  ;;  %v2852_v32 = vpack.c.bf16 %v2948_v29, %v2947_v22  ;;  %v2431_v33 = vadd.f32 %v2948_v29, %v2430_v27  ;;  %v2473_v34 = vmul.f32 %v2948_v29, %v2948_v29 }
 0x1c4   :  { %2926 = vst [vmem:[%s3966_s2 + $0x18] sm:$0xff] %v2852_v32   ;;  %v2508_v35 = vadd.f32 %v2507_v31, %v2473_v34  ;;  %v1633_v36 = vpop.f32.mrb[16].mxu1 }
 0x1c5   :  { %v1987_v37 = vpop.f32.mrb[16].mxu0  ;;  %v1635_v38 = vpop.f32.mrb[17].mxu1 }
 0x1c6   :  { %v2949_v39 = vadd.f32 %v1987_v37, %v1633_v36  ;;  %v1989_v40 = vpop.f32.mrb[17].mxu0  ;;  %v1636_v41 = vpop.f32.mrb[18].mxu1 }
 0x1c7   :  { %v1990_v42 = vpop.f32.mrb[18].mxu0  ;;  %v1638_v43 = vpop.f32.mrb[19].mxu1 }
 0x1c8   :  { %v2432_v44 = vadd.f32 %v2949_v39, %v2431_v33  ;;  %v2474_v45 = vmul.f32 %v2949_v39, %v2949_v39  ;;  %v2950_v46 = vadd.f32 %v1990_v42, %v1636_v41  ;;  %v1992_v47 = vpop.f32.mrb[19].mxu0 }
 0x1ca   :  { %v2509_v48 = vadd.f32 %v2508_v35, %v2474_v45  ;;  %v2857_v49 = vpack.c.bf16 %v2950_v46, %v2949_v39  ;;  %v2433_v50 = vadd.f32 %v2950_v46, %v2432_v44  ;;  %v2475_v51 = vmul.f32 %v2950_v46, %v2950_v46 }
 0x1cc   :  { %2927 = vst [vmem:[%s3966_s2 + $0x20] sm:$0xff] %v2857_v49   ;;  %v2510_v52 = vadd.f32 %v2509_v48, %v2475_v51  ;;  %v1641_v53 = vpop.f32.mrb[20].mxu1 }
 0x1cd   :  { %v1995_v54 = vpop.f32.mrb[20].mxu0  ;;  %v1643_v55 = vpop.f32.mrb[21].mxu1 }
 0x1ce   :  { %v2951_v56 = vadd.f32 %v1995_v54, %v1641_v53  ;;  %v1997_v57 = vpop.f32.mrb[21].mxu0  ;;  %v1644_v58 = vpop.f32.mrb[22].mxu1 }
 0x1cf   :  { %v1998_v59 = vpop.f32.mrb[22].mxu0  ;;  %v1646_v60 = vpop.f32.mrb[23].mxu1 }
 0x1d0   :  { %v2434_v61 = vadd.f32 %v2951_v56, %v2433_v50  ;;  %v2476_v62 = vmul.f32 %v2951_v56, %v2951_v56  ;;  %v2952_v63 = vadd.f32 %v1998_v59, %v1644_v58  ;;  %v2000_v1 = vpop.f32.mrb[23].mxu0 }
 0x1d2   :  { %v2511_v2 = vadd.f32 %v2510_v52, %v2476_v62  ;;  %v2862_v3 = vpack.c.bf16 %v2952_v63, %v2951_v56  ;;  %v2435_v4 = vadd.f32 %v2952_v63, %v2434_v61  ;;  %v2477_v5 = vmul.f32 %v2952_v63, %v2952_v63 }
 0x1d4   :  { %2928 = vst [vmem:[%s3966_s2 + $0x28] sm:$0xff] %v2862_v3   ;;  %v2512_v6 = vadd.f32 %v2511_v2, %v2477_v5  ;;  %v1649_v7 = vpop.f32.mrb[24].mxu1 }
 0x1d5   :  { %v2003_v8 = vpop.f32.mrb[24].mxu0  ;;  %v1651_v9 = vpop.f32.mrb[25].mxu1 }
 0x1d6   :  { %v2953_v10 = vadd.f32 %v2003_v8, %v1649_v7  ;;  %v2005_v11 = vpop.f32.mrb[25].mxu0  ;;  %v1652_v12 = vpop.f32.mrb[26].mxu1 }
 0x1d7   :  { %v2006_v13 = vpop.f32.mrb[26].mxu0  ;;  %v1654_v14 = vpop.f32.mrb[27].mxu1 }
 0x1d8   :  { %v2436_v15 = vadd.f32 %v2953_v10, %v2435_v4  ;;  %v2478_v16 = vmul.f32 %v2953_v10, %v2953_v10  ;;  %v2954_v17 = vadd.f32 %v2006_v13, %v1652_v12  ;;  %v2008_v18 = vpop.f32.mrb[27].mxu0 }
 0x1da   :  { %v2513_v0 = vadd.f32 %v2512_v6, %v2478_v16  ;;  %v2867_v19 = vpack.c.bf16 %v2954_v17, %v2953_v10  ;;  %v2437_v20 = vadd.f32 %v2954_v17, %v2436_v15  ;;  %v2479_v21 = vmul.f32 %v2954_v17, %v2954_v17 }
 0x1dc   :  { %2929 = vst [vmem:[%s3966_s2 + $0x30] sm:$0xff] %v2867_v19   ;;  %v2514_v22 = vadd.f32 %v2513_v0, %v2479_v21  ;;  %v1657_v23 = vpop.f32.mrb[28].mxu1 }
 0x1dd   :  { %v2011_v24 = vpop.f32.mrb[28].mxu0  ;;  %v1659_v25 = vpop.f32.mrb[29].mxu1 }
 0x1de   :  { %v2955_v26 = vadd.f32 %v2011_v24, %v1657_v23  ;;  %v2013_v27 = vpop.f32.mrb[29].mxu0  ;;  %v1660_v28 = vpop.f32.mrb[30].mxu1 }
 0x1df   :  { %v2014_v29 = vpop.f32.mrb[30].mxu0  ;;  %v1662_v30 = vpop.f32.mrb[31].mxu1 }
 0x1e0   :  { %v2438_v31 = vadd.f32 %v2955_v26, %v2437_v20  ;;  %v2480_v32 = vmul.f32 %v2955_v26, %v2955_v26  ;;  %v2956_v33 = vadd.f32 %v2014_v29, %v1660_v28  ;;  %v2016_v34 = vpop.f32.mrb[31].mxu0 }
 0x1e2   :  { %v2515_v35 = vadd.f32 %v2514_v22, %v2480_v32  ;;  %v2872_v36 = vpack.c.bf16 %v2956_v33, %v2955_v26  ;;  %v2439_v37 = vadd.f32 %v2956_v33, %v2438_v31  ;;  %v2481_v38 = vmul.f32 %v2956_v33, %v2956_v33 }
 0x1e4   :  { %2930 = vst [vmem:[%s3966_s2 + $0x38] sm:$0xff] %v2872_v36   ;;  %v2516_v39 = vadd.f32 %v2515_v35, %v2481_v38  ;;  %v1665_v40 = vpop.f32.mrb[32].mxu1 }
 0x1e5   :  { %v2019_v41 = vpop.f32.mrb[32].mxu0  ;;  %v1667_v42 = vpop.f32.mrb[33].mxu1 }
 0x1e6   :  { %v2957_v43 = vadd.f32 %v2019_v41, %v1665_v40  ;;  %v2021_v44 = vpop.f32.mrb[33].mxu0  ;;  %v1668_v45 = vpop.f32.mrb[34].mxu1 }
 0x1e7   :  { %v2022_v46 = vpop.f32.mrb[34].mxu0  ;;  %v1670_v47 = vpop.f32.mrb[35].mxu1 }
 0x1e8   :  { %v2440_v48 = vadd.f32 %v2957_v43, %v2439_v37  ;;  %v2482_v49 = vmul.f32 %v2957_v43, %v2957_v43  ;;  %v2958_v50 = vadd.f32 %v2022_v46, %v1668_v45  ;;  %v2024_v51 = vpop.f32.mrb[35].mxu0 }
 0x1ea   :  { %v2517_v52 = vadd.f32 %v2516_v39, %v2482_v49  ;;  %v2877_v53 = vpack.c.bf16 %v2958_v50, %v2957_v43  ;;  %v2441_v54 = vadd.f32 %v2958_v50, %v2440_v48  ;;  %v2483_v55 = vmul.f32 %v2958_v50, %v2958_v50 }
 0x1ec   :  { %2931 = vst [vmem:[%s3966_s2 + $0x40] sm:$0xff] %v2877_v53   ;;  %v2518_v56 = vadd.f32 %v2517_v52, %v2483_v55  ;;  %v1673_v57 = vpop.f32.mrb[36].mxu1 }
 0x1ed   :  { %v2027_v58 = vpop.f32.mrb[36].mxu0  ;;  %v1675_v59 = vpop.f32.mrb[37].mxu1 }
 0x1ee   :  { %v2959_v60 = vadd.f32 %v2027_v58, %v1673_v57  ;;  %v2029_v61 = vpop.f32.mrb[37].mxu0  ;;  %v1676_v62 = vpop.f32.mrb[38].mxu1 }
 0x1ef   :  { %v2030_v63 = vpop.f32.mrb[38].mxu0  ;;  %v1678_v1 = vpop.f32.mrb[39].mxu1 }
 0x1f0   :  { %v2442_v2 = vadd.f32 %v2959_v60, %v2441_v54  ;;  %v2484_v3 = vmul.f32 %v2959_v60, %v2959_v60  ;;  %v2960_v4 = vadd.f32 %v2030_v63, %v1676_v62  ;;  %v2032_v5 = vpop.f32.mrb[39].mxu0 }
 0x1f2   :  { %v2519_v6 = vadd.f32 %v2518_v56, %v2484_v3  ;;  %v2882_v7 = vpack.c.bf16 %v2960_v4, %v2959_v60  ;;  %v2443_v8 = vadd.f32 %v2960_v4, %v2442_v2  ;;  %v2485_v9 = vmul.f32 %v2960_v4, %v2960_v4 }
 0x1f4   :  { %2932 = vst [vmem:[%s3966_s2 + $0x48] sm:$0xff] %v2882_v7   ;;  %v2520_v10 = vadd.f32 %v2519_v6, %v2485_v9  ;;  %v1681_v11 = vpop.f32.mrb[40].mxu1 }
 0x1f5   :  { %v2035_v12 = vpop.f32.mrb[40].mxu0  ;;  %v1683_v13 = vpop.f32.mrb[41].mxu1 }
 0x1f6   :  { %v2961_v14 = vadd.f32 %v2035_v12, %v1681_v11  ;;  %v2037_v15 = vpop.f32.mrb[41].mxu0  ;;  %v1684_v16 = vpop.f32.mrb[42].mxu1 }
 0x1f7   :  { %v2038_v17 = vpop.f32.mrb[42].mxu0  ;;  %v1686_v18 = vpop.f32.mrb[43].mxu1 }
 0x1f8   :  { %v2444_v0 = vadd.f32 %v2961_v14, %v2443_v8  ;;  %v2486_v19 = vmul.f32 %v2961_v14, %v2961_v14  ;;  %v2962_v20 = vadd.f32 %v2038_v17, %v1684_v16  ;;  %v2040_v21 = vpop.f32.mrb[43].mxu0 }
 0x1fa   :  { %v2521_v22 = vadd.f32 %v2520_v10, %v2486_v19  ;;  %v2887_v23 = vpack.c.bf16 %v2962_v20, %v2961_v14  ;;  %v2445_v24 = vadd.f32 %v2962_v20, %v2444_v0  ;;  %v2487_v25 = vmul.f32 %v2962_v20, %v2962_v20 }
 0x1fc   :  { %2933 = vst [vmem:[%s3966_s2 + $0x50] sm:$0xff] %v2887_v23   ;;  %v2522_v26 = vadd.f32 %v2521_v22, %v2487_v25  ;;  %v1689_v27 = vpop.f32.mrb[44].mxu1 }
 0x1fd   :  { %v2043_v28 = vpop.f32.mrb[44].mxu0  ;;  %v1691_v29 = vpop.f32.mrb[45].mxu1 }
 0x1fe   :  { %v2963_v30 = vadd.f32 %v2043_v28, %v1689_v27  ;;  %v2045_v31 = vpop.f32.mrb[45].mxu0  ;;  %v1692_v32 = vpop.f32.mrb[46].mxu1 }
 0x1ff   :  { %v2046_v33 = vpop.f32.mrb[46].mxu0  ;;  %v1694_v34 = vpop.f32.mrb[47].mxu1 }
 0x200   :  { %v2446_v35 = vadd.f32 %v2963_v30, %v2445_v24  ;;  %v2488_v36 = vmul.f32 %v2963_v30, %v2963_v30  ;;  %v2964_v37 = vadd.f32 %v2046_v33, %v1692_v32  ;;  %v2048_v38 = vpop.f32.mrb[47].mxu0 }
 0x202   :  { %v2523_v39 = vadd.f32 %v2522_v26, %v2488_v36  ;;  %v2892_v40 = vpack.c.bf16 %v2964_v37, %v2963_v30  ;;  %v2447_v41 = vadd.f32 %v2964_v37, %v2446_v35  ;;  %v2489_v42 = vmul.f32 %v2964_v37, %v2964_v37 }
 0x204   :  { %2934 = vst [vmem:[%s3966_s2 + $0x58] sm:$0xff] %v2892_v40   ;;  %v2524_v43 = vadd.f32 %v2523_v39, %v2489_v42  ;;  %v1697_v44 = vpop.f32.mrb[48].mxu1 }
 0x205   :  { %v2051_v45 = vpop.f32.mrb[48].mxu0  ;;  %v1699_v46 = vpop.f32.mrb[49].mxu1 }
 0x206   :  { %v2965_v47 = vadd.f32 %v2051_v45, %v1697_v44  ;;  %v2053_v48 = vpop.f32.mrb[49].mxu0  ;;  %v1700_v49 = vpop.f32.mrb[50].mxu1 }
 0x207   :  { %v2054_v50 = vpop.f32.mrb[50].mxu0  ;;  %v1702_v51 = vpop.f32.mrb[51].mxu1 }
 0x208   :  { %v2448_v52 = vadd.f32 %v2965_v47, %v2447_v41  ;;  %v2490_v53 = vmul.f32 %v2965_v47, %v2965_v47  ;;  %v2966_v54 = vadd.f32 %v2054_v50, %v1700_v49  ;;  %v2056_v55 = vpop.f32.mrb[51].mxu0 }
 0x20a   :  { %v2525_v56 = vadd.f32 %v2524_v43, %v2490_v53  ;;  %v2897_v57 = vpack.c.bf16 %v2966_v54, %v2965_v47  ;;  %v2449_v58 = vadd.f32 %v2966_v54, %v2448_v52  ;;  %v2491_v59 = vmul.f32 %v2966_v54, %v2966_v54 }
 0x20c   :  { %2935 = vst [vmem:[%s3966_s2 + $0x60] sm:$0xff] %v2897_v57   ;;  %v2526_v60 = vadd.f32 %v2525_v56, %v2491_v59  ;;  %v1705_v61 = vpop.f32.mrb[52].mxu1 }
 0x20d   :  { %v2059_v62 = vpop.f32.mrb[52].mxu0  ;;  %v1707_v63 = vpop.f32.mrb[53].mxu1 }
 0x20e   :  { %v2967_v1 = vadd.f32 %v2059_v62, %v1705_v61  ;;  %v2061_v2 = vpop.f32.mrb[53].mxu0  ;;  %v1708_v3 = vpop.f32.mrb[54].mxu1 }
 0x20f   :  { %v2062_v4 = vpop.f32.mrb[54].mxu0  ;;  %v1710_v5 = vpop.f32.mrb[55].mxu1 }
 0x210   :  { %v2450_v6 = vadd.f32 %v2967_v1, %v2449_v58  ;;  %v2492_v7 = vmul.f32 %v2967_v1, %v2967_v1  ;;  %v2968_v8 = vadd.f32 %v2062_v4, %v1708_v3  ;;  %v2064_v9 = vpop.f32.mrb[55].mxu0 }
 0x212   :  { %v2527_v10 = vadd.f32 %v2526_v60, %v2492_v7  ;;  %v2902_v11 = vpack.c.bf16 %v2968_v8, %v2967_v1  ;;  %v2451_v12 = vadd.f32 %v2968_v8, %v2450_v6  ;;  %v2493_v13 = vmul.f32 %v2968_v8, %v2968_v8 }
 0x214   :  { %2936 = vst [vmem:[%s3966_s2 + $0x68] sm:$0xff] %v2902_v11   ;;  %v2528_v14 = vadd.f32 %v2527_v10, %v2493_v13  ;;  %v1713_v15 = vpop.f32.mrb[56].mxu1 }
 0x215   :  { %v2067_v16 = vpop.f32.mrb[56].mxu0  ;;  %v1715_v17 = vpop.f32.mrb[57].mxu1 }
 0x216   :  { %v2969_v18 = vadd.f32 %v2067_v16, %v1713_v15  ;;  %v2069_v0 = vpop.f32.mrb[57].mxu0  ;;  %v1716_v19 = vpop.f32.mrb[58].mxu1 }
 0x217   :  { %v2070_v20 = vpop.f32.mrb[58].mxu0  ;;  %v1718_v21 = vpop.f32.mrb[59].mxu1 }
 0x218   :  { %v2452_v22 = vadd.f32 %v2969_v18, %v2451_v12  ;;  %v2494_v23 = vmul.f32 %v2969_v18, %v2969_v18  ;;  %v2970_v24 = vadd.f32 %v2070_v20, %v1716_v19  ;;  %v2072_v25 = vpop.f32.mrb[59].mxu0 }
 0x21a   :  { %v2529_v26 = vadd.f32 %v2528_v14, %v2494_v23  ;;  %v2907_v27 = vpack.c.bf16 %v2970_v24, %v2969_v18  ;;  %v2453_v28 = vadd.f32 %v2970_v24, %v2452_v22  ;;  %v2495_v29 = vmul.f32 %v2970_v24, %v2970_v24 }
 0x21c   :  { %2937 = vst [vmem:[%s3966_s2 + $0x70] sm:$0xff] %v2907_v27   ;;  %v2530_v30 = vadd.f32 %v2529_v26, %v2495_v29  ;;  %v1721_v31 = vpop.f32.mrb[60].mxu1 }
 0x21d   :  { %v2075_v32 = vpop.f32.mrb[60].mxu0  ;;  %v1723_v33 = vpop.f32.mrb[61].mxu1 }
 0x21e   :  { %v2971_v34 = vadd.f32 %v2075_v32, %v1721_v31  ;;  %v2077_v35 = vpop.f32.mrb[61].mxu0  ;;  %v1724_v36 = vpop.f32.mrb[62].mxu1 }
 0x21f   :  { %v2078_v37 = vpop.f32.mrb[62].mxu0  ;;  %v1726_v38 = vpop.f32.mrb[63].mxu1 }
 0x220   :  { %v2454_v39 = vadd.f32 %v2971_v34, %v2453_v28  ;;  %v2496_v40 = vmul.f32 %v2971_v34, %v2971_v34  ;;  %v2972_v41 = vadd.f32 %v2078_v37, %v1724_v36  ;;  %v2080_v42 = vpop.f32.mrb[63].mxu0 }
 0x222   :  { %v2531_v43 = vadd.f32 %v2530_v30, %v2496_v40  ;;  %v2912_v44 = vpack.c.bf16 %v2972_v41, %v2971_v34  ;;  %v2455_v45 = vadd.f32 %v2972_v41, %v2454_v39  ;;  %v2497_v46 = vmul.f32 %v2972_v41, %v2972_v41 }
 0x224   :  { %2938 = vst [vmem:[%s3966_s2 + $0x78] sm:$0xff] %v2912_v44   ;;  %v2532_v47 = vadd.f32 %v2531_v43, %v2497_v46  ;;  %v1729_v48 = vpop.f32.mrb[64].mxu1 }
 0x225   :  { %v2083_v49 = vpop.f32.mrb[64].mxu0  ;;  %v1731_v50 = vpop.f32.mrb[65].mxu1 }
 0x226   :  { %v2973_v51 = vadd.f32 %v2083_v49, %v1729_v48  ;;  %v2085_v52 = vpop.f32.mrb[65].mxu0  ;;  %v1732_v53 = vpop.f32.mrb[66].mxu1 }
 0x227   :  { %v2086_v54 = vpop.f32.mrb[66].mxu0  ;;  %v1734_v55 = vpop.f32.mrb[67].mxu1 }
 0x228   :  { %v2456_v56 = vadd.f32 %v2973_v51, %v2455_v45  ;;  %v2498_v57 = vmul.f32 %v2973_v51, %v2973_v51  ;;  %v2974_v58 = vadd.f32 %v2086_v54, %v1732_v53  ;;  %v2088_v59 = vpop.f32.mrb[67].mxu0 }
 0x22a   :  { %v2533_v60 = vadd.f32 %v2532_v47, %v2498_v57  ;;  %v2917_v61 = vpack.c.bf16 %v2974_v58, %v2973_v51  ;;  %v2457_v62 = vadd.f32 %v2974_v58, %v2456_v56  ;;  %v2499_v63 = vmul.f32 %v2974_v58, %v2974_v58 }
 0x22c   :  { %2939 = vst [vmem:[%s3966_s2 + $0x80] sm:$0xff] %v2917_v61   ;;  %v2534_v1 = vadd.f32 %v2533_v60, %v2499_v63  ;;  %v1737_v2 = vpop.f32.mrb[68].mxu1 }
 0x22d   :  { %v2091_v3 = vpop.f32.mrb[68].mxu0  ;;  %v1739_v4 = vpop.f32.mrb[69].mxu1 }
 0x22e   :  { %v2975_v5 = vadd.f32 %v2091_v3, %v1737_v2  ;;  %v2093_v6 = vpop.f32.mrb[69].mxu0  ;;  %v1740_v7 = vpop.f32.mrb[70].mxu1 }
 0x22f   :  { %v2094_v8 = vpop.f32.mrb[70].mxu0  ;;  %v1742_v9 = vpop.f32.mrb[71].mxu1 }
 0x230   :  { %v2458_v10 = vadd.f32 %v2975_v5, %v2457_v62  ;;  %v2500_v11 = vmul.f32 %v2975_v5, %v2975_v5  ;;  %v2976_v12 = vadd.f32 %v2094_v8, %v1740_v7  ;;  %v2096_v13 = vpop.f32.mrb[71].mxu0 }
 0x232   :  { %v2535_v14 = vadd.f32 %v2534_v1, %v2500_v11  ;;  %v2922_v15 = vpack.c.bf16 %v2976_v12, %v2975_v5  ;;  %v2459_v16 = vadd.f32 %v2976_v12, %v2458_v10  ;;  %v2501_v17 = vmul.f32 %v2976_v12, %v2976_v12 }
 0x234   :  { %2940 = vst [vmem:[%s3966_s2 + $0x88] sm:$0xff] %v2922_v15   ;;  %v2460_v18 = vrot.slane %v2459_v16, 4  ;;  %v2536_v0 = vadd.f32 %v2535_v14, %v2501_v17 }
 0x236   :  { %v2461_v19 = vadd.f32 %v2460_v18, %v2459_v16  ;;  %v2537_v20 = vrot.slane %v2536_v0, 4 }
 0x238   :  { %v2462_v21 = vrot.slane %v2461_v19, 2  ;;  %v2538_v22 = vadd.f32 %v2537_v20, %v2536_v0 }
 0x23a   :  { %v2463_v23 = vadd.f32 %v2462_v21, %v2461_v19  ;;  %v2539_v24 = vrot.slane %v2538_v22, 2 }
 0x23c   :  { %v2464_v25 = vrot.slane %v2463_v23, 1  ;;  %v2540_v26 = vadd.f32 %v2539_v24, %v2538_v22 }
 0x23e   :  { %v2541_v27 = vrot.slane %v2540_v26, 1  ;;  %v2465_v28 = vadd.f32 %v2464_v25, %v2463_v23 }
 0x240   :  { %v2542_v29 = vadd.f32 %v2541_v27, %v2540_v26 }
 0x242   :  { %v2544_v30 = vsel %vm2543_vm0, %v2465_v28, %v2542_v29 }
 0x243   :  { %2545 = vst [vmem:[%s3967_s3] sm:$0x3] %v2544_v30 }

// kernel: netd_forward.11
= control target key start
LH: loop header
LB: loop body
LE: loop exit
PB: predicated region body
PF: predicated region fallthrough
CT: control target
= control target key end

     0   :  { %v43_v0 = vlaneseq  ;;  %s386_s0 = inlined_call_operand.vmem [shape: bf16[72,256], index: 0, kind: input, shape index: {}]   ;;  %s387_s1 = inlined_call_operand.vmem [shape: f32[1,256], index: 1, kind: input, shape index: {}]   ;;  %s388_s2 = inlined_call_operand.vmem [shape: f32[1,256], index: 2, kind: input, shape index: {}]   ;;  %s389_s3 = inlined_call_operand.vmem [shape: bf16[72,256], index: 3, kind: output, shape index: {}]  }
   0x1   :  { %v14_v1 = vld [vmem:[%s386_s0] sm:$0xff]  ;;  %v15_v6 = vld [vmem:[%s386_s0 + $0x8] sm:$0xff]  ;;  %v16_v7 = vld [vmem:[%s386_s0 + $0x10] sm:$0xff] }
   0x2   :  { %v41_v2 = vld [vmem:[%s387_s1] sm:$0x3]  ;;  %v23_v3 = vunpack.c.l.bf16 %v14_v1  ;;  %v24_v4 = vunpack.c.h.bf16 %v14_v1  ;;  %v44_v5 = vshrl.u32 %v43_v0, 7  ;;  %v17_v8 = vld [vmem:[%s386_s0 + $0x18] sm:$0xff]  ;;  %v25_v10 = vunpack.c.l.bf16 %v15_v6  ;;  %v288_v15 = vld [vmem:[%s386_s0 + $0x28] sm:$0xff] }
   0x3   :  { %v71_v9 = vld [vmem:[%s388_s2] sm:$0x3]  ;;  %v26_v11 = vunpack.c.h.bf16 %v15_v6  ;;  %v27_v12 = vunpack.c.l.bf16 %v16_v7  ;;  %v28_v13 = vunpack.c.h.bf16 %v16_v7  ;;  %v29_v18 = vunpack.c.l.bf16 %v17_v8  ;;  %v293_v20 = vld [vmem:[%s386_s0 + $0x30] sm:$0xff]  ;;  %v298_v21 = vld [vmem:[%s386_s0 + $0x38] sm:$0xff] }
   0x4   :  { %v283_v14 = vld [vmem:[%s386_s0 + $0x20] sm:$0xff]  ;;  %v45_v16 = vsub.s32 0, %v44_v5  ;;  %v49_v17 = vsub.s32 1, %v44_v5  ;;  %v30_v19 = vunpack.c.h.bf16 %v17_v8  ;;  %v33_v24 = vunpack.c.l.bf16 %v288_v15 }
   0x5   :  { %v31_v22 = vunpack.c.l.bf16 %v283_v14  ;;  %v32_v23 = vunpack.c.h.bf16 %v283_v14  ;;  %v34_v25 = vunpack.c.h.bf16 %v288_v15  ;;  %v35_v30 = vunpack.c.l.bf16 %v293_v20 }
   0x6   :  { %v304_v26 = vrot.slane %v41_v2, %v45_v16  ;;  %v306_v27 = vrot.slane %v41_v2, %v49_v17  ;;  %v308_v28 = vrot.slane %v71_v9, %v45_v16  ;;  %v310_v29 = vrot.slane %v71_v9, %v49_v17 }
   0x7   :  { %v36_v31 = vunpack.c.h.bf16 %v293_v20  ;;  %v37_v32 = vunpack.c.l.bf16 %v298_v21  ;;  %v38_v33 = vunpack.c.h.bf16 %v298_v21 }
   0x8   :  { %v53_v34 = vmul.f32 %v304_v26, %v23_v3  ;;  %v54_v35 = vmul.f32 %v306_v27, %v24_v4  ;;  %v55_v36 = vmul.f32 %v304_v26, %v25_v10  ;;  %v56_v37 = vmul.f32 %v306_v27, %v26_v11 }
   0x9   :  { %v57_v38 = vmul.f32 %v304_v26, %v27_v12  ;;  %v58_v39 = vmul.f32 %v306_v27, %v28_v13  ;;  %v59_v40 = vmul.f32 %v304_v26, %v29_v18  ;;  %v60_v41 = vmul.f32 %v306_v27, %v30_v19 }
   0xa   :  { %v83_v42 = vadd.f32 %v308_v28, %v53_v34  ;;  %v84_v43 = vadd.f32 %v310_v29, %v54_v35  ;;  %v85_v44 = vadd.f32 %v308_v28, %v55_v36  ;;  %v86_v45 = vadd.f32 %v310_v29, %v56_v37 }
   0xb   :  { %v87_v46 = vadd.f32 %v308_v28, %v57_v38  ;;  %v88_v47 = vadd.f32 %v310_v29, %v58_v39  ;;  %v89_v48 = vadd.f32 %v308_v28, %v59_v40  ;;  %v90_v49 = vadd.f32 %v310_v29, %v60_v41 }
   0xc   :  { %vm101_vm0 = vcmp.ge.f32.partialorder %v83_v42, 0.0  ;;  %vm102_vm1 = vcmp.ge.f32.partialorder %v84_v43, 0.0  ;;  %v119_v50 = vmul.f32 0.2, %v83_v42  ;;  %v120_v51 = vmul.f32 0.2, %v84_v43 }
   0xd   :  { %vm103_vm2 = vcmp.ge.f32.partialorder %v85_v44, 0.0  ;;  %vm104_vm3 = vcmp.ge.f32.partialorder %v86_v45, 0.0  ;;  %v121_v52 = vmul.f32 0.2, %v85_v44  ;;  %v122_v53 = vmul.f32 0.2, %v86_v45 }
   0xe   :  { %v137_v54 = vsel %vm101_vm0, %v83_v42, %v119_v50  ;;  %v138_v55 = vsel %vm102_vm1, %v84_v43, %v120_v51  ;;  %vm105_vm4 = vcmp.ge.f32.partialorder %v87_v46, 0.0  ;;  %vm106_vm5 = vcmp.ge.f32.partialorder %v88_v47, 0.0 }
   0xf   :  { %v233_v56 = vpack.c.bf16 %v138_v55, %v137_v54  ;;  %v139_v57 = vsel %vm103_vm2, %v85_v44, %v121_v52  ;;  %v140_v58 = vsel %vm104_vm3, %v86_v45, %v122_v53  ;;  %v123_v59 = vmul.f32 0.2, %v87_v46 }
  0x10   :  { %v234_v60 = vpack.c.bf16 %v140_v58, %v139_v57  ;;  %v124_v61 = vmul.f32 0.2, %v88_v47  ;;  %vm107_vm6 = vcmp.ge.f32.partialorder %v89_v48, 0.0  ;;  %vm108_vm7 = vcmp.ge.f32.partialorder %v90_v49, 0.0 }
  0x11   :  { %211 = vst [vmem:[%s389_s3] sm:$0xff] %v233_v56  ;;  %v141_v62 = vsel %vm105_vm4, %v87_v46, %v123_v59  ;;  %v125_v63 = vmul.f32 0.2, %v89_v48  ;;  %v126_v0 = vmul.f32 0.2, %v90_v49  ;;  %v61_v1 = vmul.f32 %v304_v26, %v31_v22 }
  0x12   :  { %212 = vst [vmem:[%s389_s3 + $0x8] sm:$0xff] %v234_v60  ;;  %v142_v2 = vsel %vm106_vm5, %v88_v47, %v124_v61  ;;  %v62_v3 = vmul.f32 %v306_v27, %v32_v23  ;;  %v63_v4 = vmul.f32 %v304_v26, %v33_v24  ;;  %v64_v5 = vmul.f32 %v306_v27, %v34_v25 }
  0x13   :  { %v235_v6 = vpack.c.bf16 %v142_v2, %v141_v62  ;;  %v143_v7 = vsel %vm107_vm6, %v89_v48, %v125_v63  ;;  %v144_v8 = vsel %vm108_vm7, %v90_v49, %v126_v0  ;;  %v91_v9 = vadd.f32 %v308_v28, %v61_v1 }
  0x14   :  { %v236_v10 = vpack.c.bf16 %v144_v8, %v143_v7  ;;  %v92_v11 = vadd.f32 %v310_v29, %v62_v3  ;;  %v93_v12 = vadd.f32 %v308_v28, %v63_v4  ;;  %v94_v13 = vadd.f32 %v310_v29, %v64_v5 }
  0x15   :  { %213 = vst [vmem:[%s389_s3 + $0x10] sm:$0xff] %v235_v6  ;;  %vm109_vm8 = vcmp.ge.f32.partialorder %v91_v9, 0.0  ;;  %v127_v14 = vmul.f32 0.2, %v91_v9  ;;  %v65_v15 = vmul.f32 %v304_v26, %v35_v30  ;;  %v66_v16 = vmul.f32 %v306_v27, %v36_v31  ;;  %v22_v31 = vld [vmem:[%s386_s0 + $0x40] sm:$0xff] }
  0x16   :  { %214 = vst [vmem:[%s389_s3 + $0x18] sm:$0xff] %v236_v10  ;;  %vm110_vm9 = vcmp.ge.f32.partialorder %v92_v11, 0.0  ;;  %v128_v17 = vmul.f32 0.2, %v92_v11  ;;  %vm111_vm10 = vcmp.ge.f32.partialorder %v93_v12, 0.0  ;;  %vm112_vm11 = vcmp.ge.f32.partialorder %v94_v13, 0.0 }
  0x17   :  { %v145_v18 = vsel %vm109_vm8, %v91_v9, %v127_v14  ;;  %v129_v19 = vmul.f32 0.2, %v93_v12  ;;  %v130_v20 = vmul.f32 0.2, %v94_v13  ;;  %v95_v22 = vadd.f32 %v308_v28, %v65_v15 }
  0x18   :  { %v146_v23 = vsel %vm110_vm9, %v92_v11, %v128_v17  ;;  %v96_v24 = vadd.f32 %v310_v29, %v66_v16  ;;  %v67_v25 = vmul.f32 %v304_v26, %v37_v32  ;;  %v68_v30 = vmul.f32 %v306_v27, %v38_v33 }
  0x19   :  { %v237_v34 = vpack.c.bf16 %v146_v23, %v145_v18  ;;  %v147_v35 = vsel %vm111_vm10, %v93_v12, %v129_v19  ;;  %v148_v36 = vsel %vm112_vm11, %v94_v13, %v130_v20  ;;  %vm113_vm12 = vcmp.ge.f32.partialorder %v95_v22, 0.0 }
  0x1a   :  { %v238_v37 = vpack.c.bf16 %v148_v36, %v147_v35  ;;  %vm114_vm13 = vcmp.ge.f32.partialorder %v96_v24, 0.0  ;;  %v131_v38 = vmul.f32 0.2, %v95_v22  ;;  %v132_v39 = vmul.f32 0.2, %v96_v24 }
  0x1b   :  { %215 = vst [vmem:[%s389_s3 + $0x20] sm:$0xff] %v237_v34  ;;  %v97_v21 = vadd.f32 %v308_v28, %v67_v25  ;;  %v98_v32 = vadd.f32 %v310_v29, %v68_v30  ;;  %v39_v33 = vunpack.c.l.bf16 %v22_v31  ;;  %v40_v40 = vunpack.c.h.bf16 %v22_v31 }
  0x1c   :  { %216 = vst [vmem:[%s389_s3 + $0x28] sm:$0xff] %v238_v37  ;;  %v149_v41 = vsel %vm113_vm12, %v95_v22, %v131_v38  ;;  %v150_v42 = vsel %vm114_vm13, %v96_v24, %v132_v39 }
  0x1d   :  { %v239_v43 = vpack.c.bf16 %v150_v42, %v149_v41  ;;  %vm115_vm14 = vcmp.ge.f32.partialorder %v97_v21, 0.0  ;;  %vm116_vm15 = vcmp.ge.f32.partialorder %v98_v32, 0.0  ;;  %v133_v44 = vmul.f32 0.2, %v97_v21 }
  0x1e   :  { %v134_v45 = vmul.f32 0.2, %v98_v32  ;;  %v69_v46 = vmul.f32 %v304_v26, %v39_v33  ;;  %v70_v47 = vmul.f32 %v306_v27, %v40_v40 }
  0x1f   :  { %217 = vst [vmem:[%s389_s3 + $0x30] sm:$0xff] %v239_v43  ;;  %v151_v48 = vsel %vm115_vm14, %v97_v21, %v133_v44 }
  0x20   :  { %v152_v49 = vsel %vm116_vm15, %v98_v32, %v134_v45  ;;  %v99_v50 = vadd.f32 %v308_v28, %v69_v46  ;;  %v100_v51 = vadd.f32 %v310_v29, %v70_v47 }
  0x21   :  { %v240_v52 = vpack.c.bf16 %v152_v49, %v151_v48 }
  0x22   :  { %vm117_vm0 = vcmp.ge.f32.partialorder %v99_v50, 0.0  ;;  %vm118_vm1 = vcmp.ge.f32.partialorder %v100_v51, 0.0  ;;  %v135_v53 = vmul.f32 0.2, %v99_v50  ;;  %v136_v54 = vmul.f32 0.2, %v100_v51 }
  0x23   :  { %218 = vst [vmem:[%s389_s3 + $0x38] sm:$0xff] %v240_v52 }
  0x24   :  { %v153_v26 = vsel %vm117_vm0, %v99_v50, %v135_v53  ;;  %v154_v27 = vsel %vm118_vm1, %v100_v51, %v136_v54 }
  0x25   :  { %v241_v55 = vpack.c.bf16 %v154_v27, %v153_v26 }
  0x27   :  { %219 = vst [vmem:[%s389_s3 + $0x40] sm:$0xff] %v241_v55 }

// kernel: netd_forward.10
= control target key start
LH: loop header
LB: loop body
LE: loop exit
PB: predicated region body
PF: predicated region fallthrough
CT: control target
= control target key end

     0   :  { %vm2832_vm0 = vcmask 1040384   ;;  %s4830_s1 = inlined_call_operand.vmem [shape: bf16[2048,256], index: 1, kind: input, shape index: {}]   ;;  %s4831_s0 = inlined_call_operand.vmem [shape: bf16[72,2048], index: 0, kind: input, shape index: {}]   ;;  %s4832_s2 = inlined_call_operand.vmem [shape: bf16[72,256], index: 2, kind: output, shape index: {0}]   ;;  %s4833_s3 = inlined_call_operand.vmem [shape: f32[1,2,256], index: 3, kind: output, shape index: {1}]  }
   0x1   :  { %v3348_v0 = vld [vmem:[%s4830_s1 + $0x4] ss:$8 sps:$4 sm:$0xff]   ;;  %v3352_v2 = vld [vmem:[%s4830_s1] ss:$8 sps:$4 sm:$0xff]   ;;  %v3354_v4 = vld [vmem:[%s4830_s1 + $0x14] ss:$8 sps:$4 sm:$0xff]  }
   0x2   :  { %v3350_v1 = vld [vmem:[%s4830_s1 + $0x404] ss:$8 sps:$4 sm:$0xff]   ;;  %1997 = vmatprep.subr.bf16.mxu1 %v3348_v0  ;;  %v3353_v3 = vld [vmem:[%s4830_s1 + $0x400] ss:$8 sps:$4 sm:$0xff]   ;;  %v3356_v5 = vld [vmem:[%s4830_s1 + $0x414] ss:$8 sps:$4 sm:$0xff]  }
   0x3   :  { %2321 = vmatprep.subr.bf16.mxu0 %v3350_v1  ;;  %1998 = vmatpush1.bf16.msra.mxu1 %v3352_v2  ;;  %v3358_v6 = vld [vmem:[%s4830_s1 + $0x10] ss:$8 sps:$4 sm:$0xff]   ;;  %v3360_v8 = vld [vmem:[%s4830_s1 + $0x24] ss:$8 sps:$4 sm:$0xff]   ;;  %v3364_v10 = vld [vmem:[%s4830_s1 + $0x20] ss:$8 sps:$4 sm:$0xff]  }
   0x4   :  { %2322 = vmatpush1.bf16.msra.mxu0 %v3353_v3  ;;  %1999 = vmatprep.subr.bf16.mxu1 %v3354_v4  ;;  %v3359_v7 = vld [vmem:[%s4830_s1 + $0x410] ss:$8 sps:$4 sm:$0xff]   ;;  %v3362_v9 = vld [vmem:[%s4830_s1 + $0x424] ss:$8 sps:$4 sm:$0xff]   ;;  %v3365_v11 = vld [vmem:[%s4830_s1 + $0x420] ss:$8 sps:$4 sm:$0xff]  }
   0x5   :  { %2323 = vmatprep.subr.bf16.mxu0 %v3356_v5  ;;  %v3366_v12 = vld [vmem:[%s4830_s1 + $0x34] ss:$8 sps:$4 sm:$0xff]   ;;  %v3370_v14 = vld [vmem:[%s4830_s1 + $0x30] ss:$8 sps:$4 sm:$0xff]   ;;  %v3372_v16 = vld [vmem:[%s4830_s1 + $0x44] ss:$8 sps:$4 sm:$0xff]  }
   0x6   :  { %v3368_v13 = vld [vmem:[%s4830_s1 + $0x434] ss:$8 sps:$4 sm:$0xff]   ;;  %v3371_v15 = vld [vmem:[%s4830_s1 + $0x430] ss:$8 sps:$4 sm:$0xff]   ;;  %v3374_v17 = vld [vmem:[%s4830_s1 + $0x444] ss:$8 sps:$4 sm:$0xff]  }
   0x7   :  { %2000 = vmatpush1.bf16.msra.mxu1 %v3358_v6  ;;  %v3376_v18 = vld [vmem:[%s4830_s1 + $0x40] ss:$8 sps:$4 sm:$0xff]   ;;  %v3378_v20 = vld [vmem:[%s4830_s1 + $0x54] ss:$8 sps:$4 sm:$0xff]   ;;  %v3382_v22 = vld [vmem:[%s4830_s1 + $0x50] ss:$8 sps:$4 sm:$0xff]  }
   0x8   :  { %2324 = vmatpush1.bf16.msra.mxu0 %v3359_v7  ;;  %2001 = vmatprep.subr.bf16.mxu1 %v3360_v8  ;;  %v3377_v19 = vld [vmem:[%s4830_s1 + $0x440] ss:$8 sps:$4 sm:$0xff]   ;;  %v3380_v21 = vld [vmem:[%s4830_s1 + $0x454] ss:$8 sps:$4 sm:$0xff]   ;;  %v3383_v23 = vld [vmem:[%s4830_s1 + $0x450] ss:$8 sps:$4 sm:$0xff]  }
   0x9   :  { %2325 = vmatprep.subr.bf16.mxu0 %v3362_v9  ;;  %v3384_v24 = vld [vmem:[%s4830_s1 + $0x64] ss:$8 sps:$4 sm:$0xff]   ;;  %v3388_v26 = vld [vmem:[%s4830_s1 + $0x60] ss:$8 sps:$4 sm:$0xff]   ;;  %v3390_v28 = vld [vmem:[%s4830_s1 + $0x74] ss:$8 sps:$4 sm:$0xff]  }
   0xa   :  { %v3386_v25 = vld [vmem:[%s4830_s1 + $0x464] ss:$8 sps:$4 sm:$0xff]   ;;  %v3389_v27 = vld [vmem:[%s4830_s1 + $0x460] ss:$8 sps:$4 sm:$0xff]   ;;  %v3392_v29 = vld [vmem:[%s4830_s1 + $0x474] ss:$8 sps:$4 sm:$0xff]  }
   0xb   :  { %2002 = vmatpush1.bf16.msra.mxu1 %v3364_v10  ;;  %v3394_v30 = vld [vmem:[%s4830_s1 + $0x70] ss:$8 sps:$4 sm:$0xff]   ;;  %v3396_v32 = vld [vmem:[%s4830_s1 + $0x84] ss:$8 sps:$4 sm:$0xff]   ;;  %v3400_v34 = vld [vmem:[%s4830_s1 + $0x80] ss:$8 sps:$4 sm:$0xff]  }
   0xc   :  { %2326 = vmatpush1.bf16.msra.mxu0 %v3365_v11  ;;  %2003 = vmatprep.subr.bf16.mxu1 %v3366_v12  ;;  %v3395_v31 = vld [vmem:[%s4830_s1 + $0x470] ss:$8 sps:$4 sm:$0xff]   ;;  %v3398_v33 = vld [vmem:[%s4830_s1 + $0x484] ss:$8 sps:$4 sm:$0xff]   ;;  %v3401_v35 = vld [vmem:[%s4830_s1 + $0x480] ss:$8 sps:$4 sm:$0xff]  }
   0xd   :  { %2327 = vmatprep.subr.bf16.mxu0 %v3368_v13  ;;  %v3402_v36 = vld [vmem:[%s4830_s1 + $0x94] ss:$8 sps:$4 sm:$0xff]   ;;  %v3406_v38 = vld [vmem:[%s4830_s1 + $0x90] ss:$8 sps:$4 sm:$0xff]   ;;  %v3408_v40 = vld [vmem:[%s4830_s1 + $0xa4] ss:$8 sps:$4 sm:$0xff]  }
   0xe   :  { %v3404_v37 = vld [vmem:[%s4830_s1 + $0x494] ss:$8 sps:$4 sm:$0xff]   ;;  %v3407_v39 = vld [vmem:[%s4830_s1 + $0x490] ss:$8 sps:$4 sm:$0xff]   ;;  %v3410_v41 = vld [vmem:[%s4830_s1 + $0x4a4] ss:$8 sps:$4 sm:$0xff]  }
   0xf   :  { %2004 = vmatpush1.bf16.msra.mxu1 %v3370_v14  ;;  %v3412_v42 = vld [vmem:[%s4830_s1 + $0xa0] ss:$8 sps:$4 sm:$0xff]   ;;  %v3414_v44 = vld [vmem:[%s4830_s1 + $0xb4] ss:$8 sps:$4 sm:$0xff]   ;;  %v3418_v46 = vld [vmem:[%s4830_s1 + $0xb0] ss:$8 sps:$4 sm:$0xff]  }
  0x10   :  { %2328 = vmatpush1.bf16.msra.mxu0 %v3371_v15  ;;  %2005 = vmatprep.subr.bf16.mxu1 %v3372_v16  ;;  %v3413_v43 = vld [vmem:[%s4830_s1 + $0x4a0] ss:$8 sps:$4 sm:$0xff]   ;;  %v3416_v45 = vld [vmem:[%s4830_s1 + $0x4b4] ss:$8 sps:$4 sm:$0xff]   ;;  %v3419_v47 = vld [vmem:[%s4830_s1 + $0x4b0] ss:$8 sps:$4 sm:$0xff]  }
  0x11   :  { %2329 = vmatprep.subr.bf16.mxu0 %v3374_v17  ;;  %v13_v48 = vld [vmem:[%s4831_s0] sm:$0xff]  ;;  %v3426_v58 = vld [vmem:[%s4830_s1 + $0xd4] ss:$8 sps:$4 sm:$0xff]   ;;  %v3430_v60 = vld [vmem:[%s4830_s1 + $0xd0] ss:$8 sps:$4 sm:$0xff]  }
  0x12   :  { %v21_v49 = vld [vmem:[%s4831_s0 + $0x40] sm:$0xff]  ;;  %v3428_v59 = vld [vmem:[%s4830_s1 + $0x4d4] ss:$8 sps:$4 sm:$0xff]   ;;  %v3431_v61 = vld [vmem:[%s4830_s1 + $0x4d0] ss:$8 sps:$4 sm:$0xff]  }
  0x13   :  { %2006 = vmatpush1.bf16.msra.mxu1 %v3376_v18  ;;  %v3420_v50 = vld [vmem:[%s4830_s1 + $0xc4] ss:$8 sps:$4 sm:$0xff]   ;;  %v2856_v52 = vcombine.high %v13_v48, %v21_v49  ;;  %v3424_v56 = vld [vmem:[%s4830_s1 + $0xc0] ss:$8 sps:$4 sm:$0xff]   ;;  %v3438_v2 = vld [vmem:[%s4830_s1 + $0xf4] ss:$8 sps:$4 sm:$0xff]   ;;  %v2855_v8 = vcombine.low %v13_v48, %v21_v49 }
  0x14   :  { %2330 = vmatpush1.bf16.msra.mxu0 %v3377_v19  ;;  %2007 = vmatprep.subr.bf16.mxu1 %v3378_v20  ;;  %v3422_v51 = vld [vmem:[%s4830_s1 + $0x4c4] ss:$8 sps:$4 sm:$0xff]   ;;  %v3425_v57 = vld [vmem:[%s4830_s1 + $0x4c0] ss:$8 sps:$4 sm:$0xff]   ;;  %v3440_v3 = vld [vmem:[%s4830_s1 + $0x4f4] ss:$8 sps:$4 sm:$0xff]  }
  0x15   :  { %2331 = vmatprep.subr.bf16.mxu0 %v3380_v21  ;;  %v17_v53 = vld [vmem:[%s4831_s0 + $0x20] sm:$0xff]  ;;  %2029 = vmatprep.mubr.bf16.mxu1 %v2856_v52  ;;  %v3442_v4 = vld [vmem:[%s4830_s1 + $0xf0] ss:$8 sps:$4 sm:$0xff]   ;;  %v3452_v12 = vld [vmem:[%s4830_s1 + $0x114] ss:$8 sps:$4 sm:$0xff]  }
  0x16   :  { %v25_v54 = vld [vmem:[%s4831_s0 + $0x60] sm:$0xff]  ;;  %v3443_v5 = vld [vmem:[%s4830_s1 + $0x4f0] ss:$8 sps:$4 sm:$0xff]   ;;  %v3455_v13 = vld [vmem:[%s4830_s1 + $0x514] ss:$8 sps:$4 sm:$0xff]  }
  0x17   :  { %2008 = vmatpush1.bf16.msra.mxu1 %v3382_v22  ;;  %v2864_v55 = vcombine.high %v17_v53, %v25_v54  ;;  %v3432_v62 = vld [vmem:[%s4830_s1 + $0xe4] ss:$8 sps:$4 sm:$0xff]   ;;  %v3436_v0 = vld [vmem:[%s4830_s1 + $0xe0] ss:$8 sps:$4 sm:$0xff]   ;;  %v2863_v10 = vcombine.low %v17_v53, %v25_v54  ;;  %v3450_v16 = vld [vmem:[%s4830_s1 + $0x110] ss:$8 sps:$4 sm:$0xff]  }
  0x18   :  { %2332 = vmatpush1.bf16.msra.mxu0 %v3383_v23  ;;  %2009 = vmatprep.subr.bf16.mxu1 %v3384_v24  ;;  %v3434_v63 = vld [vmem:[%s4830_s1 + $0x4e4] ss:$8 sps:$4 sm:$0xff]   ;;  %v3437_v1 = vld [vmem:[%s4830_s1 + $0x4e0] ss:$8 sps:$4 sm:$0xff]   ;;  %v3453_v18 = vld [vmem:[%s4830_s1 + $0x510] ss:$8 sps:$4 sm:$0xff]  }
  0x19   :  { %2333 = vmatprep.subr.bf16.mxu0 %v3386_v25  ;;  %2353 = vmatprep.mubr.bf16.mxu0 %v2864_v55  ;;  %v3446_v6 = vld [vmem:[%s4830_s1 + $0x104] ss:$8 sps:$4 sm:$0xff]   ;;  %v3444_v9 = vld [vmem:[%s4830_s1 + $0x100] ss:$8 sps:$4 sm:$0xff]   ;;  %v3474_v52 = vld [vmem:[%s4830_s1 + $0x150] ss:$8 sps:$4 sm:$0xff]  }
  0x1a   :  { %v3449_v7 = vld [vmem:[%s4830_s1 + $0x504] ss:$8 sps:$4 sm:$0xff]   ;;  %v3447_v11 = vld [vmem:[%s4830_s1 + $0x500] ss:$8 sps:$4 sm:$0xff]   ;;  %v3477_v53 = vld [vmem:[%s4830_s1 + $0x550] ss:$8 sps:$4 sm:$0xff]  }
  0x1b   :  { %2010 = vmatpush1.bf16.msra.mxu1 %v3388_v26  ;;  %v29_v14 = vld [vmem:[%s4831_s0 + $0x80] sm:$0xff] }
  0x1c   :  { %2334 = vmatpush1.bf16.msra.mxu0 %v3389_v27  ;;  %2011 = vmatprep.subr.bf16.mxu1 %v3390_v28  ;;  %v37_v15 = vld [vmem:[%s4831_s0 + $0xc0] sm:$0xff] }
  0x1d   :  { %2335 = vmatprep.subr.bf16.mxu0 %v3392_v29  ;;  %v2872_v17 = vcombine.high %v29_v14, %v37_v15  ;;  %v33_v19 = vld [vmem:[%s4831_s0 + $0xa0] sm:$0xff]  ;;  %v2871_v26 = vcombine.low %v29_v14, %v37_v15  ;;  %v3500_v14 = vld [vmem:[%s4830_s1 + $0x194] ss:$8 sps:$4 sm:$0xff]  }
  0x1e   :  { %v41_v20 = vld [vmem:[%s4831_s0 + $0xe0] sm:$0xff]  ;;  %v3503_v15 = vld [vmem:[%s4830_s1 + $0x594] ss:$8 sps:$4 sm:$0xff]  }
  0x1f   :  { %2012 = vmatpush1.bf16.msra.mxu1 %v3394_v30  ;;  %v3458_v21 = vld [vmem:[%s4830_s1 + $0x124] ss:$8 sps:$4 sm:$0xff]   ;;  %v2880_v22 = vcombine.high %v33_v19, %v41_v20  ;;  %v3456_v24 = vld [vmem:[%s4830_s1 + $0x120] ss:$8 sps:$4 sm:$0xff]   ;;  %v2879_v27 = vcombine.low %v33_v19, %v41_v20  ;;  %v3464_v30 = vld [vmem:[%s4830_s1 + $0x134] ss:$8 sps:$4 sm:$0xff]  }
  0x20   :  { %2336 = vmatpush1.bf16.msra.mxu0 %v3395_v31  ;;  %2013 = vmatprep.subr.bf16.mxu1 %v3396_v32  ;;  %v3461_v23 = vld [vmem:[%s4830_s1 + $0x524] ss:$8 sps:$4 sm:$0xff]   ;;  %v3459_v25 = vld [vmem:[%s4830_s1 + $0x520] ss:$8 sps:$4 sm:$0xff]   ;;  %v3467_v31 = vld [vmem:[%s4830_s1 + $0x534] ss:$8 sps:$4 sm:$0xff]  }
  0x21   :  { %2337 = vmatprep.subr.bf16.mxu0 %v3398_v33  ;;  %v45_v28 = vld [vmem:[%s4831_s0 + $0x100] sm:$0xff]  ;;  %v3501_v19 = vld [vmem:[%s4830_s1 + $0x590] ss:$8 sps:$4 sm:$0xff]  }
  0x22   :  { %v53_v29 = vld [vmem:[%s4831_s0 + $0x140] sm:$0xff] }
  0x23   :  { %2014 = vmatpush1.bf16.msra.mxu1 %v3400_v34  ;;  %v2888_v32 = vcombine.high %v45_v28, %v53_v29  ;;  %v49_v33 = vld [vmem:[%s4831_s0 + $0x120] sm:$0xff] }
  0x24   :  { %2338 = vmatpush1.bf16.msra.mxu0 %v3401_v35  ;;  %2015 = vmatprep.subr.bf16.mxu1 %v3402_v36  ;;  %v57_v34 = vld [vmem:[%s4831_s0 + $0x160] sm:$0xff]  ;;  %v3462_v35 = vld [vmem:[%s4830_s1 + $0x130] ss:$8 sps:$4 sm:$0xff]  }
  0x25   :  { %2339 = vmatprep.subr.bf16.mxu0 %v3404_v37  ;;  %v3465_v36 = vld [vmem:[%s4830_s1 + $0x530] ss:$8 sps:$4 sm:$0xff]   ;;  %v2896_v37 = vcombine.high %v49_v33, %v57_v34  ;;  %v65_v48 = vld [vmem:[%s4831_s0 + $0x1a0] sm:$0xff] }
  0x26   :  { %v73_v49 = vld [vmem:[%s4831_s0 + $0x1e0] sm:$0xff] }
  0x27   :  { %2016 = vmatpush1.bf16.msra.mxu1 %v3406_v38  ;;  %v3470_v38 = vld [vmem:[%s4830_s1 + $0x144] ss:$8 sps:$4 sm:$0xff]  }
  0x28   :  { %2340 = vmatpush1.bf16.msra.mxu0 %v3407_v39  ;;  %2017 = vmatprep.subr.bf16.mxu1 %v3408_v40  ;;  %v3473_v39 = vld [vmem:[%s4830_s1 + $0x544] ss:$8 sps:$4 sm:$0xff]   ;;  %v3468_v40 = vld [vmem:[%s4830_s1 + $0x140] ss:$8 sps:$4 sm:$0xff]  }
  0x29   :  { %2341 = vmatprep.subr.bf16.mxu0 %v3410_v41  ;;  %v3471_v41 = vld [vmem:[%s4830_s1 + $0x540] ss:$8 sps:$4 sm:$0xff]   ;;  %v3482_v54 = vld [vmem:[%s4830_s1 + $0x164] ss:$8 sps:$4 sm:$0xff]  }
  0x2a   :  { %v3485_v55 = vld [vmem:[%s4830_s1 + $0x564] ss:$8 sps:$4 sm:$0xff]  }
  0x2b   :  { %2018 = vmatpush1.bf16.msra.mxu1 %v3412_v42  ;;  %v61_v42 = vld [vmem:[%s4831_s0 + $0x180] sm:$0xff] }
  0x2c   :  { %2342 = vmatpush1.bf16.msra.mxu0 %v3413_v43  ;;  %2019 = vmatprep.subr.bf16.mxu1 %v3414_v44  ;;  %v2887_v43 = vcombine.low %v45_v28, %v53_v29  ;;  %v2895_v44 = vcombine.low %v49_v33, %v57_v34  ;;  %v3506_v20 = vld [vmem:[%s4830_s1 + $0x1a4] ss:$8 sps:$4 sm:$0xff]   ;;  %v3527_v33 = vld [vmem:[%s4830_s1 + $0x5d4] ss:$8 sps:$4 sm:$0xff]   ;;  %v3522_v34 = vld [vmem:[%s4830_s1 + $0x1d0] ss:$8 sps:$4 sm:$0xff]  }
  0x2d   :  { %2343 = vmatprep.subr.bf16.mxu0 %v3416_v45  ;;  %v69_v45 = vld [vmem:[%s4831_s0 + $0x1c0] sm:$0xff] }
  0x2e   :  { %v3518_v28 = vld [vmem:[%s4830_s1 + $0x1c4] ss:$8 sps:$4 sm:$0xff]  }
  0x2f   :  { %2020 = vmatpush1.bf16.msra.mxu1 %v3418_v46  ;;  %v3476_v46 = vld [vmem:[%s4830_s1 + $0x154] ss:$8 sps:$4 sm:$0xff]   ;;  %v3521_v29 = vld [vmem:[%s4830_s1 + $0x5c4] ss:$8 sps:$4 sm:$0xff]  }
  0x30   :  { %2344 = vmatpush1.bf16.msra.mxu0 %v3419_v47  ;;  %2021 = vmatprep.subr.bf16.mxu1 %v3420_v50  ;;  %v3479_v47 = vld [vmem:[%s4830_s1 + $0x554] ss:$8 sps:$4 sm:$0xff]   ;;  %v2904_v50 = vcombine.high %v61_v42, %v69_v45 }
  0x31   :  { %2345 = vmatprep.subr.bf16.mxu0 %v3422_v51  ;;  %v2912_v51 = vcombine.high %v65_v48, %v73_v49 }
  0x33   :  { %2022 = vmatpush1.bf16.msra.mxu1 %v3424_v56  ;;  %v77_v56 = vld [vmem:[%s4831_s0 + $0x200] sm:$0xff] }
  0x34   :  { %2346 = vmatpush1.bf16.msra.mxu0 %v3425_v57  ;;  %2023 = vmatprep.subr.bf16.mxu1 %v3426_v58  ;;  %v2903_v57 = vcombine.low %v61_v42, %v69_v45  ;;  %v2911_v58 = vcombine.low %v65_v48, %v73_v49  ;;  %v3538_v42 = vld [vmem:[%s4830_s1 + $0x1f0] ss:$8 sps:$4 sm:$0xff]   ;;  %v3549_v45 = vld [vmem:[%s4830_s1 + $0x604] ss:$8 sps:$4 sm:$0xff]  }
  0x35   :  { %2347 = vmatprep.subr.bf16.mxu0 %v3428_v59  ;;  %v81_v59 = vld [vmem:[%s4831_s0 + $0x220] sm:$0xff] }
  0x37   :  { %2024 = vmatpush1.bf16.msra.mxu1 %v3430_v60  ;;  %v3480_v60 = vld [vmem:[%s4830_s1 + $0x160] ss:$8 sps:$4 sm:$0xff]  }
  0x38   :  { %2348 = vmatpush1.bf16.msra.mxu0 %v3431_v61  ;;  %2025 = vmatprep.subr.bf16.mxu1 %v3432_v62  ;;  %v3483_v61 = vld [vmem:[%s4830_s1 + $0x560] ss:$8 sps:$4 sm:$0xff]   ;;  %v3488_v62 = vld [vmem:[%s4830_s1 + $0x174] ss:$8 sps:$4 sm:$0xff]  }
  0x39   :  { %2349 = vmatprep.subr.bf16.mxu0 %v3434_v63  ;;  %v3491_v63 = vld [vmem:[%s4830_s1 + $0x574] ss:$8 sps:$4 sm:$0xff]  }
  0x3b   :  { %2026 = vmatpush1.bf16.msra.mxu1 %v3436_v0  ;;  %v2920_v0 = vcombine.high %v77_v56, %v77_v56 }
  0x3c   :  { %2350 = vmatpush1.bf16.msra.mxu0 %v3437_v1  ;;  %2027 = vmatprep.subr.bf16.mxu1 %v3438_v2  ;;  %v2928_v1 = vcombine.high %v81_v59, %v81_v59  ;;  %v3486_v2 = vld [vmem:[%s4830_s1 + $0x170] ss:$8 sps:$4 sm:$0xff]  }
  0x3d   :  { %2351 = vmatprep.subr.bf16.mxu0 %v3440_v3  ;;  %v3489_v3 = vld [vmem:[%s4830_s1 + $0x570] ss:$8 sps:$4 sm:$0xff]  }
  0x3f   :  { %2028 = vmatpush1.bf16.msra.mxu1 %v3442_v4  ;;  %v3494_v4 = vld [vmem:[%s4830_s1 + $0x184] ss:$8 sps:$4 sm:$0xff]  }
  0x40   :  { %2352 = vmatpush1.bf16.msra.mxu0 %v3443_v5  ;;  %2078 = vmatprep.subr.bf16.mxu1 %v3446_v6  ;;  %v3497_v5 = vld [vmem:[%s4830_s1 + $0x584] ss:$8 sps:$4 sm:$0xff]  }
  0x41   :  { %2402 = vmatprep.subr.bf16.mxu0 %v3449_v7  ;;  %v4119_v6 = vld [vmem:[%s4831_s0 + $0x8] sm:$0xff] }
  0x42   :  { %2030 = vmatmul.mubr.bf16.vlgmr.msra.gmra.mrb[0].mxu1 %v2855_v8  ;;  %v4124_v7 = vld [vmem:[%s4831_s0 + $0x48] sm:$0xff] }
  0x43   :  { %2354 = vmatmul.mubr.bf16.vlgmr.msra.gmra.mrb[0].mxu0 %v2863_v10  ;;  %2079 = vmatpush1.bf16.msra.mxu1 %v3444_v9  ;;  %v4129_v8 = vld [vmem:[%s4831_s0 + $0x28] sm:$0xff]  ;;  %v2919_v9 = vcombine.low %v77_v56, %v77_v56  ;;  %v2927_v10 = vcombine.low %v81_v59, %v81_v59  ;;  %v2857_v48 = vcombine.low %v4119_v6, %v4124_v7  ;;  %v3553_v59 = vld [vmem:[%s4830_s1 + $0x610] ss:$8 sps:$4 sm:$0xff]  }
  0x44   :  { %2403 = vmatpush1.bf16.msra.mxu0 %v3447_v11  ;;  %2080 = vmatprep.subr.bf16.mxu1 %v3452_v12  ;;  %v4134_v11 = vld [vmem:[%s4831_s0 + $0x68] sm:$0xff] }
  0x45   :  { %2404 = vmatprep.subr.bf16.mxu0 %v3455_v13  ;;  %2039 = vmatprep.mubr.bf16.mxu1 %v2872_v17  ;;  %v3492_v12 = vld [vmem:[%s4830_s1 + $0x180] ss:$8 sps:$4 sm:$0xff]   ;;  %v2866_v17 = vcombine.high %v4129_v8, %v4134_v11  ;;  %v2865_v49 = vcombine.low %v4129_v8, %v4134_v11  ;;  %v3565_v11 = vld [vmem:[%s4830_s1 + $0x630] ss:$8 sps:$4 sm:$0xff]  }
  0x46   :  { %2363 = vmatprep.mubr.bf16.mxu0 %v2880_v22  ;;  %v3495_v13 = vld [vmem:[%s4830_s1 + $0x580] ss:$8 sps:$4 sm:$0xff]  }
  0x47   :  { %2081 = vmatpush1.bf16.msra.mxu1 %v3450_v16  ;;  %v2858_v16 = vcombine.high %v4119_v6, %v4124_v7  ;;  %v3504_v22 = vld [vmem:[%s4830_s1 + $0x1a0] ss:$8 sps:$4 sm:$0xff]   ;;  %v3564_v6 = vld [vmem:[%s4830_s1 + $0x234] ss:$8 sps:$4 sm:$0xff]  }
  0x48   :  { %2405 = vmatpush1.bf16.msra.mxu0 %v3453_v18  ;;  %2082 = vmatprep.subr.bf16.mxu1 %v3458_v21  ;;  %v3498_v18 = vld [vmem:[%s4830_s1 + $0x190] ss:$8 sps:$4 sm:$0xff]   ;;  %v3509_v21 = vld [vmem:[%s4830_s1 + $0x5a4] ss:$8 sps:$4 sm:$0xff]   ;;  %v3567_v7 = vld [vmem:[%s4830_s1 + $0x634] ss:$8 sps:$4 sm:$0xff]  }
  0x49   :  { %2406 = vmatprep.subr.bf16.mxu0 %v3461_v23  ;;  %v3507_v23 = vld [vmem:[%s4830_s1 + $0x5a0] ss:$8 sps:$4 sm:$0xff]  }
  0x4a   :  { %2040 = vmatmul.mubr.bf16.gmra.mrb[4].mxu1 %v2871_v26  ;;  %v3510_v26 = vld [vmem:[%s4830_s1 + $0x1b0] ss:$8 sps:$4 sm:$0xff]  }
  0x4b   :  { %2364 = vmatmul.mubr.bf16.gmra.mrb[4].mxu0 %v2879_v27  ;;  %2083 = vmatpush1.bf16.msra.mxu1 %v3456_v24  ;;  %v3512_v24 = vld [vmem:[%s4830_s1 + $0x1b4] ss:$8 sps:$4 sm:$0xff]   ;;  %v3513_v27 = vld [vmem:[%s4830_s1 + $0x5b0] ss:$8 sps:$4 sm:$0xff]  }
  0x4c   :  { %2407 = vmatpush1.bf16.msra.mxu0 %v3459_v25  ;;  %2084 = vmatprep.subr.bf16.mxu1 %v3464_v30  ;;  %v3515_v25 = vld [vmem:[%s4830_s1 + $0x5b4] ss:$8 sps:$4 sm:$0xff]   ;;  %v3516_v30 = vld [vmem:[%s4830_s1 + $0x1c0] ss:$8 sps:$4 sm:$0xff]  }
  0x4d   :  { %2408 = vmatprep.subr.bf16.mxu0 %v3467_v31  ;;  %2049 = vmatprep.mubr.bf16.mxu1 %v2888_v32  ;;  %v3519_v31 = vld [vmem:[%s4830_s1 + $0x5c0] ss:$8 sps:$4 sm:$0xff]   ;;  %v3524_v32 = vld [vmem:[%s4830_s1 + $0x1d4] ss:$8 sps:$4 sm:$0xff]  }
  0x4e   :  { %2373 = vmatprep.mubr.bf16.mxu0 %v2896_v37  ;;  %v3535_v37 = vld [vmem:[%s4830_s1 + $0x5e4] ss:$8 sps:$4 sm:$0xff]  }
  0x4f   :  { %2085 = vmatpush1.bf16.msra.mxu1 %v3462_v35  ;;  %v3525_v35 = vld [vmem:[%s4830_s1 + $0x5d0] ss:$8 sps:$4 sm:$0xff]  }
  0x50   :  { %2409 = vmatpush1.bf16.msra.mxu0 %v3465_v36  ;;  %2086 = vmatprep.subr.bf16.mxu1 %v3470_v38  ;;  %v3531_v36 = vld [vmem:[%s4830_s1 + $0x1e4] ss:$8 sps:$4 sm:$0xff]   ;;  %v3529_v38 = vld [vmem:[%s4830_s1 + $0x1e0] ss:$8 sps:$4 sm:$0xff]  }
  0x51   :  { %2410 = vmatprep.subr.bf16.mxu0 %v3473_v39  ;;  %v3533_v39 = vld [vmem:[%s4830_s1 + $0x5e0] ss:$8 sps:$4 sm:$0xff]  }
  0x52   :  { %2050 = vmatmul.mubr.bf16.gmra.mrb[8].mxu1 %v2887_v43  ;;  %v3541_v43 = vld [vmem:[%s4830_s1 + $0x5f0] ss:$8 sps:$4 sm:$0xff]  }
  0x53   :  { %2374 = vmatmul.mubr.bf16.gmra.mrb[8].mxu0 %v2895_v44  ;;  %2087 = vmatpush1.bf16.msra.mxu1 %v3468_v40  ;;  %v3540_v40 = vld [vmem:[%s4830_s1 + $0x1f4] ss:$8 sps:$4 sm:$0xff]   ;;  %v3546_v44 = vld [vmem:[%s4830_s1 + $0x204] ss:$8 sps:$4 sm:$0xff]  }
  0x54   :  { %2411 = vmatpush1.bf16.msra.mxu0 %v3471_v41  ;;  %2088 = vmatprep.subr.bf16.mxu1 %v3476_v46  ;;  %v3543_v41 = vld [vmem:[%s4830_s1 + $0x5f4] ss:$8 sps:$4 sm:$0xff]   ;;  %v3544_v46 = vld [vmem:[%s4830_s1 + $0x200] ss:$8 sps:$4 sm:$0xff]  }
  0x55   :  { %2412 = vmatprep.subr.bf16.mxu0 %v3479_v47  ;;  %2059 = vmatprep.mubr.bf16.mxu1 %v2904_v50  ;;  %v30_v47 = vld [vmem:[%s4831_s0 + $0x88] sm:$0xff] }
  0x56   :  { %2383 = vmatprep.mubr.bf16.mxu0 %v2912_v51  ;;  %v38_v50 = vld [vmem:[%s4831_s0 + $0xc8] sm:$0xff] }
  0x57   :  { %2089 = vmatpush1.bf16.msra.mxu1 %v3474_v52  ;;  %v34_v51 = vld [vmem:[%s4831_s0 + $0xa8] sm:$0xff]  ;;  %v2874_v56 = vcombine.high %v30_v47, %v38_v50 }
  0x58   :  { %2413 = vmatpush1.bf16.msra.mxu0 %v3477_v53  ;;  %2090 = vmatprep.subr.bf16.mxu1 %v3482_v54  ;;  %v42_v52 = vld [vmem:[%s4831_s0 + $0xe8] sm:$0xff]  ;;  %v3552_v54 = vld [vmem:[%s4830_s1 + $0x214] ss:$8 sps:$4 sm:$0xff]  }
  0x59   :  { %2414 = vmatprep.subr.bf16.mxu0 %v3485_v55  ;;  %v3547_v53 = vld [vmem:[%s4830_s1 + $0x600] ss:$8 sps:$4 sm:$0xff]   ;;  %v3555_v55 = vld [vmem:[%s4830_s1 + $0x614] ss:$8 sps:$4 sm:$0xff]  }
  0x5a   :  { %2060 = vmatmul.mubr.bf16.gmra.mrb[12].mxu1 %v2903_v57  ;;  %v2882_v57 = vcombine.high %v34_v51, %v42_v52 }
  0x5b   :  { %2384 = vmatmul.mubr.bf16.gmra.mrb[12].mxu0 %v2911_v58  ;;  %2091 = vmatpush1.bf16.msra.mxu1 %v3480_v60  ;;  %v3550_v58 = vld [vmem:[%s4830_s1 + $0x210] ss:$8 sps:$4 sm:$0xff]   ;;  %v3558_v60 = vld [vmem:[%s4830_s1 + $0x224] ss:$8 sps:$4 sm:$0xff]  }
  0x5c   :  { %2415 = vmatpush1.bf16.msra.mxu0 %v3483_v61  ;;  %2092 = vmatprep.subr.bf16.mxu1 %v3488_v62  ;;  %v3561_v61 = vld [vmem:[%s4830_s1 + $0x624] ss:$8 sps:$4 sm:$0xff]   ;;  %v3556_v62 = vld [vmem:[%s4830_s1 + $0x220] ss:$8 sps:$4 sm:$0xff]  }
  0x5d   :  { %2416 = vmatprep.subr.bf16.mxu0 %v3491_v63  ;;  %2069 = vmatprep.mubr.bf16.mxu1 %v2920_v0  ;;  %v3559_v63 = vld [vmem:[%s4830_s1 + $0x620] ss:$8 sps:$4 sm:$0xff]  }
  0x5e   :  { %2393 = vmatprep.mubr.bf16.mxu0 %v2928_v1  ;;  %v46_v0 = vld [vmem:[%s4831_s0 + $0x108] sm:$0xff]  ;;  %v2873_v1 = vcombine.low %v30_v47, %v38_v50  ;;  %v4392_v47 = vld [vmem:[%s4831_s0 + $0x50] sm:$0xff] }
  0x5f   :  { %2093 = vmatpush1.bf16.msra.mxu1 %v3486_v2  ;;  %v2881_v2 = vcombine.low %v34_v51, %v42_v52  ;;  %v4397_v50 = vld [vmem:[%s4831_s0 + $0x30] sm:$0xff] }
  0x60   :  { %2417 = vmatpush1.bf16.msra.mxu0 %v3489_v3  ;;  %2094 = vmatprep.subr.bf16.mxu1 %v3494_v4  ;;  %v54_v3 = vld [vmem:[%s4831_s0 + $0x148] sm:$0xff]  ;;  %v4402_v51 = vld [vmem:[%s4831_s0 + $0x70] sm:$0xff] }
  0x61   :  { %2418 = vmatprep.subr.bf16.mxu0 %v3497_v5  ;;  %v50_v4 = vld [vmem:[%s4831_s0 + $0x128] sm:$0xff]  ;;  %v2890_v8 = vcombine.high %v46_v0, %v54_v3  ;;  %v3600_v52 = vld [vmem:[%s4830_s1 + $0x294] ss:$8 sps:$4 sm:$0xff]  }
  0x62   :  { %2070 = vmatmul.mubr.bf16.gmra.mrb[16].mxu1 %v2919_v9  ;;  %v58_v5 = vld [vmem:[%s4831_s0 + $0x168] sm:$0xff] }
  0x63   :  { %2394 = vmatmul.mubr.bf16.gmra.mrb[16].mxu0 %v2927_v10  ;;  %2095 = vmatpush1.bf16.msra.mxu1 %v3492_v12  ;;  %v2898_v9 = vcombine.high %v50_v4, %v58_v5  ;;  %v3562_v10 = vld [vmem:[%s4830_s1 + $0x230] ss:$8 sps:$4 sm:$0xff]   ;;  %v3570_v12 = vld [vmem:[%s4830_s1 + $0x244] ss:$8 sps:$4 sm:$0xff]  }
  0x64   :  { %2419 = vmatpush1.bf16.msra.mxu0 %v3495_v13  ;;  %2096 = vmatprep.subr.bf16.mxu1 %v3500_v14  ;;  %v3573_v13 = vld [vmem:[%s4830_s1 + $0x644] ss:$8 sps:$4 sm:$0xff]   ;;  %v3568_v14 = vld [vmem:[%s4830_s1 + $0x240] ss:$8 sps:$4 sm:$0xff]  }
  0x65   :  { %2420 = vmatprep.subr.bf16.mxu0 %v3503_v15  ;;  %2110 = vmatprep.mubr.bf16.mxu1 %v2858_v16  ;;  %v3571_v15 = vld [vmem:[%s4830_s1 + $0x640] ss:$8 sps:$4 sm:$0xff]  }
  0x66   :  { %2434 = vmatprep.mubr.bf16.mxu0 %v2866_v17  ;;  %v62_v16 = vld [vmem:[%s4831_s0 + $0x188] sm:$0xff] }
  0x67   :  { %2097 = vmatpush1.bf16.msra.mxu1 %v3498_v18  ;;  %v70_v17 = vld [vmem:[%s4831_s0 + $0x1c8] sm:$0xff]  ;;  %v2889_v18 = vcombine.low %v46_v0, %v54_v3  ;;  %v3610_v0 = vld [vmem:[%s4830_s1 + $0x2b0] ss:$8 sps:$4 sm:$0xff]  }
  0x68   :  { %2421 = vmatpush1.bf16.msra.mxu0 %v3501_v19  ;;  %2098 = vmatprep.subr.bf16.mxu1 %v3506_v20  ;;  %v2897_v19 = vcombine.low %v50_v4, %v58_v5  ;;  %v66_v20 = vld [vmem:[%s4831_s0 + $0x1a8] sm:$0xff] }
  0x69   :  { %2422 = vmatprep.subr.bf16.mxu0 %v3509_v21  ;;  %v74_v21 = vld [vmem:[%s4831_s0 + $0x1e8] sm:$0xff] }
  0x6a   :  { %v3621_v3 = vld [vmem:[%s4830_s1 + $0x6c4] ss:$8 sps:$4 sm:$0xff]   ;;  %v3616_v4 = vld [vmem:[%s4830_s1 + $0x2c0] ss:$8 sps:$4 sm:$0xff]  }
  0x6b   :  { %2099 = vmatpush1.bf16.msra.mxu1 %v3504_v22  ;;  %v3576_v22 = vld [vmem:[%s4830_s1 + $0x254] ss:$8 sps:$4 sm:$0xff]   ;;  %v3619_v5 = vld [vmem:[%s4830_s1 + $0x6c0] ss:$8 sps:$4 sm:$0xff]  }
  0x6c   :  { %2423 = vmatpush1.bf16.msra.mxu0 %v3507_v23  ;;  %2100 = vmatprep.subr.bf16.mxu1 %v3512_v24  ;;  %v3579_v23 = vld [vmem:[%s4830_s1 + $0x654] ss:$8 sps:$4 sm:$0xff]   ;;  %v2906_v24 = vcombine.high %v62_v16, %v70_v17 }
  0x6d   :  { %2424 = vmatprep.subr.bf16.mxu0 %v3515_v25  ;;  %v2914_v25 = vcombine.high %v66_v20, %v74_v21 }
  0x6f   :  { %2101 = vmatpush1.bf16.msra.mxu1 %v3510_v26  ;;  %v3574_v26 = vld [vmem:[%s4830_s1 + $0x250] ss:$8 sps:$4 sm:$0xff]  }
  0x70   :  { %2425 = vmatpush1.bf16.msra.mxu0 %v3513_v27  ;;  %2102 = vmatprep.subr.bf16.mxu1 %v3518_v28  ;;  %v3577_v27 = vld [vmem:[%s4830_s1 + $0x650] ss:$8 sps:$4 sm:$0xff]   ;;  %v3582_v28 = vld [vmem:[%s4830_s1 + $0x264] ss:$8 sps:$4 sm:$0xff]  }
  0x71   :  { %2426 = vmatprep.subr.bf16.mxu0 %v3521_v29  ;;  %v3585_v29 = vld [vmem:[%s4830_s1 + $0x664] ss:$8 sps:$4 sm:$0xff]  }
  0x73   :  { %2103 = vmatpush1.bf16.msra.mxu1 %v3516_v30  ;;  %v3580_v30 = vld [vmem:[%s4830_s1 + $0x260] ss:$8 sps:$4 sm:$0xff]  }
  0x74   :  { %2427 = vmatpush1.bf16.msra.mxu0 %v3519_v31  ;;  %2104 = vmatprep.subr.bf16.mxu1 %v3524_v32  ;;  %v3583_v31 = vld [vmem:[%s4830_s1 + $0x660] ss:$8 sps:$4 sm:$0xff]   ;;  %v2905_v32 = vcombine.low %v62_v16, %v70_v17  ;;  %v3638_v16 = vld [vmem:[%s4830_s1 + $0x2f0] ss:$8 sps:$4 sm:$0xff]  }
  0x75   :  { %2428 = vmatprep.subr.bf16.mxu0 %v3527_v33  ;;  %v2913_v33 = vcombine.low %v66_v20, %v74_v21  ;;  %v3641_v17 = vld [vmem:[%s4830_s1 + $0x6f0] ss:$8 sps:$4 sm:$0xff]  }
  0x76   :  { %v31_v20 = vld [vmem:[%s4831_s0 + $0x90] sm:$0xff] }
  0x77   :  { %2105 = vmatpush1.bf16.msra.mxu1 %v3522_v34  ;;  %v78_v34 = vld [vmem:[%s4831_s0 + $0x208] sm:$0xff] }
  0x78   :  { %2429 = vmatpush1.bf16.msra.mxu0 %v3525_v35  ;;  %2106 = vmatprep.subr.bf16.mxu1 %v3531_v36  ;;  %v82_v35 = vld [vmem:[%s4831_s0 + $0x228] sm:$0xff]  ;;  %v3588_v36 = vld [vmem:[%s4830_s1 + $0x274] ss:$8 sps:$4 sm:$0xff]  }
  0x79   :  { %2430 = vmatprep.subr.bf16.mxu0 %v3535_v37  ;;  %v3591_v37 = vld [vmem:[%s4830_s1 + $0x674] ss:$8 sps:$4 sm:$0xff]  }
  0x7b   :  { %2107 = vmatpush1.bf16.msra.mxu1 %v3529_v38  ;;  %v2922_v38 = vcombine.high %v78_v34, %v78_v34 }
  0x7c   :  { %2431 = vmatpush1.bf16.msra.mxu0 %v3533_v39  ;;  %2108 = vmatprep.subr.bf16.mxu1 %v3540_v40  ;;  %v2930_v39 = vcombine.high %v82_v35, %v82_v35  ;;  %v3586_v40 = vld [vmem:[%s4830_s1 + $0x270] ss:$8 sps:$4 sm:$0xff]  }
  0x7d   :  { %2432 = vmatprep.subr.bf16.mxu0 %v3543_v41  ;;  %v3589_v41 = vld [vmem:[%s4830_s1 + $0x670] ss:$8 sps:$4 sm:$0xff]  }
  0x7f   :  { %2109 = vmatpush1.bf16.msra.mxu1 %v3538_v42  ;;  %v3594_v42 = vld [vmem:[%s4830_s1 + $0x284] ss:$8 sps:$4 sm:$0xff]  }
  0x80   :  { %2433 = vmatpush1.bf16.msra.mxu0 %v3541_v43  ;;  %2159 = vmatprep.subr.bf16.mxu1 %v3546_v44  ;;  %v3597_v43 = vld [vmem:[%s4830_s1 + $0x684] ss:$8 sps:$4 sm:$0xff]   ;;  %v3592_v44 = vld [vmem:[%s4830_s1 + $0x280] ss:$8 sps:$4 sm:$0xff]  }
  0x81   :  { %2483 = vmatprep.subr.bf16.mxu0 %v3549_v45  ;;  %v3595_v45 = vld [vmem:[%s4830_s1 + $0x680] ss:$8 sps:$4 sm:$0xff]  }
  0x82   :  { %2111 = vmatmul.mubr.bf16.vlgmr.msra.gmra.mrb[0].mxu1 %v2857_v48  ;;  %v2921_v48 = vcombine.low %v78_v34, %v78_v34  ;;  %v3658_v34 = vld [vmem:[%s4830_s1 + $0x324] ss:$8 sps:$4 sm:$0xff]  }
  0x83   :  { %2435 = vmatmul.mubr.bf16.vlgmr.msra.gmra.mrb[0].mxu0 %v2865_v49  ;;  %2160 = vmatpush1.bf16.msra.mxu1 %v3544_v46  ;;  %v4387_v46 = vld [vmem:[%s4831_s0 + $0x10] sm:$0xff]  ;;  %v2929_v49 = vcombine.low %v82_v35, %v82_v35  ;;  %v3661_v35 = vld [vmem:[%s4830_s1 + $0x724] ss:$8 sps:$4 sm:$0xff]  }
  0x84   :  { %2484 = vmatpush1.bf16.msra.mxu0 %v3547_v53  ;;  %2161 = vmatprep.subr.bf16.mxu1 %v3552_v54  ;;  %v3603_v53 = vld [vmem:[%s4830_s1 + $0x694] ss:$8 sps:$4 sm:$0xff]   ;;  %v2860_v54 = vcombine.high %v4387_v46, %v4392_v47  ;;  %v2859_v21 = vcombine.low %v4387_v46, %v4392_v47 }
  0x85   :  { %2485 = vmatprep.subr.bf16.mxu0 %v3555_v55  ;;  %2120 = vmatprep.mubr.bf16.mxu1 %v2874_v56  ;;  %v2868_v55 = vcombine.high %v4397_v50, %v4402_v51  ;;  %v3598_v56 = vld [vmem:[%s4830_s1 + $0x290] ss:$8 sps:$4 sm:$0xff]  }
  0x86   :  { %2444 = vmatprep.mubr.bf16.mxu0 %v2882_v57  ;;  %v3601_v57 = vld [vmem:[%s4830_s1 + $0x690] ss:$8 sps:$4 sm:$0xff]  }
  0x87   :  { %2162 = vmatpush1.bf16.msra.mxu1 %v3550_v58  ;;  %v3606_v58 = vld [vmem:[%s4830_s1 + $0x2a4] ss:$8 sps:$4 sm:$0xff]  }
  0x88   :  { %2486 = vmatpush1.bf16.msra.mxu0 %v3553_v59  ;;  %2163 = vmatprep.subr.bf16.mxu1 %v3558_v60  ;;  %v3609_v59 = vld [vmem:[%s4830_s1 + $0x6a4] ss:$8 sps:$4 sm:$0xff]   ;;  %v3604_v60 = vld [vmem:[%s4830_s1 + $0x2a0] ss:$8 sps:$4 sm:$0xff]  }
  0x89   :  { %2487 = vmatprep.subr.bf16.mxu0 %v3561_v61  ;;  %v3607_v61 = vld [vmem:[%s4830_s1 + $0x6a0] ss:$8 sps:$4 sm:$0xff]  }
  0x8a   :  { %2121 = vmatmul.mubr.bf16.gmra.mrb[4].mxu1 %v2873_v1  ;;  %v3613_v1 = vld [vmem:[%s4830_s1 + $0x6b0] ss:$8 sps:$4 sm:$0xff]  }
  0x8b   :  { %2445 = vmatmul.mubr.bf16.gmra.mrb[4].mxu0 %v2881_v2  ;;  %2164 = vmatpush1.bf16.msra.mxu1 %v3556_v62  ;;  %v3612_v62 = vld [vmem:[%s4830_s1 + $0x2b4] ss:$8 sps:$4 sm:$0xff]   ;;  %v3618_v2 = vld [vmem:[%s4830_s1 + $0x2c4] ss:$8 sps:$4 sm:$0xff]  }
  0x8c   :  { %2488 = vmatpush1.bf16.msra.mxu0 %v3559_v63  ;;  %2165 = vmatprep.subr.bf16.mxu1 %v3564_v6  ;;  %v3615_v63 = vld [vmem:[%s4830_s1 + $0x6b4] ss:$8 sps:$4 sm:$0xff]  }
  0x8d   :  { %2489 = vmatprep.subr.bf16.mxu0 %v3567_v7  ;;  %2130 = vmatprep.mubr.bf16.mxu1 %v2890_v8  ;;  %v3624_v6 = vld [vmem:[%s4830_s1 + $0x2d4] ss:$8 sps:$4 sm:$0xff]   ;;  %v3622_v8 = vld [vmem:[%s4830_s1 + $0x2d0] ss:$8 sps:$4 sm:$0xff]  }
  0x8e   :  { %2454 = vmatprep.mubr.bf16.mxu0 %v2898_v9  ;;  %v3627_v7 = vld [vmem:[%s4830_s1 + $0x6d4] ss:$8 sps:$4 sm:$0xff]   ;;  %v3625_v9 = vld [vmem:[%s4830_s1 + $0x6d0] ss:$8 sps:$4 sm:$0xff]  }
  0x8f   :  { %2166 = vmatpush1.bf16.msra.mxu1 %v3562_v10  ;;  %v3631_v10 = vld [vmem:[%s4830_s1 + $0x2e4] ss:$8 sps:$4 sm:$0xff]  }
  0x90   :  { %2490 = vmatpush1.bf16.msra.mxu0 %v3565_v11  ;;  %2167 = vmatprep.subr.bf16.mxu1 %v3570_v12  ;;  %v3635_v11 = vld [vmem:[%s4830_s1 + $0x6e4] ss:$8 sps:$4 sm:$0xff]   ;;  %v3629_v12 = vld [vmem:[%s4830_s1 + $0x2e0] ss:$8 sps:$4 sm:$0xff]  }
  0x91   :  { %2491 = vmatprep.subr.bf16.mxu0 %v3573_v13  ;;  %v3633_v13 = vld [vmem:[%s4830_s1 + $0x6e0] ss:$8 sps:$4 sm:$0xff]  }
  0x92   :  { %2131 = vmatmul.mubr.bf16.gmra.mrb[8].mxu1 %v2889_v18  ;;  %v3646_v18 = vld [vmem:[%s4830_s1 + $0x304] ss:$8 sps:$4 sm:$0xff]  }
  0x93   :  { %2455 = vmatmul.mubr.bf16.gmra.mrb[8].mxu0 %v2897_v19  ;;  %2168 = vmatpush1.bf16.msra.mxu1 %v3568_v14  ;;  %v3640_v14 = vld [vmem:[%s4830_s1 + $0x2f4] ss:$8 sps:$4 sm:$0xff]   ;;  %v3649_v19 = vld [vmem:[%s4830_s1 + $0x704] ss:$8 sps:$4 sm:$0xff]  }
  0x94   :  { %2492 = vmatpush1.bf16.msra.mxu0 %v3571_v15  ;;  %2169 = vmatprep.subr.bf16.mxu1 %v3576_v22  ;;  %v3643_v15 = vld [vmem:[%s4830_s1 + $0x6f4] ss:$8 sps:$4 sm:$0xff]   ;;  %v2867_v22 = vcombine.low %v4397_v50, %v4402_v51  ;;  %v3670_v50 = vld [vmem:[%s4830_s1 + $0x344] ss:$8 sps:$4 sm:$0xff]  }
  0x95   :  { %2493 = vmatprep.subr.bf16.mxu0 %v3579_v23  ;;  %2140 = vmatprep.mubr.bf16.mxu1 %v2906_v24  ;;  %v39_v23 = vld [vmem:[%s4831_s0 + $0xd0] sm:$0xff]  ;;  %v3673_v51 = vld [vmem:[%s4830_s1 + $0x744] ss:$8 sps:$4 sm:$0xff]  }
  0x96   :  { %2464 = vmatprep.mubr.bf16.mxu0 %v2914_v25  ;;  %v35_v24 = vld [vmem:[%s4831_s0 + $0xb0] sm:$0xff] }
  0x97   :  { %2170 = vmatpush1.bf16.msra.mxu1 %v3574_v26  ;;  %v43_v25 = vld [vmem:[%s4831_s0 + $0xf0] sm:$0xff]  ;;  %v3644_v26 = vld [vmem:[%s4830_s1 + $0x300] ss:$8 sps:$4 sm:$0xff]  }
  0x98   :  { %2494 = vmatpush1.bf16.msra.mxu0 %v3577_v27  ;;  %2171 = vmatprep.subr.bf16.mxu1 %v3582_v28  ;;  %v3647_v27 = vld [vmem:[%s4830_s1 + $0x700] ss:$8 sps:$4 sm:$0xff]   ;;  %v3652_v28 = vld [vmem:[%s4830_s1 + $0x314] ss:$8 sps:$4 sm:$0xff]  }
  0x99   :  { %2495 = vmatprep.subr.bf16.mxu0 %v3585_v29  ;;  %v3655_v29 = vld [vmem:[%s4830_s1 + $0x714] ss:$8 sps:$4 sm:$0xff]  }
  0x9a   :  { %2141 = vmatmul.mubr.bf16.gmra.mrb[12].mxu1 %v2905_v32  ;;  %v3650_v32 = vld [vmem:[%s4830_s1 + $0x310] ss:$8 sps:$4 sm:$0xff]  }
  0x9b   :  { %2465 = vmatmul.mubr.bf16.gmra.mrb[12].mxu0 %v2913_v33  ;;  %2172 = vmatpush1.bf16.msra.mxu1 %v3580_v30  ;;  %v2876_v30 = vcombine.high %v31_v20, %v39_v23  ;;  %v3653_v33 = vld [vmem:[%s4830_s1 + $0x710] ss:$8 sps:$4 sm:$0xff]  }
  0x9c   :  { %2496 = vmatpush1.bf16.msra.mxu0 %v3583_v31  ;;  %2173 = vmatprep.subr.bf16.mxu1 %v3588_v36  ;;  %v2884_v31 = vcombine.high %v35_v24, %v43_v25  ;;  %v47_v36 = vld [vmem:[%s4831_s0 + $0x110] sm:$0xff] }
  0x9d   :  { %2497 = vmatprep.subr.bf16.mxu0 %v3591_v37  ;;  %2150 = vmatprep.mubr.bf16.mxu1 %v2922_v38  ;;  %v2875_v37 = vcombine.low %v31_v20, %v39_v23  ;;  %v2883_v38 = vcombine.low %v35_v24, %v43_v25  ;;  %v4658_v23 = vld [vmem:[%s4831_s0 + $0x78] sm:$0xff]  ;;  %v3692_v24 = vld [vmem:[%s4830_s1 + $0x380] ss:$8 sps:$4 sm:$0xff]  }
  0x9e   :  { %2474 = vmatprep.mubr.bf16.mxu0 %v2930_v39  ;;  %v55_v39 = vld [vmem:[%s4831_s0 + $0x150] sm:$0xff]  ;;  %v3695_v25 = vld [vmem:[%s4830_s1 + $0x780] ss:$8 sps:$4 sm:$0xff]  }
  0x9f   :  { %2174 = vmatpush1.bf16.msra.mxu1 %v3586_v40  ;;  %v51_v40 = vld [vmem:[%s4831_s0 + $0x130] sm:$0xff]  ;;  %v2892_v46 = vcombine.high %v47_v36, %v55_v39 }
  0xa0   :  { %2498 = vmatpush1.bf16.msra.mxu0 %v3589_v41  ;;  %2175 = vmatprep.subr.bf16.mxu1 %v3594_v42  ;;  %v59_v41 = vld [vmem:[%s4831_s0 + $0x170] sm:$0xff]  ;;  %v3656_v42 = vld [vmem:[%s4830_s1 + $0x320] ss:$8 sps:$4 sm:$0xff]  }
  0xa1   :  { %2499 = vmatprep.subr.bf16.mxu0 %v3597_v43  ;;  %v3659_v43 = vld [vmem:[%s4830_s1 + $0x720] ss:$8 sps:$4 sm:$0xff]   ;;  %v2900_v47 = vcombine.high %v51_v40, %v59_v41 }
  0xa2   :  { %2151 = vmatmul.mubr.bf16.gmra.mrb[16].mxu1 %v2921_v48  ;;  %v3662_v48 = vld [vmem:[%s4830_s1 + $0x330] ss:$8 sps:$4 sm:$0xff]  }
  0xa3   :  { %2475 = vmatmul.mubr.bf16.gmra.mrb[16].mxu0 %v2929_v49  ;;  %2176 = vmatpush1.bf16.msra.mxu1 %v3592_v44  ;;  %v3664_v44 = vld [vmem:[%s4830_s1 + $0x334] ss:$8 sps:$4 sm:$0xff]   ;;  %v3665_v49 = vld [vmem:[%s4830_s1 + $0x730] ss:$8 sps:$4 sm:$0xff]  }
  0xa4   :  { %2500 = vmatpush1.bf16.msra.mxu0 %v3595_v45  ;;  %2177 = vmatprep.subr.bf16.mxu1 %v3600_v52  ;;  %v3667_v45 = vld [vmem:[%s4830_s1 + $0x734] ss:$8 sps:$4 sm:$0xff]  }
  0xa5   :  { %2501 = vmatprep.subr.bf16.mxu0 %v3603_v53  ;;  %2191 = vmatprep.mubr.bf16.mxu1 %v2860_v54  ;;  %v63_v52 = vld [vmem:[%s4831_s0 + $0x190] sm:$0xff]  ;;  %v2891_v53 = vcombine.low %v47_v36, %v55_v39  ;;  %v2899_v54 = vcombine.low %v51_v40, %v59_v41  ;;  %v3718_v40 = vld [vmem:[%s4830_s1 + $0x3c4] ss:$8 sps:$4 sm:$0xff]  }
  0xa6   :  { %2515 = vmatprep.mubr.bf16.mxu0 %v2868_v55  ;;  %v71_v55 = vld [vmem:[%s4831_s0 + $0x1d0] sm:$0xff]  ;;  %v3721_v41 = vld [vmem:[%s4830_s1 + $0x7c4] ss:$8 sps:$4 sm:$0xff]  }
  0xa7   :  { %2178 = vmatpush1.bf16.msra.mxu1 %v3598_v56  ;;  %v67_v56 = vld [vmem:[%s4831_s0 + $0x1b0] sm:$0xff] }
  0xa8   :  { %2502 = vmatpush1.bf16.msra.mxu0 %v3601_v57  ;;  %2179 = vmatprep.subr.bf16.mxu1 %v3606_v58  ;;  %v75_v57 = vld [vmem:[%s4831_s0 + $0x1f0] sm:$0xff]  ;;  %v3668_v58 = vld [vmem:[%s4830_s1 + $0x340] ss:$8 sps:$4 sm:$0xff]  }
  0xa9   :  { %2503 = vmatprep.subr.bf16.mxu0 %v3609_v59  ;;  %v3671_v59 = vld [vmem:[%s4830_s1 + $0x740] ss:$8 sps:$4 sm:$0xff]   ;;  %v3712_v36 = vld [vmem:[%s4830_s1 + $0x3b4] ss:$8 sps:$4 sm:$0xff]   ;;  %v3713_v39 = vld [vmem:[%s4830_s1 + $0x7b0] ss:$8 sps:$4 sm:$0xff]  }
  0xab   :  { %2180 = vmatpush1.bf16.msra.mxu1 %v3604_v60  ;;  %v3676_v60 = vld [vmem:[%s4830_s1 + $0x354] ss:$8 sps:$4 sm:$0xff]  }
  0xac   :  { %2504 = vmatpush1.bf16.msra.mxu0 %v3607_v61  ;;  %2181 = vmatprep.subr.bf16.mxu1 %v3612_v62  ;;  %v3679_v61 = vld [vmem:[%s4830_s1 + $0x754] ss:$8 sps:$4 sm:$0xff]   ;;  %v2908_v62 = vcombine.high %v63_v52, %v71_v55 }
  0xad   :  { %2505 = vmatprep.subr.bf16.mxu0 %v3615_v63  ;;  %v2916_v63 = vcombine.high %v67_v56, %v75_v57 }
  0xaf   :  { %2182 = vmatpush1.bf16.msra.mxu1 %v3610_v0  ;;  %v3674_v0 = vld [vmem:[%s4830_s1 + $0x350] ss:$8 sps:$4 sm:$0xff]  }
  0xb0   :  { %2506 = vmatpush1.bf16.msra.mxu0 %v3613_v1  ;;  %2183 = vmatprep.subr.bf16.mxu1 %v3618_v2  ;;  %v3677_v1 = vld [vmem:[%s4830_s1 + $0x750] ss:$8 sps:$4 sm:$0xff]   ;;  %v3682_v2 = vld [vmem:[%s4830_s1 + $0x364] ss:$8 sps:$4 sm:$0xff]  }
  0xb1   :  { %2507 = vmatprep.subr.bf16.mxu0 %v3621_v3  ;;  %v3685_v3 = vld [vmem:[%s4830_s1 + $0x764] ss:$8 sps:$4 sm:$0xff]  }
  0xb3   :  { %2184 = vmatpush1.bf16.msra.mxu1 %v3616_v4  ;;  %v2907_v4 = vcombine.low %v63_v52, %v71_v55  ;;  %v3740_v52 = vld [vmem:[%s4830_s1 + $0x3f4] ss:$8 sps:$4 sm:$0xff]   ;;  %v3741_v55 = vld [vmem:[%s4830_s1 + $0x7f0] ss:$8 sps:$4 sm:$0xff]  }
  0xb4   :  { %2508 = vmatpush1.bf16.msra.mxu0 %v3619_v5  ;;  %2185 = vmatprep.subr.bf16.mxu1 %v3624_v6  ;;  %v2915_v5 = vcombine.low %v67_v56, %v75_v57  ;;  %v79_v6 = vld [vmem:[%s4831_s0 + $0x210] sm:$0xff]  ;;  %v32_v56 = vld [vmem:[%s4831_s0 + $0x98] sm:$0xff] }
  0xb5   :  { %2509 = vmatprep.subr.bf16.mxu0 %v3627_v7  ;;  %v83_v7 = vld [vmem:[%s4831_s0 + $0x230] sm:$0xff]  ;;  %v40_v57 = vld [vmem:[%s4831_s0 + $0xd8] sm:$0xff] }
  0xb6   :  { %v2931_v20 = vcombine.low %v83_v7, %v83_v7 }
  0xb7   :  { %2186 = vmatpush1.bf16.msra.mxu1 %v3622_v8  ;;  %v3680_v8 = vld [vmem:[%s4830_s1 + $0x360] ss:$8 sps:$4 sm:$0xff]  }
  0xb8   :  { %2510 = vmatpush1.bf16.msra.mxu0 %v3625_v9  ;;  %2187 = vmatprep.subr.bf16.mxu1 %v3631_v10  ;;  %v3683_v9 = vld [vmem:[%s4830_s1 + $0x760] ss:$8 sps:$4 sm:$0xff]   ;;  %v3688_v10 = vld [vmem:[%s4830_s1 + $0x374] ss:$8 sps:$4 sm:$0xff]  }
  0xb9   :  { %2511 = vmatprep.subr.bf16.mxu0 %v3635_v11  ;;  %v3691_v11 = vld [vmem:[%s4830_s1 + $0x774] ss:$8 sps:$4 sm:$0xff]  }
  0xbb   :  { %2188 = vmatpush1.bf16.msra.mxu1 %v3629_v12  ;;  %v2924_v12 = vcombine.high %v79_v6, %v79_v6 }
  0xbc   :  { %2512 = vmatpush1.bf16.msra.mxu0 %v3633_v13  ;;  %2189 = vmatprep.subr.bf16.mxu1 %v3640_v14  ;;  %v2932_v13 = vcombine.high %v83_v7, %v83_v7  ;;  %v3686_v14 = vld [vmem:[%s4830_s1 + $0x370] ss:$8 sps:$4 sm:$0xff]  }
  0xbd   :  { %2513 = vmatprep.subr.bf16.mxu0 %v3643_v15  ;;  %v3689_v15 = vld [vmem:[%s4830_s1 + $0x770] ss:$8 sps:$4 sm:$0xff]  }
  0xbf   :  { %2190 = vmatpush1.bf16.msra.mxu1 %v3638_v16  ;;  %v3694_v16 = vld [vmem:[%s4830_s1 + $0x384] ss:$8 sps:$4 sm:$0xff]  }
  0xc0   :  { %2514 = vmatpush1.bf16.msra.mxu0 %v3641_v17  ;;  %2240 = vmatprep.subr.bf16.mxu1 %v3646_v18  ;;  %v3697_v17 = vld [vmem:[%s4830_s1 + $0x784] ss:$8 sps:$4 sm:$0xff]   ;;  %v4643_v18 = vld [vmem:[%s4831_s0 + $0x18] sm:$0xff] }
  0xc1   :  { %2564 = vmatprep.subr.bf16.mxu0 %v3649_v19  ;;  %v2923_v19 = vcombine.low %v79_v6, %v79_v6 }
  0xc2   :  { %2192 = vmatmul.mubr.bf16.vlgmr.msra.gmra.mrb[0].mxu1 %v2859_v21  ;;  %v4648_v21 = vld [vmem:[%s4831_s0 + $0x58] sm:$0xff] }
  0xc3   :  { %2516 = vmatmul.mubr.bf16.vlgmr.msra.gmra.mrb[0].mxu0 %v2867_v22  ;;  %2241 = vmatpush1.bf16.msra.mxu1 %v3644_v26  ;;  %v4653_v22 = vld [vmem:[%s4831_s0 + $0x38] sm:$0xff] }
  0xc4   :  { %2565 = vmatpush1.bf16.msra.mxu0 %v3647_v27  ;;  %2242 = vmatprep.subr.bf16.mxu1 %v3652_v28  ;;  %v3700_v26 = vld [vmem:[%s4830_s1 + $0x394] ss:$8 sps:$4 sm:$0xff]   ;;  %v2862_v28 = vcombine.high %v4643_v18, %v4648_v21 }
  0xc5   :  { %2566 = vmatprep.subr.bf16.mxu0 %v3655_v29  ;;  %2201 = vmatprep.mubr.bf16.mxu1 %v2876_v30  ;;  %v3703_v27 = vld [vmem:[%s4830_s1 + $0x794] ss:$8 sps:$4 sm:$0xff]   ;;  %v2870_v29 = vcombine.high %v4653_v22, %v4658_v23  ;;  %v3698_v30 = vld [vmem:[%s4830_s1 + $0x390] ss:$8 sps:$4 sm:$0xff]  }
  0xc6   :  { %2525 = vmatprep.mubr.bf16.mxu0 %v2884_v31  ;;  %v3701_v31 = vld [vmem:[%s4830_s1 + $0x790] ss:$8 sps:$4 sm:$0xff]  }
  0xc7   :  { %2243 = vmatpush1.bf16.msra.mxu1 %v3650_v32  ;;  %v3706_v32 = vld [vmem:[%s4830_s1 + $0x3a4] ss:$8 sps:$4 sm:$0xff]  }
  0xc8   :  { %2567 = vmatpush1.bf16.msra.mxu0 %v3653_v33  ;;  %2244 = vmatprep.subr.bf16.mxu1 %v3658_v34  ;;  %v3709_v33 = vld [vmem:[%s4830_s1 + $0x7a4] ss:$8 sps:$4 sm:$0xff]   ;;  %v3704_v34 = vld [vmem:[%s4830_s1 + $0x3a0] ss:$8 sps:$4 sm:$0xff]  }
  0xc9   :  { %2568 = vmatprep.subr.bf16.mxu0 %v3661_v35  ;;  %v3707_v35 = vld [vmem:[%s4830_s1 + $0x7a0] ss:$8 sps:$4 sm:$0xff]  }
  0xca   :  { %2202 = vmatmul.mubr.bf16.gmra.mrb[4].mxu1 %v2875_v37  ;;  %v3715_v37 = vld [vmem:[%s4830_s1 + $0x7b4] ss:$8 sps:$4 sm:$0xff]  }
  0xcb   :  { %2526 = vmatmul.mubr.bf16.gmra.mrb[4].mxu0 %v2883_v38  ;;  %2245 = vmatpush1.bf16.msra.mxu1 %v3656_v42  ;;  %v3710_v38 = vld [vmem:[%s4830_s1 + $0x3b0] ss:$8 sps:$4 sm:$0xff]   ;;  %v3716_v42 = vld [vmem:[%s4830_s1 + $0x3c0] ss:$8 sps:$4 sm:$0xff]  }
  0xcc   :  { %2569 = vmatpush1.bf16.msra.mxu0 %v3659_v43  ;;  %2246 = vmatprep.subr.bf16.mxu1 %v3664_v44  ;;  %v3719_v43 = vld [vmem:[%s4830_s1 + $0x7c0] ss:$8 sps:$4 sm:$0xff]   ;;  %v3724_v44 = vld [vmem:[%s4830_s1 + $0x3d4] ss:$8 sps:$4 sm:$0xff]  }
  0xcd   :  { %2570 = vmatprep.subr.bf16.mxu0 %v3667_v45  ;;  %2211 = vmatprep.mubr.bf16.mxu1 %v2892_v46  ;;  %v3727_v45 = vld [vmem:[%s4830_s1 + $0x7d4] ss:$8 sps:$4 sm:$0xff]   ;;  %v3722_v46 = vld [vmem:[%s4830_s1 + $0x3d0] ss:$8 sps:$4 sm:$0xff]  }
  0xce   :  { %2535 = vmatprep.mubr.bf16.mxu0 %v2900_v47  ;;  %v3725_v47 = vld [vmem:[%s4830_s1 + $0x7d0] ss:$8 sps:$4 sm:$0xff]  }
  0xcf   :  { %2247 = vmatpush1.bf16.msra.mxu1 %v3662_v48  ;;  %v3733_v48 = vld [vmem:[%s4830_s1 + $0x3e4] ss:$8 sps:$4 sm:$0xff]  }
  0xd0   :  { %2571 = vmatpush1.bf16.msra.mxu0 %v3665_v49  ;;  %2248 = vmatprep.subr.bf16.mxu1 %v3670_v50  ;;  %v3737_v49 = vld [vmem:[%s4830_s1 + $0x7e4] ss:$8 sps:$4 sm:$0xff]   ;;  %v3731_v50 = vld [vmem:[%s4830_s1 + $0x3e0] ss:$8 sps:$4 sm:$0xff]  }
  0xd1   :  { %2572 = vmatprep.subr.bf16.mxu0 %v3673_v51  ;;  %v3735_v51 = vld [vmem:[%s4830_s1 + $0x7e0] ss:$8 sps:$4 sm:$0xff]  }
  0xd2   :  { %2212 = vmatmul.mubr.bf16.gmra.mrb[8].mxu1 %v2891_v53  ;;  %v3743_v53 = vld [vmem:[%s4830_s1 + $0x7f4] ss:$8 sps:$4 sm:$0xff]  }
  0xd3   :  { %2536 = vmatmul.mubr.bf16.gmra.mrb[8].mxu0 %v2899_v54  ;;  %2249 = vmatpush1.bf16.msra.mxu1 %v3668_v58  ;;  %v3738_v54 = vld [vmem:[%s4830_s1 + $0x3f0] ss:$8 sps:$4 sm:$0xff]  }
  0xd4   :  { %2573 = vmatpush1.bf16.msra.mxu0 %v3671_v59  ;;  %2250 = vmatprep.subr.bf16.mxu1 %v3676_v60  ;;  %v36_v58 = vld [vmem:[%s4831_s0 + $0xb8] sm:$0xff]  ;;  %v2861_v60 = vcombine.low %v4643_v18, %v4648_v21 }
  0xd5   :  { %2574 = vmatprep.subr.bf16.mxu0 %v3679_v61  ;;  %2221 = vmatprep.mubr.bf16.mxu1 %v2908_v62  ;;  %v44_v59 = vld [vmem:[%s4831_s0 + $0xf8] sm:$0xff]  ;;  %v2869_v61 = vcombine.low %v4653_v22, %v4658_v23  ;;  %v2878_v62 = vcombine.high %v32_v56, %v40_v57 }
  0xd6   :  { %2545 = vmatprep.mubr.bf16.mxu0 %v2916_v63  ;;  %v2886_v63 = vcombine.high %v36_v58, %v44_v59 }
  0xd7   :  { %2251 = vmatpush1.bf16.msra.mxu1 %v3674_v0  ;;  %v48_v0 = vld [vmem:[%s4831_s0 + $0x118] sm:$0xff] }
  0xd8   :  { %2575 = vmatpush1.bf16.msra.mxu0 %v3677_v1  ;;  %2252 = vmatprep.subr.bf16.mxu1 %v3682_v2  ;;  %v56_v1 = vld [vmem:[%s4831_s0 + $0x158] sm:$0xff] }
  0xd9   :  { %2576 = vmatprep.subr.bf16.mxu0 %v3685_v3  ;;  %v52_v2 = vld [vmem:[%s4831_s0 + $0x138] sm:$0xff]  ;;  %v2894_v6 = vcombine.high %v48_v0, %v56_v1 }
  0xda   :  { %2222 = vmatmul.mubr.bf16.gmra.mrb[12].mxu1 %v2907_v4  ;;  %v60_v3 = vld [vmem:[%s4831_s0 + $0x178] sm:$0xff]  ;;  %v2877_v4 = vcombine.low %v32_v56, %v40_v57 }
  0xdb   :  { %2546 = vmatmul.mubr.bf16.gmra.mrb[12].mxu0 %v2915_v5  ;;  %2253 = vmatpush1.bf16.msra.mxu1 %v3680_v8  ;;  %v2885_v5 = vcombine.low %v36_v58, %v44_v59  ;;  %v2902_v7 = vcombine.high %v52_v2, %v60_v3  ;;  %v64_v8 = vld [vmem:[%s4831_s0 + $0x198] sm:$0xff] }
  0xdc   :  { %2577 = vmatpush1.bf16.msra.mxu0 %v3683_v9  ;;  %2254 = vmatprep.subr.bf16.mxu1 %v3688_v10  ;;  %v72_v9 = vld [vmem:[%s4831_s0 + $0x1d8] sm:$0xff] }
  0xdd   :  { %2578 = vmatprep.subr.bf16.mxu0 %v3691_v11  ;;  %2231 = vmatprep.mubr.bf16.mxu1 %v2924_v12  ;;  %v68_v10 = vld [vmem:[%s4831_s0 + $0x1b8] sm:$0xff]  ;;  %v2893_v12 = vcombine.low %v48_v0, %v56_v1  ;;  %v2909_v18 = vcombine.low %v64_v8, %v72_v9 }
  0xde   :  { %2555 = vmatprep.mubr.bf16.mxu0 %v2932_v13  ;;  %v76_v11 = vld [vmem:[%s4831_s0 + $0x1f8] sm:$0xff]  ;;  %v2901_v13 = vcombine.low %v52_v2, %v60_v3 }
  0xdf   :  { %2255 = vmatpush1.bf16.msra.mxu1 %v3686_v14  ;;  %v2910_v14 = vcombine.high %v64_v8, %v72_v9 }
  0xe0   :  { %2579 = vmatpush1.bf16.msra.mxu0 %v3689_v15  ;;  %2256 = vmatprep.subr.bf16.mxu1 %v3694_v16  ;;  %v2918_v15 = vcombine.high %v68_v10, %v76_v11  ;;  %v80_v16 = vld [vmem:[%s4831_s0 + $0x218] sm:$0xff] }
  0xe1   :  { %2580 = vmatprep.subr.bf16.mxu0 %v3697_v17  ;;  %v84_v17 = vld [vmem:[%s4831_s0 + $0x238] sm:$0xff]  ;;  %v2925_v22 = vcombine.low %v80_v16, %v80_v16 }
  0xe2   :  { %2232 = vmatmul.mubr.bf16.gmra.mrb[16].mxu1 %v2923_v19  ;;  %v2917_v19 = vcombine.low %v68_v10, %v76_v11  ;;  %v2934_v21 = vcombine.high %v84_v17, %v84_v17  ;;  %v2933_v23 = vcombine.low %v84_v17, %v84_v17 }
  0xe3   :  { %2556 = vmatmul.mubr.bf16.gmra.mrb[16].mxu0 %v2931_v20  ;;  %2257 = vmatpush1.bf16.msra.mxu1 %v3692_v24  ;;  %v2926_v20 = vcombine.high %v80_v16, %v80_v16 }
  0xe4   :  { %2581 = vmatpush1.bf16.msra.mxu0 %v3695_v25  ;;  %2258 = vmatprep.subr.bf16.mxu1 %v3700_v26 }
  0xe5   :  { %2582 = vmatprep.subr.bf16.mxu0 %v3703_v27  ;;  %2272 = vmatprep.mubr.bf16.mxu1 %v2862_v28 }
  0xe6   :  { %2596 = vmatprep.mubr.bf16.mxu0 %v2870_v29 }
  0xe7   :  { %2259 = vmatpush1.bf16.msra.mxu1 %v3698_v30 }
  0xe8   :  { %2583 = vmatpush1.bf16.msra.mxu0 %v3701_v31  ;;  %2260 = vmatprep.subr.bf16.mxu1 %v3706_v32 }
  0xe9   :  { %2584 = vmatprep.subr.bf16.mxu0 %v3709_v33 }
  0xeb   :  { %2261 = vmatpush1.bf16.msra.mxu1 %v3704_v34 }
  0xec   :  { %2585 = vmatpush1.bf16.msra.mxu0 %v3707_v35  ;;  %2262 = vmatprep.subr.bf16.mxu1 %v3712_v36 }
  0xed   :  { %2586 = vmatprep.subr.bf16.mxu0 %v3715_v37 }
  0xef   :  { %2263 = vmatpush1.bf16.msra.mxu1 %v3710_v38 }
  0xf0   :  { %2587 = vmatpush1.bf16.msra.mxu0 %v3713_v39  ;;  %2264 = vmatprep.subr.bf16.mxu1 %v3718_v40 }
  0xf1   :  { %2588 = vmatprep.subr.bf16.mxu0 %v3721_v41 }
  0xf3   :  { %2265 = vmatpush1.bf16.msra.mxu1 %v3716_v42 }
  0xf4   :  { %2589 = vmatpush1.bf16.msra.mxu0 %v3719_v43  ;;  %2266 = vmatprep.subr.bf16.mxu1 %v3724_v44 }
  0xf5   :  { %2590 = vmatprep.subr.bf16.mxu0 %v3727_v45 }
  0xf7   :  { %2267 = vmatpush1.bf16.msra.mxu1 %v3722_v46 }
  0xf8   :  { %2591 = vmatpush1.bf16.msra.mxu0 %v3725_v47  ;;  %2268 = vmatprep.subr.bf16.mxu1 %v3733_v48 }
  0xf9   :  { %2592 = vmatprep.subr.bf16.mxu0 %v3737_v49 }
  0xfb   :  { %2269 = vmatpush1.bf16.msra.mxu1 %v3731_v50 }
  0xfc   :  { %2593 = vmatpush1.bf16.msra.mxu0 %v3735_v51  ;;  %2270 = vmatprep.subr.bf16.mxu1 %v3740_v52 }
  0xfd   :  { %2594 = vmatprep.subr.bf16.mxu0 %v3743_v53 }
  0xff   :  { %2271 = vmatpush1.bf16.msra.mxu1 %v3738_v54 }
 0x100   :  { %2595 = vmatpush1.bf16.msra.mxu0 %v3741_v55 }
 0x102   :  { %2273 = vmatmul.mubr.bf16.vlgmr.msra.gmra.mrb[0].mxu1 %v2861_v60 }
 0x103   :  { %2597 = vmatmul.mubr.bf16.vlgmr.msra.gmra.mrb[0].mxu0 %v2869_v61  ;;  %2282 = vmatprep.mubr.bf16.mxu1 %v2878_v62 }
 0x104   :  { %2606 = vmatprep.mubr.bf16.mxu0 %v2886_v63 }
 0x10a   :  { %2283 = vmatmul.mubr.bf16.gmra.mrb[4].mxu1 %v2877_v4 }
 0x10b   :  { %2607 = vmatmul.mubr.bf16.gmra.mrb[4].mxu0 %v2885_v5  ;;  %2292 = vmatprep.mubr.bf16.mxu1 %v2894_v6 }
 0x10c   :  { %2616 = vmatprep.mubr.bf16.mxu0 %v2902_v7 }
 0x112   :  { %2293 = vmatmul.mubr.bf16.gmra.mrb[8].mxu1 %v2893_v12 }
 0x113   :  { %2617 = vmatmul.mubr.bf16.gmra.mrb[8].mxu0 %v2901_v13  ;;  %2302 = vmatprep.mubr.bf16.mxu1 %v2910_v14 }
 0x114   :  { %2626 = vmatprep.mubr.bf16.mxu0 %v2918_v15 }
 0x11a   :  { %2303 = vmatmul.mubr.bf16.gmra.mrb[12].mxu1 %v2909_v18 }
 0x11b   :  { %2627 = vmatmul.mubr.bf16.gmra.mrb[12].mxu0 %v2917_v19  ;;  %2312 = vmatprep.mubr.bf16.mxu1 %v2926_v20 }
 0x11c   :  { %2636 = vmatprep.mubr.bf16.mxu0 %v2934_v21 }
 0x122   :  { %2313 = vmatmul.mubr.bf16.gmra.mrb[16].mxu1 %v2925_v22 }
 0x123   :  { %2637 = vmatmul.mubr.bf16.gmra.mrb[16].mxu0 %v2933_v23 }
 0x1d5   :  { %v2274_v24 = vpop.f32.mrb[0].mxu1 }
 0x1d6   :  { %v2598_v25 = vpop.f32.mrb[0].mxu0  ;;  %v2276_v27 = vpop.f32.mrb[1].mxu1 }
 0x1d7   :  { %v3210_v26 = vadd.f32 %v2598_v25, %v2274_v24  ;;  %v2600_v28 = vpop.f32.mrb[1].mxu0  ;;  %v2278_v30 = vpop.f32.mrb[2].mxu1 }
 0x1d8   :  { %v3211_v29 = vadd.f32 %v2600_v28, %v2276_v27  ;;  %v2602_v31 = vpop.f32.mrb[2].mxu0  ;;  %v2280_v33 = vpop.f32.mrb[3].mxu1 }
 0x1d9   :  { %v3212_v32 = vadd.f32 %v2602_v31, %v2278_v30  ;;  %v2604_v34 = vpop.f32.mrb[3].mxu0  ;;  %v2786_v37 = vmul.f32 %v3210_v26, %v3210_v26 }
 0x1da   :  { %v3201_v35 = vpack.c.bf16 %v3211_v29, %v3210_v26  ;;  %v3213_v36 = vadd.f32 %v2604_v34, %v2280_v33  ;;  %v2787_v40 = vmul.f32 %v3211_v29, %v3211_v29 }
 0x1db   :  { %v2758_v38 = vadd.f32 %v3212_v32, %v3210_v26  ;;  %v2788_v39 = vmul.f32 %v3212_v32, %v3212_v32 }
 0x1dc   :  { %2701 = vst [vmem:[%s4832_s2] sm:$0xff] %v3201_v35  ;;  %v3202_v41 = vpack.c.bf16 %v3213_v36, %v3212_v32  ;;  %v2772_v42 = vadd.f32 %v3213_v36, %v3211_v29  ;;  %v2789_v43 = vmul.f32 %v3213_v36, %v3213_v36 }
 0x1dd   :  { %v2804_v44 = vadd.f32 %v2788_v39, %v2786_v37  ;;  %v2284_v46 = vpop.f32.mrb[4].mxu1 }
 0x1de   :  { %2702 = vst [vmem:[%s4832_s2 + $0x8] sm:$0xff] %v3202_v41  ;;  %v2818_v45 = vadd.f32 %v2789_v43, %v2787_v40  ;;  %v2608_v47 = vpop.f32.mrb[4].mxu0  ;;  %v2286_v49 = vpop.f32.mrb[5].mxu1 }
 0x1df   :  { %v3214_v48 = vadd.f32 %v2608_v47, %v2284_v46  ;;  %v2610_v50 = vpop.f32.mrb[5].mxu0  ;;  %v2288_v52 = vpop.f32.mrb[6].mxu1 }
 0x1e0   :  { %v3215_v51 = vadd.f32 %v2610_v50, %v2286_v49  ;;  %v2612_v53 = vpop.f32.mrb[6].mxu0  ;;  %v2290_v57 = vpop.f32.mrb[7].mxu1 }
 0x1e1   :  { %v2759_v54 = vadd.f32 %v3214_v48, %v2758_v38  ;;  %v2790_v55 = vmul.f32 %v3214_v48, %v3214_v48  ;;  %v3216_v56 = vadd.f32 %v2612_v53, %v2288_v52  ;;  %v2614_v58 = vpop.f32.mrb[7].mxu0 }
 0x1e2   :  { %v3203_v59 = vpack.c.bf16 %v3215_v51, %v3214_v48  ;;  %v2773_v60 = vadd.f32 %v3215_v51, %v2772_v42  ;;  %v2791_v61 = vmul.f32 %v3215_v51, %v3215_v51  ;;  %v3217_v62 = vadd.f32 %v2614_v58, %v2290_v57 }
 0x1e3   :  { %v2805_v63 = vadd.f32 %v2804_v44, %v2790_v55  ;;  %v2760_v0 = vadd.f32 %v3216_v56, %v2759_v54  ;;  %v2792_v1 = vmul.f32 %v3216_v56, %v3216_v56 }
 0x1e4   :  { %2703 = vst [vmem:[%s4832_s2 + $0x10] sm:$0xff] %v3203_v59  ;;  %v2819_v2 = vadd.f32 %v2818_v45, %v2791_v61  ;;  %v3204_v3 = vpack.c.bf16 %v3217_v62, %v3216_v56  ;;  %v2774_v4 = vadd.f32 %v3217_v62, %v2773_v60  ;;  %v2793_v5 = vmul.f32 %v3217_v62, %v3217_v62 }
 0x1e5   :  { %v2806_v6 = vadd.f32 %v2805_v63, %v2792_v1  ;;  %v2294_v8 = vpop.f32.mrb[8].mxu1 }
 0x1e6   :  { %2704 = vst [vmem:[%s4832_s2 + $0x18] sm:$0xff] %v3204_v3  ;;  %v2820_v7 = vadd.f32 %v2819_v2, %v2793_v5  ;;  %v2618_v9 = vpop.f32.mrb[8].mxu0  ;;  %v2296_v11 = vpop.f32.mrb[9].mxu1 }
 0x1e7   :  { %v3218_v10 = vadd.f32 %v2618_v9, %v2294_v8  ;;  %v2620_v12 = vpop.f32.mrb[9].mxu0  ;;  %v2298_v14 = vpop.f32.mrb[10].mxu1 }
 0x1e8   :  { %v3219_v13 = vadd.f32 %v2620_v12, %v2296_v11  ;;  %v2622_v15 = vpop.f32.mrb[10].mxu0  ;;  %v2300_v19 = vpop.f32.mrb[11].mxu1 }
 0x1e9   :  { %v2761_v16 = vadd.f32 %v3218_v10, %v2760_v0  ;;  %v2794_v17 = vmul.f32 %v3218_v10, %v3218_v10  ;;  %v3220_v18 = vadd.f32 %v2622_v15, %v2298_v14  ;;  %v2624_v20 = vpop.f32.mrb[11].mxu0 }
 0x1ea   :  { %v3205_v21 = vpack.c.bf16 %v3219_v13, %v3218_v10  ;;  %v2775_v22 = vadd.f32 %v3219_v13, %v2774_v4  ;;  %v2795_v23 = vmul.f32 %v3219_v13, %v3219_v13  ;;  %v3221_v24 = vadd.f32 %v2624_v20, %v2300_v19 }
 0x1eb   :  { %v2807_v25 = vadd.f32 %v2806_v6, %v2794_v17  ;;  %v2762_v26 = vadd.f32 %v3220_v18, %v2761_v16  ;;  %v2796_v27 = vmul.f32 %v3220_v18, %v3220_v18 }
 0x1ec   :  { %2705 = vst [vmem:[%s4832_s2 + $0x20] sm:$0xff] %v3205_v21  ;;  %v2821_v28 = vadd.f32 %v2820_v7, %v2795_v23  ;;  %v3206_v29 = vpack.c.bf16 %v3221_v24, %v3220_v18  ;;  %v2776_v30 = vadd.f32 %v3221_v24, %v2775_v22  ;;  %v2797_v31 = vmul.f32 %v3221_v24, %v3221_v24 }
 0x1ed   :  { %v2808_v32 = vadd.f32 %v2807_v25, %v2796_v27  ;;  %v2304_v34 = vpop.f32.mrb[12].mxu1 }
 0x1ee   :  { %2706 = vst [vmem:[%s4832_s2 + $0x28] sm:$0xff] %v3206_v29  ;;  %v2822_v33 = vadd.f32 %v2821_v28, %v2797_v31  ;;  %v2628_v35 = vpop.f32.mrb[12].mxu0  ;;  %v2306_v37 = vpop.f32.mrb[13].mxu1 }
 0x1ef   :  { %v3222_v36 = vadd.f32 %v2628_v35, %v2304_v34  ;;  %v2630_v38 = vpop.f32.mrb[13].mxu0  ;;  %v2308_v40 = vpop.f32.mrb[14].mxu1 }
 0x1f0   :  { %v3223_v39 = vadd.f32 %v2630_v38, %v2306_v37  ;;  %v2632_v41 = vpop.f32.mrb[14].mxu0  ;;  %v2310_v45 = vpop.f32.mrb[15].mxu1 }
 0x1f1   :  { %v2763_v42 = vadd.f32 %v3222_v36, %v2762_v26  ;;  %v2798_v43 = vmul.f32 %v3222_v36, %v3222_v36  ;;  %v3224_v44 = vadd.f32 %v2632_v41, %v2308_v40  ;;  %v2634_v46 = vpop.f32.mrb[15].mxu0 }
 0x1f2   :  { %v3207_v47 = vpack.c.bf16 %v3223_v39, %v3222_v36  ;;  %v2777_v48 = vadd.f32 %v3223_v39, %v2776_v30  ;;  %v2799_v49 = vmul.f32 %v3223_v39, %v3223_v39  ;;  %v3225_v50 = vadd.f32 %v2634_v46, %v2310_v45 }
 0x1f3   :  { %v2809_v51 = vadd.f32 %v2808_v32, %v2798_v43  ;;  %v2764_v52 = vadd.f32 %v3224_v44, %v2763_v42  ;;  %v2800_v53 = vmul.f32 %v3224_v44, %v3224_v44 }
 0x1f4   :  { %2707 = vst [vmem:[%s4832_s2 + $0x30] sm:$0xff] %v3207_v47  ;;  %v2823_v54 = vadd.f32 %v2822_v33, %v2799_v49  ;;  %v3208_v55 = vpack.c.bf16 %v3225_v50, %v3224_v44  ;;  %v2778_v56 = vadd.f32 %v3225_v50, %v2777_v48  ;;  %v2801_v57 = vmul.f32 %v3225_v50, %v3225_v50 }
 0x1f5   :  { %v2810_v58 = vadd.f32 %v2809_v51, %v2800_v53  ;;  %v2314_v60 = vpop.f32.mrb[16].mxu1 }
 0x1f6   :  { %2708 = vst [vmem:[%s4832_s2 + $0x38] sm:$0xff] %v3208_v55  ;;  %v2824_v59 = vadd.f32 %v2823_v54, %v2801_v57  ;;  %v2638_v61 = vpop.f32.mrb[16].mxu0  ;;  %v2316_v63 = vpop.f32.mrb[17].mxu1 }
 0x1f7   :  { %v3226_v62 = vadd.f32 %v2638_v61, %v2314_v60  ;;  %v2640_v0 = vpop.f32.mrb[17].mxu0  ;;  %v2318_v2 = vpop.f32.mrb[18].mxu1 }
 0x1f8   :  { %v3227_v1 = vadd.f32 %v2640_v0, %v2316_v63  ;;  %v2642_v3 = vpop.f32.mrb[18].mxu0  ;;  %v2319_v6 = vpop.f32.mrb[19].mxu1 }
 0x1f9   :  { %v2765_v4 = vadd.f32 %v3226_v62, %v2764_v52  ;;  %v2802_v5 = vmul.f32 %v3226_v62, %v3226_v62  ;;  %v2643_v7 = vpop.f32.mrb[19].mxu0 }
 0x1fa   :  { %v3209_v8 = vpack.c.bf16 %v3227_v1, %v3226_v62  ;;  %v2779_v9 = vadd.f32 %v3227_v1, %v2778_v56  ;;  %v2803_v10 = vmul.f32 %v3227_v1, %v3227_v1 }
 0x1fb   :  { %v2766_v11 = vrot.slane %v2765_v4, 4  ;;  %v2811_v12 = vadd.f32 %v2810_v58, %v2802_v5 }
 0x1fc   :  { %2709 = vst [vmem:[%s4832_s2 + $0x40] sm:$0xff] %v3209_v8  ;;  %v2780_v13 = vrot.slane %v2779_v9, 4  ;;  %v2825_v14 = vadd.f32 %v2824_v59, %v2803_v10 }
 0x1fd   :  { %v2767_v15 = vadd.f32 %v2766_v11, %v2765_v4  ;;  %v2812_v16 = vrot.slane %v2811_v12, 4 }
 0x1fe   :  { %v2781_v17 = vadd.f32 %v2780_v13, %v2779_v9  ;;  %v2826_v18 = vrot.slane %v2825_v14, 4 }
 0x1ff   :  { %v2768_v19 = vrot.slane %v2767_v15, 2  ;;  %v2813_v20 = vadd.f32 %v2812_v16, %v2811_v12 }
 0x200   :  { %v2782_v21 = vrot.slane %v2781_v17, 2  ;;  %v2827_v22 = vadd.f32 %v2826_v18, %v2825_v14 }
 0x201   :  { %v2769_v23 = vadd.f32 %v2768_v19, %v2767_v15  ;;  %v2814_v24 = vrot.slane %v2813_v20, 2 }
 0x202   :  { %v2783_v25 = vadd.f32 %v2782_v21, %v2781_v17  ;;  %v2828_v26 = vrot.slane %v2827_v22, 2 }
 0x203   :  { %v2770_v27 = vrot.slane %v2769_v23, 1  ;;  %v2815_v28 = vadd.f32 %v2814_v24, %v2813_v20 }
 0x204   :  { %v2784_v29 = vrot.slane %v2783_v25, 1  ;;  %v2829_v30 = vadd.f32 %v2828_v26, %v2827_v22 }
 0x205   :  { %v2816_v31 = vrot.slane %v2815_v28, 1  ;;  %v2771_v33 = vadd.f32 %v2770_v27, %v2769_v23 }
 0x206   :  { %v2830_v32 = vrot.slane %v2829_v30, 1  ;;  %v2785_v35 = vadd.f32 %v2784_v29, %v2783_v25 }
 0x207   :  { %v2817_v34 = vadd.f32 %v2816_v31, %v2815_v28 }
 0x208   :  { %v2831_v36 = vadd.f32 %v2830_v32, %v2829_v30 }
 0x209   :  { %v2833_v37 = vsel %vm2832_vm0, %v2771_v33, %v2817_v34 }
 0x20a   :  { %v2834_v38 = vsel %vm2832_vm0, %v2785_v35, %v2831_v36 }
 0x20b   :  { %v2837_v39 = vcombine.low %v2833_v37, %v2834_v38 }
 0x20d   :  { %3200 = vst.sshfl [vmem:[%s4833_s3] sm:$0x33 pattern:$0x76325410] %v2837_v39 }

// kernel: netd_forward.13
= control target key start
LH: loop header
LB: loop body
LE: loop exit
PB: predicated region body
PF: predicated region fallthrough
CT: control target
= control target key end

     0   :  { %v34_v0 = vlaneseq  ;;  %s275_s0 = inlined_call_operand.vmem [shape: bf16[18,512], index: 0, kind: input, shape index: {}]   ;;  %s276_s1 = inlined_call_operand.vmem [shape: f32[1,512], index: 1, kind: input, shape index: {}]   ;;  %s277_s2 = inlined_call_operand.vmem [shape: f32[1,512], index: 2, kind: input, shape index: {}]   ;;  %s278_s3 = inlined_call_operand.vmem [shape: bf16[18,512], index: 3, kind: output, shape index: {}]  }
   0x1   :  { %v14_v1 = vld [vmem:[%s275_s0] sm:$0xff]  ;;  %v15_v5 = vld [vmem:[%s275_s0 + $0x8] sm:$0xff]  ;;  %v16_v6 = vld [vmem:[%s275_s0 + $0x10] sm:$0xff] }
   0x2   :  { %v20_v2 = vunpack.c.l.bf16 %v14_v1  ;;  %v21_v3 = vunpack.c.h.bf16 %v14_v1  ;;  %v35_v4 = vshrl.u32 %v34_v0, 7  ;;  %v17_v7 = vld [vmem:[%s275_s0 + $0x18] sm:$0xff]  ;;  %v32_v8 = vld [vmem:[%s276_s1] sm:$0xf]  ;;  %v22_v10 = vunpack.c.l.bf16 %v15_v5  ;;  %v19_v57 = vld [vmem:[%s275_s0 + $0x28] sm:$0x11] }
   0x3   :  { %v66_v9 = vld [vmem:[%s277_s2] sm:$0xf]  ;;  %v23_v11 = vunpack.c.h.bf16 %v15_v5  ;;  %v24_v12 = vunpack.c.l.bf16 %v16_v6  ;;  %v25_v13 = vunpack.c.h.bf16 %v16_v6  ;;  %v26_v19 = vunpack.c.l.bf16 %v17_v7 }
   0x4   :  { %v239_v14 = vld [vmem:[%s275_s0 + $0x20] sm:$0x11]  ;;  %v36_v15 = vsub.s32 0, %v35_v4  ;;  %v40_v16 = vsub.s32 1, %v35_v4  ;;  %v44_v17 = vsub.s32 2, %v35_v4  ;;  %v48_v18 = vsub.s32 3, %v35_v4 }
   0x5   :  { %v27_v20 = vunpack.c.h.bf16 %v17_v7  ;;  %v28_v21 = vunpack.c.l.bf16 %v239_v14  ;;  %v29_v22 = vunpack.c.h.bf16 %v239_v14 }
   0x6   :  { %v37_v23 = vrot.slane %v32_v8, %v36_v15  ;;  %v41_v24 = vrot.slane %v32_v8, %v40_v16  ;;  %v71_v25 = vrot.slane %v66_v9, %v36_v15  ;;  %v75_v26 = vrot.slane %v66_v9, %v40_v16 }
   0x7   :  { %v45_v27 = vrot.slane %v32_v8, %v44_v17  ;;  %v49_v28 = vrot.slane %v32_v8, %v48_v18  ;;  %v243_v29 = vrot.slane %v66_v9, %v44_v17  ;;  %v245_v30 = vrot.slane %v66_v9, %v48_v18 }
   0x8   :  { %v54_v31 = vmul.f32 %v37_v23, %v20_v2  ;;  %v55_v32 = vmul.f32 %v41_v24, %v21_v3  ;;  %v58_v33 = vmul.f32 %v37_v23, %v24_v12  ;;  %v59_v34 = vmul.f32 %v41_v24, %v25_v13 }
   0x9   :  { %v56_v35 = vmul.f32 %v45_v27, %v22_v10  ;;  %v57_v36 = vmul.f32 %v49_v28, %v23_v11  ;;  %v60_v37 = vmul.f32 %v45_v27, %v26_v19  ;;  %v61_v38 = vmul.f32 %v49_v28, %v27_v20 }
   0xa   :  { %v88_v39 = vadd.f32 %v71_v25, %v54_v31  ;;  %v89_v40 = vadd.f32 %v75_v26, %v55_v32  ;;  %v92_v41 = vadd.f32 %v71_v25, %v58_v33  ;;  %v93_v42 = vadd.f32 %v75_v26, %v59_v34 }
   0xb   :  { %v90_v43 = vadd.f32 %v243_v29, %v56_v35  ;;  %v91_v44 = vadd.f32 %v245_v30, %v57_v36  ;;  %v94_v45 = vadd.f32 %v243_v29, %v60_v37  ;;  %v95_v46 = vadd.f32 %v245_v30, %v61_v38 }
   0xc   :  { %vm100_vm0 = vcmp.ge.f32.partialorder %v88_v39, 0.0  ;;  %vm101_vm1 = vcmp.ge.f32.partialorder %v89_v40, 0.0  ;;  %v112_v47 = vmul.f32 0.2, %v88_v39  ;;  %v113_v48 = vmul.f32 0.2, %v89_v40 }
   0xd   :  { %vm102_vm2 = vcmp.ge.f32.partialorder %v90_v43, 0.0  ;;  %vm103_vm3 = vcmp.ge.f32.partialorder %v91_v44, 0.0  ;;  %v114_v49 = vmul.f32 0.2, %v90_v43  ;;  %v115_v50 = vmul.f32 0.2, %v91_v44 }
   0xe   :  { %v124_v51 = vsel %vm100_vm0, %v88_v39, %v112_v47  ;;  %v125_v52 = vsel %vm101_vm1, %v89_v40, %v113_v48  ;;  %vm104_vm4 = vcmp.ge.f32.partialorder %v92_v41, 0.0  ;;  %vm105_vm5 = vcmp.ge.f32.partialorder %v93_v42, 0.0 }
   0xf   :  { %v192_v53 = vpack.c.bf16 %v125_v52, %v124_v51  ;;  %v126_v54 = vsel %vm102_vm2, %v90_v43, %v114_v49  ;;  %v127_v55 = vsel %vm103_vm3, %v91_v44, %v115_v50  ;;  %v116_v56 = vmul.f32 0.2, %v92_v41 }
  0x10   :  { %v193_v58 = vpack.c.bf16 %v127_v55, %v126_v54  ;;  %v117_v59 = vmul.f32 0.2, %v93_v42  ;;  %vm106_vm6 = vcmp.ge.f32.partialorder %v94_v45, 0.0  ;;  %vm107_vm7 = vcmp.ge.f32.partialorder %v95_v46, 0.0 }
  0x11   :  { %176 = vst [vmem:[%s278_s3] sm:$0xff] %v192_v53  ;;  %v128_v60 = vsel %vm104_vm4, %v92_v41, %v116_v56  ;;  %v118_v61 = vmul.f32 0.2, %v94_v45  ;;  %v119_v62 = vmul.f32 0.2, %v95_v46  ;;  %v62_v63 = vmul.f32 %v37_v23, %v28_v21 }
  0x12   :  { %177 = vst [vmem:[%s278_s3 + $0x8] sm:$0xff] %v193_v58  ;;  %v129_v0 = vsel %vm105_vm5, %v93_v42, %v117_v59  ;;  %v63_v1 = vmul.f32 %v41_v24, %v29_v22  ;;  %v30_v2 = vunpack.c.l.bf16 %v19_v57  ;;  %v31_v3 = vunpack.c.h.bf16 %v19_v57 }
  0x13   :  { %v194_v4 = vpack.c.bf16 %v129_v0, %v128_v60  ;;  %v130_v5 = vsel %vm106_vm6, %v94_v45, %v118_v61  ;;  %v131_v6 = vsel %vm107_vm7, %v95_v46, %v119_v62  ;;  %v96_v7 = vadd.f32 %v71_v25, %v62_v63 }
  0x14   :  { %v195_v8 = vpack.c.bf16 %v131_v6, %v130_v5  ;;  %v97_v9 = vadd.f32 %v75_v26, %v63_v1  ;;  %v64_v10 = vmul.f32 %v45_v27, %v30_v2  ;;  %v65_v11 = vmul.f32 %v49_v28, %v31_v3 }
  0x15   :  { %178 = vst [vmem:[%s278_s3 + $0x10] sm:$0xff] %v194_v4  ;;  %vm108_vm8 = vcmp.ge.f32.partialorder %v96_v7, 0.0  ;;  %v120_v12 = vmul.f32 0.2, %v96_v7 }
  0x16   :  { %179 = vst [vmem:[%s278_s3 + $0x18] sm:$0xff] %v195_v8  ;;  %vm109_vm9 = vcmp.ge.f32.partialorder %v97_v9, 0.0  ;;  %v121_v13 = vmul.f32 0.2, %v97_v9  ;;  %v98_v14 = vadd.f32 %v243_v29, %v64_v10  ;;  %v99_v15 = vadd.f32 %v245_v30, %v65_v11 }
  0x17   :  { %v132_v16 = vsel %vm108_vm8, %v96_v7, %v120_v12 }
  0x18   :  { %v133_v17 = vsel %vm109_vm9, %v97_v9, %v121_v13  ;;  %vm110_vm10 = vcmp.ge.f32.partialorder %v98_v14, 0.0  ;;  %vm111_vm11 = vcmp.ge.f32.partialorder %v99_v15, 0.0  ;;  %v122_v18 = vmul.f32 0.2, %v98_v14 }
  0x19   :  { %v196_v19 = vpack.c.bf16 %v133_v17, %v132_v16  ;;  %v123_v20 = vmul.f32 0.2, %v99_v15 }
  0x1a   :  { %v134_v21 = vsel %vm110_vm10, %v98_v14, %v122_v18 }
  0x1b   :  { %180 = vst [vmem:[%s278_s3 + $0x20] sm:$0x11] %v196_v19  ;;  %v135_v22 = vsel %vm111_vm11, %v99_v15, %v123_v20 }
  0x1c   :  { %v197_v23 = vpack.c.bf16 %v135_v22, %v134_v21 }
  0x1e   :  { %181 = vst [vmem:[%s278_s3 + $0x28] sm:$0x11] %v197_v23 }

// kernel: netd_forward.12
= control target key start
LH: loop header
LB: loop body
LE: loop exit
PB: predicated region body
PF: predicated region fallthrough
CT: control target
= control target key end

     0   :  { %vm8180_vm1 = vcmask 1041408   ;;  %vm8264_vm2 = vcmask 1040384   ;;  %s14607_s1 = inlined_call_operand.vmem [shape: bf16[4096,512], index: 1, kind: input, shape index: {}]   ;;  %s14608_s0 = inlined_call_operand.vmem [shape: bf16[18,4096], index: 0, kind: input, shape index: {}]   ;;  %s14609_s2 = inlined_call_operand.vmem [shape: bf16[18,512], index: 2, kind: output, shape index: {0}]   ;;  %s14610_s3 = inlined_call_operand.vmem [shape: f32[1,2,512], index: 3, kind: output, shape index: {1}]  }
   0x1   :  { %v9641_v0 = vld [vmem:[%s14607_s1 + $0x4] ss:$16 sps:$4 sm:$0xff]   ;;  %v9643_v1 = vld [vmem:[%s14607_s1 + $0xc] ss:$16 sps:$4 sm:$0xff]   ;;  %v9645_v2 = vld [vmem:[%s14607_s1] ss:$16 sps:$4 sm:$0xff]  }
   0x2   :  { %6477 = vmatprep.subr.bf16.mxu0 %v9641_v0  ;;  %v9646_v3 = vld [vmem:[%s14607_s1 + $0x8] ss:$16 sps:$4 sm:$0xff]   ;;  %7293 = vmatprep.subr.bf16.mxu1 %v9643_v1  ;;  %v9647_v4 = vld [vmem:[%s14607_s1 + $0x24] ss:$16 sps:$4 sm:$0xff]   ;;  %v9649_v5 = vld [vmem:[%s14607_s1 + $0x2c] ss:$16 sps:$4 sm:$0xff]  }
   0x3   :  { %6478 = vmatpush1.bf16.msra.mxu0 %v9645_v2  ;;  %7294 = vmatpush1.bf16.msra.mxu1 %v9646_v3  ;;  %v9651_v6 = vld [vmem:[%s14607_s1 + $0x20] ss:$16 sps:$4 sm:$0xff]   ;;  %v9652_v7 = vld [vmem:[%s14607_s1 + $0x28] ss:$16 sps:$4 sm:$0xff]   ;;  %v9653_v8 = vld [vmem:[%s14607_s1 + $0x44] ss:$16 sps:$4 sm:$0xff]  }
   0x4   :  { %6479 = vmatprep.subr.bf16.mxu0 %v9647_v4  ;;  %7295 = vmatprep.subr.bf16.mxu1 %v9649_v5  ;;  %v9655_v9 = vld [vmem:[%s14607_s1 + $0x4c] ss:$16 sps:$4 sm:$0xff]   ;;  %v9657_v10 = vld [vmem:[%s14607_s1 + $0x40] ss:$16 sps:$4 sm:$0xff]   ;;  %v9658_v11 = vld [vmem:[%s14607_s1 + $0x48] ss:$16 sps:$4 sm:$0xff]  }
   0x5   :  { %v9659_v12 = vld [vmem:[%s14607_s1 + $0x64] ss:$16 sps:$4 sm:$0xff]   ;;  %v9661_v13 = vld [vmem:[%s14607_s1 + $0x6c] ss:$16 sps:$4 sm:$0xff]   ;;  %v9663_v14 = vld [vmem:[%s14607_s1 + $0x60] ss:$16 sps:$4 sm:$0xff]  }
   0x6   :  { %v9664_v15 = vld [vmem:[%s14607_s1 + $0x68] ss:$16 sps:$4 sm:$0xff]   ;;  %v9665_v16 = vld [vmem:[%s14607_s1 + $0x84] ss:$16 sps:$4 sm:$0xff]   ;;  %v9667_v17 = vld [vmem:[%s14607_s1 + $0x8c] ss:$16 sps:$4 sm:$0xff]  }
   0x7   :  { %6480 = vmatpush1.bf16.msra.mxu0 %v9651_v6  ;;  %7296 = vmatpush1.bf16.msra.mxu1 %v9652_v7  ;;  %v9669_v18 = vld [vmem:[%s14607_s1 + $0x80] ss:$16 sps:$4 sm:$0xff]   ;;  %v9670_v19 = vld [vmem:[%s14607_s1 + $0x88] ss:$16 sps:$4 sm:$0xff]   ;;  %v9671_v20 = vld [vmem:[%s14607_s1 + $0xa4] ss:$16 sps:$4 sm:$0xff]  }
   0x8   :  { %6481 = vmatprep.subr.bf16.mxu0 %v9653_v8  ;;  %7297 = vmatprep.subr.bf16.mxu1 %v9655_v9  ;;  %v9673_v21 = vld [vmem:[%s14607_s1 + $0xac] ss:$16 sps:$4 sm:$0xff]   ;;  %v9675_v22 = vld [vmem:[%s14607_s1 + $0xa0] ss:$16 sps:$4 sm:$0xff]   ;;  %v9676_v23 = vld [vmem:[%s14607_s1 + $0xa8] ss:$16 sps:$4 sm:$0xff]  }
   0x9   :  { %v9677_v24 = vld [vmem:[%s14607_s1 + $0xc4] ss:$16 sps:$4 sm:$0xff]   ;;  %v9679_v25 = vld [vmem:[%s14607_s1 + $0xcc] ss:$16 sps:$4 sm:$0xff]   ;;  %v9681_v26 = vld [vmem:[%s14607_s1 + $0xc0] ss:$16 sps:$4 sm:$0xff]  }
   0xa   :  { %v9682_v27 = vld [vmem:[%s14607_s1 + $0xc8] ss:$16 sps:$4 sm:$0xff]   ;;  %v9683_v28 = vld [vmem:[%s14607_s1 + $0xe4] ss:$16 sps:$4 sm:$0xff]   ;;  %v9685_v29 = vld [vmem:[%s14607_s1 + $0xec] ss:$16 sps:$4 sm:$0xff]  }
   0xb   :  { %6482 = vmatpush1.bf16.msra.mxu0 %v9657_v10  ;;  %7298 = vmatpush1.bf16.msra.mxu1 %v9658_v11  ;;  %v9687_v30 = vld [vmem:[%s14607_s1 + $0xe0] ss:$16 sps:$4 sm:$0xff]   ;;  %v9688_v31 = vld [vmem:[%s14607_s1 + $0xe8] ss:$16 sps:$4 sm:$0xff]   ;;  %v9689_v32 = vld [vmem:[%s14607_s1 + $0x104] ss:$16 sps:$4 sm:$0xff]  }
   0xc   :  { %6483 = vmatprep.subr.bf16.mxu0 %v9659_v12  ;;  %7299 = vmatprep.subr.bf16.mxu1 %v9661_v13  ;;  %v9691_v33 = vld [vmem:[%s14607_s1 + $0x10c] ss:$16 sps:$4 sm:$0xff]   ;;  %v9693_v34 = vld [vmem:[%s14607_s1 + $0x100] ss:$16 sps:$4 sm:$0xff]   ;;  %v9694_v35 = vld [vmem:[%s14607_s1 + $0x108] ss:$16 sps:$4 sm:$0xff]  }
   0xd   :  { %v9695_v36 = vld [vmem:[%s14607_s1 + $0x124] ss:$16 sps:$4 sm:$0xff]   ;;  %v9697_v37 = vld [vmem:[%s14607_s1 + $0x12c] ss:$16 sps:$4 sm:$0xff]   ;;  %v9699_v38 = vld [vmem:[%s14607_s1 + $0x120] ss:$16 sps:$4 sm:$0xff]  }
   0xe   :  { %v9700_v39 = vld [vmem:[%s14607_s1 + $0x128] ss:$16 sps:$4 sm:$0xff]   ;;  %v9701_v40 = vld [vmem:[%s14607_s1 + $0x144] ss:$16 sps:$4 sm:$0xff]   ;;  %v9703_v41 = vld [vmem:[%s14607_s1 + $0x14c] ss:$16 sps:$4 sm:$0xff]  }
   0xf   :  { %6484 = vmatpush1.bf16.msra.mxu0 %v9663_v14  ;;  %7300 = vmatpush1.bf16.msra.mxu1 %v9664_v15  ;;  %v9705_v42 = vld [vmem:[%s14607_s1 + $0x140] ss:$16 sps:$4 sm:$0xff]   ;;  %v9706_v43 = vld [vmem:[%s14607_s1 + $0x148] ss:$16 sps:$4 sm:$0xff]   ;;  %v9707_v44 = vld [vmem:[%s14607_s1 + $0x164] ss:$16 sps:$4 sm:$0xff]  }
  0x10   :  { %6485 = vmatprep.subr.bf16.mxu0 %v9665_v16  ;;  %7301 = vmatprep.subr.bf16.mxu1 %v9667_v17  ;;  %v9709_v45 = vld [vmem:[%s14607_s1 + $0x16c] ss:$16 sps:$4 sm:$0xff]   ;;  %v13_v46 = vld [vmem:[%s14608_s0] sm:$0xff]  ;;  %v9712_v49 = vld [vmem:[%s14607_s1 + $0x168] ss:$16 sps:$4 sm:$0xff]  }
  0x11   :  { %v29_v47 = vld [vmem:[%s14608_s0 + $0x80] sm:$0xff]  ;;  %v9715_v52 = vld [vmem:[%s14607_s1 + $0x18c] ss:$16 sps:$4 sm:$0xff]   ;;  %v9718_v54 = vld [vmem:[%s14607_s1 + $0x188] ss:$16 sps:$4 sm:$0xff]  }
  0x12   :  { %v9711_v48 = vld [vmem:[%s14607_s1 + $0x160] ss:$16 sps:$4 sm:$0xff]   ;;  %v8301_v50 = vcombine.high %v13_v46, %v29_v47  ;;  %v9713_v51 = vld [vmem:[%s14607_s1 + $0x184] ss:$16 sps:$4 sm:$0xff]   ;;  %v9721_v56 = vld [vmem:[%s14607_s1 + $0x1ac] ss:$16 sps:$4 sm:$0xff]   ;;  %v8300_v5 = vcombine.low %v13_v46, %v29_v47 }
  0x13   :  { %6486 = vmatpush1.bf16.msra.mxu0 %v9669_v18  ;;  %7302 = vmatpush1.bf16.msra.mxu1 %v9670_v19  ;;  %v9717_v53 = vld [vmem:[%s14607_s1 + $0x180] ss:$16 sps:$4 sm:$0xff]   ;;  %v9719_v55 = vld [vmem:[%s14607_s1 + $0x1a4] ss:$16 sps:$4 sm:$0xff]   ;;  %v9724_v58 = vld [vmem:[%s14607_s1 + $0x1a8] ss:$16 sps:$4 sm:$0xff]  }
  0x14   :  { %6487 = vmatprep.subr.bf16.mxu0 %v9671_v20  ;;  %7303 = vmatprep.subr.bf16.mxu1 %v9673_v21  ;;  %v9723_v57 = vld [vmem:[%s14607_s1 + $0x1a0] ss:$16 sps:$4 sm:$0xff]   ;;  %v9725_v59 = vld [vmem:[%s14607_s1 + $0x1c4] ss:$16 sps:$4 sm:$0xff]   ;;  %v9727_v60 = vld [vmem:[%s14607_s1 + $0x1cc] ss:$16 sps:$4 sm:$0xff]  }
  0x15   :  { %6509 = vmatprep.mubr.bf16.mxu0 %v8301_v50  ;;  %7325 = vmatprep.mubr.bf16.mxu1 %v8301_v50  ;;  %v9729_v61 = vld [vmem:[%s14607_s1 + $0x1c0] ss:$16 sps:$4 sm:$0xff]   ;;  %v9730_v62 = vld [vmem:[%s14607_s1 + $0x1c8] ss:$16 sps:$4 sm:$0xff]   ;;  %v9731_v63 = vld [vmem:[%s14607_s1 + $0x1e4] ss:$16 sps:$4 sm:$0xff]  }
  0x16   :  { %v9733_v0 = vld [vmem:[%s14607_s1 + $0x1ec] ss:$16 sps:$4 sm:$0xff]   ;;  %v9735_v1 = vld [vmem:[%s14607_s1 + $0x1e0] ss:$16 sps:$4 sm:$0xff]   ;;  %v9736_v2 = vld [vmem:[%s14607_s1 + $0x1e8] ss:$16 sps:$4 sm:$0xff]  }
  0x17   :  { %6488 = vmatpush1.bf16.msra.mxu0 %v9675_v22  ;;  %7304 = vmatpush1.bf16.msra.mxu1 %v9676_v23  ;;  %v9739_v3 = vld [vmem:[%s14607_s1 + $0x204] ss:$16 sps:$4 sm:$0xff]   ;;  %v9742_v4 = vld [vmem:[%s14607_s1 + $0x20c] ss:$16 sps:$4 sm:$0xff]   ;;  %v9737_v6 = vld [vmem:[%s14607_s1 + $0x200] ss:$16 sps:$4 sm:$0xff]  }
  0x18   :  { %6489 = vmatprep.subr.bf16.mxu0 %v9677_v24  ;;  %7305 = vmatprep.subr.bf16.mxu1 %v9679_v25  ;;  %v9740_v7 = vld [vmem:[%s14607_s1 + $0x208] ss:$16 sps:$4 sm:$0xff]   ;;  %v9745_v8 = vld [vmem:[%s14607_s1 + $0x224] ss:$16 sps:$4 sm:$0xff]   ;;  %v9748_v9 = vld [vmem:[%s14607_s1 + $0x22c] ss:$16 sps:$4 sm:$0xff]  }
  0x19   :  { %v9743_v10 = vld [vmem:[%s14607_s1 + $0x220] ss:$16 sps:$4 sm:$0xff]   ;;  %v9746_v11 = vld [vmem:[%s14607_s1 + $0x228] ss:$16 sps:$4 sm:$0xff]   ;;  %v9751_v12 = vld [vmem:[%s14607_s1 + $0x244] ss:$16 sps:$4 sm:$0xff]  }
  0x1a   :  { %v9754_v13 = vld [vmem:[%s14607_s1 + $0x24c] ss:$16 sps:$4 sm:$0xff]   ;;  %v9749_v14 = vld [vmem:[%s14607_s1 + $0x240] ss:$16 sps:$4 sm:$0xff]   ;;  %v9752_v15 = vld [vmem:[%s14607_s1 + $0x248] ss:$16 sps:$4 sm:$0xff]  }
  0x1b   :  { %6490 = vmatpush1.bf16.msra.mxu0 %v9681_v26  ;;  %7306 = vmatpush1.bf16.msra.mxu1 %v9682_v27  ;;  %v9757_v16 = vld [vmem:[%s14607_s1 + $0x264] ss:$16 sps:$4 sm:$0xff]   ;;  %v9760_v17 = vld [vmem:[%s14607_s1 + $0x26c] ss:$16 sps:$4 sm:$0xff]   ;;  %v9755_v18 = vld [vmem:[%s14607_s1 + $0x260] ss:$16 sps:$4 sm:$0xff]  }
  0x1c   :  { %6491 = vmatprep.subr.bf16.mxu0 %v9683_v28  ;;  %7307 = vmatprep.subr.bf16.mxu1 %v9685_v29  ;;  %v9758_v19 = vld [vmem:[%s14607_s1 + $0x268] ss:$16 sps:$4 sm:$0xff]   ;;  %v9763_v20 = vld [vmem:[%s14607_s1 + $0x284] ss:$16 sps:$4 sm:$0xff]   ;;  %v9766_v21 = vld [vmem:[%s14607_s1 + $0x28c] ss:$16 sps:$4 sm:$0xff]  }
  0x1d   :  { %v9761_v22 = vld [vmem:[%s14607_s1 + $0x280] ss:$16 sps:$4 sm:$0xff]   ;;  %v9764_v23 = vld [vmem:[%s14607_s1 + $0x288] ss:$16 sps:$4 sm:$0xff]   ;;  %v9769_v24 = vld [vmem:[%s14607_s1 + $0x2a4] ss:$16 sps:$4 sm:$0xff]  }
  0x1e   :  { %v45_v25 = vld [vmem:[%s14608_s0 + $0x100] sm:$0x11]  ;;  %v9772_v26 = vld [vmem:[%s14607_s1 + $0x2ac] ss:$16 sps:$4 sm:$0xff]  }
  0x1f   :  { %6492 = vmatpush1.bf16.msra.mxu0 %v9687_v30  ;;  %7308 = vmatpush1.bf16.msra.mxu1 %v9688_v31  ;;  %v8333_v27 = vcombine.high %v45_v25, %v45_v25  ;;  %v8332_v28 = vcombine.low %v45_v25, %v45_v25  ;;  %v9767_v29 = vld [vmem:[%s14607_s1 + $0x2a0] ss:$16 sps:$4 sm:$0xff]   ;;  %v9770_v30 = vld [vmem:[%s14607_s1 + $0x2a8] ss:$16 sps:$4 sm:$0xff]   ;;  %v9775_v31 = vld [vmem:[%s14607_s1 + $0x2c4] ss:$16 sps:$4 sm:$0xff]  }
  0x20   :  { %6493 = vmatprep.subr.bf16.mxu0 %v9689_v32  ;;  %7309 = vmatprep.subr.bf16.mxu1 %v9691_v33  ;;  %v9778_v32 = vld [vmem:[%s14607_s1 + $0x2cc] ss:$16 sps:$4 sm:$0xff]   ;;  %v9793_v46 = vld [vmem:[%s14607_s1 + $0x324] ss:$16 sps:$4 sm:$0xff]  }
  0x21   :  { %v11512_v33 = vld [vmem:[%s14608_s0 + $0x8] sm:$0xff]  ;;  %v9799_v50 = vld [vmem:[%s14607_s1 + $0x344] ss:$16 sps:$4 sm:$0xff]  }
  0x22   :  { %v9796_v47 = vld [vmem:[%s14607_s1 + $0x32c] ss:$16 sps:$4 sm:$0xff]  }
  0x23   :  { %6494 = vmatpush1.bf16.msra.mxu0 %v9693_v34  ;;  %7310 = vmatpush1.bf16.msra.mxu1 %v9694_v35  ;;  %v11517_v34 = vld [vmem:[%s14608_s0 + $0x88] sm:$0xff]  ;;  %v9773_v35 = vld [vmem:[%s14607_s1 + $0x2c0] ss:$16 sps:$4 sm:$0xff]  }
  0x24   :  { %6495 = vmatprep.subr.bf16.mxu0 %v9695_v36  ;;  %7311 = vmatprep.subr.bf16.mxu1 %v9697_v37  ;;  %v8303_v36 = vcombine.high %v11512_v33, %v11517_v34  ;;  %v9776_v37 = vld [vmem:[%s14607_s1 + $0x2c8] ss:$16 sps:$4 sm:$0xff]  }
  0x27   :  { %6496 = vmatpush1.bf16.msra.mxu0 %v9699_v38  ;;  %7312 = vmatpush1.bf16.msra.mxu1 %v9700_v39  ;;  %v9781_v38 = vld [vmem:[%s14607_s1 + $0x2e4] ss:$16 sps:$4 sm:$0xff]   ;;  %v9784_v39 = vld [vmem:[%s14607_s1 + $0x2ec] ss:$16 sps:$4 sm:$0xff]  }
  0x28   :  { %6497 = vmatprep.subr.bf16.mxu0 %v9701_v40  ;;  %7313 = vmatprep.subr.bf16.mxu1 %v9703_v41  ;;  %v9779_v40 = vld [vmem:[%s14607_s1 + $0x2e0] ss:$16 sps:$4 sm:$0xff]   ;;  %v9782_v41 = vld [vmem:[%s14607_s1 + $0x2e8] ss:$16 sps:$4 sm:$0xff]  }
  0x2b   :  { %6498 = vmatpush1.bf16.msra.mxu0 %v9705_v42  ;;  %7314 = vmatpush1.bf16.msra.mxu1 %v9706_v43  ;;  %v9787_v42 = vld [vmem:[%s14607_s1 + $0x304] ss:$16 sps:$4 sm:$0xff]   ;;  %v9790_v43 = vld [vmem:[%s14607_s1 + $0x30c] ss:$16 sps:$4 sm:$0xff]  }
  0x2c   :  { %6499 = vmatprep.subr.bf16.mxu0 %v9707_v44  ;;  %7315 = vmatprep.subr.bf16.mxu1 %v9709_v45  ;;  %v9785_v44 = vld [vmem:[%s14607_s1 + $0x300] ss:$16 sps:$4 sm:$0xff]   ;;  %v9788_v45 = vld [vmem:[%s14607_s1 + $0x308] ss:$16 sps:$4 sm:$0xff]  }
  0x2f   :  { %6500 = vmatpush1.bf16.msra.mxu0 %v9711_v48  ;;  %7316 = vmatpush1.bf16.msra.mxu1 %v9712_v49  ;;  %v9791_v48 = vld [vmem:[%s14607_s1 + $0x320] ss:$16 sps:$4 sm:$0xff]   ;;  %v9794_v49 = vld [vmem:[%s14607_s1 + $0x328] ss:$16 sps:$4 sm:$0xff]  }
  0x30   :  { %6501 = vmatprep.subr.bf16.mxu0 %v9713_v51  ;;  %7317 = vmatprep.subr.bf16.mxu1 %v9715_v52  ;;  %v9802_v51 = vld [vmem:[%s14607_s1 + $0x34c] ss:$16 sps:$4 sm:$0xff]   ;;  %v9797_v52 = vld [vmem:[%s14607_s1 + $0x340] ss:$16 sps:$4 sm:$0xff]  }
  0x33   :  { %6502 = vmatpush1.bf16.msra.mxu0 %v9717_v53  ;;  %7318 = vmatpush1.bf16.msra.mxu1 %v9718_v54  ;;  %v9800_v53 = vld [vmem:[%s14607_s1 + $0x348] ss:$16 sps:$4 sm:$0xff]   ;;  %v9805_v54 = vld [vmem:[%s14607_s1 + $0x364] ss:$16 sps:$4 sm:$0xff]  }
  0x34   :  { %6503 = vmatprep.subr.bf16.mxu0 %v9719_v55  ;;  %7319 = vmatprep.subr.bf16.mxu1 %v9721_v56  ;;  %v9808_v55 = vld [vmem:[%s14607_s1 + $0x36c] ss:$16 sps:$4 sm:$0xff]   ;;  %v9803_v56 = vld [vmem:[%s14607_s1 + $0x360] ss:$16 sps:$4 sm:$0xff]  }
  0x37   :  { %6504 = vmatpush1.bf16.msra.mxu0 %v9723_v57  ;;  %7320 = vmatpush1.bf16.msra.mxu1 %v9724_v58  ;;  %v9806_v57 = vld [vmem:[%s14607_s1 + $0x368] ss:$16 sps:$4 sm:$0xff]   ;;  %v9811_v58 = vld [vmem:[%s14607_s1 + $0x384] ss:$16 sps:$4 sm:$0xff]  }
  0x38   :  { %6505 = vmatprep.subr.bf16.mxu0 %v9725_v59  ;;  %7321 = vmatprep.subr.bf16.mxu1 %v9727_v60  ;;  %v9814_v59 = vld [vmem:[%s14607_s1 + $0x38c] ss:$16 sps:$4 sm:$0xff]   ;;  %v9809_v60 = vld [vmem:[%s14607_s1 + $0x380] ss:$16 sps:$4 sm:$0xff]  }
  0x3b   :  { %6506 = vmatpush1.bf16.msra.mxu0 %v9729_v61  ;;  %7322 = vmatpush1.bf16.msra.mxu1 %v9730_v62  ;;  %v9812_v61 = vld [vmem:[%s14607_s1 + $0x388] ss:$16 sps:$4 sm:$0xff]   ;;  %v9817_v62 = vld [vmem:[%s14607_s1 + $0x3a4] ss:$16 sps:$4 sm:$0xff]  }
  0x3c   :  { %6507 = vmatprep.subr.bf16.mxu0 %v9731_v63  ;;  %7323 = vmatprep.subr.bf16.mxu1 %v9733_v0  ;;  %v9820_v63 = vld [vmem:[%s14607_s1 + $0x3ac] ss:$16 sps:$4 sm:$0xff]   ;;  %v9815_v0 = vld [vmem:[%s14607_s1 + $0x3a0] ss:$16 sps:$4 sm:$0xff]  }
  0x3f   :  { %6508 = vmatpush1.bf16.msra.mxu0 %v9735_v1  ;;  %7324 = vmatpush1.bf16.msra.mxu1 %v9736_v2  ;;  %v9818_v1 = vld [vmem:[%s14607_s1 + $0x3a8] ss:$16 sps:$4 sm:$0xff]   ;;  %v9824_v2 = vld [vmem:[%s14607_s1 + $0x3c4] ss:$16 sps:$4 sm:$0xff]  }
  0x40   :  { %6528 = vmatprep.subr.bf16.mxu0 %v9739_v3  ;;  %7344 = vmatprep.subr.bf16.mxu1 %v9742_v4  ;;  %v9827_v3 = vld [vmem:[%s14607_s1 + $0x3cc] ss:$16 sps:$4 sm:$0xff]   ;;  %v9822_v4 = vld [vmem:[%s14607_s1 + $0x3c0] ss:$16 sps:$4 sm:$0xff]  }
  0x42   :  { %6510 = vmatmul.mubr.bf16.vlgmr.msra.gmra.mrb[0].mxu0 %v8300_v5  ;;  %7326 = vmatmul.mubr.bf16.vlgmr.msra.gmra.mrb[0].mxu1 %v8300_v5  ;;  %v9825_v5 = vld [vmem:[%s14607_s1 + $0x3c8] ss:$16 sps:$4 sm:$0xff]  }
  0x43   :  { %6529 = vmatpush1.bf16.msra.mxu0 %v9737_v6  ;;  %7345 = vmatpush1.bf16.msra.mxu1 %v9740_v7  ;;  %v9831_v6 = vld [vmem:[%s14607_s1 + $0x3e4] ss:$16 sps:$4 sm:$0xff]   ;;  %v9834_v7 = vld [vmem:[%s14607_s1 + $0x3ec] ss:$16 sps:$4 sm:$0xff]  }
  0x44   :  { %6530 = vmatprep.subr.bf16.mxu0 %v9745_v8  ;;  %7346 = vmatprep.subr.bf16.mxu1 %v9748_v9  ;;  %v9829_v8 = vld [vmem:[%s14607_s1 + $0x3e0] ss:$16 sps:$4 sm:$0xff]   ;;  %v9832_v9 = vld [vmem:[%s14607_s1 + $0x3e8] ss:$16 sps:$4 sm:$0xff]  }
  0x45   :  { %6519 = vmatprep.mubr.bf16.mxu0 %v8333_v27  ;;  %7335 = vmatprep.mubr.bf16.mxu1 %v8333_v27  ;;  %v11684_v27 = vld [vmem:[%s14608_s0 + $0x90] sm:$0xff] }
  0x47   :  { %6531 = vmatpush1.bf16.msra.mxu0 %v9743_v10  ;;  %7347 = vmatpush1.bf16.msra.mxu1 %v9746_v11  ;;  %v9837_v10 = vld [vmem:[%s14607_s1 + $0x404] ss:$16 sps:$4 sm:$0xff]   ;;  %v9840_v11 = vld [vmem:[%s14607_s1 + $0x40c] ss:$16 sps:$4 sm:$0xff]  }
  0x48   :  { %6532 = vmatprep.subr.bf16.mxu0 %v9751_v12  ;;  %7348 = vmatprep.subr.bf16.mxu1 %v9754_v13  ;;  %v8302_v12 = vcombine.low %v11512_v33, %v11517_v34  ;;  %v46_v13 = vld [vmem:[%s14608_s0 + $0x108] sm:$0x11]  ;;  %v9861_v33 = vld [vmem:[%s14607_s1 + $0x484] ss:$16 sps:$4 sm:$0xff]  }
  0x49   :  { %v8334_v25 = vcombine.low %v46_v13, %v46_v13  ;;  %v9864_v34 = vld [vmem:[%s14607_s1 + $0x48c] ss:$16 sps:$4 sm:$0xff]  }
  0x4a   :  { %6520 = vmatmul.mubr.bf16.gmra.mrb[4].mxu0 %v8332_v28  ;;  %7336 = vmatmul.mubr.bf16.gmra.mrb[4].mxu1 %v8332_v28  ;;  %v9855_v28 = vld [vmem:[%s14607_s1 + $0x464] ss:$16 sps:$4 sm:$0xff]  }
  0x4b   :  { %6533 = vmatpush1.bf16.msra.mxu0 %v9749_v14  ;;  %7349 = vmatpush1.bf16.msra.mxu1 %v9752_v15  ;;  %v9835_v14 = vld [vmem:[%s14607_s1 + $0x400] ss:$16 sps:$4 sm:$0xff]   ;;  %v9838_v15 = vld [vmem:[%s14607_s1 + $0x408] ss:$16 sps:$4 sm:$0xff]  }
  0x4c   :  { %6534 = vmatprep.subr.bf16.mxu0 %v9757_v16  ;;  %7350 = vmatprep.subr.bf16.mxu1 %v9760_v17  ;;  %v9843_v16 = vld [vmem:[%s14607_s1 + $0x424] ss:$16 sps:$4 sm:$0xff]   ;;  %v9846_v17 = vld [vmem:[%s14607_s1 + $0x42c] ss:$16 sps:$4 sm:$0xff]  }
  0x4d   :  { %6560 = vmatprep.mubr.bf16.mxu0 %v8303_v36  ;;  %7376 = vmatprep.mubr.bf16.mxu1 %v8303_v36  ;;  %v9862_v36 = vld [vmem:[%s14607_s1 + $0x488] ss:$16 sps:$4 sm:$0xff]  }
  0x4f   :  { %6535 = vmatpush1.bf16.msra.mxu0 %v9755_v18  ;;  %7351 = vmatpush1.bf16.msra.mxu1 %v9758_v19  ;;  %v8335_v18 = vcombine.high %v46_v13, %v46_v13  ;;  %v9841_v19 = vld [vmem:[%s14607_s1 + $0x420] ss:$16 sps:$4 sm:$0xff]   ;;  %v9929_v13 = vld [vmem:[%s14607_s1 + $0x5e4] ss:$16 sps:$4 sm:$0xff]  }
  0x50   :  { %6536 = vmatprep.subr.bf16.mxu0 %v9763_v20  ;;  %7352 = vmatprep.subr.bf16.mxu1 %v9766_v21  ;;  %v9844_v20 = vld [vmem:[%s14607_s1 + $0x428] ss:$16 sps:$4 sm:$0xff]   ;;  %v9849_v21 = vld [vmem:[%s14607_s1 + $0x444] ss:$16 sps:$4 sm:$0xff]  }
  0x53   :  { %6537 = vmatpush1.bf16.msra.mxu0 %v9761_v22  ;;  %7353 = vmatpush1.bf16.msra.mxu1 %v9764_v23  ;;  %v9852_v22 = vld [vmem:[%s14607_s1 + $0x44c] ss:$16 sps:$4 sm:$0xff]   ;;  %v9847_v23 = vld [vmem:[%s14607_s1 + $0x440] ss:$16 sps:$4 sm:$0xff]  }
  0x54   :  { %6538 = vmatprep.subr.bf16.mxu0 %v9769_v24  ;;  %7354 = vmatprep.subr.bf16.mxu1 %v9772_v26  ;;  %v9850_v24 = vld [vmem:[%s14607_s1 + $0x448] ss:$16 sps:$4 sm:$0xff]   ;;  %v11679_v26 = vld [vmem:[%s14608_s0 + $0x10] sm:$0xff] }
  0x57   :  { %6539 = vmatpush1.bf16.msra.mxu0 %v9767_v29  ;;  %7355 = vmatpush1.bf16.msra.mxu1 %v9770_v30  ;;  %v9858_v29 = vld [vmem:[%s14607_s1 + $0x46c] ss:$16 sps:$4 sm:$0xff]   ;;  %v8305_v30 = vcombine.high %v11679_v26, %v11684_v27 }
  0x58   :  { %6540 = vmatprep.subr.bf16.mxu0 %v9775_v31  ;;  %7356 = vmatprep.subr.bf16.mxu1 %v9778_v32  ;;  %v9853_v31 = vld [vmem:[%s14607_s1 + $0x460] ss:$16 sps:$4 sm:$0xff]   ;;  %v9856_v32 = vld [vmem:[%s14607_s1 + $0x468] ss:$16 sps:$4 sm:$0xff]  }
  0x5b   :  { %6541 = vmatpush1.bf16.msra.mxu0 %v9773_v35  ;;  %7357 = vmatpush1.bf16.msra.mxu1 %v9776_v37  ;;  %v9859_v35 = vld [vmem:[%s14607_s1 + $0x480] ss:$16 sps:$4 sm:$0xff]   ;;  %v9867_v37 = vld [vmem:[%s14607_s1 + $0x4a4] ss:$16 sps:$4 sm:$0xff]  }
  0x5c   :  { %6542 = vmatprep.subr.bf16.mxu0 %v9781_v38  ;;  %7358 = vmatprep.subr.bf16.mxu1 %v9784_v39  ;;  %v9870_v38 = vld [vmem:[%s14607_s1 + $0x4ac] ss:$16 sps:$4 sm:$0xff]   ;;  %v9865_v39 = vld [vmem:[%s14607_s1 + $0x4a0] ss:$16 sps:$4 sm:$0xff]  }
  0x5f   :  { %6543 = vmatpush1.bf16.msra.mxu0 %v9779_v40  ;;  %7359 = vmatpush1.bf16.msra.mxu1 %v9782_v41  ;;  %v9868_v40 = vld [vmem:[%s14607_s1 + $0x4a8] ss:$16 sps:$4 sm:$0xff]   ;;  %v9873_v41 = vld [vmem:[%s14607_s1 + $0x4c4] ss:$16 sps:$4 sm:$0xff]  }
  0x60   :  { %6544 = vmatprep.subr.bf16.mxu0 %v9787_v42  ;;  %7360 = vmatprep.subr.bf16.mxu1 %v9790_v43  ;;  %v9876_v42 = vld [vmem:[%s14607_s1 + $0x4cc] ss:$16 sps:$4 sm:$0xff]   ;;  %v9871_v43 = vld [vmem:[%s14607_s1 + $0x4c0] ss:$16 sps:$4 sm:$0xff]  }
  0x63   :  { %6545 = vmatpush1.bf16.msra.mxu0 %v9785_v44  ;;  %7361 = vmatpush1.bf16.msra.mxu1 %v9788_v45  ;;  %v9874_v44 = vld [vmem:[%s14607_s1 + $0x4c8] ss:$16 sps:$4 sm:$0xff]   ;;  %v9879_v45 = vld [vmem:[%s14607_s1 + $0x4e4] ss:$16 sps:$4 sm:$0xff]  }
  0x64   :  { %6546 = vmatprep.subr.bf16.mxu0 %v9793_v46  ;;  %7362 = vmatprep.subr.bf16.mxu1 %v9796_v47  ;;  %v9882_v46 = vld [vmem:[%s14607_s1 + $0x4ec] ss:$16 sps:$4 sm:$0xff]   ;;  %v9877_v47 = vld [vmem:[%s14607_s1 + $0x4e0] ss:$16 sps:$4 sm:$0xff]  }
  0x67   :  { %6547 = vmatpush1.bf16.msra.mxu0 %v9791_v48  ;;  %7363 = vmatpush1.bf16.msra.mxu1 %v9794_v49  ;;  %v9880_v48 = vld [vmem:[%s14607_s1 + $0x4e8] ss:$16 sps:$4 sm:$0xff]   ;;  %v9885_v49 = vld [vmem:[%s14607_s1 + $0x504] ss:$16 sps:$4 sm:$0xff]  }
  0x68   :  { %6548 = vmatprep.subr.bf16.mxu0 %v9799_v50  ;;  %7364 = vmatprep.subr.bf16.mxu1 %v9802_v51  ;;  %v9888_v50 = vld [vmem:[%s14607_s1 + $0x50c] ss:$16 sps:$4 sm:$0xff]   ;;  %v9883_v51 = vld [vmem:[%s14607_s1 + $0x500] ss:$16 sps:$4 sm:$0xff]  }
  0x6b   :  { %6549 = vmatpush1.bf16.msra.mxu0 %v9797_v52  ;;  %7365 = vmatpush1.bf16.msra.mxu1 %v9800_v53  ;;  %v9886_v52 = vld [vmem:[%s14607_s1 + $0x508] ss:$16 sps:$4 sm:$0xff]   ;;  %v9891_v53 = vld [vmem:[%s14607_s1 + $0x524] ss:$16 sps:$4 sm:$0xff]  }
  0x6c   :  { %6550 = vmatprep.subr.bf16.mxu0 %v9805_v54  ;;  %7366 = vmatprep.subr.bf16.mxu1 %v9808_v55  ;;  %v9894_v54 = vld [vmem:[%s14607_s1 + $0x52c] ss:$16 sps:$4 sm:$0xff]   ;;  %v9889_v55 = vld [vmem:[%s14607_s1 + $0x520] ss:$16 sps:$4 sm:$0xff]  }
  0x6f   :  { %6551 = vmatpush1.bf16.msra.mxu0 %v9803_v56  ;;  %7367 = vmatpush1.bf16.msra.mxu1 %v9806_v57  ;;  %v9892_v56 = vld [vmem:[%s14607_s1 + $0x528] ss:$16 sps:$4 sm:$0xff]   ;;  %v9897_v57 = vld [vmem:[%s14607_s1 + $0x544] ss:$16 sps:$4 sm:$0xff]  }
  0x70   :  { %6552 = vmatprep.subr.bf16.mxu0 %v9811_v58  ;;  %7368 = vmatprep.subr.bf16.mxu1 %v9814_v59  ;;  %v9900_v58 = vld [vmem:[%s14607_s1 + $0x54c] ss:$16 sps:$4 sm:$0xff]   ;;  %v9895_v59 = vld [vmem:[%s14607_s1 + $0x540] ss:$16 sps:$4 sm:$0xff]  }
  0x73   :  { %6553 = vmatpush1.bf16.msra.mxu0 %v9809_v60  ;;  %7369 = vmatpush1.bf16.msra.mxu1 %v9812_v61  ;;  %v9898_v60 = vld [vmem:[%s14607_s1 + $0x548] ss:$16 sps:$4 sm:$0xff]   ;;  %v9903_v61 = vld [vmem:[%s14607_s1 + $0x564] ss:$16 sps:$4 sm:$0xff]  }
  0x74   :  { %6554 = vmatprep.subr.bf16.mxu0 %v9817_v62  ;;  %7370 = vmatprep.subr.bf16.mxu1 %v9820_v63  ;;  %v9906_v62 = vld [vmem:[%s14607_s1 + $0x56c] ss:$16 sps:$4 sm:$0xff]   ;;  %v9901_v63 = vld [vmem:[%s14607_s1 + $0x560] ss:$16 sps:$4 sm:$0xff]  }
  0x77   :  { %6555 = vmatpush1.bf16.msra.mxu0 %v9815_v0  ;;  %7371 = vmatpush1.bf16.msra.mxu1 %v9818_v1  ;;  %v9904_v0 = vld [vmem:[%s14607_s1 + $0x568] ss:$16 sps:$4 sm:$0xff]   ;;  %v9909_v1 = vld [vmem:[%s14607_s1 + $0x584] ss:$16 sps:$4 sm:$0xff]  }
  0x78   :  { %6556 = vmatprep.subr.bf16.mxu0 %v9824_v2  ;;  %7372 = vmatprep.subr.bf16.mxu1 %v9827_v3  ;;  %v9912_v2 = vld [vmem:[%s14607_s1 + $0x58c] ss:$16 sps:$4 sm:$0xff]   ;;  %v9907_v3 = vld [vmem:[%s14607_s1 + $0x580] ss:$16 sps:$4 sm:$0xff]  }
  0x7b   :  { %6557 = vmatpush1.bf16.msra.mxu0 %v9822_v4  ;;  %7373 = vmatpush1.bf16.msra.mxu1 %v9825_v5  ;;  %v9910_v4 = vld [vmem:[%s14607_s1 + $0x588] ss:$16 sps:$4 sm:$0xff]   ;;  %v9915_v5 = vld [vmem:[%s14607_s1 + $0x5a4] ss:$16 sps:$4 sm:$0xff]  }
  0x7c   :  { %6558 = vmatprep.subr.bf16.mxu0 %v9831_v6  ;;  %7374 = vmatprep.subr.bf16.mxu1 %v9834_v7  ;;  %v9918_v6 = vld [vmem:[%s14607_s1 + $0x5ac] ss:$16 sps:$4 sm:$0xff]   ;;  %v9913_v7 = vld [vmem:[%s14607_s1 + $0x5a0] ss:$16 sps:$4 sm:$0xff]  }
  0x7f   :  { %6559 = vmatpush1.bf16.msra.mxu0 %v9829_v8  ;;  %7375 = vmatpush1.bf16.msra.mxu1 %v9832_v9  ;;  %v9916_v8 = vld [vmem:[%s14607_s1 + $0x5a8] ss:$16 sps:$4 sm:$0xff]   ;;  %v9922_v9 = vld [vmem:[%s14607_s1 + $0x5c4] ss:$16 sps:$4 sm:$0xff]  }
  0x80   :  { %6579 = vmatprep.subr.bf16.mxu0 %v9837_v10  ;;  %7395 = vmatprep.subr.bf16.mxu1 %v9840_v11  ;;  %v9925_v10 = vld [vmem:[%s14607_s1 + $0x5cc] ss:$16 sps:$4 sm:$0xff]   ;;  %v9920_v11 = vld [vmem:[%s14607_s1 + $0x5c0] ss:$16 sps:$4 sm:$0xff]  }
  0x82   :  { %6561 = vmatmul.mubr.bf16.vlgmr.msra.gmra.mrb[0].mxu0 %v8302_v12  ;;  %7377 = vmatmul.mubr.bf16.vlgmr.msra.gmra.mrb[0].mxu1 %v8302_v12  ;;  %v9923_v12 = vld [vmem:[%s14607_s1 + $0x5c8] ss:$16 sps:$4 sm:$0xff]  }
  0x83   :  { %6580 = vmatpush1.bf16.msra.mxu0 %v9835_v14  ;;  %7396 = vmatpush1.bf16.msra.mxu1 %v9838_v15  ;;  %v9932_v14 = vld [vmem:[%s14607_s1 + $0x5ec] ss:$16 sps:$4 sm:$0xff]   ;;  %v9927_v15 = vld [vmem:[%s14607_s1 + $0x5e0] ss:$16 sps:$4 sm:$0xff]  }
  0x84   :  { %6581 = vmatprep.subr.bf16.mxu0 %v9843_v16  ;;  %7397 = vmatprep.subr.bf16.mxu1 %v9846_v17  ;;  %v9930_v16 = vld [vmem:[%s14607_s1 + $0x5e8] ss:$16 sps:$4 sm:$0xff]   ;;  %v9935_v17 = vld [vmem:[%s14607_s1 + $0x604] ss:$16 sps:$4 sm:$0xff]  }
  0x85   :  { %6570 = vmatprep.mubr.bf16.mxu0 %v8335_v18  ;;  %7386 = vmatprep.mubr.bf16.mxu1 %v8335_v18  ;;  %v9938_v18 = vld [vmem:[%s14607_s1 + $0x60c] ss:$16 sps:$4 sm:$0xff]  }
  0x87   :  { %6582 = vmatpush1.bf16.msra.mxu0 %v9841_v19  ;;  %7398 = vmatpush1.bf16.msra.mxu1 %v9844_v20  ;;  %v8304_v19 = vcombine.low %v11679_v26, %v11684_v27  ;;  %v9933_v20 = vld [vmem:[%s14607_s1 + $0x600] ss:$16 sps:$4 sm:$0xff]   ;;  %v9942_v27 = vld [vmem:[%s14607_s1 + $0x628] ss:$16 sps:$4 sm:$0xff]  }
  0x88   :  { %6583 = vmatprep.subr.bf16.mxu0 %v9849_v21  ;;  %7399 = vmatprep.subr.bf16.mxu1 %v9852_v22  ;;  %v47_v21 = vld [vmem:[%s14608_s0 + $0x110] sm:$0x11]  ;;  %v9936_v22 = vld [vmem:[%s14607_s1 + $0x608] ss:$16 sps:$4 sm:$0xff]  }
  0x89   :  { %v9939_v26 = vld [vmem:[%s14607_s1 + $0x620] ss:$16 sps:$4 sm:$0xff]  }
  0x8a   :  { %6571 = vmatmul.mubr.bf16.gmra.mrb[4].mxu0 %v8334_v25  ;;  %7387 = vmatmul.mubr.bf16.gmra.mrb[4].mxu1 %v8334_v25  ;;  %v8337_v25 = vcombine.high %v47_v21, %v47_v21 }
  0x8b   :  { %6584 = vmatpush1.bf16.msra.mxu0 %v9847_v23  ;;  %7400 = vmatpush1.bf16.msra.mxu1 %v9850_v24  ;;  %v9941_v23 = vld [vmem:[%s14607_s1 + $0x624] ss:$16 sps:$4 sm:$0xff]   ;;  %v9944_v24 = vld [vmem:[%s14607_s1 + $0x62c] ss:$16 sps:$4 sm:$0xff]  }
  0x8c   :  { %6585 = vmatprep.subr.bf16.mxu0 %v9855_v28  ;;  %7401 = vmatprep.subr.bf16.mxu1 %v9858_v29  ;;  %v9947_v28 = vld [vmem:[%s14607_s1 + $0x644] ss:$16 sps:$4 sm:$0xff]   ;;  %v9950_v29 = vld [vmem:[%s14607_s1 + $0x64c] ss:$16 sps:$4 sm:$0xff]  }
  0x8d   :  { %6611 = vmatprep.mubr.bf16.mxu0 %v8305_v30  ;;  %7427 = vmatprep.mubr.bf16.mxu1 %v8305_v30  ;;  %v9945_v30 = vld [vmem:[%s14607_s1 + $0x640] ss:$16 sps:$4 sm:$0xff]  }
  0x8f   :  { %6586 = vmatpush1.bf16.msra.mxu0 %v9853_v31  ;;  %7402 = vmatpush1.bf16.msra.mxu1 %v9856_v32  ;;  %v8336_v31 = vcombine.low %v47_v21, %v47_v21  ;;  %v11885_v32 = vld [vmem:[%s14608_s0 + $0x18] sm:$0xff] }
  0x90   :  { %6587 = vmatprep.subr.bf16.mxu0 %v9861_v33  ;;  %7403 = vmatprep.subr.bf16.mxu1 %v9864_v34  ;;  %v11890_v33 = vld [vmem:[%s14608_s0 + $0x98] sm:$0xff] }
  0x91   :  { %v9948_v34 = vld [vmem:[%s14607_s1 + $0x648] ss:$16 sps:$4 sm:$0xff]   ;;  %v10030_v21 = vld [vmem:[%s14607_s1 + $0x7ec] ss:$16 sps:$4 sm:$0xff]  }
  0x93   :  { %6588 = vmatpush1.bf16.msra.mxu0 %v9859_v35  ;;  %7404 = vmatpush1.bf16.msra.mxu1 %v9862_v36  ;;  %v9953_v35 = vld [vmem:[%s14607_s1 + $0x664] ss:$16 sps:$4 sm:$0xff]   ;;  %v9956_v36 = vld [vmem:[%s14607_s1 + $0x66c] ss:$16 sps:$4 sm:$0xff]  }
  0x94   :  { %6589 = vmatprep.subr.bf16.mxu0 %v9867_v37  ;;  %7405 = vmatprep.subr.bf16.mxu1 %v9870_v38  ;;  %v8307_v37 = vcombine.high %v11885_v32, %v11890_v33  ;;  %v9951_v38 = vld [vmem:[%s14607_s1 + $0x660] ss:$16 sps:$4 sm:$0xff]  }
  0x97   :  { %6590 = vmatpush1.bf16.msra.mxu0 %v9865_v39  ;;  %7406 = vmatpush1.bf16.msra.mxu1 %v9868_v40  ;;  %v9954_v39 = vld [vmem:[%s14607_s1 + $0x668] ss:$16 sps:$4 sm:$0xff]   ;;  %v9959_v40 = vld [vmem:[%s14607_s1 + $0x684] ss:$16 sps:$4 sm:$0xff]  }
  0x98   :  { %6591 = vmatprep.subr.bf16.mxu0 %v9873_v41  ;;  %7407 = vmatprep.subr.bf16.mxu1 %v9876_v42  ;;  %v9962_v41 = vld [vmem:[%s14607_s1 + $0x68c] ss:$16 sps:$4 sm:$0xff]   ;;  %v9957_v42 = vld [vmem:[%s14607_s1 + $0x680] ss:$16 sps:$4 sm:$0xff]  }
  0x9b   :  { %6592 = vmatpush1.bf16.msra.mxu0 %v9871_v43  ;;  %7408 = vmatpush1.bf16.msra.mxu1 %v9874_v44  ;;  %v9960_v43 = vld [vmem:[%s14607_s1 + $0x688] ss:$16 sps:$4 sm:$0xff]   ;;  %v9965_v44 = vld [vmem:[%s14607_s1 + $0x6a4] ss:$16 sps:$4 sm:$0xff]  }
  0x9c   :  { %6593 = vmatprep.subr.bf16.mxu0 %v9879_v45  ;;  %7409 = vmatprep.subr.bf16.mxu1 %v9882_v46  ;;  %v9968_v45 = vld [vmem:[%s14607_s1 + $0x6ac] ss:$16 sps:$4 sm:$0xff]   ;;  %v9963_v46 = vld [vmem:[%s14607_s1 + $0x6a0] ss:$16 sps:$4 sm:$0xff]  }
  0x9f   :  { %6594 = vmatpush1.bf16.msra.mxu0 %v9877_v47  ;;  %7410 = vmatpush1.bf16.msra.mxu1 %v9880_v48  ;;  %v9966_v47 = vld [vmem:[%s14607_s1 + $0x6a8] ss:$16 sps:$4 sm:$0xff]   ;;  %v9971_v48 = vld [vmem:[%s14607_s1 + $0x6c4] ss:$16 sps:$4 sm:$0xff]  }
  0xa0   :  { %6595 = vmatprep.subr.bf16.mxu0 %v9885_v49  ;;  %7411 = vmatprep.subr.bf16.mxu1 %v9888_v50  ;;  %v9974_v49 = vld [vmem:[%s14607_s1 + $0x6cc] ss:$16 sps:$4 sm:$0xff]   ;;  %v9969_v50 = vld [vmem:[%s14607_s1 + $0x6c0] ss:$16 sps:$4 sm:$0xff]  }
  0xa3   :  { %6596 = vmatpush1.bf16.msra.mxu0 %v9883_v51  ;;  %7412 = vmatpush1.bf16.msra.mxu1 %v9886_v52  ;;  %v9972_v51 = vld [vmem:[%s14607_s1 + $0x6c8] ss:$16 sps:$4 sm:$0xff]   ;;  %v9977_v52 = vld [vmem:[%s14607_s1 + $0x6e4] ss:$16 sps:$4 sm:$0xff]  }
  0xa4   :  { %6597 = vmatprep.subr.bf16.mxu0 %v9891_v53  ;;  %7413 = vmatprep.subr.bf16.mxu1 %v9894_v54  ;;  %v9980_v53 = vld [vmem:[%s14607_s1 + $0x6ec] ss:$16 sps:$4 sm:$0xff]   ;;  %v9975_v54 = vld [vmem:[%s14607_s1 + $0x6e0] ss:$16 sps:$4 sm:$0xff]  }
  0xa7   :  { %6598 = vmatpush1.bf16.msra.mxu0 %v9889_v55  ;;  %7414 = vmatpush1.bf16.msra.mxu1 %v9892_v56  ;;  %v9978_v55 = vld [vmem:[%s14607_s1 + $0x6e8] ss:$16 sps:$4 sm:$0xff]   ;;  %v9983_v56 = vld [vmem:[%s14607_s1 + $0x704] ss:$16 sps:$4 sm:$0xff]  }
  0xa8   :  { %6599 = vmatprep.subr.bf16.mxu0 %v9897_v57  ;;  %7415 = vmatprep.subr.bf16.mxu1 %v9900_v58  ;;  %v9986_v57 = vld [vmem:[%s14607_s1 + $0x70c] ss:$16 sps:$4 sm:$0xff]   ;;  %v9981_v58 = vld [vmem:[%s14607_s1 + $0x700] ss:$16 sps:$4 sm:$0xff]  }
  0xab   :  { %6600 = vmatpush1.bf16.msra.mxu0 %v9895_v59  ;;  %7416 = vmatpush1.bf16.msra.mxu1 %v9898_v60  ;;  %v9984_v59 = vld [vmem:[%s14607_s1 + $0x708] ss:$16 sps:$4 sm:$0xff]   ;;  %v9989_v60 = vld [vmem:[%s14607_s1 + $0x724] ss:$16 sps:$4 sm:$0xff]  }
  0xac   :  { %6601 = vmatprep.subr.bf16.mxu0 %v9903_v61  ;;  %7417 = vmatprep.subr.bf16.mxu1 %v9906_v62  ;;  %v9992_v61 = vld [vmem:[%s14607_s1 + $0x72c] ss:$16 sps:$4 sm:$0xff]   ;;  %v9987_v62 = vld [vmem:[%s14607_s1 + $0x720] ss:$16 sps:$4 sm:$0xff]  }
  0xaf   :  { %6602 = vmatpush1.bf16.msra.mxu0 %v9901_v63  ;;  %7418 = vmatpush1.bf16.msra.mxu1 %v9904_v0  ;;  %v9990_v63 = vld [vmem:[%s14607_s1 + $0x728] ss:$16 sps:$4 sm:$0xff]   ;;  %v9995_v0 = vld [vmem:[%s14607_s1 + $0x744] ss:$16 sps:$4 sm:$0xff]  }
  0xb0   :  { %6603 = vmatprep.subr.bf16.mxu0 %v9909_v1  ;;  %7419 = vmatprep.subr.bf16.mxu1 %v9912_v2  ;;  %v9998_v1 = vld [vmem:[%s14607_s1 + $0x74c] ss:$16 sps:$4 sm:$0xff]   ;;  %v9993_v2 = vld [vmem:[%s14607_s1 + $0x740] ss:$16 sps:$4 sm:$0xff]  }
  0xb3   :  { %6604 = vmatpush1.bf16.msra.mxu0 %v9907_v3  ;;  %7420 = vmatpush1.bf16.msra.mxu1 %v9910_v4  ;;  %v9996_v3 = vld [vmem:[%s14607_s1 + $0x748] ss:$16 sps:$4 sm:$0xff]   ;;  %v10001_v4 = vld [vmem:[%s14607_s1 + $0x764] ss:$16 sps:$4 sm:$0xff]  }
  0xb4   :  { %6605 = vmatprep.subr.bf16.mxu0 %v9915_v5  ;;  %7421 = vmatprep.subr.bf16.mxu1 %v9918_v6  ;;  %v10004_v5 = vld [vmem:[%s14607_s1 + $0x76c] ss:$16 sps:$4 sm:$0xff]   ;;  %v9999_v6 = vld [vmem:[%s14607_s1 + $0x760] ss:$16 sps:$4 sm:$0xff]  }
  0xb7   :  { %6606 = vmatpush1.bf16.msra.mxu0 %v9913_v7  ;;  %7422 = vmatpush1.bf16.msra.mxu1 %v9916_v8  ;;  %v10002_v7 = vld [vmem:[%s14607_s1 + $0x768] ss:$16 sps:$4 sm:$0xff]   ;;  %v10007_v8 = vld [vmem:[%s14607_s1 + $0x784] ss:$16 sps:$4 sm:$0xff]  }
  0xb8   :  { %6607 = vmatprep.subr.bf16.mxu0 %v9922_v9  ;;  %7423 = vmatprep.subr.bf16.mxu1 %v9925_v10  ;;  %v10010_v9 = vld [vmem:[%s14607_s1 + $0x78c] ss:$16 sps:$4 sm:$0xff]   ;;  %v10005_v10 = vld [vmem:[%s14607_s1 + $0x780] ss:$16 sps:$4 sm:$0xff]  }
  0xbb   :  { %6608 = vmatpush1.bf16.msra.mxu0 %v9920_v11  ;;  %7424 = vmatpush1.bf16.msra.mxu1 %v9923_v12  ;;  %v10008_v11 = vld [vmem:[%s14607_s1 + $0x788] ss:$16 sps:$4 sm:$0xff]   ;;  %v10013_v12 = vld [vmem:[%s14607_s1 + $0x7a4] ss:$16 sps:$4 sm:$0xff]  }
  0xbc   :  { %6609 = vmatprep.subr.bf16.mxu0 %v9929_v13  ;;  %7425 = vmatprep.subr.bf16.mxu1 %v9932_v14  ;;  %v10016_v13 = vld [vmem:[%s14607_s1 + $0x7ac] ss:$16 sps:$4 sm:$0xff]   ;;  %v10011_v14 = vld [vmem:[%s14607_s1 + $0x7a0] ss:$16 sps:$4 sm:$0xff]  }
  0xbf   :  { %6610 = vmatpush1.bf16.msra.mxu0 %v9927_v15  ;;  %7426 = vmatpush1.bf16.msra.mxu1 %v9930_v16  ;;  %v10014_v15 = vld [vmem:[%s14607_s1 + $0x7a8] ss:$16 sps:$4 sm:$0xff]   ;;  %v10020_v16 = vld [vmem:[%s14607_s1 + $0x7c4] ss:$16 sps:$4 sm:$0xff]  }
  0xc0   :  { %6630 = vmatprep.subr.bf16.mxu0 %v9935_v17  ;;  %7446 = vmatprep.subr.bf16.mxu1 %v9938_v18  ;;  %v10023_v17 = vld [vmem:[%s14607_s1 + $0x7cc] ss:$16 sps:$4 sm:$0xff]   ;;  %v10018_v18 = vld [vmem:[%s14607_s1 + $0x7c0] ss:$16 sps:$4 sm:$0xff]  }
  0xc2   :  { %6612 = vmatmul.mubr.bf16.vlgmr.msra.gmra.mrb[0].mxu0 %v8304_v19  ;;  %7428 = vmatmul.mubr.bf16.vlgmr.msra.gmra.mrb[0].mxu1 %v8304_v19  ;;  %v10021_v19 = vld [vmem:[%s14607_s1 + $0x7c8] ss:$16 sps:$4 sm:$0xff]  }
  0xc3   :  { %6631 = vmatpush1.bf16.msra.mxu0 %v9933_v20  ;;  %7447 = vmatpush1.bf16.msra.mxu1 %v9936_v22  ;;  %v10027_v20 = vld [vmem:[%s14607_s1 + $0x7e4] ss:$16 sps:$4 sm:$0xff]   ;;  %v10025_v22 = vld [vmem:[%s14607_s1 + $0x7e0] ss:$16 sps:$4 sm:$0xff]  }
  0xc4   :  { %6632 = vmatprep.subr.bf16.mxu0 %v9941_v23  ;;  %7448 = vmatprep.subr.bf16.mxu1 %v9944_v24  ;;  %v10028_v23 = vld [vmem:[%s14607_s1 + $0x7e8] ss:$16 sps:$4 sm:$0xff]   ;;  %v10033_v24 = vld [vmem:[%s14607_s1 + $0x804] ss:$16 sps:$4 sm:$0xff]  }
  0xc5   :  { %6621 = vmatprep.mubr.bf16.mxu0 %v8337_v25  ;;  %7437 = vmatprep.mubr.bf16.mxu1 %v8337_v25  ;;  %v10036_v25 = vld [vmem:[%s14607_s1 + $0x80c] ss:$16 sps:$4 sm:$0xff]  }
  0xc7   :  { %6633 = vmatpush1.bf16.msra.mxu0 %v9939_v26  ;;  %7449 = vmatpush1.bf16.msra.mxu1 %v9942_v27  ;;  %v8306_v26 = vcombine.low %v11885_v32, %v11890_v33  ;;  %v10031_v27 = vld [vmem:[%s14607_s1 + $0x800] ss:$16 sps:$4 sm:$0xff]  }
  0xc8   :  { %6634 = vmatprep.subr.bf16.mxu0 %v9947_v28  ;;  %7450 = vmatprep.subr.bf16.mxu1 %v9950_v29  ;;  %v48_v28 = vld [vmem:[%s14608_s0 + $0x118] sm:$0x11]  ;;  %v10037_v33 = vld [vmem:[%s14607_s1 + $0x820] ss:$16 sps:$4 sm:$0xff]  }
  0xc9   :  { %v10034_v29 = vld [vmem:[%s14607_s1 + $0x808] ss:$16 sps:$4 sm:$0xff]   ;;  %v8339_v32 = vcombine.high %v48_v28, %v48_v28 }
  0xca   :  { %6622 = vmatmul.mubr.bf16.gmra.mrb[4].mxu0 %v8336_v31  ;;  %7438 = vmatmul.mubr.bf16.gmra.mrb[4].mxu1 %v8336_v31  ;;  %v10042_v31 = vld [vmem:[%s14607_s1 + $0x82c] ss:$16 sps:$4 sm:$0xff]  }
  0xcb   :  { %6635 = vmatpush1.bf16.msra.mxu0 %v9945_v30  ;;  %7451 = vmatpush1.bf16.msra.mxu1 %v9948_v34  ;;  %v10039_v30 = vld [vmem:[%s14607_s1 + $0x824] ss:$16 sps:$4 sm:$0xff]   ;;  %v10040_v34 = vld [vmem:[%s14607_s1 + $0x828] ss:$16 sps:$4 sm:$0xff]  }
  0xcc   :  { %6636 = vmatprep.subr.bf16.mxu0 %v9953_v35  ;;  %7452 = vmatprep.subr.bf16.mxu1 %v9956_v36  ;;  %v10045_v35 = vld [vmem:[%s14607_s1 + $0x844] ss:$16 sps:$4 sm:$0xff]   ;;  %v10048_v36 = vld [vmem:[%s14607_s1 + $0x84c] ss:$16 sps:$4 sm:$0xff]  }
  0xcd   :  { %6662 = vmatprep.mubr.bf16.mxu0 %v8307_v37  ;;  %7478 = vmatprep.mubr.bf16.mxu1 %v8307_v37  ;;  %v10043_v37 = vld [vmem:[%s14607_s1 + $0x840] ss:$16 sps:$4 sm:$0xff]  }
  0xcf   :  { %6637 = vmatpush1.bf16.msra.mxu0 %v9951_v38  ;;  %7453 = vmatpush1.bf16.msra.mxu1 %v9954_v39  ;;  %v12094_v38 = vld [vmem:[%s14608_s0 + $0x20] sm:$0xff]  ;;  %v8338_v39 = vcombine.low %v48_v28, %v48_v28  ;;  %v10128_v28 = vld [vmem:[%s14607_s1 + $0x9ec] ss:$16 sps:$4 sm:$0xff]  }
  0xd0   :  { %6638 = vmatprep.subr.bf16.mxu0 %v9959_v40  ;;  %7454 = vmatprep.subr.bf16.mxu1 %v9962_v41  ;;  %v12099_v40 = vld [vmem:[%s14608_s0 + $0xa0] sm:$0xff]  ;;  %v10046_v41 = vld [vmem:[%s14607_s1 + $0x848] ss:$16 sps:$4 sm:$0xff]  }
  0xd3   :  { %6639 = vmatpush1.bf16.msra.mxu0 %v9957_v42  ;;  %7455 = vmatpush1.bf16.msra.mxu1 %v9960_v43  ;;  %v10051_v42 = vld [vmem:[%s14607_s1 + $0x864] ss:$16 sps:$4 sm:$0xff]   ;;  %v10054_v43 = vld [vmem:[%s14607_s1 + $0x86c] ss:$16 sps:$4 sm:$0xff]  }
  0xd4   :  { %6640 = vmatprep.subr.bf16.mxu0 %v9965_v44  ;;  %7456 = vmatprep.subr.bf16.mxu1 %v9968_v45  ;;  %v8309_v44 = vcombine.high %v12094_v38, %v12099_v40  ;;  %v10049_v45 = vld [vmem:[%s14607_s1 + $0x860] ss:$16 sps:$4 sm:$0xff]  }
  0xd7   :  { %6641 = vmatpush1.bf16.msra.mxu0 %v9963_v46  ;;  %7457 = vmatpush1.bf16.msra.mxu1 %v9966_v47  ;;  %v10052_v46 = vld [vmem:[%s14607_s1 + $0x868] ss:$16 sps:$4 sm:$0xff]   ;;  %v10057_v47 = vld [vmem:[%s14607_s1 + $0x884] ss:$16 sps:$4 sm:$0xff]  }
  0xd8   :  { %6642 = vmatprep.subr.bf16.mxu0 %v9971_v48  ;;  %7458 = vmatprep.subr.bf16.mxu1 %v9974_v49  ;;  %v10060_v48 = vld [vmem:[%s14607_s1 + $0x88c] ss:$16 sps:$4 sm:$0xff]   ;;  %v10055_v49 = vld [vmem:[%s14607_s1 + $0x880] ss:$16 sps:$4 sm:$0xff]  }
  0xdb   :  { %6643 = vmatpush1.bf16.msra.mxu0 %v9969_v50  ;;  %7459 = vmatpush1.bf16.msra.mxu1 %v9972_v51  ;;  %v10058_v50 = vld [vmem:[%s14607_s1 + $0x888] ss:$16 sps:$4 sm:$0xff]   ;;  %v10063_v51 = vld [vmem:[%s14607_s1 + $0x8a4] ss:$16 sps:$4 sm:$0xff]  }
  0xdc   :  { %6644 = vmatprep.subr.bf16.mxu0 %v9977_v52  ;;  %7460 = vmatprep.subr.bf16.mxu1 %v9980_v53  ;;  %v10066_v52 = vld [vmem:[%s14607_s1 + $0x8ac] ss:$16 sps:$4 sm:$0xff]   ;;  %v10061_v53 = vld [vmem:[%s14607_s1 + $0x8a0] ss:$16 sps:$4 sm:$0xff]  }
  0xdf   :  { %6645 = vmatpush1.bf16.msra.mxu0 %v9975_v54  ;;  %7461 = vmatpush1.bf16.msra.mxu1 %v9978_v55  ;;  %v10064_v54 = vld [vmem:[%s14607_s1 + $0x8a8] ss:$16 sps:$4 sm:$0xff]   ;;  %v10069_v55 = vld [vmem:[%s14607_s1 + $0x8c4] ss:$16 sps:$4 sm:$0xff]  }
  0xe0   :  { %6646 = vmatprep.subr.bf16.mxu0 %v9983_v56  ;;  %7462 = vmatprep.subr.bf16.mxu1 %v9986_v57  ;;  %v10072_v56 = vld [vmem:[%s14607_s1 + $0x8cc] ss:$16 sps:$4 sm:$0xff]   ;;  %v10067_v57 = vld [vmem:[%s14607_s1 + $0x8c0] ss:$16 sps:$4 sm:$0xff]  }
  0xe3   :  { %6647 = vmatpush1.bf16.msra.mxu0 %v9981_v58  ;;  %7463 = vmatpush1.bf16.msra.mxu1 %v9984_v59  ;;  %v10070_v58 = vld [vmem:[%s14607_s1 + $0x8c8] ss:$16 sps:$4 sm:$0xff]   ;;  %v10075_v59 = vld [vmem:[%s14607_s1 + $0x8e4] ss:$16 sps:$4 sm:$0xff]  }
  0xe4   :  { %6648 = vmatprep.subr.bf16.mxu0 %v9989_v60  ;;  %7464 = vmatprep.subr.bf16.mxu1 %v9992_v61  ;;  %v10078_v60 = vld [vmem:[%s14607_s1 + $0x8ec] ss:$16 sps:$4 sm:$0xff]   ;;  %v10073_v61 = vld [vmem:[%s14607_s1 + $0x8e0] ss:$16 sps:$4 sm:$0xff]  }
  0xe7   :  { %6649 = vmatpush1.bf16.msra.mxu0 %v9987_v62  ;;  %7465 = vmatpush1.bf16.msra.mxu1 %v9990_v63  ;;  %v10076_v62 = vld [vmem:[%s14607_s1 + $0x8e8] ss:$16 sps:$4 sm:$0xff]   ;;  %v10081_v63 = vld [vmem:[%s14607_s1 + $0x904] ss:$16 sps:$4 sm:$0xff]  }
  0xe8   :  { %6650 = vmatprep.subr.bf16.mxu0 %v9995_v0  ;;  %7466 = vmatprep.subr.bf16.mxu1 %v9998_v1  ;;  %v10084_v0 = vld [vmem:[%s14607_s1 + $0x90c] ss:$16 sps:$4 sm:$0xff]   ;;  %v10079_v1 = vld [vmem:[%s14607_s1 + $0x900] ss:$16 sps:$4 sm:$0xff]  }
  0xeb   :  { %6651 = vmatpush1.bf16.msra.mxu0 %v9993_v2  ;;  %7467 = vmatpush1.bf16.msra.mxu1 %v9996_v3  ;;  %v10082_v2 = vld [vmem:[%s14607_s1 + $0x908] ss:$16 sps:$4 sm:$0xff]   ;;  %v10087_v3 = vld [vmem:[%s14607_s1 + $0x924] ss:$16 sps:$4 sm:$0xff]  }
  0xec   :  { %6652 = vmatprep.subr.bf16.mxu0 %v10001_v4  ;;  %7468 = vmatprep.subr.bf16.mxu1 %v10004_v5  ;;  %v10090_v4 = vld [vmem:[%s14607_s1 + $0x92c] ss:$16 sps:$4 sm:$0xff]   ;;  %v10085_v5 = vld [vmem:[%s14607_s1 + $0x920] ss:$16 sps:$4 sm:$0xff]  }
  0xef   :  { %6653 = vmatpush1.bf16.msra.mxu0 %v9999_v6  ;;  %7469 = vmatpush1.bf16.msra.mxu1 %v10002_v7  ;;  %v10088_v6 = vld [vmem:[%s14607_s1 + $0x928] ss:$16 sps:$4 sm:$0xff]   ;;  %v10093_v7 = vld [vmem:[%s14607_s1 + $0x944] ss:$16 sps:$4 sm:$0xff]  }
  0xf0   :  { %6654 = vmatprep.subr.bf16.mxu0 %v10007_v8  ;;  %7470 = vmatprep.subr.bf16.mxu1 %v10010_v9  ;;  %v10096_v8 = vld [vmem:[%s14607_s1 + $0x94c] ss:$16 sps:$4 sm:$0xff]   ;;  %v10091_v9 = vld [vmem:[%s14607_s1 + $0x940] ss:$16 sps:$4 sm:$0xff]  }
  0xf3   :  { %6655 = vmatpush1.bf16.msra.mxu0 %v10005_v10  ;;  %7471 = vmatpush1.bf16.msra.mxu1 %v10008_v11  ;;  %v10094_v10 = vld [vmem:[%s14607_s1 + $0x948] ss:$16 sps:$4 sm:$0xff]   ;;  %v10099_v11 = vld [vmem:[%s14607_s1 + $0x964] ss:$16 sps:$4 sm:$0xff]  }
  0xf4   :  { %6656 = vmatprep.subr.bf16.mxu0 %v10013_v12  ;;  %7472 = vmatprep.subr.bf16.mxu1 %v10016_v13  ;;  %v10102_v12 = vld [vmem:[%s14607_s1 + $0x96c] ss:$16 sps:$4 sm:$0xff]   ;;  %v10097_v13 = vld [vmem:[%s14607_s1 + $0x960] ss:$16 sps:$4 sm:$0xff]  }
  0xf7   :  { %6657 = vmatpush1.bf16.msra.mxu0 %v10011_v14  ;;  %7473 = vmatpush1.bf16.msra.mxu1 %v10014_v15  ;;  %v10100_v14 = vld [vmem:[%s14607_s1 + $0x968] ss:$16 sps:$4 sm:$0xff]   ;;  %v10105_v15 = vld [vmem:[%s14607_s1 + $0x984] ss:$16 sps:$4 sm:$0xff]  }
  0xf8   :  { %6658 = vmatprep.subr.bf16.mxu0 %v10020_v16  ;;  %7474 = vmatprep.subr.bf16.mxu1 %v10023_v17  ;;  %v10108_v16 = vld [vmem:[%s14607_s1 + $0x98c] ss:$16 sps:$4 sm:$0xff]   ;;  %v10103_v17 = vld [vmem:[%s14607_s1 + $0x980] ss:$16 sps:$4 sm:$0xff]  }
  0xfb   :  { %6659 = vmatpush1.bf16.msra.mxu0 %v10018_v18  ;;  %7475 = vmatpush1.bf16.msra.mxu1 %v10021_v19  ;;  %v10106_v18 = vld [vmem:[%s14607_s1 + $0x988] ss:$16 sps:$4 sm:$0xff]   ;;  %v10111_v19 = vld [vmem:[%s14607_s1 + $0x9a4] ss:$16 sps:$4 sm:$0xff]  }
  0xfc   :  { %6660 = vmatprep.subr.bf16.mxu0 %v10027_v20  ;;  %7476 = vmatprep.subr.bf16.mxu1 %v10030_v21  ;;  %v10114_v20 = vld [vmem:[%s14607_s1 + $0x9ac] ss:$16 sps:$4 sm:$0xff]   ;;  %v10109_v21 = vld [vmem:[%s14607_s1 + $0x9a0] ss:$16 sps:$4 sm:$0xff]  }
  0xff   :  { %6661 = vmatpush1.bf16.msra.mxu0 %v10025_v22  ;;  %7477 = vmatpush1.bf16.msra.mxu1 %v10028_v23  ;;  %v10112_v22 = vld [vmem:[%s14607_s1 + $0x9a8] ss:$16 sps:$4 sm:$0xff]   ;;  %v10118_v23 = vld [vmem:[%s14607_s1 + $0x9c4] ss:$16 sps:$4 sm:$0xff]  }
 0x100   :  { %6681 = vmatprep.subr.bf16.mxu0 %v10033_v24  ;;  %7497 = vmatprep.subr.bf16.mxu1 %v10036_v25  ;;  %v10121_v24 = vld [vmem:[%s14607_s1 + $0x9cc] ss:$16 sps:$4 sm:$0xff]   ;;  %v10116_v25 = vld [vmem:[%s14607_s1 + $0x9c0] ss:$16 sps:$4 sm:$0xff]  }
 0x102   :  { %6663 = vmatmul.mubr.bf16.vlgmr.msra.gmra.mrb[0].mxu0 %v8306_v26  ;;  %7479 = vmatmul.mubr.bf16.vlgmr.msra.gmra.mrb[0].mxu1 %v8306_v26  ;;  %v10119_v26 = vld [vmem:[%s14607_s1 + $0x9c8] ss:$16 sps:$4 sm:$0xff]  }
 0x103   :  { %6682 = vmatpush1.bf16.msra.mxu0 %v10031_v27  ;;  %7498 = vmatpush1.bf16.msra.mxu1 %v10034_v29  ;;  %v10125_v27 = vld [vmem:[%s14607_s1 + $0x9e4] ss:$16 sps:$4 sm:$0xff]   ;;  %v10123_v29 = vld [vmem:[%s14607_s1 + $0x9e0] ss:$16 sps:$4 sm:$0xff]  }
 0x104   :  { %6683 = vmatprep.subr.bf16.mxu0 %v10039_v30  ;;  %7499 = vmatprep.subr.bf16.mxu1 %v10042_v31  ;;  %v10126_v30 = vld [vmem:[%s14607_s1 + $0x9e8] ss:$16 sps:$4 sm:$0xff]   ;;  %v10131_v31 = vld [vmem:[%s14607_s1 + $0xa04] ss:$16 sps:$4 sm:$0xff]  }
 0x105   :  { %6672 = vmatprep.mubr.bf16.mxu0 %v8339_v32  ;;  %7488 = vmatprep.mubr.bf16.mxu1 %v8339_v32  ;;  %v10134_v32 = vld [vmem:[%s14607_s1 + $0xa0c] ss:$16 sps:$4 sm:$0xff]  }
 0x107   :  { %6684 = vmatpush1.bf16.msra.mxu0 %v10037_v33  ;;  %7500 = vmatpush1.bf16.msra.mxu1 %v10040_v34  ;;  %v49_v33 = vld [vmem:[%s14608_s0 + $0x120] sm:$0x11]  ;;  %v8308_v34 = vcombine.low %v12094_v38, %v12099_v40  ;;  %v10140_v38 = vld [vmem:[%s14607_s1 + $0xa2c] ss:$16 sps:$4 sm:$0xff]   ;;  %v10138_v40 = vld [vmem:[%s14607_s1 + $0xa28] ss:$16 sps:$4 sm:$0xff]  }
 0x108   :  { %6685 = vmatprep.subr.bf16.mxu0 %v10045_v35  ;;  %7501 = vmatprep.subr.bf16.mxu1 %v10048_v36  ;;  %v10129_v35 = vld [vmem:[%s14607_s1 + $0xa00] ss:$16 sps:$4 sm:$0xff]   ;;  %v10132_v36 = vld [vmem:[%s14607_s1 + $0xa08] ss:$16 sps:$4 sm:$0xff]  }
 0x10a   :  { %6673 = vmatmul.mubr.bf16.gmra.mrb[4].mxu0 %v8338_v39  ;;  %7489 = vmatmul.mubr.bf16.gmra.mrb[4].mxu1 %v8338_v39  ;;  %v10135_v39 = vld [vmem:[%s14607_s1 + $0xa20] ss:$16 sps:$4 sm:$0xff]  }
 0x10b   :  { %6686 = vmatpush1.bf16.msra.mxu0 %v10043_v37  ;;  %7502 = vmatpush1.bf16.msra.mxu1 %v10046_v41  ;;  %v10137_v37 = vld [vmem:[%s14607_s1 + $0xa24] ss:$16 sps:$4 sm:$0xff]   ;;  %v8341_v41 = vcombine.high %v49_v33, %v49_v33 }
 0x10c   :  { %6687 = vmatprep.subr.bf16.mxu0 %v10051_v42  ;;  %7503 = vmatprep.subr.bf16.mxu1 %v10054_v43  ;;  %v10143_v42 = vld [vmem:[%s14607_s1 + $0xa44] ss:$16 sps:$4 sm:$0xff]   ;;  %v10146_v43 = vld [vmem:[%s14607_s1 + $0xa4c] ss:$16 sps:$4 sm:$0xff]  }
 0x10d   :  { %6713 = vmatprep.mubr.bf16.mxu0 %v8309_v44  ;;  %7529 = vmatprep.mubr.bf16.mxu1 %v8309_v44  ;;  %v12300_v44 = vld [vmem:[%s14608_s0 + $0x28] sm:$0xff] }
 0x10f   :  { %6688 = vmatpush1.bf16.msra.mxu0 %v10049_v45  ;;  %7504 = vmatpush1.bf16.msra.mxu1 %v10052_v46  ;;  %v12305_v45 = vld [vmem:[%s14608_s0 + $0xa8] sm:$0xff]  ;;  %v8340_v46 = vcombine.low %v49_v33, %v49_v33 }
 0x110   :  { %6689 = vmatprep.subr.bf16.mxu0 %v10057_v47  ;;  %7505 = vmatprep.subr.bf16.mxu1 %v10060_v48  ;;  %v10141_v47 = vld [vmem:[%s14607_s1 + $0xa40] ss:$16 sps:$4 sm:$0xff]   ;;  %v10144_v48 = vld [vmem:[%s14607_s1 + $0xa48] ss:$16 sps:$4 sm:$0xff]  }
 0x111   :  { %v10217_v33 = vld [vmem:[%s14607_s1 + $0xbc8] ss:$16 sps:$4 sm:$0xff]  }
 0x113   :  { %6690 = vmatpush1.bf16.msra.mxu0 %v10055_v49  ;;  %7506 = vmatpush1.bf16.msra.mxu1 %v10058_v50  ;;  %v10149_v49 = vld [vmem:[%s14607_s1 + $0xa64] ss:$16 sps:$4 sm:$0xff]   ;;  %v10152_v50 = vld [vmem:[%s14607_s1 + $0xa6c] ss:$16 sps:$4 sm:$0xff]  }
 0x114   :  { %6691 = vmatprep.subr.bf16.mxu0 %v10063_v51  ;;  %7507 = vmatprep.subr.bf16.mxu1 %v10066_v52  ;;  %v8311_v51 = vcombine.high %v12300_v44, %v12305_v45  ;;  %v10147_v52 = vld [vmem:[%s14607_s1 + $0xa60] ss:$16 sps:$4 sm:$0xff]  }
 0x117   :  { %6692 = vmatpush1.bf16.msra.mxu0 %v10061_v53  ;;  %7508 = vmatpush1.bf16.msra.mxu1 %v10064_v54  ;;  %v10150_v53 = vld [vmem:[%s14607_s1 + $0xa68] ss:$16 sps:$4 sm:$0xff]   ;;  %v10155_v54 = vld [vmem:[%s14607_s1 + $0xa84] ss:$16 sps:$4 sm:$0xff]  }
 0x118   :  { %6693 = vmatprep.subr.bf16.mxu0 %v10069_v55  ;;  %7509 = vmatprep.subr.bf16.mxu1 %v10072_v56  ;;  %v10158_v55 = vld [vmem:[%s14607_s1 + $0xa8c] ss:$16 sps:$4 sm:$0xff]   ;;  %v10153_v56 = vld [vmem:[%s14607_s1 + $0xa80] ss:$16 sps:$4 sm:$0xff]  }
 0x11b   :  { %6694 = vmatpush1.bf16.msra.mxu0 %v10067_v57  ;;  %7510 = vmatpush1.bf16.msra.mxu1 %v10070_v58  ;;  %v10156_v57 = vld [vmem:[%s14607_s1 + $0xa88] ss:$16 sps:$4 sm:$0xff]   ;;  %v10161_v58 = vld [vmem:[%s14607_s1 + $0xaa4] ss:$16 sps:$4 sm:$0xff]  }
 0x11c   :  { %6695 = vmatprep.subr.bf16.mxu0 %v10075_v59  ;;  %7511 = vmatprep.subr.bf16.mxu1 %v10078_v60  ;;  %v10164_v59 = vld [vmem:[%s14607_s1 + $0xaac] ss:$16 sps:$4 sm:$0xff]   ;;  %v10159_v60 = vld [vmem:[%s14607_s1 + $0xaa0] ss:$16 sps:$4 sm:$0xff]  }
 0x11f   :  { %6696 = vmatpush1.bf16.msra.mxu0 %v10073_v61  ;;  %7512 = vmatpush1.bf16.msra.mxu1 %v10076_v62  ;;  %v10162_v61 = vld [vmem:[%s14607_s1 + $0xaa8] ss:$16 sps:$4 sm:$0xff]   ;;  %v10167_v62 = vld [vmem:[%s14607_s1 + $0xac4] ss:$16 sps:$4 sm:$0xff]  }
 0x120   :  { %6697 = vmatprep.subr.bf16.mxu0 %v10081_v63  ;;  %7513 = vmatprep.subr.bf16.mxu1 %v10084_v0  ;;  %v10170_v63 = vld [vmem:[%s14607_s1 + $0xacc] ss:$16 sps:$4 sm:$0xff]   ;;  %v10165_v0 = vld [vmem:[%s14607_s1 + $0xac0] ss:$16 sps:$4 sm:$0xff]  }
 0x123   :  { %6698 = vmatpush1.bf16.msra.mxu0 %v10079_v1  ;;  %7514 = vmatpush1.bf16.msra.mxu1 %v10082_v2  ;;  %v10168_v1 = vld [vmem:[%s14607_s1 + $0xac8] ss:$16 sps:$4 sm:$0xff]   ;;  %v10173_v2 = vld [vmem:[%s14607_s1 + $0xae4] ss:$16 sps:$4 sm:$0xff]  }
 0x124   :  { %6699 = vmatprep.subr.bf16.mxu0 %v10087_v3  ;;  %7515 = vmatprep.subr.bf16.mxu1 %v10090_v4  ;;  %v10176_v3 = vld [vmem:[%s14607_s1 + $0xaec] ss:$16 sps:$4 sm:$0xff]   ;;  %v10171_v4 = vld [vmem:[%s14607_s1 + $0xae0] ss:$16 sps:$4 sm:$0xff]  }
 0x127   :  { %6700 = vmatpush1.bf16.msra.mxu0 %v10085_v5  ;;  %7516 = vmatpush1.bf16.msra.mxu1 %v10088_v6  ;;  %v10174_v5 = vld [vmem:[%s14607_s1 + $0xae8] ss:$16 sps:$4 sm:$0xff]   ;;  %v10179_v6 = vld [vmem:[%s14607_s1 + $0xb04] ss:$16 sps:$4 sm:$0xff]  }
 0x128   :  { %6701 = vmatprep.subr.bf16.mxu0 %v10093_v7  ;;  %7517 = vmatprep.subr.bf16.mxu1 %v10096_v8  ;;  %v10182_v7 = vld [vmem:[%s14607_s1 + $0xb0c] ss:$16 sps:$4 sm:$0xff]   ;;  %v10177_v8 = vld [vmem:[%s14607_s1 + $0xb00] ss:$16 sps:$4 sm:$0xff]  }
 0x12b   :  { %6702 = vmatpush1.bf16.msra.mxu0 %v10091_v9  ;;  %7518 = vmatpush1.bf16.msra.mxu1 %v10094_v10  ;;  %v10180_v9 = vld [vmem:[%s14607_s1 + $0xb08] ss:$16 sps:$4 sm:$0xff]   ;;  %v10185_v10 = vld [vmem:[%s14607_s1 + $0xb24] ss:$16 sps:$4 sm:$0xff]  }
 0x12c   :  { %6703 = vmatprep.subr.bf16.mxu0 %v10099_v11  ;;  %7519 = vmatprep.subr.bf16.mxu1 %v10102_v12  ;;  %v10188_v11 = vld [vmem:[%s14607_s1 + $0xb2c] ss:$16 sps:$4 sm:$0xff]   ;;  %v10183_v12 = vld [vmem:[%s14607_s1 + $0xb20] ss:$16 sps:$4 sm:$0xff]  }
 0x12f   :  { %6704 = vmatpush1.bf16.msra.mxu0 %v10097_v13  ;;  %7520 = vmatpush1.bf16.msra.mxu1 %v10100_v14  ;;  %v10186_v13 = vld [vmem:[%s14607_s1 + $0xb28] ss:$16 sps:$4 sm:$0xff]   ;;  %v10191_v14 = vld [vmem:[%s14607_s1 + $0xb44] ss:$16 sps:$4 sm:$0xff]  }
 0x130   :  { %6705 = vmatprep.subr.bf16.mxu0 %v10105_v15  ;;  %7521 = vmatprep.subr.bf16.mxu1 %v10108_v16  ;;  %v10194_v15 = vld [vmem:[%s14607_s1 + $0xb4c] ss:$16 sps:$4 sm:$0xff]   ;;  %v10189_v16 = vld [vmem:[%s14607_s1 + $0xb40] ss:$16 sps:$4 sm:$0xff]  }
 0x133   :  { %6706 = vmatpush1.bf16.msra.mxu0 %v10103_v17  ;;  %7522 = vmatpush1.bf16.msra.mxu1 %v10106_v18  ;;  %v10192_v17 = vld [vmem:[%s14607_s1 + $0xb48] ss:$16 sps:$4 sm:$0xff]   ;;  %v10197_v18 = vld [vmem:[%s14607_s1 + $0xb64] ss:$16 sps:$4 sm:$0xff]  }
 0x134   :  { %6707 = vmatprep.subr.bf16.mxu0 %v10111_v19  ;;  %7523 = vmatprep.subr.bf16.mxu1 %v10114_v20  ;;  %v10200_v19 = vld [vmem:[%s14607_s1 + $0xb6c] ss:$16 sps:$4 sm:$0xff]   ;;  %v10195_v20 = vld [vmem:[%s14607_s1 + $0xb60] ss:$16 sps:$4 sm:$0xff]  }
 0x137   :  { %6708 = vmatpush1.bf16.msra.mxu0 %v10109_v21  ;;  %7524 = vmatpush1.bf16.msra.mxu1 %v10112_v22  ;;  %v10198_v21 = vld [vmem:[%s14607_s1 + $0xb68] ss:$16 sps:$4 sm:$0xff]   ;;  %v10203_v22 = vld [vmem:[%s14607_s1 + $0xb84] ss:$16 sps:$4 sm:$0xff]  }
 0x138   :  { %6709 = vmatprep.subr.bf16.mxu0 %v10118_v23  ;;  %7525 = vmatprep.subr.bf16.mxu1 %v10121_v24  ;;  %v10206_v23 = vld [vmem:[%s14607_s1 + $0xb8c] ss:$16 sps:$4 sm:$0xff]   ;;  %v10201_v24 = vld [vmem:[%s14607_s1 + $0xb80] ss:$16 sps:$4 sm:$0xff]  }
 0x13b   :  { %6710 = vmatpush1.bf16.msra.mxu0 %v10116_v25  ;;  %7526 = vmatpush1.bf16.msra.mxu1 %v10119_v26  ;;  %v10204_v25 = vld [vmem:[%s14607_s1 + $0xb88] ss:$16 sps:$4 sm:$0xff]   ;;  %v10209_v26 = vld [vmem:[%s14607_s1 + $0xba4] ss:$16 sps:$4 sm:$0xff]  }
 0x13c   :  { %6711 = vmatprep.subr.bf16.mxu0 %v10125_v27  ;;  %7527 = vmatprep.subr.bf16.mxu1 %v10128_v28  ;;  %v10212_v27 = vld [vmem:[%s14607_s1 + $0xbac] ss:$16 sps:$4 sm:$0xff]   ;;  %v10207_v28 = vld [vmem:[%s14607_s1 + $0xba0] ss:$16 sps:$4 sm:$0xff]  }
 0x13f   :  { %6712 = vmatpush1.bf16.msra.mxu0 %v10123_v29  ;;  %7528 = vmatpush1.bf16.msra.mxu1 %v10126_v30  ;;  %v10210_v29 = vld [vmem:[%s14607_s1 + $0xba8] ss:$16 sps:$4 sm:$0xff]   ;;  %v10216_v30 = vld [vmem:[%s14607_s1 + $0xbc4] ss:$16 sps:$4 sm:$0xff]  }
 0x140   :  { %6732 = vmatprep.subr.bf16.mxu0 %v10131_v31  ;;  %7548 = vmatprep.subr.bf16.mxu1 %v10134_v32  ;;  %v10219_v31 = vld [vmem:[%s14607_s1 + $0xbcc] ss:$16 sps:$4 sm:$0xff]   ;;  %v10214_v32 = vld [vmem:[%s14607_s1 + $0xbc0] ss:$16 sps:$4 sm:$0xff]  }
 0x142   :  { %6714 = vmatmul.mubr.bf16.vlgmr.msra.gmra.mrb[0].mxu0 %v8308_v34  ;;  %7530 = vmatmul.mubr.bf16.vlgmr.msra.gmra.mrb[0].mxu1 %v8308_v34  ;;  %v10223_v34 = vld [vmem:[%s14607_s1 + $0xbe4] ss:$16 sps:$4 sm:$0xff]  }
 0x143   :  { %6733 = vmatpush1.bf16.msra.mxu0 %v10129_v35  ;;  %7549 = vmatpush1.bf16.msra.mxu1 %v10132_v36  ;;  %v10226_v35 = vld [vmem:[%s14607_s1 + $0xbec] ss:$16 sps:$4 sm:$0xff]   ;;  %v10221_v36 = vld [vmem:[%s14607_s1 + $0xbe0] ss:$16 sps:$4 sm:$0xff]  }
 0x144   :  { %6734 = vmatprep.subr.bf16.mxu0 %v10137_v37  ;;  %7550 = vmatprep.subr.bf16.mxu1 %v10140_v38  ;;  %v10224_v37 = vld [vmem:[%s14607_s1 + $0xbe8] ss:$16 sps:$4 sm:$0xff]   ;;  %v10229_v38 = vld [vmem:[%s14607_s1 + $0xc04] ss:$16 sps:$4 sm:$0xff]  }
 0x145   :  { %6723 = vmatprep.mubr.bf16.mxu0 %v8341_v41  ;;  %7539 = vmatprep.mubr.bf16.mxu1 %v8341_v41  ;;  %v8310_v41 = vcombine.low %v12300_v44, %v12305_v45  ;;  %v10238_v44 = vld [vmem:[%s14607_s1 + $0xc2c] ss:$16 sps:$4 sm:$0xff]   ;;  %v10233_v45 = vld [vmem:[%s14607_s1 + $0xc20] ss:$16 sps:$4 sm:$0xff]  }
 0x147   :  { %6735 = vmatpush1.bf16.msra.mxu0 %v10135_v39  ;;  %7551 = vmatpush1.bf16.msra.mxu1 %v10138_v40  ;;  %v10232_v39 = vld [vmem:[%s14607_s1 + $0xc0c] ss:$16 sps:$4 sm:$0xff]  }
 0x148   :  { %6736 = vmatprep.subr.bf16.mxu0 %v10143_v42  ;;  %7552 = vmatprep.subr.bf16.mxu1 %v10146_v43  ;;  %v50_v40 = vld [vmem:[%s14608_s0 + $0x128] sm:$0x11]  ;;  %v10227_v42 = vld [vmem:[%s14607_s1 + $0xc00] ss:$16 sps:$4 sm:$0xff]  }
 0x149   :  { %v10230_v43 = vld [vmem:[%s14607_s1 + $0xc08] ss:$16 sps:$4 sm:$0xff]  }
 0x14a   :  { %6724 = vmatmul.mubr.bf16.gmra.mrb[4].mxu0 %v8340_v46  ;;  %7540 = vmatmul.mubr.bf16.gmra.mrb[4].mxu1 %v8340_v46  ;;  %v10235_v46 = vld [vmem:[%s14607_s1 + $0xc24] ss:$16 sps:$4 sm:$0xff]  }
 0x14b   :  { %6737 = vmatpush1.bf16.msra.mxu0 %v10141_v47  ;;  %7553 = vmatpush1.bf16.msra.mxu1 %v10144_v48  ;;  %v10236_v47 = vld [vmem:[%s14607_s1 + $0xc28] ss:$16 sps:$4 sm:$0xff]   ;;  %v8343_v48 = vcombine.high %v50_v40, %v50_v40 }
 0x14c   :  { %6738 = vmatprep.subr.bf16.mxu0 %v10149_v49  ;;  %7554 = vmatprep.subr.bf16.mxu1 %v10152_v50  ;;  %v10241_v49 = vld [vmem:[%s14607_s1 + $0xc44] ss:$16 sps:$4 sm:$0xff]   ;;  %v10244_v50 = vld [vmem:[%s14607_s1 + $0xc4c] ss:$16 sps:$4 sm:$0xff]  }
 0x14d   :  { %6764 = vmatprep.mubr.bf16.mxu0 %v8311_v51  ;;  %7580 = vmatprep.mubr.bf16.mxu1 %v8311_v51  ;;  %v12509_v51 = vld [vmem:[%s14608_s0 + $0x30] sm:$0xff] }
 0x14f   :  { %6739 = vmatpush1.bf16.msra.mxu0 %v10147_v52  ;;  %7555 = vmatpush1.bf16.msra.mxu1 %v10150_v53  ;;  %v12514_v52 = vld [vmem:[%s14608_s0 + $0xb0] sm:$0xff]  ;;  %v8342_v53 = vcombine.low %v50_v40, %v50_v40  ;;  %v10315_v40 = vld [vmem:[%s14607_s1 + $0xdc8] ss:$16 sps:$4 sm:$0xff]  }
 0x150   :  { %6740 = vmatprep.subr.bf16.mxu0 %v10155_v54  ;;  %7556 = vmatprep.subr.bf16.mxu1 %v10158_v55  ;;  %v10239_v54 = vld [vmem:[%s14607_s1 + $0xc40] ss:$16 sps:$4 sm:$0xff]   ;;  %v10242_v55 = vld [vmem:[%s14607_s1 + $0xc48] ss:$16 sps:$4 sm:$0xff]  }
 0x153   :  { %6741 = vmatpush1.bf16.msra.mxu0 %v10153_v56  ;;  %7557 = vmatpush1.bf16.msra.mxu1 %v10156_v57  ;;  %v10247_v56 = vld [vmem:[%s14607_s1 + $0xc64] ss:$16 sps:$4 sm:$0xff]   ;;  %v10250_v57 = vld [vmem:[%s14607_s1 + $0xc6c] ss:$16 sps:$4 sm:$0xff]  }
 0x154   :  { %6742 = vmatprep.subr.bf16.mxu0 %v10161_v58  ;;  %7558 = vmatprep.subr.bf16.mxu1 %v10164_v59  ;;  %v8313_v58 = vcombine.high %v12509_v51, %v12514_v52  ;;  %v10245_v59 = vld [vmem:[%s14607_s1 + $0xc60] ss:$16 sps:$4 sm:$0xff]  }
 0x157   :  { %6743 = vmatpush1.bf16.msra.mxu0 %v10159_v60  ;;  %7559 = vmatpush1.bf16.msra.mxu1 %v10162_v61  ;;  %v10248_v60 = vld [vmem:[%s14607_s1 + $0xc68] ss:$16 sps:$4 sm:$0xff]   ;;  %v10253_v61 = vld [vmem:[%s14607_s1 + $0xc84] ss:$16 sps:$4 sm:$0xff]  }
 0x158   :  { %6744 = vmatprep.subr.bf16.mxu0 %v10167_v62  ;;  %7560 = vmatprep.subr.bf16.mxu1 %v10170_v63  ;;  %v10256_v62 = vld [vmem:[%s14607_s1 + $0xc8c] ss:$16 sps:$4 sm:$0xff]   ;;  %v10251_v63 = vld [vmem:[%s14607_s1 + $0xc80] ss:$16 sps:$4 sm:$0xff]  }
 0x15b   :  { %6745 = vmatpush1.bf16.msra.mxu0 %v10165_v0  ;;  %7561 = vmatpush1.bf16.msra.mxu1 %v10168_v1  ;;  %v10254_v0 = vld [vmem:[%s14607_s1 + $0xc88] ss:$16 sps:$4 sm:$0xff]   ;;  %v10259_v1 = vld [vmem:[%s14607_s1 + $0xca4] ss:$16 sps:$4 sm:$0xff]  }
 0x15c   :  { %6746 = vmatprep.subr.bf16.mxu0 %v10173_v2  ;;  %7562 = vmatprep.subr.bf16.mxu1 %v10176_v3  ;;  %v10262_v2 = vld [vmem:[%s14607_s1 + $0xcac] ss:$16 sps:$4 sm:$0xff]   ;;  %v10257_v3 = vld [vmem:[%s14607_s1 + $0xca0] ss:$16 sps:$4 sm:$0xff]  }
 0x15f   :  { %6747 = vmatpush1.bf16.msra.mxu0 %v10171_v4  ;;  %7563 = vmatpush1.bf16.msra.mxu1 %v10174_v5  ;;  %v10260_v4 = vld [vmem:[%s14607_s1 + $0xca8] ss:$16 sps:$4 sm:$0xff]   ;;  %v10265_v5 = vld [vmem:[%s14607_s1 + $0xcc4] ss:$16 sps:$4 sm:$0xff]  }
 0x160   :  { %6748 = vmatprep.subr.bf16.mxu0 %v10179_v6  ;;  %7564 = vmatprep.subr.bf16.mxu1 %v10182_v7  ;;  %v10268_v6 = vld [vmem:[%s14607_s1 + $0xccc] ss:$16 sps:$4 sm:$0xff]   ;;  %v10263_v7 = vld [vmem:[%s14607_s1 + $0xcc0] ss:$16 sps:$4 sm:$0xff]  }
 0x163   :  { %6749 = vmatpush1.bf16.msra.mxu0 %v10177_v8  ;;  %7565 = vmatpush1.bf16.msra.mxu1 %v10180_v9  ;;  %v10266_v8 = vld [vmem:[%s14607_s1 + $0xcc8] ss:$16 sps:$4 sm:$0xff]   ;;  %v10271_v9 = vld [vmem:[%s14607_s1 + $0xce4] ss:$16 sps:$4 sm:$0xff]  }
 0x164   :  { %6750 = vmatprep.subr.bf16.mxu0 %v10185_v10  ;;  %7566 = vmatprep.subr.bf16.mxu1 %v10188_v11  ;;  %v10274_v10 = vld [vmem:[%s14607_s1 + $0xcec] ss:$16 sps:$4 sm:$0xff]   ;;  %v10269_v11 = vld [vmem:[%s14607_s1 + $0xce0] ss:$16 sps:$4 sm:$0xff]  }
 0x167   :  { %6751 = vmatpush1.bf16.msra.mxu0 %v10183_v12  ;;  %7567 = vmatpush1.bf16.msra.mxu1 %v10186_v13  ;;  %v10272_v12 = vld [vmem:[%s14607_s1 + $0xce8] ss:$16 sps:$4 sm:$0xff]   ;;  %v10277_v13 = vld [vmem:[%s14607_s1 + $0xd04] ss:$16 sps:$4 sm:$0xff]  }
 0x168   :  { %6752 = vmatprep.subr.bf16.mxu0 %v10191_v14  ;;  %7568 = vmatprep.subr.bf16.mxu1 %v10194_v15  ;;  %v10280_v14 = vld [vmem:[%s14607_s1 + $0xd0c] ss:$16 sps:$4 sm:$0xff]   ;;  %v10275_v15 = vld [vmem:[%s14607_s1 + $0xd00] ss:$16 sps:$4 sm:$0xff]  }
 0x16b   :  { %6753 = vmatpush1.bf16.msra.mxu0 %v10189_v16  ;;  %7569 = vmatpush1.bf16.msra.mxu1 %v10192_v17  ;;  %v10278_v16 = vld [vmem:[%s14607_s1 + $0xd08] ss:$16 sps:$4 sm:$0xff]   ;;  %v10283_v17 = vld [vmem:[%s14607_s1 + $0xd24] ss:$16 sps:$4 sm:$0xff]  }
 0x16c   :  { %6754 = vmatprep.subr.bf16.mxu0 %v10197_v18  ;;  %7570 = vmatprep.subr.bf16.mxu1 %v10200_v19  ;;  %v10286_v18 = vld [vmem:[%s14607_s1 + $0xd2c] ss:$16 sps:$4 sm:$0xff]   ;;  %v10281_v19 = vld [vmem:[%s14607_s1 + $0xd20] ss:$16 sps:$4 sm:$0xff]  }
 0x16f   :  { %6755 = vmatpush1.bf16.msra.mxu0 %v10195_v20  ;;  %7571 = vmatpush1.bf16.msra.mxu1 %v10198_v21  ;;  %v10284_v20 = vld [vmem:[%s14607_s1 + $0xd28] ss:$16 sps:$4 sm:$0xff]   ;;  %v10289_v21 = vld [vmem:[%s14607_s1 + $0xd44] ss:$16 sps:$4 sm:$0xff]  }
 0x170   :  { %6756 = vmatprep.subr.bf16.mxu0 %v10203_v22  ;;  %7572 = vmatprep.subr.bf16.mxu1 %v10206_v23  ;;  %v10292_v22 = vld [vmem:[%s14607_s1 + $0xd4c] ss:$16 sps:$4 sm:$0xff]   ;;  %v10287_v23 = vld [vmem:[%s14607_s1 + $0xd40] ss:$16 sps:$4 sm:$0xff]  }
 0x173   :  { %6757 = vmatpush1.bf16.msra.mxu0 %v10201_v24  ;;  %7573 = vmatpush1.bf16.msra.mxu1 %v10204_v25  ;;  %v10290_v24 = vld [vmem:[%s14607_s1 + $0xd48] ss:$16 sps:$4 sm:$0xff]   ;;  %v10295_v25 = vld [vmem:[%s14607_s1 + $0xd64] ss:$16 sps:$4 sm:$0xff]  }
 0x174   :  { %6758 = vmatprep.subr.bf16.mxu0 %v10209_v26  ;;  %7574 = vmatprep.subr.bf16.mxu1 %v10212_v27  ;;  %v10298_v26 = vld [vmem:[%s14607_s1 + $0xd6c] ss:$16 sps:$4 sm:$0xff]   ;;  %v10293_v27 = vld [vmem:[%s14607_s1 + $0xd60] ss:$16 sps:$4 sm:$0xff]  }
 0x177   :  { %6759 = vmatpush1.bf16.msra.mxu0 %v10207_v28  ;;  %7575 = vmatpush1.bf16.msra.mxu1 %v10210_v29  ;;  %v10296_v28 = vld [vmem:[%s14607_s1 + $0xd68] ss:$16 sps:$4 sm:$0xff]   ;;  %v10301_v29 = vld [vmem:[%s14607_s1 + $0xd84] ss:$16 sps:$4 sm:$0xff]  }
 0x178   :  { %6760 = vmatprep.subr.bf16.mxu0 %v10216_v30  ;;  %7576 = vmatprep.subr.bf16.mxu1 %v10219_v31  ;;  %v10304_v30 = vld [vmem:[%s14607_s1 + $0xd8c] ss:$16 sps:$4 sm:$0xff]   ;;  %v10299_v31 = vld [vmem:[%s14607_s1 + $0xd80] ss:$16 sps:$4 sm:$0xff]  }
 0x17b   :  { %6761 = vmatpush1.bf16.msra.mxu0 %v10214_v32  ;;  %7577 = vmatpush1.bf16.msra.mxu1 %v10217_v33  ;;  %v10302_v32 = vld [vmem:[%s14607_s1 + $0xd88] ss:$16 sps:$4 sm:$0xff]   ;;  %v10307_v33 = vld [vmem:[%s14607_s1 + $0xda4] ss:$16 sps:$4 sm:$0xff]  }
 0x17c   :  { %6762 = vmatprep.subr.bf16.mxu0 %v10223_v34  ;;  %7578 = vmatprep.subr.bf16.mxu1 %v10226_v35  ;;  %v10310_v34 = vld [vmem:[%s14607_s1 + $0xdac] ss:$16 sps:$4 sm:$0xff]   ;;  %v10305_v35 = vld [vmem:[%s14607_s1 + $0xda0] ss:$16 sps:$4 sm:$0xff]  }
 0x17f   :  { %6763 = vmatpush1.bf16.msra.mxu0 %v10221_v36  ;;  %7579 = vmatpush1.bf16.msra.mxu1 %v10224_v37  ;;  %v10308_v36 = vld [vmem:[%s14607_s1 + $0xda8] ss:$16 sps:$4 sm:$0xff]   ;;  %v10314_v37 = vld [vmem:[%s14607_s1 + $0xdc4] ss:$16 sps:$4 sm:$0xff]  }
 0x180   :  { %6783 = vmatprep.subr.bf16.mxu0 %v10229_v38  ;;  %7599 = vmatprep.subr.bf16.mxu1 %v10232_v39  ;;  %v10317_v38 = vld [vmem:[%s14607_s1 + $0xdcc] ss:$16 sps:$4 sm:$0xff]   ;;  %v10312_v39 = vld [vmem:[%s14607_s1 + $0xdc0] ss:$16 sps:$4 sm:$0xff]  }
 0x182   :  { %6765 = vmatmul.mubr.bf16.vlgmr.msra.gmra.mrb[0].mxu0 %v8310_v41  ;;  %7581 = vmatmul.mubr.bf16.vlgmr.msra.gmra.mrb[0].mxu1 %v8310_v41  ;;  %v10321_v41 = vld [vmem:[%s14607_s1 + $0xde4] ss:$16 sps:$4 sm:$0xff]  }
 0x183   :  { %6784 = vmatpush1.bf16.msra.mxu0 %v10227_v42  ;;  %7600 = vmatpush1.bf16.msra.mxu1 %v10230_v43  ;;  %v10324_v42 = vld [vmem:[%s14607_s1 + $0xdec] ss:$16 sps:$4 sm:$0xff]   ;;  %v10319_v43 = vld [vmem:[%s14607_s1 + $0xde0] ss:$16 sps:$4 sm:$0xff]  }
 0x184   :  { %6785 = vmatprep.subr.bf16.mxu0 %v10235_v46  ;;  %7601 = vmatprep.subr.bf16.mxu1 %v10238_v44  ;;  %v10322_v46 = vld [vmem:[%s14607_s1 + $0xde8] ss:$16 sps:$4 sm:$0xff]   ;;  %v10327_v44 = vld [vmem:[%s14607_s1 + $0xe04] ss:$16 sps:$4 sm:$0xff]  }
 0x185   :  { %6774 = vmatprep.mubr.bf16.mxu0 %v8343_v48  ;;  %7590 = vmatprep.mubr.bf16.mxu1 %v8343_v48  ;;  %v8312_v48 = vcombine.low %v12509_v51, %v12514_v52  ;;  %v10336_v51 = vld [vmem:[%s14607_s1 + $0xe2c] ss:$16 sps:$4 sm:$0xff]   ;;  %v10331_v52 = vld [vmem:[%s14607_s1 + $0xe20] ss:$16 sps:$4 sm:$0xff]  }
 0x187   :  { %6786 = vmatpush1.bf16.msra.mxu0 %v10233_v45  ;;  %7602 = vmatpush1.bf16.msra.mxu1 %v10236_v47  ;;  %v10330_v45 = vld [vmem:[%s14607_s1 + $0xe0c] ss:$16 sps:$4 sm:$0xff]   ;;  %v51_v47 = vld [vmem:[%s14608_s0 + $0x130] sm:$0x11] }
 0x188   :  { %6787 = vmatprep.subr.bf16.mxu0 %v10241_v49  ;;  %7603 = vmatprep.subr.bf16.mxu1 %v10244_v50  ;;  %v10325_v49 = vld [vmem:[%s14607_s1 + $0xe00] ss:$16 sps:$4 sm:$0xff]   ;;  %v10328_v50 = vld [vmem:[%s14607_s1 + $0xe08] ss:$16 sps:$4 sm:$0xff]  }
 0x18a   :  { %6775 = vmatmul.mubr.bf16.gmra.mrb[4].mxu0 %v8342_v53  ;;  %7591 = vmatmul.mubr.bf16.gmra.mrb[4].mxu1 %v8342_v53  ;;  %v10333_v53 = vld [vmem:[%s14607_s1 + $0xe24] ss:$16 sps:$4 sm:$0xff]  }
 0x18b   :  { %6788 = vmatpush1.bf16.msra.mxu0 %v10239_v54  ;;  %7604 = vmatpush1.bf16.msra.mxu1 %v10242_v55  ;;  %v10334_v54 = vld [vmem:[%s14607_s1 + $0xe28] ss:$16 sps:$4 sm:$0xff]   ;;  %v8345_v55 = vcombine.high %v51_v47, %v51_v47 }
 0x18c   :  { %6789 = vmatprep.subr.bf16.mxu0 %v10247_v56  ;;  %7605 = vmatprep.subr.bf16.mxu1 %v10250_v57  ;;  %v10339_v56 = vld [vmem:[%s14607_s1 + $0xe44] ss:$16 sps:$4 sm:$0xff]   ;;  %v10342_v57 = vld [vmem:[%s14607_s1 + $0xe4c] ss:$16 sps:$4 sm:$0xff]  }
 0x18d   :  { %6815 = vmatprep.mubr.bf16.mxu0 %v8313_v58  ;;  %7631 = vmatprep.mubr.bf16.mxu1 %v8313_v58  ;;  %v12718_v58 = vld [vmem:[%s14608_s0 + $0x38] sm:$0xff] }
 0x18f   :  { %6790 = vmatpush1.bf16.msra.mxu0 %v10245_v59  ;;  %7606 = vmatpush1.bf16.msra.mxu1 %v10248_v60  ;;  %v12723_v59 = vld [vmem:[%s14608_s0 + $0xb8] sm:$0xff]  ;;  %v8344_v60 = vcombine.low %v51_v47, %v51_v47 }
 0x190   :  { %6791 = vmatprep.subr.bf16.mxu0 %v10253_v61  ;;  %7607 = vmatprep.subr.bf16.mxu1 %v10256_v62  ;;  %v10337_v61 = vld [vmem:[%s14607_s1 + $0xe40] ss:$16 sps:$4 sm:$0xff]   ;;  %v10340_v62 = vld [vmem:[%s14607_s1 + $0xe48] ss:$16 sps:$4 sm:$0xff]  }
 0x191   :  { %v10413_v47 = vld [vmem:[%s14607_s1 + $0xfc8] ss:$16 sps:$4 sm:$0xff]  }
 0x193   :  { %6792 = vmatpush1.bf16.msra.mxu0 %v10251_v63  ;;  %7608 = vmatpush1.bf16.msra.mxu1 %v10254_v0  ;;  %v10345_v63 = vld [vmem:[%s14607_s1 + $0xe64] ss:$16 sps:$4 sm:$0xff]   ;;  %v10348_v0 = vld [vmem:[%s14607_s1 + $0xe6c] ss:$16 sps:$4 sm:$0xff]  }
 0x194   :  { %6793 = vmatprep.subr.bf16.mxu0 %v10259_v1  ;;  %7609 = vmatprep.subr.bf16.mxu1 %v10262_v2  ;;  %v8315_v1 = vcombine.high %v12718_v58, %v12723_v59  ;;  %v10343_v2 = vld [vmem:[%s14607_s1 + $0xe60] ss:$16 sps:$4 sm:$0xff]  }
 0x197   :  { %6794 = vmatpush1.bf16.msra.mxu0 %v10257_v3  ;;  %7610 = vmatpush1.bf16.msra.mxu1 %v10260_v4  ;;  %v10346_v3 = vld [vmem:[%s14607_s1 + $0xe68] ss:$16 sps:$4 sm:$0xff]   ;;  %v10351_v4 = vld [vmem:[%s14607_s1 + $0xe84] ss:$16 sps:$4 sm:$0xff]  }
 0x198   :  { %6795 = vmatprep.subr.bf16.mxu0 %v10265_v5  ;;  %7611 = vmatprep.subr.bf16.mxu1 %v10268_v6  ;;  %v10354_v5 = vld [vmem:[%s14607_s1 + $0xe8c] ss:$16 sps:$4 sm:$0xff]   ;;  %v10349_v6 = vld [vmem:[%s14607_s1 + $0xe80] ss:$16 sps:$4 sm:$0xff]  }
 0x19b   :  { %6796 = vmatpush1.bf16.msra.mxu0 %v10263_v7  ;;  %7612 = vmatpush1.bf16.msra.mxu1 %v10266_v8  ;;  %v10352_v7 = vld [vmem:[%s14607_s1 + $0xe88] ss:$16 sps:$4 sm:$0xff]   ;;  %v10357_v8 = vld [vmem:[%s14607_s1 + $0xea4] ss:$16 sps:$4 sm:$0xff]  }
 0x19c   :  { %6797 = vmatprep.subr.bf16.mxu0 %v10271_v9  ;;  %7613 = vmatprep.subr.bf16.mxu1 %v10274_v10  ;;  %v10360_v9 = vld [vmem:[%s14607_s1 + $0xeac] ss:$16 sps:$4 sm:$0xff]   ;;  %v10355_v10 = vld [vmem:[%s14607_s1 + $0xea0] ss:$16 sps:$4 sm:$0xff]  }
 0x19f   :  { %6798 = vmatpush1.bf16.msra.mxu0 %v10269_v11  ;;  %7614 = vmatpush1.bf16.msra.mxu1 %v10272_v12  ;;  %v10358_v11 = vld [vmem:[%s14607_s1 + $0xea8] ss:$16 sps:$4 sm:$0xff]   ;;  %v10363_v12 = vld [vmem:[%s14607_s1 + $0xec4] ss:$16 sps:$4 sm:$0xff]  }
 0x1a0   :  { %6799 = vmatprep.subr.bf16.mxu0 %v10277_v13  ;;  %7615 = vmatprep.subr.bf16.mxu1 %v10280_v14  ;;  %v10366_v13 = vld [vmem:[%s14607_s1 + $0xecc] ss:$16 sps:$4 sm:$0xff]   ;;  %v10361_v14 = vld [vmem:[%s14607_s1 + $0xec0] ss:$16 sps:$4 sm:$0xff]  }
 0x1a3   :  { %6800 = vmatpush1.bf16.msra.mxu0 %v10275_v15  ;;  %7616 = vmatpush1.bf16.msra.mxu1 %v10278_v16  ;;  %v10364_v15 = vld [vmem:[%s14607_s1 + $0xec8] ss:$16 sps:$4 sm:$0xff]   ;;  %v10369_v16 = vld [vmem:[%s14607_s1 + $0xee4] ss:$16 sps:$4 sm:$0xff]  }
 0x1a4   :  { %6801 = vmatprep.subr.bf16.mxu0 %v10283_v17  ;;  %7617 = vmatprep.subr.bf16.mxu1 %v10286_v18  ;;  %v10372_v17 = vld [vmem:[%s14607_s1 + $0xeec] ss:$16 sps:$4 sm:$0xff]   ;;  %v10367_v18 = vld [vmem:[%s14607_s1 + $0xee0] ss:$16 sps:$4 sm:$0xff]  }
 0x1a7   :  { %6802 = vmatpush1.bf16.msra.mxu0 %v10281_v19  ;;  %7618 = vmatpush1.bf16.msra.mxu1 %v10284_v20  ;;  %v10370_v19 = vld [vmem:[%s14607_s1 + $0xee8] ss:$16 sps:$4 sm:$0xff]   ;;  %v10375_v20 = vld [vmem:[%s14607_s1 + $0xf04] ss:$16 sps:$4 sm:$0xff]  }
 0x1a8   :  { %6803 = vmatprep.subr.bf16.mxu0 %v10289_v21  ;;  %7619 = vmatprep.subr.bf16.mxu1 %v10292_v22  ;;  %v10378_v21 = vld [vmem:[%s14607_s1 + $0xf0c] ss:$16 sps:$4 sm:$0xff]   ;;  %v10373_v22 = vld [vmem:[%s14607_s1 + $0xf00] ss:$16 sps:$4 sm:$0xff]  }
 0x1ab   :  { %6804 = vmatpush1.bf16.msra.mxu0 %v10287_v23  ;;  %7620 = vmatpush1.bf16.msra.mxu1 %v10290_v24  ;;  %v10376_v23 = vld [vmem:[%s14607_s1 + $0xf08] ss:$16 sps:$4 sm:$0xff]   ;;  %v10381_v24 = vld [vmem:[%s14607_s1 + $0xf24] ss:$16 sps:$4 sm:$0xff]  }
 0x1ac   :  { %6805 = vmatprep.subr.bf16.mxu0 %v10295_v25  ;;  %7621 = vmatprep.subr.bf16.mxu1 %v10298_v26  ;;  %v10384_v25 = vld [vmem:[%s14607_s1 + $0xf2c] ss:$16 sps:$4 sm:$0xff]   ;;  %v10379_v26 = vld [vmem:[%s14607_s1 + $0xf20] ss:$16 sps:$4 sm:$0xff]  }
 0x1af   :  { %6806 = vmatpush1.bf16.msra.mxu0 %v10293_v27  ;;  %7622 = vmatpush1.bf16.msra.mxu1 %v10296_v28  ;;  %v10382_v27 = vld [vmem:[%s14607_s1 + $0xf28] ss:$16 sps:$4 sm:$0xff]   ;;  %v10387_v28 = vld [vmem:[%s14607_s1 + $0xf44] ss:$16 sps:$4 sm:$0xff]  }
 0x1b0   :  { %6807 = vmatprep.subr.bf16.mxu0 %v10301_v29  ;;  %7623 = vmatprep.subr.bf16.mxu1 %v10304_v30  ;;  %v10390_v29 = vld [vmem:[%s14607_s1 + $0xf4c] ss:$16 sps:$4 sm:$0xff]   ;;  %v10385_v30 = vld [vmem:[%s14607_s1 + $0xf40] ss:$16 sps:$4 sm:$0xff]  }
 0x1b3   :  { %6808 = vmatpush1.bf16.msra.mxu0 %v10299_v31  ;;  %7624 = vmatpush1.bf16.msra.mxu1 %v10302_v32  ;;  %v10388_v31 = vld [vmem:[%s14607_s1 + $0xf48] ss:$16 sps:$4 sm:$0xff]   ;;  %v10393_v32 = vld [vmem:[%s14607_s1 + $0xf64] ss:$16 sps:$4 sm:$0xff]  }
 0x1b4   :  { %6809 = vmatprep.subr.bf16.mxu0 %v10307_v33  ;;  %7625 = vmatprep.subr.bf16.mxu1 %v10310_v34  ;;  %v10396_v33 = vld [vmem:[%s14607_s1 + $0xf6c] ss:$16 sps:$4 sm:$0xff]   ;;  %v10391_v34 = vld [vmem:[%s14607_s1 + $0xf60] ss:$16 sps:$4 sm:$0xff]  }
 0x1b7   :  { %6810 = vmatpush1.bf16.msra.mxu0 %v10305_v35  ;;  %7626 = vmatpush1.bf16.msra.mxu1 %v10308_v36  ;;  %v10394_v35 = vld [vmem:[%s14607_s1 + $0xf68] ss:$16 sps:$4 sm:$0xff]   ;;  %v10399_v36 = vld [vmem:[%s14607_s1 + $0xf84] ss:$16 sps:$4 sm:$0xff]  }
 0x1b8   :  { %6811 = vmatprep.subr.bf16.mxu0 %v10314_v37  ;;  %7627 = vmatprep.subr.bf16.mxu1 %v10317_v38  ;;  %v10402_v37 = vld [vmem:[%s14607_s1 + $0xf8c] ss:$16 sps:$4 sm:$0xff]   ;;  %v10397_v38 = vld [vmem:[%s14607_s1 + $0xf80] ss:$16 sps:$4 sm:$0xff]  }
 0x1bb   :  { %6812 = vmatpush1.bf16.msra.mxu0 %v10312_v39  ;;  %7628 = vmatpush1.bf16.msra.mxu1 %v10315_v40  ;;  %v10400_v39 = vld [vmem:[%s14607_s1 + $0xf88] ss:$16 sps:$4 sm:$0xff]   ;;  %v10405_v40 = vld [vmem:[%s14607_s1 + $0xfa4] ss:$16 sps:$4 sm:$0xff]  }
 0x1bc   :  { %6813 = vmatprep.subr.bf16.mxu0 %v10321_v41  ;;  %7629 = vmatprep.subr.bf16.mxu1 %v10324_v42  ;;  %v10408_v41 = vld [vmem:[%s14607_s1 + $0xfac] ss:$16 sps:$4 sm:$0xff]   ;;  %v10403_v42 = vld [vmem:[%s14607_s1 + $0xfa0] ss:$16 sps:$4 sm:$0xff]  }
 0x1bf   :  { %6814 = vmatpush1.bf16.msra.mxu0 %v10319_v43  ;;  %7630 = vmatpush1.bf16.msra.mxu1 %v10322_v46  ;;  %v10406_v43 = vld [vmem:[%s14607_s1 + $0xfa8] ss:$16 sps:$4 sm:$0xff]   ;;  %v10412_v46 = vld [vmem:[%s14607_s1 + $0xfc4] ss:$16 sps:$4 sm:$0xff]  }
 0x1c0   :  { %6834 = vmatprep.subr.bf16.mxu0 %v10327_v44  ;;  %7650 = vmatprep.subr.bf16.mxu1 %v10330_v45  ;;  %v10415_v44 = vld [vmem:[%s14607_s1 + $0xfcc] ss:$16 sps:$4 sm:$0xff]   ;;  %v10410_v45 = vld [vmem:[%s14607_s1 + $0xfc0] ss:$16 sps:$4 sm:$0xff]  }
 0x1c2   :  { %6816 = vmatmul.mubr.bf16.vlgmr.msra.gmra.mrb[0].mxu0 %v8312_v48  ;;  %7632 = vmatmul.mubr.bf16.vlgmr.msra.gmra.mrb[0].mxu1 %v8312_v48  ;;  %v10419_v48 = vld [vmem:[%s14607_s1 + $0xfe4] ss:$16 sps:$4 sm:$0xff]  }
 0x1c3   :  { %6835 = vmatpush1.bf16.msra.mxu0 %v10325_v49  ;;  %7651 = vmatpush1.bf16.msra.mxu1 %v10328_v50  ;;  %v10422_v49 = vld [vmem:[%s14607_s1 + $0xfec] ss:$16 sps:$4 sm:$0xff]   ;;  %v10417_v50 = vld [vmem:[%s14607_s1 + $0xfe0] ss:$16 sps:$4 sm:$0xff]  }
 0x1c4   :  { %6836 = vmatprep.subr.bf16.mxu0 %v10333_v53  ;;  %7652 = vmatprep.subr.bf16.mxu1 %v10336_v51  ;;  %v10420_v53 = vld [vmem:[%s14607_s1 + $0xfe8] ss:$16 sps:$4 sm:$0xff]   ;;  %v10425_v51 = vld [vmem:[%s14607_s1 + $0x1004] ss:$16 sps:$4 sm:$0xff]  }
 0x1c5   :  { %6825 = vmatprep.mubr.bf16.mxu0 %v8345_v55  ;;  %7641 = vmatprep.mubr.bf16.mxu1 %v8345_v55  ;;  %v8314_v55 = vcombine.low %v12718_v58, %v12723_v59  ;;  %v10434_v58 = vld [vmem:[%s14607_s1 + $0x102c] ss:$16 sps:$4 sm:$0xff]   ;;  %v10429_v59 = vld [vmem:[%s14607_s1 + $0x1020] ss:$16 sps:$4 sm:$0xff]  }
 0x1c7   :  { %6837 = vmatpush1.bf16.msra.mxu0 %v10331_v52  ;;  %7653 = vmatpush1.bf16.msra.mxu1 %v10334_v54  ;;  %v10428_v52 = vld [vmem:[%s14607_s1 + $0x100c] ss:$16 sps:$4 sm:$0xff]  }
 0x1c8   :  { %6838 = vmatprep.subr.bf16.mxu0 %v10339_v56  ;;  %7654 = vmatprep.subr.bf16.mxu1 %v10342_v57  ;;  %v52_v54 = vld [vmem:[%s14608_s0 + $0x138] sm:$0x11]  ;;  %v10423_v56 = vld [vmem:[%s14607_s1 + $0x1000] ss:$16 sps:$4 sm:$0xff]  }
 0x1c9   :  { %v10426_v57 = vld [vmem:[%s14607_s1 + $0x1008] ss:$16 sps:$4 sm:$0xff]  }
 0x1ca   :  { %6826 = vmatmul.mubr.bf16.gmra.mrb[4].mxu0 %v8344_v60  ;;  %7642 = vmatmul.mubr.bf16.gmra.mrb[4].mxu1 %v8344_v60  ;;  %v10431_v60 = vld [vmem:[%s14607_s1 + $0x1024] ss:$16 sps:$4 sm:$0xff]  }
 0x1cb   :  { %6839 = vmatpush1.bf16.msra.mxu0 %v10337_v61  ;;  %7655 = vmatpush1.bf16.msra.mxu1 %v10340_v62  ;;  %v10432_v61 = vld [vmem:[%s14607_s1 + $0x1028] ss:$16 sps:$4 sm:$0xff]   ;;  %v8347_v62 = vcombine.high %v52_v54, %v52_v54 }
 0x1cc   :  { %6840 = vmatprep.subr.bf16.mxu0 %v10345_v63  ;;  %7656 = vmatprep.subr.bf16.mxu1 %v10348_v0  ;;  %v10437_v63 = vld [vmem:[%s14607_s1 + $0x1044] ss:$16 sps:$4 sm:$0xff]   ;;  %v10440_v0 = vld [vmem:[%s14607_s1 + $0x104c] ss:$16 sps:$4 sm:$0xff]  }
 0x1cd   :  { %6866 = vmatprep.mubr.bf16.mxu0 %v8315_v1  ;;  %7682 = vmatprep.mubr.bf16.mxu1 %v8315_v1  ;;  %v12927_v1 = vld [vmem:[%s14608_s0 + $0x40] sm:$0xff] }
 0x1cf   :  { %6841 = vmatpush1.bf16.msra.mxu0 %v10343_v2  ;;  %7657 = vmatpush1.bf16.msra.mxu1 %v10346_v3  ;;  %v12932_v2 = vld [vmem:[%s14608_s0 + $0xc0] sm:$0xff]  ;;  %v8346_v3 = vcombine.low %v52_v54, %v52_v54  ;;  %v10511_v54 = vld [vmem:[%s14607_s1 + $0x11c8] ss:$16 sps:$4 sm:$0xff]  }
 0x1d0   :  { %6842 = vmatprep.subr.bf16.mxu0 %v10351_v4  ;;  %7658 = vmatprep.subr.bf16.mxu1 %v10354_v5  ;;  %v10435_v4 = vld [vmem:[%s14607_s1 + $0x1040] ss:$16 sps:$4 sm:$0xff]   ;;  %v10438_v5 = vld [vmem:[%s14607_s1 + $0x1048] ss:$16 sps:$4 sm:$0xff]  }
 0x1d3   :  { %6843 = vmatpush1.bf16.msra.mxu0 %v10349_v6  ;;  %7659 = vmatpush1.bf16.msra.mxu1 %v10352_v7  ;;  %v10443_v6 = vld [vmem:[%s14607_s1 + $0x1064] ss:$16 sps:$4 sm:$0xff]   ;;  %v10446_v7 = vld [vmem:[%s14607_s1 + $0x106c] ss:$16 sps:$4 sm:$0xff]  }
 0x1d4   :  { %6844 = vmatprep.subr.bf16.mxu0 %v10357_v8  ;;  %7660 = vmatprep.subr.bf16.mxu1 %v10360_v9  ;;  %v8317_v8 = vcombine.high %v12927_v1, %v12932_v2  ;;  %v10441_v9 = vld [vmem:[%s14607_s1 + $0x1060] ss:$16 sps:$4 sm:$0xff]  }
 0x1d7   :  { %6845 = vmatpush1.bf16.msra.mxu0 %v10355_v10  ;;  %7661 = vmatpush1.bf16.msra.mxu1 %v10358_v11  ;;  %v10444_v10 = vld [vmem:[%s14607_s1 + $0x1068] ss:$16 sps:$4 sm:$0xff]   ;;  %v10449_v11 = vld [vmem:[%s14607_s1 + $0x1084] ss:$16 sps:$4 sm:$0xff]  }
 0x1d8   :  { %6846 = vmatprep.subr.bf16.mxu0 %v10363_v12  ;;  %7662 = vmatprep.subr.bf16.mxu1 %v10366_v13  ;;  %v10452_v12 = vld [vmem:[%s14607_s1 + $0x108c] ss:$16 sps:$4 sm:$0xff]   ;;  %v10447_v13 = vld [vmem:[%s14607_s1 + $0x1080] ss:$16 sps:$4 sm:$0xff]  }
 0x1db   :  { %6847 = vmatpush1.bf16.msra.mxu0 %v10361_v14  ;;  %7663 = vmatpush1.bf16.msra.mxu1 %v10364_v15  ;;  %v10450_v14 = vld [vmem:[%s14607_s1 + $0x1088] ss:$16 sps:$4 sm:$0xff]   ;;  %v10455_v15 = vld [vmem:[%s14607_s1 + $0x10a4] ss:$16 sps:$4 sm:$0xff]  }
 0x1dc   :  { %6848 = vmatprep.subr.bf16.mxu0 %v10369_v16  ;;  %7664 = vmatprep.subr.bf16.mxu1 %v10372_v17  ;;  %v10458_v16 = vld [vmem:[%s14607_s1 + $0x10ac] ss:$16 sps:$4 sm:$0xff]   ;;  %v10453_v17 = vld [vmem:[%s14607_s1 + $0x10a0] ss:$16 sps:$4 sm:$0xff]  }
 0x1df   :  { %6849 = vmatpush1.bf16.msra.mxu0 %v10367_v18  ;;  %7665 = vmatpush1.bf16.msra.mxu1 %v10370_v19  ;;  %v10456_v18 = vld [vmem:[%s14607_s1 + $0x10a8] ss:$16 sps:$4 sm:$0xff]   ;;  %v10461_v19 = vld [vmem:[%s14607_s1 + $0x10c4] ss:$16 sps:$4 sm:$0xff]  }
 0x1e0   :  { %6850 = vmatprep.subr.bf16.mxu0 %v10375_v20  ;;  %7666 = vmatprep.subr.bf16.mxu1 %v10378_v21  ;;  %v10464_v20 = vld [vmem:[%s14607_s1 + $0x10cc] ss:$16 sps:$4 sm:$0xff]   ;;  %v10459_v21 = vld [vmem:[%s14607_s1 + $0x10c0] ss:$16 sps:$4 sm:$0xff]  }
 0x1e3   :  { %6851 = vmatpush1.bf16.msra.mxu0 %v10373_v22  ;;  %7667 = vmatpush1.bf16.msra.mxu1 %v10376_v23  ;;  %v10462_v22 = vld [vmem:[%s14607_s1 + $0x10c8] ss:$16 sps:$4 sm:$0xff]   ;;  %v10467_v23 = vld [vmem:[%s14607_s1 + $0x10e4] ss:$16 sps:$4 sm:$0xff]  }
 0x1e4   :  { %6852 = vmatprep.subr.bf16.mxu0 %v10381_v24  ;;  %7668 = vmatprep.subr.bf16.mxu1 %v10384_v25  ;;  %v10470_v24 = vld [vmem:[%s14607_s1 + $0x10ec] ss:$16 sps:$4 sm:$0xff]   ;;  %v10465_v25 = vld [vmem:[%s14607_s1 + $0x10e0] ss:$16 sps:$4 sm:$0xff]  }
 0x1e7   :  { %6853 = vmatpush1.bf16.msra.mxu0 %v10379_v26  ;;  %7669 = vmatpush1.bf16.msra.mxu1 %v10382_v27  ;;  %v10468_v26 = vld [vmem:[%s14607_s1 + $0x10e8] ss:$16 sps:$4 sm:$0xff]   ;;  %v10473_v27 = vld [vmem:[%s14607_s1 + $0x1104] ss:$16 sps:$4 sm:$0xff]  }
 0x1e8   :  { %6854 = vmatprep.subr.bf16.mxu0 %v10387_v28  ;;  %7670 = vmatprep.subr.bf16.mxu1 %v10390_v29  ;;  %v10476_v28 = vld [vmem:[%s14607_s1 + $0x110c] ss:$16 sps:$4 sm:$0xff]   ;;  %v10471_v29 = vld [vmem:[%s14607_s1 + $0x1100] ss:$16 sps:$4 sm:$0xff]  }
 0x1eb   :  { %6855 = vmatpush1.bf16.msra.mxu0 %v10385_v30  ;;  %7671 = vmatpush1.bf16.msra.mxu1 %v10388_v31  ;;  %v10474_v30 = vld [vmem:[%s14607_s1 + $0x1108] ss:$16 sps:$4 sm:$0xff]   ;;  %v10479_v31 = vld [vmem:[%s14607_s1 + $0x1124] ss:$16 sps:$4 sm:$0xff]  }
 0x1ec   :  { %6856 = vmatprep.subr.bf16.mxu0 %v10393_v32  ;;  %7672 = vmatprep.subr.bf16.mxu1 %v10396_v33  ;;  %v10482_v32 = vld [vmem:[%s14607_s1 + $0x112c] ss:$16 sps:$4 sm:$0xff]   ;;  %v10477_v33 = vld [vmem:[%s14607_s1 + $0x1120] ss:$16 sps:$4 sm:$0xff]  }
 0x1ef   :  { %6857 = vmatpush1.bf16.msra.mxu0 %v10391_v34  ;;  %7673 = vmatpush1.bf16.msra.mxu1 %v10394_v35  ;;  %v10480_v34 = vld [vmem:[%s14607_s1 + $0x1128] ss:$16 sps:$4 sm:$0xff]   ;;  %v10485_v35 = vld [vmem:[%s14607_s1 + $0x1144] ss:$16 sps:$4 sm:$0xff]  }
 0x1f0   :  { %6858 = vmatprep.subr.bf16.mxu0 %v10399_v36  ;;  %7674 = vmatprep.subr.bf16.mxu1 %v10402_v37  ;;  %v10488_v36 = vld [vmem:[%s14607_s1 + $0x114c] ss:$16 sps:$4 sm:$0xff]   ;;  %v10483_v37 = vld [vmem:[%s14607_s1 + $0x1140] ss:$16 sps:$4 sm:$0xff]  }
 0x1f3   :  { %6859 = vmatpush1.bf16.msra.mxu0 %v10397_v38  ;;  %7675 = vmatpush1.bf16.msra.mxu1 %v10400_v39  ;;  %v10486_v38 = vld [vmem:[%s14607_s1 + $0x1148] ss:$16 sps:$4 sm:$0xff]   ;;  %v10491_v39 = vld [vmem:[%s14607_s1 + $0x1164] ss:$16 sps:$4 sm:$0xff]  }
 0x1f4   :  { %6860 = vmatprep.subr.bf16.mxu0 %v10405_v40  ;;  %7676 = vmatprep.subr.bf16.mxu1 %v10408_v41  ;;  %v10494_v40 = vld [vmem:[%s14607_s1 + $0x116c] ss:$16 sps:$4 sm:$0xff]   ;;  %v10489_v41 = vld [vmem:[%s14607_s1 + $0x1160] ss:$16 sps:$4 sm:$0xff]  }
 0x1f7   :  { %6861 = vmatpush1.bf16.msra.mxu0 %v10403_v42  ;;  %7677 = vmatpush1.bf16.msra.mxu1 %v10406_v43  ;;  %v10492_v42 = vld [vmem:[%s14607_s1 + $0x1168] ss:$16 sps:$4 sm:$0xff]   ;;  %v10497_v43 = vld [vmem:[%s14607_s1 + $0x1184] ss:$16 sps:$4 sm:$0xff]  }
 0x1f8   :  { %6862 = vmatprep.subr.bf16.mxu0 %v10412_v46  ;;  %7678 = vmatprep.subr.bf16.mxu1 %v10415_v44  ;;  %v10500_v46 = vld [vmem:[%s14607_s1 + $0x118c] ss:$16 sps:$4 sm:$0xff]   ;;  %v10495_v44 = vld [vmem:[%s14607_s1 + $0x1180] ss:$16 sps:$4 sm:$0xff]  }
 0x1fb   :  { %6863 = vmatpush1.bf16.msra.mxu0 %v10410_v45  ;;  %7679 = vmatpush1.bf16.msra.mxu1 %v10413_v47  ;;  %v10498_v45 = vld [vmem:[%s14607_s1 + $0x1188] ss:$16 sps:$4 sm:$0xff]   ;;  %v10503_v47 = vld [vmem:[%s14607_s1 + $0x11a4] ss:$16 sps:$4 sm:$0xff]  }
 0x1fc   :  { %6864 = vmatprep.subr.bf16.mxu0 %v10419_v48  ;;  %7680 = vmatprep.subr.bf16.mxu1 %v10422_v49  ;;  %v10506_v48 = vld [vmem:[%s14607_s1 + $0x11ac] ss:$16 sps:$4 sm:$0xff]   ;;  %v10501_v49 = vld [vmem:[%s14607_s1 + $0x11a0] ss:$16 sps:$4 sm:$0xff]  }
 0x1ff   :  { %6865 = vmatpush1.bf16.msra.mxu0 %v10417_v50  ;;  %7681 = vmatpush1.bf16.msra.mxu1 %v10420_v53  ;;  %v10504_v50 = vld [vmem:[%s14607_s1 + $0x11a8] ss:$16 sps:$4 sm:$0xff]   ;;  %v10510_v53 = vld [vmem:[%s14607_s1 + $0x11c4] ss:$16 sps:$4 sm:$0xff]  }
 0x200   :  { %6885 = vmatprep.subr.bf16.mxu0 %v10425_v51  ;;  %7701 = vmatprep.subr.bf16.mxu1 %v10428_v52  ;;  %v10513_v51 = vld [vmem:[%s14607_s1 + $0x11cc] ss:$16 sps:$4 sm:$0xff]   ;;  %v10508_v52 = vld [vmem:[%s14607_s1 + $0x11c0] ss:$16 sps:$4 sm:$0xff]  }
 0x202   :  { %6867 = vmatmul.mubr.bf16.vlgmr.msra.gmra.mrb[0].mxu0 %v8314_v55  ;;  %7683 = vmatmul.mubr.bf16.vlgmr.msra.gmra.mrb[0].mxu1 %v8314_v55  ;;  %v10517_v55 = vld [vmem:[%s14607_s1 + $0x11e4] ss:$16 sps:$4 sm:$0xff]  }
 0x203   :  { %6886 = vmatpush1.bf16.msra.mxu0 %v10423_v56  ;;  %7702 = vmatpush1.bf16.msra.mxu1 %v10426_v57  ;;  %v10520_v56 = vld [vmem:[%s14607_s1 + $0x11ec] ss:$16 sps:$4 sm:$0xff]   ;;  %v10515_v57 = vld [vmem:[%s14607_s1 + $0x11e0] ss:$16 sps:$4 sm:$0xff]  }
 0x204   :  { %6887 = vmatprep.subr.bf16.mxu0 %v10431_v60  ;;  %7703 = vmatprep.subr.bf16.mxu1 %v10434_v58  ;;  %v10518_v60 = vld [vmem:[%s14607_s1 + $0x11e8] ss:$16 sps:$4 sm:$0xff]   ;;  %v10523_v58 = vld [vmem:[%s14607_s1 + $0x1204] ss:$16 sps:$4 sm:$0xff]  }
 0x205   :  { %6876 = vmatprep.mubr.bf16.mxu0 %v8347_v62  ;;  %7692 = vmatprep.mubr.bf16.mxu1 %v8347_v62  ;;  %v8316_v62 = vcombine.low %v12927_v1, %v12932_v2  ;;  %v10532_v1 = vld [vmem:[%s14607_s1 + $0x122c] ss:$16 sps:$4 sm:$0xff]   ;;  %v10527_v2 = vld [vmem:[%s14607_s1 + $0x1220] ss:$16 sps:$4 sm:$0xff]  }
 0x207   :  { %6888 = vmatpush1.bf16.msra.mxu0 %v10429_v59  ;;  %7704 = vmatpush1.bf16.msra.mxu1 %v10432_v61  ;;  %v10526_v59 = vld [vmem:[%s14607_s1 + $0x120c] ss:$16 sps:$4 sm:$0xff]   ;;  %v53_v61 = vld [vmem:[%s14608_s0 + $0x140] sm:$0x11] }
 0x208   :  { %6889 = vmatprep.subr.bf16.mxu0 %v10437_v63  ;;  %7705 = vmatprep.subr.bf16.mxu1 %v10440_v0  ;;  %v10521_v63 = vld [vmem:[%s14607_s1 + $0x1200] ss:$16 sps:$4 sm:$0xff]   ;;  %v10524_v0 = vld [vmem:[%s14607_s1 + $0x1208] ss:$16 sps:$4 sm:$0xff]  }
 0x20a   :  { %6877 = vmatmul.mubr.bf16.gmra.mrb[4].mxu0 %v8346_v3  ;;  %7693 = vmatmul.mubr.bf16.gmra.mrb[4].mxu1 %v8346_v3  ;;  %v10529_v3 = vld [vmem:[%s14607_s1 + $0x1224] ss:$16 sps:$4 sm:$0xff]  }
 0x20b   :  { %6890 = vmatpush1.bf16.msra.mxu0 %v10435_v4  ;;  %7706 = vmatpush1.bf16.msra.mxu1 %v10438_v5  ;;  %v10530_v4 = vld [vmem:[%s14607_s1 + $0x1228] ss:$16 sps:$4 sm:$0xff]   ;;  %v8349_v5 = vcombine.high %v53_v61, %v53_v61 }
 0x20c   :  { %6891 = vmatprep.subr.bf16.mxu0 %v10443_v6  ;;  %7707 = vmatprep.subr.bf16.mxu1 %v10446_v7  ;;  %v10535_v6 = vld [vmem:[%s14607_s1 + $0x1244] ss:$16 sps:$4 sm:$0xff]   ;;  %v10538_v7 = vld [vmem:[%s14607_s1 + $0x124c] ss:$16 sps:$4 sm:$0xff]  }
 0x20d   :  { %6917 = vmatprep.mubr.bf16.mxu0 %v8317_v8  ;;  %7733 = vmatprep.mubr.bf16.mxu1 %v8317_v8  ;;  %v13136_v8 = vld [vmem:[%s14608_s0 + $0x48] sm:$0xff] }
 0x20f   :  { %6892 = vmatpush1.bf16.msra.mxu0 %v10441_v9  ;;  %7708 = vmatpush1.bf16.msra.mxu1 %v10444_v10  ;;  %v13141_v9 = vld [vmem:[%s14608_s0 + $0xc8] sm:$0xff]  ;;  %v8348_v10 = vcombine.low %v53_v61, %v53_v61 }
 0x210   :  { %6893 = vmatprep.subr.bf16.mxu0 %v10449_v11  ;;  %7709 = vmatprep.subr.bf16.mxu1 %v10452_v12  ;;  %v10533_v11 = vld [vmem:[%s14607_s1 + $0x1240] ss:$16 sps:$4 sm:$0xff]   ;;  %v10536_v12 = vld [vmem:[%s14607_s1 + $0x1248] ss:$16 sps:$4 sm:$0xff]  }
 0x211   :  { %v10609_v61 = vld [vmem:[%s14607_s1 + $0x13c8] ss:$16 sps:$4 sm:$0xff]  }
 0x213   :  { %6894 = vmatpush1.bf16.msra.mxu0 %v10447_v13  ;;  %7710 = vmatpush1.bf16.msra.mxu1 %v10450_v14  ;;  %v10541_v13 = vld [vmem:[%s14607_s1 + $0x1264] ss:$16 sps:$4 sm:$0xff]   ;;  %v10544_v14 = vld [vmem:[%s14607_s1 + $0x126c] ss:$16 sps:$4 sm:$0xff]  }
 0x214   :  { %6895 = vmatprep.subr.bf16.mxu0 %v10455_v15  ;;  %7711 = vmatprep.subr.bf16.mxu1 %v10458_v16  ;;  %v8319_v15 = vcombine.high %v13136_v8, %v13141_v9  ;;  %v10539_v16 = vld [vmem:[%s14607_s1 + $0x1260] ss:$16 sps:$4 sm:$0xff]  }
 0x217   :  { %6896 = vmatpush1.bf16.msra.mxu0 %v10453_v17  ;;  %7712 = vmatpush1.bf16.msra.mxu1 %v10456_v18  ;;  %v10542_v17 = vld [vmem:[%s14607_s1 + $0x1268] ss:$16 sps:$4 sm:$0xff]   ;;  %v10547_v18 = vld [vmem:[%s14607_s1 + $0x1284] ss:$16 sps:$4 sm:$0xff]  }
 0x218   :  { %6897 = vmatprep.subr.bf16.mxu0 %v10461_v19  ;;  %7713 = vmatprep.subr.bf16.mxu1 %v10464_v20  ;;  %v10550_v19 = vld [vmem:[%s14607_s1 + $0x128c] ss:$16 sps:$4 sm:$0xff]   ;;  %v10545_v20 = vld [vmem:[%s14607_s1 + $0x1280] ss:$16 sps:$4 sm:$0xff]  }
 0x21b   :  { %6898 = vmatpush1.bf16.msra.mxu0 %v10459_v21  ;;  %7714 = vmatpush1.bf16.msra.mxu1 %v10462_v22  ;;  %v10548_v21 = vld [vmem:[%s14607_s1 + $0x1288] ss:$16 sps:$4 sm:$0xff]   ;;  %v10553_v22 = vld [vmem:[%s14607_s1 + $0x12a4] ss:$16 sps:$4 sm:$0xff]  }
 0x21c   :  { %6899 = vmatprep.subr.bf16.mxu0 %v10467_v23  ;;  %7715 = vmatprep.subr.bf16.mxu1 %v10470_v24  ;;  %v10556_v23 = vld [vmem:[%s14607_s1 + $0x12ac] ss:$16 sps:$4 sm:$0xff]   ;;  %v10551_v24 = vld [vmem:[%s14607_s1 + $0x12a0] ss:$16 sps:$4 sm:$0xff]  }
 0x21f   :  { %6900 = vmatpush1.bf16.msra.mxu0 %v10465_v25  ;;  %7716 = vmatpush1.bf16.msra.mxu1 %v10468_v26  ;;  %v10554_v25 = vld [vmem:[%s14607_s1 + $0x12a8] ss:$16 sps:$4 sm:$0xff]   ;;  %v10559_v26 = vld [vmem:[%s14607_s1 + $0x12c4] ss:$16 sps:$4 sm:$0xff]  }
 0x220   :  { %6901 = vmatprep.subr.bf16.mxu0 %v10473_v27  ;;  %7717 = vmatprep.subr.bf16.mxu1 %v10476_v28  ;;  %v10562_v27 = vld [vmem:[%s14607_s1 + $0x12cc] ss:$16 sps:$4 sm:$0xff]   ;;  %v10557_v28 = vld [vmem:[%s14607_s1 + $0x12c0] ss:$16 sps:$4 sm:$0xff]  }
 0x223   :  { %6902 = vmatpush1.bf16.msra.mxu0 %v10471_v29  ;;  %7718 = vmatpush1.bf16.msra.mxu1 %v10474_v30  ;;  %v10560_v29 = vld [vmem:[%s14607_s1 + $0x12c8] ss:$16 sps:$4 sm:$0xff]   ;;  %v10565_v30 = vld [vmem:[%s14607_s1 + $0x12e4] ss:$16 sps:$4 sm:$0xff]  }
 0x224   :  { %6903 = vmatprep.subr.bf16.mxu0 %v10479_v31  ;;  %7719 = vmatprep.subr.bf16.mxu1 %v10482_v32  ;;  %v10568_v31 = vld [vmem:[%s14607_s1 + $0x12ec] ss:$16 sps:$4 sm:$0xff]   ;;  %v10563_v32 = vld [vmem:[%s14607_s1 + $0x12e0] ss:$16 sps:$4 sm:$0xff]  }
 0x227   :  { %6904 = vmatpush1.bf16.msra.mxu0 %v10477_v33  ;;  %7720 = vmatpush1.bf16.msra.mxu1 %v10480_v34  ;;  %v10566_v33 = vld [vmem:[%s14607_s1 + $0x12e8] ss:$16 sps:$4 sm:$0xff]   ;;  %v10571_v34 = vld [vmem:[%s14607_s1 + $0x1304] ss:$16 sps:$4 sm:$0xff]  }
 0x228   :  { %6905 = vmatprep.subr.bf16.mxu0 %v10485_v35  ;;  %7721 = vmatprep.subr.bf16.mxu1 %v10488_v36  ;;  %v10574_v35 = vld [vmem:[%s14607_s1 + $0x130c] ss:$16 sps:$4 sm:$0xff]   ;;  %v10569_v36 = vld [vmem:[%s14607_s1 + $0x1300] ss:$16 sps:$4 sm:$0xff]  }
 0x22b   :  { %6906 = vmatpush1.bf16.msra.mxu0 %v10483_v37  ;;  %7722 = vmatpush1.bf16.msra.mxu1 %v10486_v38  ;;  %v10572_v37 = vld [vmem:[%s14607_s1 + $0x1308] ss:$16 sps:$4 sm:$0xff]   ;;  %v10577_v38 = vld [vmem:[%s14607_s1 + $0x1324] ss:$16 sps:$4 sm:$0xff]  }
 0x22c   :  { %6907 = vmatprep.subr.bf16.mxu0 %v10491_v39  ;;  %7723 = vmatprep.subr.bf16.mxu1 %v10494_v40  ;;  %v10580_v39 = vld [vmem:[%s14607_s1 + $0x132c] ss:$16 sps:$4 sm:$0xff]   ;;  %v10575_v40 = vld [vmem:[%s14607_s1 + $0x1320] ss:$16 sps:$4 sm:$0xff]  }
 0x22f   :  { %6908 = vmatpush1.bf16.msra.mxu0 %v10489_v41  ;;  %7724 = vmatpush1.bf16.msra.mxu1 %v10492_v42  ;;  %v10578_v41 = vld [vmem:[%s14607_s1 + $0x1328] ss:$16 sps:$4 sm:$0xff]   ;;  %v10583_v42 = vld [vmem:[%s14607_s1 + $0x1344] ss:$16 sps:$4 sm:$0xff]  }
 0x230   :  { %6909 = vmatprep.subr.bf16.mxu0 %v10497_v43  ;;  %7725 = vmatprep.subr.bf16.mxu1 %v10500_v46  ;;  %v10586_v43 = vld [vmem:[%s14607_s1 + $0x134c] ss:$16 sps:$4 sm:$0xff]   ;;  %v10581_v46 = vld [vmem:[%s14607_s1 + $0x1340] ss:$16 sps:$4 sm:$0xff]  }
 0x233   :  { %6910 = vmatpush1.bf16.msra.mxu0 %v10495_v44  ;;  %7726 = vmatpush1.bf16.msra.mxu1 %v10498_v45  ;;  %v10584_v44 = vld [vmem:[%s14607_s1 + $0x1348] ss:$16 sps:$4 sm:$0xff]   ;;  %v10589_v45 = vld [vmem:[%s14607_s1 + $0x1364] ss:$16 sps:$4 sm:$0xff]  }
 0x234   :  { %6911 = vmatprep.subr.bf16.mxu0 %v10503_v47  ;;  %7727 = vmatprep.subr.bf16.mxu1 %v10506_v48  ;;  %v10592_v47 = vld [vmem:[%s14607_s1 + $0x136c] ss:$16 sps:$4 sm:$0xff]   ;;  %v10587_v48 = vld [vmem:[%s14607_s1 + $0x1360] ss:$16 sps:$4 sm:$0xff]  }
 0x237   :  { %6912 = vmatpush1.bf16.msra.mxu0 %v10501_v49  ;;  %7728 = vmatpush1.bf16.msra.mxu1 %v10504_v50  ;;  %v10590_v49 = vld [vmem:[%s14607_s1 + $0x1368] ss:$16 sps:$4 sm:$0xff]   ;;  %v10595_v50 = vld [vmem:[%s14607_s1 + $0x1384] ss:$16 sps:$4 sm:$0xff]  }
 0x238   :  { %6913 = vmatprep.subr.bf16.mxu0 %v10510_v53  ;;  %7729 = vmatprep.subr.bf16.mxu1 %v10513_v51  ;;  %v10598_v53 = vld [vmem:[%s14607_s1 + $0x138c] ss:$16 sps:$4 sm:$0xff]   ;;  %v10593_v51 = vld [vmem:[%s14607_s1 + $0x1380] ss:$16 sps:$4 sm:$0xff]  }
 0x23b   :  { %6914 = vmatpush1.bf16.msra.mxu0 %v10508_v52  ;;  %7730 = vmatpush1.bf16.msra.mxu1 %v10511_v54  ;;  %v10596_v52 = vld [vmem:[%s14607_s1 + $0x1388] ss:$16 sps:$4 sm:$0xff]   ;;  %v10601_v54 = vld [vmem:[%s14607_s1 + $0x13a4] ss:$16 sps:$4 sm:$0xff]  }
 0x23c   :  { %6915 = vmatprep.subr.bf16.mxu0 %v10517_v55  ;;  %7731 = vmatprep.subr.bf16.mxu1 %v10520_v56  ;;  %v10604_v55 = vld [vmem:[%s14607_s1 + $0x13ac] ss:$16 sps:$4 sm:$0xff]   ;;  %v10599_v56 = vld [vmem:[%s14607_s1 + $0x13a0] ss:$16 sps:$4 sm:$0xff]  }
 0x23f   :  { %6916 = vmatpush1.bf16.msra.mxu0 %v10515_v57  ;;  %7732 = vmatpush1.bf16.msra.mxu1 %v10518_v60  ;;  %v10602_v57 = vld [vmem:[%s14607_s1 + $0x13a8] ss:$16 sps:$4 sm:$0xff]   ;;  %v10608_v60 = vld [vmem:[%s14607_s1 + $0x13c4] ss:$16 sps:$4 sm:$0xff]  }
 0x240   :  { %6936 = vmatprep.subr.bf16.mxu0 %v10523_v58  ;;  %7752 = vmatprep.subr.bf16.mxu1 %v10526_v59  ;;  %v10611_v58 = vld [vmem:[%s14607_s1 + $0x13cc] ss:$16 sps:$4 sm:$0xff]   ;;  %v10606_v59 = vld [vmem:[%s14607_s1 + $0x13c0] ss:$16 sps:$4 sm:$0xff]  }
 0x242   :  { %6918 = vmatmul.mubr.bf16.vlgmr.msra.gmra.mrb[0].mxu0 %v8316_v62  ;;  %7734 = vmatmul.mubr.bf16.vlgmr.msra.gmra.mrb[0].mxu1 %v8316_v62  ;;  %v10615_v62 = vld [vmem:[%s14607_s1 + $0x13e4] ss:$16 sps:$4 sm:$0xff]  }
 0x243   :  { %6937 = vmatpush1.bf16.msra.mxu0 %v10521_v63  ;;  %7753 = vmatpush1.bf16.msra.mxu1 %v10524_v0  ;;  %v10618_v63 = vld [vmem:[%s14607_s1 + $0x13ec] ss:$16 sps:$4 sm:$0xff]   ;;  %v10613_v0 = vld [vmem:[%s14607_s1 + $0x13e0] ss:$16 sps:$4 sm:$0xff]  }
 0x244   :  { %6938 = vmatprep.subr.bf16.mxu0 %v10529_v3  ;;  %7754 = vmatprep.subr.bf16.mxu1 %v10532_v1  ;;  %v10616_v3 = vld [vmem:[%s14607_s1 + $0x13e8] ss:$16 sps:$4 sm:$0xff]   ;;  %v10621_v1 = vld [vmem:[%s14607_s1 + $0x1404] ss:$16 sps:$4 sm:$0xff]  }
 0x245   :  { %6927 = vmatprep.mubr.bf16.mxu0 %v8349_v5  ;;  %7743 = vmatprep.mubr.bf16.mxu1 %v8349_v5  ;;  %v54_v5 = vld [vmem:[%s14608_s0 + $0x148] sm:$0x11] }
 0x247   :  { %6939 = vmatpush1.bf16.msra.mxu0 %v10527_v2  ;;  %7755 = vmatpush1.bf16.msra.mxu1 %v10530_v4  ;;  %v10624_v2 = vld [vmem:[%s14607_s1 + $0x140c] ss:$16 sps:$4 sm:$0xff]   ;;  %v8318_v4 = vcombine.low %v13136_v8, %v13141_v9  ;;  %v10627_v8 = vld [vmem:[%s14607_s1 + $0x1424] ss:$16 sps:$4 sm:$0xff]  }
 0x248   :  { %6940 = vmatprep.subr.bf16.mxu0 %v10535_v6  ;;  %7756 = vmatprep.subr.bf16.mxu1 %v10538_v7  ;;  %v10619_v6 = vld [vmem:[%s14607_s1 + $0x1400] ss:$16 sps:$4 sm:$0xff]   ;;  %v10622_v7 = vld [vmem:[%s14607_s1 + $0x1408] ss:$16 sps:$4 sm:$0xff]   ;;  %v10630_v9 = vld [vmem:[%s14607_s1 + $0x142c] ss:$16 sps:$4 sm:$0xff]  }
 0x24a   :  { %6928 = vmatmul.mubr.bf16.gmra.mrb[4].mxu0 %v8348_v10  ;;  %7744 = vmatmul.mubr.bf16.gmra.mrb[4].mxu1 %v8348_v10  ;;  %v8351_v10 = vcombine.high %v54_v5, %v54_v5 }
 0x24b   :  { %6941 = vmatpush1.bf16.msra.mxu0 %v10533_v11  ;;  %7757 = vmatpush1.bf16.msra.mxu1 %v10536_v12  ;;  %v10625_v11 = vld [vmem:[%s14607_s1 + $0x1420] ss:$16 sps:$4 sm:$0xff]   ;;  %v10628_v12 = vld [vmem:[%s14607_s1 + $0x1428] ss:$16 sps:$4 sm:$0xff]  }
 0x24c   :  { %6942 = vmatprep.subr.bf16.mxu0 %v10541_v13  ;;  %7758 = vmatprep.subr.bf16.mxu1 %v10544_v14  ;;  %v10633_v13 = vld [vmem:[%s14607_s1 + $0x1444] ss:$16 sps:$4 sm:$0xff]   ;;  %v10636_v14 = vld [vmem:[%s14607_s1 + $0x144c] ss:$16 sps:$4 sm:$0xff]  }
 0x24d   :  { %6968 = vmatprep.mubr.bf16.mxu0 %v8319_v15  ;;  %7784 = vmatprep.mubr.bf16.mxu1 %v8319_v15  ;;  %v8350_v15 = vcombine.low %v54_v5, %v54_v5  ;;  %v10713_v5 = vld [vmem:[%s14607_s1 + $0x15e4] ss:$16 sps:$4 sm:$0xff]  }
 0x24f   :  { %6943 = vmatpush1.bf16.msra.mxu0 %v10539_v16  ;;  %7759 = vmatpush1.bf16.msra.mxu1 %v10542_v17  ;;  %v13345_v16 = vld [vmem:[%s14608_s0 + $0x50] sm:$0xff] }
 0x250   :  { %6944 = vmatprep.subr.bf16.mxu0 %v10547_v18  ;;  %7760 = vmatprep.subr.bf16.mxu1 %v10550_v19  ;;  %v13350_v17 = vld [vmem:[%s14608_s0 + $0xd0] sm:$0xff]  ;;  %v10634_v19 = vld [vmem:[%s14607_s1 + $0x1448] ss:$16 sps:$4 sm:$0xff]  }
 0x251   :  { %v10631_v18 = vld [vmem:[%s14607_s1 + $0x1440] ss:$16 sps:$4 sm:$0xff]  }
 0x253   :  { %6945 = vmatpush1.bf16.msra.mxu0 %v10545_v20  ;;  %7761 = vmatpush1.bf16.msra.mxu1 %v10548_v21  ;;  %v10639_v20 = vld [vmem:[%s14607_s1 + $0x1464] ss:$16 sps:$4 sm:$0xff]   ;;  %v10642_v21 = vld [vmem:[%s14607_s1 + $0x146c] ss:$16 sps:$4 sm:$0xff]  }
 0x254   :  { %6946 = vmatprep.subr.bf16.mxu0 %v10553_v22  ;;  %7762 = vmatprep.subr.bf16.mxu1 %v10556_v23  ;;  %v8321_v22 = vcombine.high %v13345_v16, %v13350_v17  ;;  %v10637_v23 = vld [vmem:[%s14607_s1 + $0x1460] ss:$16 sps:$4 sm:$0xff]  }
 0x257   :  { %6947 = vmatpush1.bf16.msra.mxu0 %v10551_v24  ;;  %7763 = vmatpush1.bf16.msra.mxu1 %v10554_v25  ;;  %v10640_v24 = vld [vmem:[%s14607_s1 + $0x1468] ss:$16 sps:$4 sm:$0xff]   ;;  %v10645_v25 = vld [vmem:[%s14607_s1 + $0x1484] ss:$16 sps:$4 sm:$0xff]  }
 0x258   :  { %6948 = vmatprep.subr.bf16.mxu0 %v10559_v26  ;;  %7764 = vmatprep.subr.bf16.mxu1 %v10562_v27  ;;  %v10648_v26 = vld [vmem:[%s14607_s1 + $0x148c] ss:$16 sps:$4 sm:$0xff]   ;;  %v10643_v27 = vld [vmem:[%s14607_s1 + $0x1480] ss:$16 sps:$4 sm:$0xff]  }
 0x25b   :  { %6949 = vmatpush1.bf16.msra.mxu0 %v10557_v28  ;;  %7765 = vmatpush1.bf16.msra.mxu1 %v10560_v29  ;;  %v10646_v28 = vld [vmem:[%s14607_s1 + $0x1488] ss:$16 sps:$4 sm:$0xff]   ;;  %v10651_v29 = vld [vmem:[%s14607_s1 + $0x14a4] ss:$16 sps:$4 sm:$0xff]  }
 0x25c   :  { %6950 = vmatprep.subr.bf16.mxu0 %v10565_v30  ;;  %7766 = vmatprep.subr.bf16.mxu1 %v10568_v31  ;;  %v10654_v30 = vld [vmem:[%s14607_s1 + $0x14ac] ss:$16 sps:$4 sm:$0xff]   ;;  %v10649_v31 = vld [vmem:[%s14607_s1 + $0x14a0] ss:$16 sps:$4 sm:$0xff]  }
 0x25f   :  { %6951 = vmatpush1.bf16.msra.mxu0 %v10563_v32  ;;  %7767 = vmatpush1.bf16.msra.mxu1 %v10566_v33  ;;  %v10652_v32 = vld [vmem:[%s14607_s1 + $0x14a8] ss:$16 sps:$4 sm:$0xff]   ;;  %v10657_v33 = vld [vmem:[%s14607_s1 + $0x14c4] ss:$16 sps:$4 sm:$0xff]  }
 0x260   :  { %6952 = vmatprep.subr.bf16.mxu0 %v10571_v34  ;;  %7768 = vmatprep.subr.bf16.mxu1 %v10574_v35  ;;  %v10660_v34 = vld [vmem:[%s14607_s1 + $0x14cc] ss:$16 sps:$4 sm:$0xff]   ;;  %v10655_v35 = vld [vmem:[%s14607_s1 + $0x14c0] ss:$16 sps:$4 sm:$0xff]  }
 0x263   :  { %6953 = vmatpush1.bf16.msra.mxu0 %v10569_v36  ;;  %7769 = vmatpush1.bf16.msra.mxu1 %v10572_v37  ;;  %v10658_v36 = vld [vmem:[%s14607_s1 + $0x14c8] ss:$16 sps:$4 sm:$0xff]   ;;  %v10663_v37 = vld [vmem:[%s14607_s1 + $0x14e4] ss:$16 sps:$4 sm:$0xff]  }
 0x264   :  { %6954 = vmatprep.subr.bf16.mxu0 %v10577_v38  ;;  %7770 = vmatprep.subr.bf16.mxu1 %v10580_v39  ;;  %v10666_v38 = vld [vmem:[%s14607_s1 + $0x14ec] ss:$16 sps:$4 sm:$0xff]   ;;  %v10661_v39 = vld [vmem:[%s14607_s1 + $0x14e0] ss:$16 sps:$4 sm:$0xff]  }
 0x267   :  { %6955 = vmatpush1.bf16.msra.mxu0 %v10575_v40  ;;  %7771 = vmatpush1.bf16.msra.mxu1 %v10578_v41  ;;  %v10664_v40 = vld [vmem:[%s14607_s1 + $0x14e8] ss:$16 sps:$4 sm:$0xff]   ;;  %v10669_v41 = vld [vmem:[%s14607_s1 + $0x1504] ss:$16 sps:$4 sm:$0xff]  }
 0x268   :  { %6956 = vmatprep.subr.bf16.mxu0 %v10583_v42  ;;  %7772 = vmatprep.subr.bf16.mxu1 %v10586_v43  ;;  %v10672_v42 = vld [vmem:[%s14607_s1 + $0x150c] ss:$16 sps:$4 sm:$0xff]   ;;  %v10667_v43 = vld [vmem:[%s14607_s1 + $0x1500] ss:$16 sps:$4 sm:$0xff]  }
 0x26b   :  { %6957 = vmatpush1.bf16.msra.mxu0 %v10581_v46  ;;  %7773 = vmatpush1.bf16.msra.mxu1 %v10584_v44  ;;  %v10670_v46 = vld [vmem:[%s14607_s1 + $0x1508] ss:$16 sps:$4 sm:$0xff]   ;;  %v10675_v44 = vld [vmem:[%s14607_s1 + $0x1524] ss:$16 sps:$4 sm:$0xff]  }
 0x26c   :  { %6958 = vmatprep.subr.bf16.mxu0 %v10589_v45  ;;  %7774 = vmatprep.subr.bf16.mxu1 %v10592_v47  ;;  %v10678_v45 = vld [vmem:[%s14607_s1 + $0x152c] ss:$16 sps:$4 sm:$0xff]   ;;  %v10673_v47 = vld [vmem:[%s14607_s1 + $0x1520] ss:$16 sps:$4 sm:$0xff]  }
 0x26f   :  { %6959 = vmatpush1.bf16.msra.mxu0 %v10587_v48  ;;  %7775 = vmatpush1.bf16.msra.mxu1 %v10590_v49  ;;  %v10676_v48 = vld [vmem:[%s14607_s1 + $0x1528] ss:$16 sps:$4 sm:$0xff]   ;;  %v10681_v49 = vld [vmem:[%s14607_s1 + $0x1544] ss:$16 sps:$4 sm:$0xff]  }
 0x270   :  { %6960 = vmatprep.subr.bf16.mxu0 %v10595_v50  ;;  %7776 = vmatprep.subr.bf16.mxu1 %v10598_v53  ;;  %v10684_v50 = vld [vmem:[%s14607_s1 + $0x154c] ss:$16 sps:$4 sm:$0xff]   ;;  %v10679_v53 = vld [vmem:[%s14607_s1 + $0x1540] ss:$16 sps:$4 sm:$0xff]  }
 0x273   :  { %6961 = vmatpush1.bf16.msra.mxu0 %v10593_v51  ;;  %7777 = vmatpush1.bf16.msra.mxu1 %v10596_v52  ;;  %v10682_v51 = vld [vmem:[%s14607_s1 + $0x1548] ss:$16 sps:$4 sm:$0xff]   ;;  %v10687_v52 = vld [vmem:[%s14607_s1 + $0x1564] ss:$16 sps:$4 sm:$0xff]  }
 0x274   :  { %6962 = vmatprep.subr.bf16.mxu0 %v10601_v54  ;;  %7778 = vmatprep.subr.bf16.mxu1 %v10604_v55  ;;  %v10690_v54 = vld [vmem:[%s14607_s1 + $0x156c] ss:$16 sps:$4 sm:$0xff]   ;;  %v10685_v55 = vld [vmem:[%s14607_s1 + $0x1560] ss:$16 sps:$4 sm:$0xff]  }
 0x277   :  { %6963 = vmatpush1.bf16.msra.mxu0 %v10599_v56  ;;  %7779 = vmatpush1.bf16.msra.mxu1 %v10602_v57  ;;  %v10688_v56 = vld [vmem:[%s14607_s1 + $0x1568] ss:$16 sps:$4 sm:$0xff]   ;;  %v10693_v57 = vld [vmem:[%s14607_s1 + $0x1584] ss:$16 sps:$4 sm:$0xff]  }
 0x278   :  { %6964 = vmatprep.subr.bf16.mxu0 %v10608_v60  ;;  %7780 = vmatprep.subr.bf16.mxu1 %v10611_v58  ;;  %v10696_v60 = vld [vmem:[%s14607_s1 + $0x158c] ss:$16 sps:$4 sm:$0xff]   ;;  %v10691_v58 = vld [vmem:[%s14607_s1 + $0x1580] ss:$16 sps:$4 sm:$0xff]  }
 0x27b   :  { %6965 = vmatpush1.bf16.msra.mxu0 %v10606_v59  ;;  %7781 = vmatpush1.bf16.msra.mxu1 %v10609_v61  ;;  %v10694_v59 = vld [vmem:[%s14607_s1 + $0x1588] ss:$16 sps:$4 sm:$0xff]   ;;  %v10699_v61 = vld [vmem:[%s14607_s1 + $0x15a4] ss:$16 sps:$4 sm:$0xff]  }
 0x27c   :  { %6966 = vmatprep.subr.bf16.mxu0 %v10615_v62  ;;  %7782 = vmatprep.subr.bf16.mxu1 %v10618_v63  ;;  %v10702_v62 = vld [vmem:[%s14607_s1 + $0x15ac] ss:$16 sps:$4 sm:$0xff]   ;;  %v10697_v63 = vld [vmem:[%s14607_s1 + $0x15a0] ss:$16 sps:$4 sm:$0xff]  }
 0x27f   :  { %6967 = vmatpush1.bf16.msra.mxu0 %v10613_v0  ;;  %7783 = vmatpush1.bf16.msra.mxu1 %v10616_v3  ;;  %v10700_v0 = vld [vmem:[%s14607_s1 + $0x15a8] ss:$16 sps:$4 sm:$0xff]   ;;  %v10706_v3 = vld [vmem:[%s14607_s1 + $0x15c4] ss:$16 sps:$4 sm:$0xff]  }
 0x280   :  { %6987 = vmatprep.subr.bf16.mxu0 %v10621_v1  ;;  %7803 = vmatprep.subr.bf16.mxu1 %v10624_v2  ;;  %v10709_v1 = vld [vmem:[%s14607_s1 + $0x15cc] ss:$16 sps:$4 sm:$0xff]   ;;  %v10704_v2 = vld [vmem:[%s14607_s1 + $0x15c0] ss:$16 sps:$4 sm:$0xff]  }
 0x282   :  { %6969 = vmatmul.mubr.bf16.vlgmr.msra.gmra.mrb[0].mxu0 %v8318_v4  ;;  %7785 = vmatmul.mubr.bf16.vlgmr.msra.gmra.mrb[0].mxu1 %v8318_v4  ;;  %v10707_v4 = vld [vmem:[%s14607_s1 + $0x15c8] ss:$16 sps:$4 sm:$0xff]  }
 0x283   :  { %6988 = vmatpush1.bf16.msra.mxu0 %v10619_v6  ;;  %7804 = vmatpush1.bf16.msra.mxu1 %v10622_v7  ;;  %v10716_v6 = vld [vmem:[%s14607_s1 + $0x15ec] ss:$16 sps:$4 sm:$0xff]   ;;  %v10711_v7 = vld [vmem:[%s14607_s1 + $0x15e0] ss:$16 sps:$4 sm:$0xff]  }
 0x284   :  { %6989 = vmatprep.subr.bf16.mxu0 %v10627_v8  ;;  %7805 = vmatprep.subr.bf16.mxu1 %v10630_v9  ;;  %v10714_v8 = vld [vmem:[%s14607_s1 + $0x15e8] ss:$16 sps:$4 sm:$0xff]   ;;  %v10719_v9 = vld [vmem:[%s14607_s1 + $0x1604] ss:$16 sps:$4 sm:$0xff]  }
 0x285   :  { %6978 = vmatprep.mubr.bf16.mxu0 %v8351_v10  ;;  %7794 = vmatprep.mubr.bf16.mxu1 %v8351_v10  ;;  %v10722_v10 = vld [vmem:[%s14607_s1 + $0x160c] ss:$16 sps:$4 sm:$0xff]  }
 0x287   :  { %6990 = vmatpush1.bf16.msra.mxu0 %v10625_v11  ;;  %7806 = vmatpush1.bf16.msra.mxu1 %v10628_v12  ;;  %v8320_v11 = vcombine.low %v13345_v16, %v13350_v17  ;;  %v55_v12 = vld [vmem:[%s14608_s0 + $0x150] sm:$0x11]  ;;  %v10728_v16 = vld [vmem:[%s14607_s1 + $0x162c] ss:$16 sps:$4 sm:$0xff]  }
 0x288   :  { %6991 = vmatprep.subr.bf16.mxu0 %v10633_v13  ;;  %7807 = vmatprep.subr.bf16.mxu1 %v10636_v14  ;;  %v10717_v13 = vld [vmem:[%s14607_s1 + $0x1600] ss:$16 sps:$4 sm:$0xff]   ;;  %v10720_v14 = vld [vmem:[%s14607_s1 + $0x1608] ss:$16 sps:$4 sm:$0xff]   ;;  %v8353_v17 = vcombine.high %v55_v12, %v55_v12 }
 0x28a   :  { %6979 = vmatmul.mubr.bf16.gmra.mrb[4].mxu0 %v8350_v15  ;;  %7795 = vmatmul.mubr.bf16.gmra.mrb[4].mxu1 %v8350_v15  ;;  %v10725_v15 = vld [vmem:[%s14607_s1 + $0x1624] ss:$16 sps:$4 sm:$0xff]  }
 0x28b   :  { %6992 = vmatpush1.bf16.msra.mxu0 %v10631_v18  ;;  %7808 = vmatpush1.bf16.msra.mxu1 %v10634_v19  ;;  %v10723_v18 = vld [vmem:[%s14607_s1 + $0x1620] ss:$16 sps:$4 sm:$0xff]   ;;  %v10726_v19 = vld [vmem:[%s14607_s1 + $0x1628] ss:$16 sps:$4 sm:$0xff]  }
 0x28c   :  { %6993 = vmatprep.subr.bf16.mxu0 %v10639_v20  ;;  %7809 = vmatprep.subr.bf16.mxu1 %v10642_v21  ;;  %v10731_v20 = vld [vmem:[%s14607_s1 + $0x1644] ss:$16 sps:$4 sm:$0xff]   ;;  %v10734_v21 = vld [vmem:[%s14607_s1 + $0x164c] ss:$16 sps:$4 sm:$0xff]  }
 0x28d   :  { %7019 = vmatprep.mubr.bf16.mxu0 %v8321_v22  ;;  %7835 = vmatprep.mubr.bf16.mxu1 %v8321_v22  ;;  %v8352_v22 = vcombine.low %v55_v12, %v55_v12  ;;  %v10811_v12 = vld [vmem:[%s14607_s1 + $0x17e4] ss:$16 sps:$4 sm:$0xff]  }
 0x28f   :  { %6994 = vmatpush1.bf16.msra.mxu0 %v10637_v23  ;;  %7810 = vmatpush1.bf16.msra.mxu1 %v10640_v24  ;;  %v13554_v23 = vld [vmem:[%s14608_s0 + $0x58] sm:$0xff] }
 0x290   :  { %6995 = vmatprep.subr.bf16.mxu0 %v10645_v25  ;;  %7811 = vmatprep.subr.bf16.mxu1 %v10648_v26  ;;  %v13559_v24 = vld [vmem:[%s14608_s0 + $0xd8] sm:$0xff]  ;;  %v10729_v25 = vld [vmem:[%s14607_s1 + $0x1640] ss:$16 sps:$4 sm:$0xff]  }
 0x291   :  { %v10732_v26 = vld [vmem:[%s14607_s1 + $0x1648] ss:$16 sps:$4 sm:$0xff]  }
 0x293   :  { %6996 = vmatpush1.bf16.msra.mxu0 %v10643_v27  ;;  %7812 = vmatpush1.bf16.msra.mxu1 %v10646_v28  ;;  %v10737_v27 = vld [vmem:[%s14607_s1 + $0x1664] ss:$16 sps:$4 sm:$0xff]   ;;  %v10740_v28 = vld [vmem:[%s14607_s1 + $0x166c] ss:$16 sps:$4 sm:$0xff]  }
 0x294   :  { %6997 = vmatprep.subr.bf16.mxu0 %v10651_v29  ;;  %7813 = vmatprep.subr.bf16.mxu1 %v10654_v30  ;;  %v8323_v29 = vcombine.high %v13554_v23, %v13559_v24  ;;  %v10735_v30 = vld [vmem:[%s14607_s1 + $0x1660] ss:$16 sps:$4 sm:$0xff]  }
 0x297   :  { %6998 = vmatpush1.bf16.msra.mxu0 %v10649_v31  ;;  %7814 = vmatpush1.bf16.msra.mxu1 %v10652_v32  ;;  %v10738_v31 = vld [vmem:[%s14607_s1 + $0x1668] ss:$16 sps:$4 sm:$0xff]   ;;  %v10743_v32 = vld [vmem:[%s14607_s1 + $0x1684] ss:$16 sps:$4 sm:$0xff]  }
 0x298   :  { %6999 = vmatprep.subr.bf16.mxu0 %v10657_v33  ;;  %7815 = vmatprep.subr.bf16.mxu1 %v10660_v34  ;;  %v10746_v33 = vld [vmem:[%s14607_s1 + $0x168c] ss:$16 sps:$4 sm:$0xff]   ;;  %v10741_v34 = vld [vmem:[%s14607_s1 + $0x1680] ss:$16 sps:$4 sm:$0xff]  }
 0x29b   :  { %7000 = vmatpush1.bf16.msra.mxu0 %v10655_v35  ;;  %7816 = vmatpush1.bf16.msra.mxu1 %v10658_v36  ;;  %v10744_v35 = vld [vmem:[%s14607_s1 + $0x1688] ss:$16 sps:$4 sm:$0xff]   ;;  %v10749_v36 = vld [vmem:[%s14607_s1 + $0x16a4] ss:$16 sps:$4 sm:$0xff]  }
 0x29c   :  { %7001 = vmatprep.subr.bf16.mxu0 %v10663_v37  ;;  %7817 = vmatprep.subr.bf16.mxu1 %v10666_v38  ;;  %v10752_v37 = vld [vmem:[%s14607_s1 + $0x16ac] ss:$16 sps:$4 sm:$0xff]   ;;  %v10747_v38 = vld [vmem:[%s14607_s1 + $0x16a0] ss:$16 sps:$4 sm:$0xff]  }
 0x29f   :  { %7002 = vmatpush1.bf16.msra.mxu0 %v10661_v39  ;;  %7818 = vmatpush1.bf16.msra.mxu1 %v10664_v40  ;;  %v10750_v39 = vld [vmem:[%s14607_s1 + $0x16a8] ss:$16 sps:$4 sm:$0xff]   ;;  %v10755_v40 = vld [vmem:[%s14607_s1 + $0x16c4] ss:$16 sps:$4 sm:$0xff]  }
 0x2a0   :  { %7003 = vmatprep.subr.bf16.mxu0 %v10669_v41  ;;  %7819 = vmatprep.subr.bf16.mxu1 %v10672_v42  ;;  %v10758_v41 = vld [vmem:[%s14607_s1 + $0x16cc] ss:$16 sps:$4 sm:$0xff]   ;;  %v10753_v42 = vld [vmem:[%s14607_s1 + $0x16c0] ss:$16 sps:$4 sm:$0xff]  }
 0x2a3   :  { %7004 = vmatpush1.bf16.msra.mxu0 %v10667_v43  ;;  %7820 = vmatpush1.bf16.msra.mxu1 %v10670_v46  ;;  %v10756_v43 = vld [vmem:[%s14607_s1 + $0x16c8] ss:$16 sps:$4 sm:$0xff]   ;;  %v10761_v46 = vld [vmem:[%s14607_s1 + $0x16e4] ss:$16 sps:$4 sm:$0xff]  }
 0x2a4   :  { %7005 = vmatprep.subr.bf16.mxu0 %v10675_v44  ;;  %7821 = vmatprep.subr.bf16.mxu1 %v10678_v45  ;;  %v10764_v44 = vld [vmem:[%s14607_s1 + $0x16ec] ss:$16 sps:$4 sm:$0xff]   ;;  %v10759_v45 = vld [vmem:[%s14607_s1 + $0x16e0] ss:$16 sps:$4 sm:$0xff]  }
 0x2a7   :  { %7006 = vmatpush1.bf16.msra.mxu0 %v10673_v47  ;;  %7822 = vmatpush1.bf16.msra.mxu1 %v10676_v48  ;;  %v10762_v47 = vld [vmem:[%s14607_s1 + $0x16e8] ss:$16 sps:$4 sm:$0xff]   ;;  %v10767_v48 = vld [vmem:[%s14607_s1 + $0x1704] ss:$16 sps:$4 sm:$0xff]  }
 0x2a8   :  { %7007 = vmatprep.subr.bf16.mxu0 %v10681_v49  ;;  %7823 = vmatprep.subr.bf16.mxu1 %v10684_v50  ;;  %v10770_v49 = vld [vmem:[%s14607_s1 + $0x170c] ss:$16 sps:$4 sm:$0xff]   ;;  %v10765_v50 = vld [vmem:[%s14607_s1 + $0x1700] ss:$16 sps:$4 sm:$0xff]  }
 0x2ab   :  { %7008 = vmatpush1.bf16.msra.mxu0 %v10679_v53  ;;  %7824 = vmatpush1.bf16.msra.mxu1 %v10682_v51  ;;  %v10768_v53 = vld [vmem:[%s14607_s1 + $0x1708] ss:$16 sps:$4 sm:$0xff]   ;;  %v10773_v51 = vld [vmem:[%s14607_s1 + $0x1724] ss:$16 sps:$4 sm:$0xff]  }
 0x2ac   :  { %7009 = vmatprep.subr.bf16.mxu0 %v10687_v52  ;;  %7825 = vmatprep.subr.bf16.mxu1 %v10690_v54  ;;  %v10776_v52 = vld [vmem:[%s14607_s1 + $0x172c] ss:$16 sps:$4 sm:$0xff]   ;;  %v10771_v54 = vld [vmem:[%s14607_s1 + $0x1720] ss:$16 sps:$4 sm:$0xff]  }
 0x2af   :  { %7010 = vmatpush1.bf16.msra.mxu0 %v10685_v55  ;;  %7826 = vmatpush1.bf16.msra.mxu1 %v10688_v56  ;;  %v10774_v55 = vld [vmem:[%s14607_s1 + $0x1728] ss:$16 sps:$4 sm:$0xff]   ;;  %v10779_v56 = vld [vmem:[%s14607_s1 + $0x1744] ss:$16 sps:$4 sm:$0xff]  }
 0x2b0   :  { %7011 = vmatprep.subr.bf16.mxu0 %v10693_v57  ;;  %7827 = vmatprep.subr.bf16.mxu1 %v10696_v60  ;;  %v10782_v57 = vld [vmem:[%s14607_s1 + $0x174c] ss:$16 sps:$4 sm:$0xff]   ;;  %v10777_v60 = vld [vmem:[%s14607_s1 + $0x1740] ss:$16 sps:$4 sm:$0xff]  }
 0x2b3   :  { %7012 = vmatpush1.bf16.msra.mxu0 %v10691_v58  ;;  %7828 = vmatpush1.bf16.msra.mxu1 %v10694_v59  ;;  %v10780_v58 = vld [vmem:[%s14607_s1 + $0x1748] ss:$16 sps:$4 sm:$0xff]   ;;  %v10785_v59 = vld [vmem:[%s14607_s1 + $0x1764] ss:$16 sps:$4 sm:$0xff]  }
 0x2b4   :  { %7013 = vmatprep.subr.bf16.mxu0 %v10699_v61  ;;  %7829 = vmatprep.subr.bf16.mxu1 %v10702_v62  ;;  %v10788_v61 = vld [vmem:[%s14607_s1 + $0x176c] ss:$16 sps:$4 sm:$0xff]   ;;  %v10783_v62 = vld [vmem:[%s14607_s1 + $0x1760] ss:$16 sps:$4 sm:$0xff]  }
 0x2b7   :  { %7014 = vmatpush1.bf16.msra.mxu0 %v10697_v63  ;;  %7830 = vmatpush1.bf16.msra.mxu1 %v10700_v0  ;;  %v10786_v63 = vld [vmem:[%s14607_s1 + $0x1768] ss:$16 sps:$4 sm:$0xff]   ;;  %v10791_v0 = vld [vmem:[%s14607_s1 + $0x1784] ss:$16 sps:$4 sm:$0xff]  }
 0x2b8   :  { %7015 = vmatprep.subr.bf16.mxu0 %v10706_v3  ;;  %7831 = vmatprep.subr.bf16.mxu1 %v10709_v1  ;;  %v10794_v3 = vld [vmem:[%s14607_s1 + $0x178c] ss:$16 sps:$4 sm:$0xff]   ;;  %v10789_v1 = vld [vmem:[%s14607_s1 + $0x1780] ss:$16 sps:$4 sm:$0xff]  }
 0x2bb   :  { %7016 = vmatpush1.bf16.msra.mxu0 %v10704_v2  ;;  %7832 = vmatpush1.bf16.msra.mxu1 %v10707_v4  ;;  %v10792_v2 = vld [vmem:[%s14607_s1 + $0x1788] ss:$16 sps:$4 sm:$0xff]   ;;  %v10797_v4 = vld [vmem:[%s14607_s1 + $0x17a4] ss:$16 sps:$4 sm:$0xff]  }
 0x2bc   :  { %7017 = vmatprep.subr.bf16.mxu0 %v10713_v5  ;;  %7833 = vmatprep.subr.bf16.mxu1 %v10716_v6  ;;  %v10800_v5 = vld [vmem:[%s14607_s1 + $0x17ac] ss:$16 sps:$4 sm:$0xff]   ;;  %v10795_v6 = vld [vmem:[%s14607_s1 + $0x17a0] ss:$16 sps:$4 sm:$0xff]  }
 0x2bf   :  { %7018 = vmatpush1.bf16.msra.mxu0 %v10711_v7  ;;  %7834 = vmatpush1.bf16.msra.mxu1 %v10714_v8  ;;  %v10798_v7 = vld [vmem:[%s14607_s1 + $0x17a8] ss:$16 sps:$4 sm:$0xff]   ;;  %v10804_v8 = vld [vmem:[%s14607_s1 + $0x17c4] ss:$16 sps:$4 sm:$0xff]  }
 0x2c0   :  { %7038 = vmatprep.subr.bf16.mxu0 %v10719_v9  ;;  %7854 = vmatprep.subr.bf16.mxu1 %v10722_v10  ;;  %v10807_v9 = vld [vmem:[%s14607_s1 + $0x17cc] ss:$16 sps:$4 sm:$0xff]   ;;  %v10802_v10 = vld [vmem:[%s14607_s1 + $0x17c0] ss:$16 sps:$4 sm:$0xff]  }
 0x2c2   :  { %7020 = vmatmul.mubr.bf16.vlgmr.msra.gmra.mrb[0].mxu0 %v8320_v11  ;;  %7836 = vmatmul.mubr.bf16.vlgmr.msra.gmra.mrb[0].mxu1 %v8320_v11  ;;  %v10805_v11 = vld [vmem:[%s14607_s1 + $0x17c8] ss:$16 sps:$4 sm:$0xff]  }
 0x2c3   :  { %7039 = vmatpush1.bf16.msra.mxu0 %v10717_v13  ;;  %7855 = vmatpush1.bf16.msra.mxu1 %v10720_v14  ;;  %v10814_v13 = vld [vmem:[%s14607_s1 + $0x17ec] ss:$16 sps:$4 sm:$0xff]   ;;  %v10809_v14 = vld [vmem:[%s14607_s1 + $0x17e0] ss:$16 sps:$4 sm:$0xff]  }
 0x2c4   :  { %7040 = vmatprep.subr.bf16.mxu0 %v10725_v15  ;;  %7856 = vmatprep.subr.bf16.mxu1 %v10728_v16  ;;  %v10812_v15 = vld [vmem:[%s14607_s1 + $0x17e8] ss:$16 sps:$4 sm:$0xff]   ;;  %v10817_v16 = vld [vmem:[%s14607_s1 + $0x1804] ss:$16 sps:$4 sm:$0xff]  }
 0x2c5   :  { %7029 = vmatprep.mubr.bf16.mxu0 %v8353_v17  ;;  %7845 = vmatprep.mubr.bf16.mxu1 %v8353_v17  ;;  %v10820_v17 = vld [vmem:[%s14607_s1 + $0x180c] ss:$16 sps:$4 sm:$0xff]  }
 0x2c7   :  { %7041 = vmatpush1.bf16.msra.mxu0 %v10723_v18  ;;  %7857 = vmatpush1.bf16.msra.mxu1 %v10726_v19  ;;  %v8322_v18 = vcombine.low %v13554_v23, %v13559_v24  ;;  %v56_v19 = vld [vmem:[%s14608_s0 + $0x158] sm:$0x11] }
 0x2c8   :  { %7042 = vmatprep.subr.bf16.mxu0 %v10731_v20  ;;  %7858 = vmatprep.subr.bf16.mxu1 %v10734_v21  ;;  %v10815_v20 = vld [vmem:[%s14607_s1 + $0x1800] ss:$16 sps:$4 sm:$0xff]   ;;  %v10818_v21 = vld [vmem:[%s14607_s1 + $0x1808] ss:$16 sps:$4 sm:$0xff]   ;;  %v10826_v23 = vld [vmem:[%s14607_s1 + $0x182c] ss:$16 sps:$4 sm:$0xff]   ;;  %v8355_v24 = vcombine.high %v56_v19, %v56_v19 }
 0x2ca   :  { %7030 = vmatmul.mubr.bf16.gmra.mrb[4].mxu0 %v8352_v22  ;;  %7846 = vmatmul.mubr.bf16.gmra.mrb[4].mxu1 %v8352_v22  ;;  %v10823_v22 = vld [vmem:[%s14607_s1 + $0x1824] ss:$16 sps:$4 sm:$0xff]  }
 0x2cb   :  { %7043 = vmatpush1.bf16.msra.mxu0 %v10729_v25  ;;  %7859 = vmatpush1.bf16.msra.mxu1 %v10732_v26  ;;  %v10821_v25 = vld [vmem:[%s14607_s1 + $0x1820] ss:$16 sps:$4 sm:$0xff]   ;;  %v10824_v26 = vld [vmem:[%s14607_s1 + $0x1828] ss:$16 sps:$4 sm:$0xff]  }
 0x2cc   :  { %7044 = vmatprep.subr.bf16.mxu0 %v10737_v27  ;;  %7860 = vmatprep.subr.bf16.mxu1 %v10740_v28  ;;  %v10829_v27 = vld [vmem:[%s14607_s1 + $0x1844] ss:$16 sps:$4 sm:$0xff]   ;;  %v10832_v28 = vld [vmem:[%s14607_s1 + $0x184c] ss:$16 sps:$4 sm:$0xff]  }
 0x2cd   :  { %7070 = vmatprep.mubr.bf16.mxu0 %v8323_v29  ;;  %7886 = vmatprep.mubr.bf16.mxu1 %v8323_v29  ;;  %v8354_v29 = vcombine.low %v56_v19, %v56_v19  ;;  %v10909_v19 = vld [vmem:[%s14607_s1 + $0x19e4] ss:$16 sps:$4 sm:$0xff]  }
 0x2cf   :  { %7045 = vmatpush1.bf16.msra.mxu0 %v10735_v30  ;;  %7861 = vmatpush1.bf16.msra.mxu1 %v10738_v31  ;;  %v13763_v30 = vld [vmem:[%s14608_s0 + $0x60] sm:$0xff] }
 0x2d0   :  { %7046 = vmatprep.subr.bf16.mxu0 %v10743_v32  ;;  %7862 = vmatprep.subr.bf16.mxu1 %v10746_v33  ;;  %v13768_v31 = vld [vmem:[%s14608_s0 + $0xe0] sm:$0xff]  ;;  %v10830_v33 = vld [vmem:[%s14607_s1 + $0x1848] ss:$16 sps:$4 sm:$0xff]  }
 0x2d1   :  { %v10827_v32 = vld [vmem:[%s14607_s1 + $0x1840] ss:$16 sps:$4 sm:$0xff]  }
 0x2d3   :  { %7047 = vmatpush1.bf16.msra.mxu0 %v10741_v34  ;;  %7863 = vmatpush1.bf16.msra.mxu1 %v10744_v35  ;;  %v10835_v34 = vld [vmem:[%s14607_s1 + $0x1864] ss:$16 sps:$4 sm:$0xff]   ;;  %v10838_v35 = vld [vmem:[%s14607_s1 + $0x186c] ss:$16 sps:$4 sm:$0xff]  }
 0x2d4   :  { %7048 = vmatprep.subr.bf16.mxu0 %v10749_v36  ;;  %7864 = vmatprep.subr.bf16.mxu1 %v10752_v37  ;;  %v8325_v36 = vcombine.high %v13763_v30, %v13768_v31  ;;  %v10833_v37 = vld [vmem:[%s14607_s1 + $0x1860] ss:$16 sps:$4 sm:$0xff]  }
 0x2d7   :  { %7049 = vmatpush1.bf16.msra.mxu0 %v10747_v38  ;;  %7865 = vmatpush1.bf16.msra.mxu1 %v10750_v39  ;;  %v10836_v38 = vld [vmem:[%s14607_s1 + $0x1868] ss:$16 sps:$4 sm:$0xff]   ;;  %v10841_v39 = vld [vmem:[%s14607_s1 + $0x1884] ss:$16 sps:$4 sm:$0xff]  }
 0x2d8   :  { %7050 = vmatprep.subr.bf16.mxu0 %v10755_v40  ;;  %7866 = vmatprep.subr.bf16.mxu1 %v10758_v41  ;;  %v10844_v40 = vld [vmem:[%s14607_s1 + $0x188c] ss:$16 sps:$4 sm:$0xff]   ;;  %v10839_v41 = vld [vmem:[%s14607_s1 + $0x1880] ss:$16 sps:$4 sm:$0xff]  }
 0x2db   :  { %7051 = vmatpush1.bf16.msra.mxu0 %v10753_v42  ;;  %7867 = vmatpush1.bf16.msra.mxu1 %v10756_v43  ;;  %v10842_v42 = vld [vmem:[%s14607_s1 + $0x1888] ss:$16 sps:$4 sm:$0xff]   ;;  %v10847_v43 = vld [vmem:[%s14607_s1 + $0x18a4] ss:$16 sps:$4 sm:$0xff]  }
 0x2dc   :  { %7052 = vmatprep.subr.bf16.mxu0 %v10761_v46  ;;  %7868 = vmatprep.subr.bf16.mxu1 %v10764_v44  ;;  %v10850_v46 = vld [vmem:[%s14607_s1 + $0x18ac] ss:$16 sps:$4 sm:$0xff]   ;;  %v10845_v44 = vld [vmem:[%s14607_s1 + $0x18a0] ss:$16 sps:$4 sm:$0xff]  }
 0x2df   :  { %7053 = vmatpush1.bf16.msra.mxu0 %v10759_v45  ;;  %7869 = vmatpush1.bf16.msra.mxu1 %v10762_v47  ;;  %v10848_v45 = vld [vmem:[%s14607_s1 + $0x18a8] ss:$16 sps:$4 sm:$0xff]   ;;  %v10853_v47 = vld [vmem:[%s14607_s1 + $0x18c4] ss:$16 sps:$4 sm:$0xff]  }
 0x2e0   :  { %7054 = vmatprep.subr.bf16.mxu0 %v10767_v48  ;;  %7870 = vmatprep.subr.bf16.mxu1 %v10770_v49  ;;  %v10856_v48 = vld [vmem:[%s14607_s1 + $0x18cc] ss:$16 sps:$4 sm:$0xff]   ;;  %v10851_v49 = vld [vmem:[%s14607_s1 + $0x18c0] ss:$16 sps:$4 sm:$0xff]  }
 0x2e3   :  { %7055 = vmatpush1.bf16.msra.mxu0 %v10765_v50  ;;  %7871 = vmatpush1.bf16.msra.mxu1 %v10768_v53  ;;  %v10854_v50 = vld [vmem:[%s14607_s1 + $0x18c8] ss:$16 sps:$4 sm:$0xff]   ;;  %v10859_v53 = vld [vmem:[%s14607_s1 + $0x18e4] ss:$16 sps:$4 sm:$0xff]  }
 0x2e4   :  { %7056 = vmatprep.subr.bf16.mxu0 %v10773_v51  ;;  %7872 = vmatprep.subr.bf16.mxu1 %v10776_v52  ;;  %v10862_v51 = vld [vmem:[%s14607_s1 + $0x18ec] ss:$16 sps:$4 sm:$0xff]   ;;  %v10857_v52 = vld [vmem:[%s14607_s1 + $0x18e0] ss:$16 sps:$4 sm:$0xff]  }
 0x2e7   :  { %7057 = vmatpush1.bf16.msra.mxu0 %v10771_v54  ;;  %7873 = vmatpush1.bf16.msra.mxu1 %v10774_v55  ;;  %v10860_v54 = vld [vmem:[%s14607_s1 + $0x18e8] ss:$16 sps:$4 sm:$0xff]   ;;  %v10865_v55 = vld [vmem:[%s14607_s1 + $0x1904] ss:$16 sps:$4 sm:$0xff]  }
 0x2e8   :  { %7058 = vmatprep.subr.bf16.mxu0 %v10779_v56  ;;  %7874 = vmatprep.subr.bf16.mxu1 %v10782_v57  ;;  %v10868_v56 = vld [vmem:[%s14607_s1 + $0x190c] ss:$16 sps:$4 sm:$0xff]   ;;  %v10863_v57 = vld [vmem:[%s14607_s1 + $0x1900] ss:$16 sps:$4 sm:$0xff]  }
 0x2eb   :  { %7059 = vmatpush1.bf16.msra.mxu0 %v10777_v60  ;;  %7875 = vmatpush1.bf16.msra.mxu1 %v10780_v58  ;;  %v10866_v60 = vld [vmem:[%s14607_s1 + $0x1908] ss:$16 sps:$4 sm:$0xff]   ;;  %v10871_v58 = vld [vmem:[%s14607_s1 + $0x1924] ss:$16 sps:$4 sm:$0xff]  }
 0x2ec   :  { %7060 = vmatprep.subr.bf16.mxu0 %v10785_v59  ;;  %7876 = vmatprep.subr.bf16.mxu1 %v10788_v61  ;;  %v10874_v59 = vld [vmem:[%s14607_s1 + $0x192c] ss:$16 sps:$4 sm:$0xff]   ;;  %v10869_v61 = vld [vmem:[%s14607_s1 + $0x1920] ss:$16 sps:$4 sm:$0xff]  }
 0x2ef   :  { %7061 = vmatpush1.bf16.msra.mxu0 %v10783_v62  ;;  %7877 = vmatpush1.bf16.msra.mxu1 %v10786_v63  ;;  %v10872_v62 = vld [vmem:[%s14607_s1 + $0x1928] ss:$16 sps:$4 sm:$0xff]   ;;  %v10877_v63 = vld [vmem:[%s14607_s1 + $0x1944] ss:$16 sps:$4 sm:$0xff]  }
 0x2f0   :  { %7062 = vmatprep.subr.bf16.mxu0 %v10791_v0  ;;  %7878 = vmatprep.subr.bf16.mxu1 %v10794_v3  ;;  %v10880_v0 = vld [vmem:[%s14607_s1 + $0x194c] ss:$16 sps:$4 sm:$0xff]   ;;  %v10875_v3 = vld [vmem:[%s14607_s1 + $0x1940] ss:$16 sps:$4 sm:$0xff]  }
 0x2f3   :  { %7063 = vmatpush1.bf16.msra.mxu0 %v10789_v1  ;;  %7879 = vmatpush1.bf16.msra.mxu1 %v10792_v2  ;;  %v10878_v1 = vld [vmem:[%s14607_s1 + $0x1948] ss:$16 sps:$4 sm:$0xff]   ;;  %v10883_v2 = vld [vmem:[%s14607_s1 + $0x1964] ss:$16 sps:$4 sm:$0xff]  }
 0x2f4   :  { %7064 = vmatprep.subr.bf16.mxu0 %v10797_v4  ;;  %7880 = vmatprep.subr.bf16.mxu1 %v10800_v5  ;;  %v10886_v4 = vld [vmem:[%s14607_s1 + $0x196c] ss:$16 sps:$4 sm:$0xff]   ;;  %v10881_v5 = vld [vmem:[%s14607_s1 + $0x1960] ss:$16 sps:$4 sm:$0xff]  }
 0x2f7   :  { %7065 = vmatpush1.bf16.msra.mxu0 %v10795_v6  ;;  %7881 = vmatpush1.bf16.msra.mxu1 %v10798_v7  ;;  %v10884_v6 = vld [vmem:[%s14607_s1 + $0x1968] ss:$16 sps:$4 sm:$0xff]   ;;  %v10889_v7 = vld [vmem:[%s14607_s1 + $0x1984] ss:$16 sps:$4 sm:$0xff]  }
 0x2f8   :  { %7066 = vmatprep.subr.bf16.mxu0 %v10804_v8  ;;  %7882 = vmatprep.subr.bf16.mxu1 %v10807_v9  ;;  %v10892_v8 = vld [vmem:[%s14607_s1 + $0x198c] ss:$16 sps:$4 sm:$0xff]   ;;  %v10887_v9 = vld [vmem:[%s14607_s1 + $0x1980] ss:$16 sps:$4 sm:$0xff]  }
 0x2fb   :  { %7067 = vmatpush1.bf16.msra.mxu0 %v10802_v10  ;;  %7883 = vmatpush1.bf16.msra.mxu1 %v10805_v11  ;;  %v10890_v10 = vld [vmem:[%s14607_s1 + $0x1988] ss:$16 sps:$4 sm:$0xff]   ;;  %v10895_v11 = vld [vmem:[%s14607_s1 + $0x19a4] ss:$16 sps:$4 sm:$0xff]  }
 0x2fc   :  { %7068 = vmatprep.subr.bf16.mxu0 %v10811_v12  ;;  %7884 = vmatprep.subr.bf16.mxu1 %v10814_v13  ;;  %v10898_v12 = vld [vmem:[%s14607_s1 + $0x19ac] ss:$16 sps:$4 sm:$0xff]   ;;  %v10893_v13 = vld [vmem:[%s14607_s1 + $0x19a0] ss:$16 sps:$4 sm:$0xff]  }
 0x2ff   :  { %7069 = vmatpush1.bf16.msra.mxu0 %v10809_v14  ;;  %7885 = vmatpush1.bf16.msra.mxu1 %v10812_v15  ;;  %v10896_v14 = vld [vmem:[%s14607_s1 + $0x19a8] ss:$16 sps:$4 sm:$0xff]   ;;  %v10902_v15 = vld [vmem:[%s14607_s1 + $0x19c4] ss:$16 sps:$4 sm:$0xff]  }
 0x300   :  { %7089 = vmatprep.subr.bf16.mxu0 %v10817_v16  ;;  %7905 = vmatprep.subr.bf16.mxu1 %v10820_v17  ;;  %v10905_v16 = vld [vmem:[%s14607_s1 + $0x19cc] ss:$16 sps:$4 sm:$0xff]   ;;  %v10900_v17 = vld [vmem:[%s14607_s1 + $0x19c0] ss:$16 sps:$4 sm:$0xff]  }
 0x302   :  { %7071 = vmatmul.mubr.bf16.vlgmr.msra.gmra.mrb[0].mxu0 %v8322_v18  ;;  %7887 = vmatmul.mubr.bf16.vlgmr.msra.gmra.mrb[0].mxu1 %v8322_v18  ;;  %v10903_v18 = vld [vmem:[%s14607_s1 + $0x19c8] ss:$16 sps:$4 sm:$0xff]  }
 0x303   :  { %7090 = vmatpush1.bf16.msra.mxu0 %v10815_v20  ;;  %7906 = vmatpush1.bf16.msra.mxu1 %v10818_v21  ;;  %v10912_v20 = vld [vmem:[%s14607_s1 + $0x19ec] ss:$16 sps:$4 sm:$0xff]   ;;  %v10907_v21 = vld [vmem:[%s14607_s1 + $0x19e0] ss:$16 sps:$4 sm:$0xff]  }
 0x304   :  { %7091 = vmatprep.subr.bf16.mxu0 %v10823_v22  ;;  %7907 = vmatprep.subr.bf16.mxu1 %v10826_v23  ;;  %v10910_v22 = vld [vmem:[%s14607_s1 + $0x19e8] ss:$16 sps:$4 sm:$0xff]   ;;  %v10915_v23 = vld [vmem:[%s14607_s1 + $0x1a04] ss:$16 sps:$4 sm:$0xff]  }
 0x305   :  { %7080 = vmatprep.mubr.bf16.mxu0 %v8355_v24  ;;  %7896 = vmatprep.mubr.bf16.mxu1 %v8355_v24  ;;  %v10918_v24 = vld [vmem:[%s14607_s1 + $0x1a0c] ss:$16 sps:$4 sm:$0xff]  }
 0x307   :  { %7092 = vmatpush1.bf16.msra.mxu0 %v10821_v25  ;;  %7908 = vmatpush1.bf16.msra.mxu1 %v10824_v26  ;;  %v8324_v25 = vcombine.low %v13763_v30, %v13768_v31  ;;  %v57_v26 = vld [vmem:[%s14608_s0 + $0x160] sm:$0x11]  ;;  %v10924_v30 = vld [vmem:[%s14607_s1 + $0x1a2c] ss:$16 sps:$4 sm:$0xff]  }
 0x308   :  { %7093 = vmatprep.subr.bf16.mxu0 %v10829_v27  ;;  %7909 = vmatprep.subr.bf16.mxu1 %v10832_v28  ;;  %v10913_v27 = vld [vmem:[%s14607_s1 + $0x1a00] ss:$16 sps:$4 sm:$0xff]   ;;  %v10916_v28 = vld [vmem:[%s14607_s1 + $0x1a08] ss:$16 sps:$4 sm:$0xff]   ;;  %v8357_v31 = vcombine.high %v57_v26, %v57_v26 }
 0x30a   :  { %7081 = vmatmul.mubr.bf16.gmra.mrb[4].mxu0 %v8354_v29  ;;  %7897 = vmatmul.mubr.bf16.gmra.mrb[4].mxu1 %v8354_v29  ;;  %v10921_v29 = vld [vmem:[%s14607_s1 + $0x1a24] ss:$16 sps:$4 sm:$0xff]  }
 0x30b   :  { %7094 = vmatpush1.bf16.msra.mxu0 %v10827_v32  ;;  %7910 = vmatpush1.bf16.msra.mxu1 %v10830_v33  ;;  %v10919_v32 = vld [vmem:[%s14607_s1 + $0x1a20] ss:$16 sps:$4 sm:$0xff]   ;;  %v10922_v33 = vld [vmem:[%s14607_s1 + $0x1a28] ss:$16 sps:$4 sm:$0xff]  }
 0x30c   :  { %7095 = vmatprep.subr.bf16.mxu0 %v10835_v34  ;;  %7911 = vmatprep.subr.bf16.mxu1 %v10838_v35  ;;  %v10927_v34 = vld [vmem:[%s14607_s1 + $0x1a44] ss:$16 sps:$4 sm:$0xff]   ;;  %v10930_v35 = vld [vmem:[%s14607_s1 + $0x1a4c] ss:$16 sps:$4 sm:$0xff]  }
 0x30d   :  { %7121 = vmatprep.mubr.bf16.mxu0 %v8325_v36  ;;  %7937 = vmatprep.mubr.bf16.mxu1 %v8325_v36  ;;  %v8356_v36 = vcombine.low %v57_v26, %v57_v26  ;;  %v11007_v26 = vld [vmem:[%s14607_s1 + $0x1be4] ss:$16 sps:$4 sm:$0xff]  }
 0x30f   :  { %7096 = vmatpush1.bf16.msra.mxu0 %v10833_v37  ;;  %7912 = vmatpush1.bf16.msra.mxu1 %v10836_v38  ;;  %v13972_v37 = vld [vmem:[%s14608_s0 + $0x68] sm:$0xff] }
 0x310   :  { %7097 = vmatprep.subr.bf16.mxu0 %v10841_v39  ;;  %7913 = vmatprep.subr.bf16.mxu1 %v10844_v40  ;;  %v13977_v38 = vld [vmem:[%s14608_s0 + $0xe8] sm:$0xff]  ;;  %v10925_v39 = vld [vmem:[%s14607_s1 + $0x1a40] ss:$16 sps:$4 sm:$0xff]  }
 0x311   :  { %v10928_v40 = vld [vmem:[%s14607_s1 + $0x1a48] ss:$16 sps:$4 sm:$0xff]  }
 0x313   :  { %7098 = vmatpush1.bf16.msra.mxu0 %v10839_v41  ;;  %7914 = vmatpush1.bf16.msra.mxu1 %v10842_v42  ;;  %v10933_v41 = vld [vmem:[%s14607_s1 + $0x1a64] ss:$16 sps:$4 sm:$0xff]   ;;  %v10936_v42 = vld [vmem:[%s14607_s1 + $0x1a6c] ss:$16 sps:$4 sm:$0xff]  }
 0x314   :  { %7099 = vmatprep.subr.bf16.mxu0 %v10847_v43  ;;  %7915 = vmatprep.subr.bf16.mxu1 %v10850_v46  ;;  %v8327_v43 = vcombine.high %v13972_v37, %v13977_v38  ;;  %v10931_v46 = vld [vmem:[%s14607_s1 + $0x1a60] ss:$16 sps:$4 sm:$0xff]  }
 0x317   :  { %7100 = vmatpush1.bf16.msra.mxu0 %v10845_v44  ;;  %7916 = vmatpush1.bf16.msra.mxu1 %v10848_v45  ;;  %v10934_v44 = vld [vmem:[%s14607_s1 + $0x1a68] ss:$16 sps:$4 sm:$0xff]   ;;  %v10939_v45 = vld [vmem:[%s14607_s1 + $0x1a84] ss:$16 sps:$4 sm:$0xff]  }
 0x318   :  { %7101 = vmatprep.subr.bf16.mxu0 %v10853_v47  ;;  %7917 = vmatprep.subr.bf16.mxu1 %v10856_v48  ;;  %v10942_v47 = vld [vmem:[%s14607_s1 + $0x1a8c] ss:$16 sps:$4 sm:$0xff]   ;;  %v10937_v48 = vld [vmem:[%s14607_s1 + $0x1a80] ss:$16 sps:$4 sm:$0xff]  }
 0x31b   :  { %7102 = vmatpush1.bf16.msra.mxu0 %v10851_v49  ;;  %7918 = vmatpush1.bf16.msra.mxu1 %v10854_v50  ;;  %v10940_v49 = vld [vmem:[%s14607_s1 + $0x1a88] ss:$16 sps:$4 sm:$0xff]   ;;  %v10945_v50 = vld [vmem:[%s14607_s1 + $0x1aa4] ss:$16 sps:$4 sm:$0xff]  }
 0x31c   :  { %7103 = vmatprep.subr.bf16.mxu0 %v10859_v53  ;;  %7919 = vmatprep.subr.bf16.mxu1 %v10862_v51  ;;  %v10948_v53 = vld [vmem:[%s14607_s1 + $0x1aac] ss:$16 sps:$4 sm:$0xff]   ;;  %v10943_v51 = vld [vmem:[%s14607_s1 + $0x1aa0] ss:$16 sps:$4 sm:$0xff]  }
 0x31f   :  { %7104 = vmatpush1.bf16.msra.mxu0 %v10857_v52  ;;  %7920 = vmatpush1.bf16.msra.mxu1 %v10860_v54  ;;  %v10946_v52 = vld [vmem:[%s14607_s1 + $0x1aa8] ss:$16 sps:$4 sm:$0xff]   ;;  %v10951_v54 = vld [vmem:[%s14607_s1 + $0x1ac4] ss:$16 sps:$4 sm:$0xff]  }
 0x320   :  { %7105 = vmatprep.subr.bf16.mxu0 %v10865_v55  ;;  %7921 = vmatprep.subr.bf16.mxu1 %v10868_v56  ;;  %v10954_v55 = vld [vmem:[%s14607_s1 + $0x1acc] ss:$16 sps:$4 sm:$0xff]   ;;  %v10949_v56 = vld [vmem:[%s14607_s1 + $0x1ac0] ss:$16 sps:$4 sm:$0xff]  }
 0x323   :  { %7106 = vmatpush1.bf16.msra.mxu0 %v10863_v57  ;;  %7922 = vmatpush1.bf16.msra.mxu1 %v10866_v60  ;;  %v10952_v57 = vld [vmem:[%s14607_s1 + $0x1ac8] ss:$16 sps:$4 sm:$0xff]   ;;  %v10957_v60 = vld [vmem:[%s14607_s1 + $0x1ae4] ss:$16 sps:$4 sm:$0xff]  }
 0x324   :  { %7107 = vmatprep.subr.bf16.mxu0 %v10871_v58  ;;  %7923 = vmatprep.subr.bf16.mxu1 %v10874_v59  ;;  %v10960_v58 = vld [vmem:[%s14607_s1 + $0x1aec] ss:$16 sps:$4 sm:$0xff]   ;;  %v10955_v59 = vld [vmem:[%s14607_s1 + $0x1ae0] ss:$16 sps:$4 sm:$0xff]  }
 0x327   :  { %7108 = vmatpush1.bf16.msra.mxu0 %v10869_v61  ;;  %7924 = vmatpush1.bf16.msra.mxu1 %v10872_v62  ;;  %v10958_v61 = vld [vmem:[%s14607_s1 + $0x1ae8] ss:$16 sps:$4 sm:$0xff]   ;;  %v10963_v62 = vld [vmem:[%s14607_s1 + $0x1b04] ss:$16 sps:$4 sm:$0xff]  }
 0x328   :  { %7109 = vmatprep.subr.bf16.mxu0 %v10877_v63  ;;  %7925 = vmatprep.subr.bf16.mxu1 %v10880_v0  ;;  %v10966_v63 = vld [vmem:[%s14607_s1 + $0x1b0c] ss:$16 sps:$4 sm:$0xff]   ;;  %v10961_v0 = vld [vmem:[%s14607_s1 + $0x1b00] ss:$16 sps:$4 sm:$0xff]  }
 0x32b   :  { %7110 = vmatpush1.bf16.msra.mxu0 %v10875_v3  ;;  %7926 = vmatpush1.bf16.msra.mxu1 %v10878_v1  ;;  %v10964_v3 = vld [vmem:[%s14607_s1 + $0x1b08] ss:$16 sps:$4 sm:$0xff]   ;;  %v10969_v1 = vld [vmem:[%s14607_s1 + $0x1b24] ss:$16 sps:$4 sm:$0xff]  }
 0x32c   :  { %7111 = vmatprep.subr.bf16.mxu0 %v10883_v2  ;;  %7927 = vmatprep.subr.bf16.mxu1 %v10886_v4  ;;  %v10972_v2 = vld [vmem:[%s14607_s1 + $0x1b2c] ss:$16 sps:$4 sm:$0xff]   ;;  %v10967_v4 = vld [vmem:[%s14607_s1 + $0x1b20] ss:$16 sps:$4 sm:$0xff]  }
 0x32f   :  { %7112 = vmatpush1.bf16.msra.mxu0 %v10881_v5  ;;  %7928 = vmatpush1.bf16.msra.mxu1 %v10884_v6  ;;  %v10970_v5 = vld [vmem:[%s14607_s1 + $0x1b28] ss:$16 sps:$4 sm:$0xff]   ;;  %v10975_v6 = vld [vmem:[%s14607_s1 + $0x1b44] ss:$16 sps:$4 sm:$0xff]  }
 0x330   :  { %7113 = vmatprep.subr.bf16.mxu0 %v10889_v7  ;;  %7929 = vmatprep.subr.bf16.mxu1 %v10892_v8  ;;  %v10978_v7 = vld [vmem:[%s14607_s1 + $0x1b4c] ss:$16 sps:$4 sm:$0xff]   ;;  %v10973_v8 = vld [vmem:[%s14607_s1 + $0x1b40] ss:$16 sps:$4 sm:$0xff]  }
 0x333   :  { %7114 = vmatpush1.bf16.msra.mxu0 %v10887_v9  ;;  %7930 = vmatpush1.bf16.msra.mxu1 %v10890_v10  ;;  %v10976_v9 = vld [vmem:[%s14607_s1 + $0x1b48] ss:$16 sps:$4 sm:$0xff]   ;;  %v10981_v10 = vld [vmem:[%s14607_s1 + $0x1b64] ss:$16 sps:$4 sm:$0xff]  }
 0x334   :  { %7115 = vmatprep.subr.bf16.mxu0 %v10895_v11  ;;  %7931 = vmatprep.subr.bf16.mxu1 %v10898_v12  ;;  %v10984_v11 = vld [vmem:[%s14607_s1 + $0x1b6c] ss:$16 sps:$4 sm:$0xff]   ;;  %v10979_v12 = vld [vmem:[%s14607_s1 + $0x1b60] ss:$16 sps:$4 sm:$0xff]  }
 0x337   :  { %7116 = vmatpush1.bf16.msra.mxu0 %v10893_v13  ;;  %7932 = vmatpush1.bf16.msra.mxu1 %v10896_v14  ;;  %v10982_v13 = vld [vmem:[%s14607_s1 + $0x1b68] ss:$16 sps:$4 sm:$0xff]   ;;  %v10987_v14 = vld [vmem:[%s14607_s1 + $0x1b84] ss:$16 sps:$4 sm:$0xff]  }
 0x338   :  { %7117 = vmatprep.subr.bf16.mxu0 %v10902_v15  ;;  %7933 = vmatprep.subr.bf16.mxu1 %v10905_v16  ;;  %v10990_v15 = vld [vmem:[%s14607_s1 + $0x1b8c] ss:$16 sps:$4 sm:$0xff]   ;;  %v10985_v16 = vld [vmem:[%s14607_s1 + $0x1b80] ss:$16 sps:$4 sm:$0xff]  }
 0x33b   :  { %7118 = vmatpush1.bf16.msra.mxu0 %v10900_v17  ;;  %7934 = vmatpush1.bf16.msra.mxu1 %v10903_v18  ;;  %v10988_v17 = vld [vmem:[%s14607_s1 + $0x1b88] ss:$16 sps:$4 sm:$0xff]   ;;  %v10993_v18 = vld [vmem:[%s14607_s1 + $0x1ba4] ss:$16 sps:$4 sm:$0xff]  }
 0x33c   :  { %7119 = vmatprep.subr.bf16.mxu0 %v10909_v19  ;;  %7935 = vmatprep.subr.bf16.mxu1 %v10912_v20  ;;  %v10996_v19 = vld [vmem:[%s14607_s1 + $0x1bac] ss:$16 sps:$4 sm:$0xff]   ;;  %v10991_v20 = vld [vmem:[%s14607_s1 + $0x1ba0] ss:$16 sps:$4 sm:$0xff]  }
 0x33f   :  { %7120 = vmatpush1.bf16.msra.mxu0 %v10907_v21  ;;  %7936 = vmatpush1.bf16.msra.mxu1 %v10910_v22  ;;  %v10994_v21 = vld [vmem:[%s14607_s1 + $0x1ba8] ss:$16 sps:$4 sm:$0xff]   ;;  %v11000_v22 = vld [vmem:[%s14607_s1 + $0x1bc4] ss:$16 sps:$4 sm:$0xff]  }
 0x340   :  { %7140 = vmatprep.subr.bf16.mxu0 %v10915_v23  ;;  %7956 = vmatprep.subr.bf16.mxu1 %v10918_v24  ;;  %v11003_v23 = vld [vmem:[%s14607_s1 + $0x1bcc] ss:$16 sps:$4 sm:$0xff]   ;;  %v10998_v24 = vld [vmem:[%s14607_s1 + $0x1bc0] ss:$16 sps:$4 sm:$0xff]  }
 0x342   :  { %7122 = vmatmul.mubr.bf16.vlgmr.msra.gmra.mrb[0].mxu0 %v8324_v25  ;;  %7938 = vmatmul.mubr.bf16.vlgmr.msra.gmra.mrb[0].mxu1 %v8324_v25  ;;  %v11001_v25 = vld [vmem:[%s14607_s1 + $0x1bc8] ss:$16 sps:$4 sm:$0xff]  }
 0x343   :  { %7141 = vmatpush1.bf16.msra.mxu0 %v10913_v27  ;;  %7957 = vmatpush1.bf16.msra.mxu1 %v10916_v28  ;;  %v11010_v27 = vld [vmem:[%s14607_s1 + $0x1bec] ss:$16 sps:$4 sm:$0xff]   ;;  %v11005_v28 = vld [vmem:[%s14607_s1 + $0x1be0] ss:$16 sps:$4 sm:$0xff]  }
 0x344   :  { %7142 = vmatprep.subr.bf16.mxu0 %v10921_v29  ;;  %7958 = vmatprep.subr.bf16.mxu1 %v10924_v30  ;;  %v11008_v29 = vld [vmem:[%s14607_s1 + $0x1be8] ss:$16 sps:$4 sm:$0xff]   ;;  %v11013_v30 = vld [vmem:[%s14607_s1 + $0x1c04] ss:$16 sps:$4 sm:$0xff]  }
 0x345   :  { %7131 = vmatprep.mubr.bf16.mxu0 %v8357_v31  ;;  %7947 = vmatprep.mubr.bf16.mxu1 %v8357_v31  ;;  %v11016_v31 = vld [vmem:[%s14607_s1 + $0x1c0c] ss:$16 sps:$4 sm:$0xff]  }
 0x347   :  { %7143 = vmatpush1.bf16.msra.mxu0 %v10919_v32  ;;  %7959 = vmatpush1.bf16.msra.mxu1 %v10922_v33  ;;  %v8326_v32 = vcombine.low %v13972_v37, %v13977_v38  ;;  %v58_v33 = vld [vmem:[%s14608_s0 + $0x168] sm:$0x11] }
 0x348   :  { %7144 = vmatprep.subr.bf16.mxu0 %v10927_v34  ;;  %7960 = vmatprep.subr.bf16.mxu1 %v10930_v35  ;;  %v11011_v34 = vld [vmem:[%s14607_s1 + $0x1c00] ss:$16 sps:$4 sm:$0xff]   ;;  %v11014_v35 = vld [vmem:[%s14607_s1 + $0x1c08] ss:$16 sps:$4 sm:$0xff]   ;;  %v11022_v37 = vld [vmem:[%s14607_s1 + $0x1c2c] ss:$16 sps:$4 sm:$0xff]   ;;  %v8359_v38 = vcombine.high %v58_v33, %v58_v33 }
 0x34a   :  { %7132 = vmatmul.mubr.bf16.gmra.mrb[4].mxu0 %v8356_v36  ;;  %7948 = vmatmul.mubr.bf16.gmra.mrb[4].mxu1 %v8356_v36  ;;  %v11019_v36 = vld [vmem:[%s14607_s1 + $0x1c24] ss:$16 sps:$4 sm:$0xff]  }
 0x34b   :  { %7145 = vmatpush1.bf16.msra.mxu0 %v10925_v39  ;;  %7961 = vmatpush1.bf16.msra.mxu1 %v10928_v40  ;;  %v11017_v39 = vld [vmem:[%s14607_s1 + $0x1c20] ss:$16 sps:$4 sm:$0xff]   ;;  %v11020_v40 = vld [vmem:[%s14607_s1 + $0x1c28] ss:$16 sps:$4 sm:$0xff]  }
 0x34c   :  { %7146 = vmatprep.subr.bf16.mxu0 %v10933_v41  ;;  %7962 = vmatprep.subr.bf16.mxu1 %v10936_v42  ;;  %v11025_v41 = vld [vmem:[%s14607_s1 + $0x1c44] ss:$16 sps:$4 sm:$0xff]   ;;  %v11028_v42 = vld [vmem:[%s14607_s1 + $0x1c4c] ss:$16 sps:$4 sm:$0xff]  }
 0x34d   :  { %7172 = vmatprep.mubr.bf16.mxu0 %v8327_v43  ;;  %7988 = vmatprep.mubr.bf16.mxu1 %v8327_v43  ;;  %v8358_v43 = vcombine.low %v58_v33, %v58_v33  ;;  %v11105_v33 = vld [vmem:[%s14607_s1 + $0x1de4] ss:$16 sps:$4 sm:$0xff]  }
 0x34f   :  { %7147 = vmatpush1.bf16.msra.mxu0 %v10931_v46  ;;  %7963 = vmatpush1.bf16.msra.mxu1 %v10934_v44  ;;  %v14181_v46 = vld [vmem:[%s14608_s0 + $0x70] sm:$0xff] }
 0x350   :  { %7148 = vmatprep.subr.bf16.mxu0 %v10939_v45  ;;  %7964 = vmatprep.subr.bf16.mxu1 %v10942_v47  ;;  %v14186_v44 = vld [vmem:[%s14608_s0 + $0xf0] sm:$0xff]  ;;  %v11026_v47 = vld [vmem:[%s14607_s1 + $0x1c48] ss:$16 sps:$4 sm:$0xff]  }
 0x351   :  { %v11023_v45 = vld [vmem:[%s14607_s1 + $0x1c40] ss:$16 sps:$4 sm:$0xff]  }
 0x353   :  { %7149 = vmatpush1.bf16.msra.mxu0 %v10937_v48  ;;  %7965 = vmatpush1.bf16.msra.mxu1 %v10940_v49  ;;  %v11031_v48 = vld [vmem:[%s14607_s1 + $0x1c64] ss:$16 sps:$4 sm:$0xff]   ;;  %v11034_v49 = vld [vmem:[%s14607_s1 + $0x1c6c] ss:$16 sps:$4 sm:$0xff]  }
 0x354   :  { %7150 = vmatprep.subr.bf16.mxu0 %v10945_v50  ;;  %7966 = vmatprep.subr.bf16.mxu1 %v10948_v53  ;;  %v8329_v50 = vcombine.high %v14181_v46, %v14186_v44  ;;  %v11029_v53 = vld [vmem:[%s14607_s1 + $0x1c60] ss:$16 sps:$4 sm:$0xff]  }
 0x357   :  { %7151 = vmatpush1.bf16.msra.mxu0 %v10943_v51  ;;  %7967 = vmatpush1.bf16.msra.mxu1 %v10946_v52  ;;  %v11032_v51 = vld [vmem:[%s14607_s1 + $0x1c68] ss:$16 sps:$4 sm:$0xff]   ;;  %v11037_v52 = vld [vmem:[%s14607_s1 + $0x1c84] ss:$16 sps:$4 sm:$0xff]  }
 0x358   :  { %7152 = vmatprep.subr.bf16.mxu0 %v10951_v54  ;;  %7968 = vmatprep.subr.bf16.mxu1 %v10954_v55  ;;  %v11040_v54 = vld [vmem:[%s14607_s1 + $0x1c8c] ss:$16 sps:$4 sm:$0xff]   ;;  %v11035_v55 = vld [vmem:[%s14607_s1 + $0x1c80] ss:$16 sps:$4 sm:$0xff]  }
 0x35b   :  { %7153 = vmatpush1.bf16.msra.mxu0 %v10949_v56  ;;  %7969 = vmatpush1.bf16.msra.mxu1 %v10952_v57  ;;  %v11038_v56 = vld [vmem:[%s14607_s1 + $0x1c88] ss:$16 sps:$4 sm:$0xff]   ;;  %v11043_v57 = vld [vmem:[%s14607_s1 + $0x1ca4] ss:$16 sps:$4 sm:$0xff]  }
 0x35c   :  { %7154 = vmatprep.subr.bf16.mxu0 %v10957_v60  ;;  %7970 = vmatprep.subr.bf16.mxu1 %v10960_v58  ;;  %v11046_v60 = vld [vmem:[%s14607_s1 + $0x1cac] ss:$16 sps:$4 sm:$0xff]   ;;  %v11041_v58 = vld [vmem:[%s14607_s1 + $0x1ca0] ss:$16 sps:$4 sm:$0xff]  }
 0x35f   :  { %7155 = vmatpush1.bf16.msra.mxu0 %v10955_v59  ;;  %7971 = vmatpush1.bf16.msra.mxu1 %v10958_v61  ;;  %v11044_v59 = vld [vmem:[%s14607_s1 + $0x1ca8] ss:$16 sps:$4 sm:$0xff]   ;;  %v11049_v61 = vld [vmem:[%s14607_s1 + $0x1cc4] ss:$16 sps:$4 sm:$0xff]  }
 0x360   :  { %7156 = vmatprep.subr.bf16.mxu0 %v10963_v62  ;;  %7972 = vmatprep.subr.bf16.mxu1 %v10966_v63  ;;  %v11052_v62 = vld [vmem:[%s14607_s1 + $0x1ccc] ss:$16 sps:$4 sm:$0xff]   ;;  %v11047_v63 = vld [vmem:[%s14607_s1 + $0x1cc0] ss:$16 sps:$4 sm:$0xff]  }
 0x363   :  { %7157 = vmatpush1.bf16.msra.mxu0 %v10961_v0  ;;  %7973 = vmatpush1.bf16.msra.mxu1 %v10964_v3  ;;  %v11050_v0 = vld [vmem:[%s14607_s1 + $0x1cc8] ss:$16 sps:$4 sm:$0xff]   ;;  %v11055_v3 = vld [vmem:[%s14607_s1 + $0x1ce4] ss:$16 sps:$4 sm:$0xff]  }
 0x364   :  { %7158 = vmatprep.subr.bf16.mxu0 %v10969_v1  ;;  %7974 = vmatprep.subr.bf16.mxu1 %v10972_v2  ;;  %v11058_v1 = vld [vmem:[%s14607_s1 + $0x1cec] ss:$16 sps:$4 sm:$0xff]   ;;  %v11053_v2 = vld [vmem:[%s14607_s1 + $0x1ce0] ss:$16 sps:$4 sm:$0xff]  }
 0x367   :  { %7159 = vmatpush1.bf16.msra.mxu0 %v10967_v4  ;;  %7975 = vmatpush1.bf16.msra.mxu1 %v10970_v5  ;;  %v11056_v4 = vld [vmem:[%s14607_s1 + $0x1ce8] ss:$16 sps:$4 sm:$0xff]   ;;  %v11061_v5 = vld [vmem:[%s14607_s1 + $0x1d04] ss:$16 sps:$4 sm:$0xff]  }
 0x368   :  { %7160 = vmatprep.subr.bf16.mxu0 %v10975_v6  ;;  %7976 = vmatprep.subr.bf16.mxu1 %v10978_v7  ;;  %v11064_v6 = vld [vmem:[%s14607_s1 + $0x1d0c] ss:$16 sps:$4 sm:$0xff]   ;;  %v11059_v7 = vld [vmem:[%s14607_s1 + $0x1d00] ss:$16 sps:$4 sm:$0xff]  }
 0x36b   :  { %7161 = vmatpush1.bf16.msra.mxu0 %v10973_v8  ;;  %7977 = vmatpush1.bf16.msra.mxu1 %v10976_v9  ;;  %v11062_v8 = vld [vmem:[%s14607_s1 + $0x1d08] ss:$16 sps:$4 sm:$0xff]   ;;  %v11067_v9 = vld [vmem:[%s14607_s1 + $0x1d24] ss:$16 sps:$4 sm:$0xff]  }
 0x36c   :  { %7162 = vmatprep.subr.bf16.mxu0 %v10981_v10  ;;  %7978 = vmatprep.subr.bf16.mxu1 %v10984_v11  ;;  %v11070_v10 = vld [vmem:[%s14607_s1 + $0x1d2c] ss:$16 sps:$4 sm:$0xff]   ;;  %v11065_v11 = vld [vmem:[%s14607_s1 + $0x1d20] ss:$16 sps:$4 sm:$0xff]  }
 0x36f   :  { %7163 = vmatpush1.bf16.msra.mxu0 %v10979_v12  ;;  %7979 = vmatpush1.bf16.msra.mxu1 %v10982_v13  ;;  %v11068_v12 = vld [vmem:[%s14607_s1 + $0x1d28] ss:$16 sps:$4 sm:$0xff]   ;;  %v11073_v13 = vld [vmem:[%s14607_s1 + $0x1d44] ss:$16 sps:$4 sm:$0xff]  }
 0x370   :  { %7164 = vmatprep.subr.bf16.mxu0 %v10987_v14  ;;  %7980 = vmatprep.subr.bf16.mxu1 %v10990_v15  ;;  %v11076_v14 = vld [vmem:[%s14607_s1 + $0x1d4c] ss:$16 sps:$4 sm:$0xff]   ;;  %v11071_v15 = vld [vmem:[%s14607_s1 + $0x1d40] ss:$16 sps:$4 sm:$0xff]  }
 0x373   :  { %7165 = vmatpush1.bf16.msra.mxu0 %v10985_v16  ;;  %7981 = vmatpush1.bf16.msra.mxu1 %v10988_v17  ;;  %v11074_v16 = vld [vmem:[%s14607_s1 + $0x1d48] ss:$16 sps:$4 sm:$0xff]   ;;  %v11079_v17 = vld [vmem:[%s14607_s1 + $0x1d64] ss:$16 sps:$4 sm:$0xff]  }
 0x374   :  { %7166 = vmatprep.subr.bf16.mxu0 %v10993_v18  ;;  %7982 = vmatprep.subr.bf16.mxu1 %v10996_v19  ;;  %v11082_v18 = vld [vmem:[%s14607_s1 + $0x1d6c] ss:$16 sps:$4 sm:$0xff]   ;;  %v11077_v19 = vld [vmem:[%s14607_s1 + $0x1d60] ss:$16 sps:$4 sm:$0xff]  }
 0x377   :  { %7167 = vmatpush1.bf16.msra.mxu0 %v10991_v20  ;;  %7983 = vmatpush1.bf16.msra.mxu1 %v10994_v21  ;;  %v11080_v20 = vld [vmem:[%s14607_s1 + $0x1d68] ss:$16 sps:$4 sm:$0xff]   ;;  %v11085_v21 = vld [vmem:[%s14607_s1 + $0x1d84] ss:$16 sps:$4 sm:$0xff]  }
 0x378   :  { %7168 = vmatprep.subr.bf16.mxu0 %v11000_v22  ;;  %7984 = vmatprep.subr.bf16.mxu1 %v11003_v23  ;;  %v11088_v22 = vld [vmem:[%s14607_s1 + $0x1d8c] ss:$16 sps:$4 sm:$0xff]   ;;  %v11083_v23 = vld [vmem:[%s14607_s1 + $0x1d80] ss:$16 sps:$4 sm:$0xff]  }
 0x37b   :  { %7169 = vmatpush1.bf16.msra.mxu0 %v10998_v24  ;;  %7985 = vmatpush1.bf16.msra.mxu1 %v11001_v25  ;;  %v11086_v24 = vld [vmem:[%s14607_s1 + $0x1d88] ss:$16 sps:$4 sm:$0xff]   ;;  %v11091_v25 = vld [vmem:[%s14607_s1 + $0x1da4] ss:$16 sps:$4 sm:$0xff]  }
 0x37c   :  { %7170 = vmatprep.subr.bf16.mxu0 %v11007_v26  ;;  %7986 = vmatprep.subr.bf16.mxu1 %v11010_v27  ;;  %v11094_v26 = vld [vmem:[%s14607_s1 + $0x1dac] ss:$16 sps:$4 sm:$0xff]   ;;  %v11089_v27 = vld [vmem:[%s14607_s1 + $0x1da0] ss:$16 sps:$4 sm:$0xff]  }
 0x37f   :  { %7171 = vmatpush1.bf16.msra.mxu0 %v11005_v28  ;;  %7987 = vmatpush1.bf16.msra.mxu1 %v11008_v29  ;;  %v11092_v28 = vld [vmem:[%s14607_s1 + $0x1da8] ss:$16 sps:$4 sm:$0xff]   ;;  %v11098_v29 = vld [vmem:[%s14607_s1 + $0x1dc4] ss:$16 sps:$4 sm:$0xff]  }
 0x380   :  { %7191 = vmatprep.subr.bf16.mxu0 %v11013_v30  ;;  %8007 = vmatprep.subr.bf16.mxu1 %v11016_v31  ;;  %v11101_v30 = vld [vmem:[%s14607_s1 + $0x1dcc] ss:$16 sps:$4 sm:$0xff]   ;;  %v11096_v31 = vld [vmem:[%s14607_s1 + $0x1dc0] ss:$16 sps:$4 sm:$0xff]  }
 0x382   :  { %7173 = vmatmul.mubr.bf16.vlgmr.msra.gmra.mrb[0].mxu0 %v8326_v32  ;;  %7989 = vmatmul.mubr.bf16.vlgmr.msra.gmra.mrb[0].mxu1 %v8326_v32  ;;  %v11099_v32 = vld [vmem:[%s14607_s1 + $0x1dc8] ss:$16 sps:$4 sm:$0xff]  }
 0x383   :  { %7192 = vmatpush1.bf16.msra.mxu0 %v11011_v34  ;;  %8008 = vmatpush1.bf16.msra.mxu1 %v11014_v35  ;;  %v11108_v34 = vld [vmem:[%s14607_s1 + $0x1dec] ss:$16 sps:$4 sm:$0xff]   ;;  %v11103_v35 = vld [vmem:[%s14607_s1 + $0x1de0] ss:$16 sps:$4 sm:$0xff]  }
 0x384   :  { %7193 = vmatprep.subr.bf16.mxu0 %v11019_v36  ;;  %8009 = vmatprep.subr.bf16.mxu1 %v11022_v37  ;;  %v11106_v36 = vld [vmem:[%s14607_s1 + $0x1de8] ss:$16 sps:$4 sm:$0xff]   ;;  %v11111_v37 = vld [vmem:[%s14607_s1 + $0x1e04] ss:$16 sps:$4 sm:$0xff]  }
 0x385   :  { %7182 = vmatprep.mubr.bf16.mxu0 %v8359_v38  ;;  %7998 = vmatprep.mubr.bf16.mxu1 %v8359_v38  ;;  %v11114_v38 = vld [vmem:[%s14607_s1 + $0x1e0c] ss:$16 sps:$4 sm:$0xff]  }
 0x387   :  { %7194 = vmatpush1.bf16.msra.mxu0 %v11017_v39  ;;  %8010 = vmatpush1.bf16.msra.mxu1 %v11020_v40  ;;  %v8328_v39 = vcombine.low %v14181_v46, %v14186_v44  ;;  %v59_v40 = vld [vmem:[%s14608_s0 + $0x170] sm:$0x11]  ;;  %v11120_v46 = vld [vmem:[%s14607_s1 + $0x1e2c] ss:$16 sps:$4 sm:$0xff]  }
 0x388   :  { %7195 = vmatprep.subr.bf16.mxu0 %v11025_v41  ;;  %8011 = vmatprep.subr.bf16.mxu1 %v11028_v42  ;;  %v11109_v41 = vld [vmem:[%s14607_s1 + $0x1e00] ss:$16 sps:$4 sm:$0xff]   ;;  %v11112_v42 = vld [vmem:[%s14607_s1 + $0x1e08] ss:$16 sps:$4 sm:$0xff]   ;;  %v8361_v44 = vcombine.high %v59_v40, %v59_v40 }
 0x38a   :  { %7183 = vmatmul.mubr.bf16.gmra.mrb[4].mxu0 %v8358_v43  ;;  %7999 = vmatmul.mubr.bf16.gmra.mrb[4].mxu1 %v8358_v43  ;;  %v11117_v43 = vld [vmem:[%s14607_s1 + $0x1e24] ss:$16 sps:$4 sm:$0xff]  }
 0x38b   :  { %7196 = vmatpush1.bf16.msra.mxu0 %v11023_v45  ;;  %8012 = vmatpush1.bf16.msra.mxu1 %v11026_v47  ;;  %v11115_v45 = vld [vmem:[%s14607_s1 + $0x1e20] ss:$16 sps:$4 sm:$0xff]   ;;  %v11118_v47 = vld [vmem:[%s14607_s1 + $0x1e28] ss:$16 sps:$4 sm:$0xff]  }
 0x38c   :  { %7197 = vmatprep.subr.bf16.mxu0 %v11031_v48  ;;  %8013 = vmatprep.subr.bf16.mxu1 %v11034_v49  ;;  %v11123_v48 = vld [vmem:[%s14607_s1 + $0x1e44] ss:$16 sps:$4 sm:$0xff]   ;;  %v11126_v49 = vld [vmem:[%s14607_s1 + $0x1e4c] ss:$16 sps:$4 sm:$0xff]  }
 0x38d   :  { %7223 = vmatprep.mubr.bf16.mxu0 %v8329_v50  ;;  %8039 = vmatprep.mubr.bf16.mxu1 %v8329_v50  ;;  %v8360_v50 = vcombine.low %v59_v40, %v59_v40  ;;  %v11203_v40 = vld [vmem:[%s14607_s1 + $0x1fe4] ss:$16 sps:$4 sm:$0xff]  }
 0x38f   :  { %7198 = vmatpush1.bf16.msra.mxu0 %v11029_v53  ;;  %8014 = vmatpush1.bf16.msra.mxu1 %v11032_v51  ;;  %v14390_v53 = vld [vmem:[%s14608_s0 + $0x78] sm:$0xff] }
 0x390   :  { %7199 = vmatprep.subr.bf16.mxu0 %v11037_v52  ;;  %8015 = vmatprep.subr.bf16.mxu1 %v11040_v54  ;;  %v14395_v51 = vld [vmem:[%s14608_s0 + $0xf8] sm:$0xff]  ;;  %v11121_v52 = vld [vmem:[%s14607_s1 + $0x1e40] ss:$16 sps:$4 sm:$0xff]  }
 0x391   :  { %v11124_v54 = vld [vmem:[%s14607_s1 + $0x1e48] ss:$16 sps:$4 sm:$0xff]  }
 0x393   :  { %7200 = vmatpush1.bf16.msra.mxu0 %v11035_v55  ;;  %8016 = vmatpush1.bf16.msra.mxu1 %v11038_v56  ;;  %v11129_v55 = vld [vmem:[%s14607_s1 + $0x1e64] ss:$16 sps:$4 sm:$0xff]   ;;  %v11132_v56 = vld [vmem:[%s14607_s1 + $0x1e6c] ss:$16 sps:$4 sm:$0xff]  }
 0x394   :  { %7201 = vmatprep.subr.bf16.mxu0 %v11043_v57  ;;  %8017 = vmatprep.subr.bf16.mxu1 %v11046_v60  ;;  %v8331_v57 = vcombine.high %v14390_v53, %v14395_v51  ;;  %v11127_v60 = vld [vmem:[%s14607_s1 + $0x1e60] ss:$16 sps:$4 sm:$0xff]  }
 0x397   :  { %7202 = vmatpush1.bf16.msra.mxu0 %v11041_v58  ;;  %8018 = vmatpush1.bf16.msra.mxu1 %v11044_v59  ;;  %v11130_v58 = vld [vmem:[%s14607_s1 + $0x1e68] ss:$16 sps:$4 sm:$0xff]   ;;  %v11135_v59 = vld [vmem:[%s14607_s1 + $0x1e84] ss:$16 sps:$4 sm:$0xff]  }
 0x398   :  { %7203 = vmatprep.subr.bf16.mxu0 %v11049_v61  ;;  %8019 = vmatprep.subr.bf16.mxu1 %v11052_v62  ;;  %v11138_v61 = vld [vmem:[%s14607_s1 + $0x1e8c] ss:$16 sps:$4 sm:$0xff]   ;;  %v11133_v62 = vld [vmem:[%s14607_s1 + $0x1e80] ss:$16 sps:$4 sm:$0xff]  }
 0x39b   :  { %7204 = vmatpush1.bf16.msra.mxu0 %v11047_v63  ;;  %8020 = vmatpush1.bf16.msra.mxu1 %v11050_v0  ;;  %v11136_v63 = vld [vmem:[%s14607_s1 + $0x1e88] ss:$16 sps:$4 sm:$0xff]   ;;  %v11141_v0 = vld [vmem:[%s14607_s1 + $0x1ea4] ss:$16 sps:$4 sm:$0xff]  }
 0x39c   :  { %7205 = vmatprep.subr.bf16.mxu0 %v11055_v3  ;;  %8021 = vmatprep.subr.bf16.mxu1 %v11058_v1  ;;  %v11144_v3 = vld [vmem:[%s14607_s1 + $0x1eac] ss:$16 sps:$4 sm:$0xff]   ;;  %v11139_v1 = vld [vmem:[%s14607_s1 + $0x1ea0] ss:$16 sps:$4 sm:$0xff]  }
 0x39f   :  { %7206 = vmatpush1.bf16.msra.mxu0 %v11053_v2  ;;  %8022 = vmatpush1.bf16.msra.mxu1 %v11056_v4  ;;  %v11142_v2 = vld [vmem:[%s14607_s1 + $0x1ea8] ss:$16 sps:$4 sm:$0xff]   ;;  %v11147_v4 = vld [vmem:[%s14607_s1 + $0x1ec4] ss:$16 sps:$4 sm:$0xff]  }
 0x3a0   :  { %7207 = vmatprep.subr.bf16.mxu0 %v11061_v5  ;;  %8023 = vmatprep.subr.bf16.mxu1 %v11064_v6  ;;  %v11150_v5 = vld [vmem:[%s14607_s1 + $0x1ecc] ss:$16 sps:$4 sm:$0xff]   ;;  %v11145_v6 = vld [vmem:[%s14607_s1 + $0x1ec0] ss:$16 sps:$4 sm:$0xff]  }
 0x3a3   :  { %7208 = vmatpush1.bf16.msra.mxu0 %v11059_v7  ;;  %8024 = vmatpush1.bf16.msra.mxu1 %v11062_v8  ;;  %v11148_v7 = vld [vmem:[%s14607_s1 + $0x1ec8] ss:$16 sps:$4 sm:$0xff]   ;;  %v11153_v8 = vld [vmem:[%s14607_s1 + $0x1ee4] ss:$16 sps:$4 sm:$0xff]  }
 0x3a4   :  { %7209 = vmatprep.subr.bf16.mxu0 %v11067_v9  ;;  %8025 = vmatprep.subr.bf16.mxu1 %v11070_v10  ;;  %v11156_v9 = vld [vmem:[%s14607_s1 + $0x1eec] ss:$16 sps:$4 sm:$0xff]   ;;  %v11151_v10 = vld [vmem:[%s14607_s1 + $0x1ee0] ss:$16 sps:$4 sm:$0xff]  }
 0x3a7   :  { %7210 = vmatpush1.bf16.msra.mxu0 %v11065_v11  ;;  %8026 = vmatpush1.bf16.msra.mxu1 %v11068_v12  ;;  %v11154_v11 = vld [vmem:[%s14607_s1 + $0x1ee8] ss:$16 sps:$4 sm:$0xff]   ;;  %v11159_v12 = vld [vmem:[%s14607_s1 + $0x1f04] ss:$16 sps:$4 sm:$0xff]  }
 0x3a8   :  { %7211 = vmatprep.subr.bf16.mxu0 %v11073_v13  ;;  %8027 = vmatprep.subr.bf16.mxu1 %v11076_v14  ;;  %v11162_v13 = vld [vmem:[%s14607_s1 + $0x1f0c] ss:$16 sps:$4 sm:$0xff]   ;;  %v11157_v14 = vld [vmem:[%s14607_s1 + $0x1f00] ss:$16 sps:$4 sm:$0xff]  }
 0x3ab   :  { %7212 = vmatpush1.bf16.msra.mxu0 %v11071_v15  ;;  %8028 = vmatpush1.bf16.msra.mxu1 %v11074_v16  ;;  %v11160_v15 = vld [vmem:[%s14607_s1 + $0x1f08] ss:$16 sps:$4 sm:$0xff]   ;;  %v11165_v16 = vld [vmem:[%s14607_s1 + $0x1f24] ss:$16 sps:$4 sm:$0xff]  }
 0x3ac   :  { %7213 = vmatprep.subr.bf16.mxu0 %v11079_v17  ;;  %8029 = vmatprep.subr.bf16.mxu1 %v11082_v18  ;;  %v11168_v17 = vld [vmem:[%s14607_s1 + $0x1f2c] ss:$16 sps:$4 sm:$0xff]   ;;  %v11163_v18 = vld [vmem:[%s14607_s1 + $0x1f20] ss:$16 sps:$4 sm:$0xff]  }
 0x3af   :  { %7214 = vmatpush1.bf16.msra.mxu0 %v11077_v19  ;;  %8030 = vmatpush1.bf16.msra.mxu1 %v11080_v20  ;;  %v11166_v19 = vld [vmem:[%s14607_s1 + $0x1f28] ss:$16 sps:$4 sm:$0xff]   ;;  %v11171_v20 = vld [vmem:[%s14607_s1 + $0x1f44] ss:$16 sps:$4 sm:$0xff]  }
 0x3b0   :  { %7215 = vmatprep.subr.bf16.mxu0 %v11085_v21  ;;  %8031 = vmatprep.subr.bf16.mxu1 %v11088_v22  ;;  %v11174_v21 = vld [vmem:[%s14607_s1 + $0x1f4c] ss:$16 sps:$4 sm:$0xff]   ;;  %v11169_v22 = vld [vmem:[%s14607_s1 + $0x1f40] ss:$16 sps:$4 sm:$0xff]  }
 0x3b3   :  { %7216 = vmatpush1.bf16.msra.mxu0 %v11083_v23  ;;  %8032 = vmatpush1.bf16.msra.mxu1 %v11086_v24  ;;  %v11172_v23 = vld [vmem:[%s14607_s1 + $0x1f48] ss:$16 sps:$4 sm:$0xff]   ;;  %v11177_v24 = vld [vmem:[%s14607_s1 + $0x1f64] ss:$16 sps:$4 sm:$0xff]  }
 0x3b4   :  { %7217 = vmatprep.subr.bf16.mxu0 %v11091_v25  ;;  %8033 = vmatprep.subr.bf16.mxu1 %v11094_v26  ;;  %v11180_v25 = vld [vmem:[%s14607_s1 + $0x1f6c] ss:$16 sps:$4 sm:$0xff]   ;;  %v11175_v26 = vld [vmem:[%s14607_s1 + $0x1f60] ss:$16 sps:$4 sm:$0xff]  }
 0x3b7   :  { %7218 = vmatpush1.bf16.msra.mxu0 %v11089_v27  ;;  %8034 = vmatpush1.bf16.msra.mxu1 %v11092_v28  ;;  %v11178_v27 = vld [vmem:[%s14607_s1 + $0x1f68] ss:$16 sps:$4 sm:$0xff]   ;;  %v11183_v28 = vld [vmem:[%s14607_s1 + $0x1f84] ss:$16 sps:$4 sm:$0xff]  }
 0x3b8   :  { %7219 = vmatprep.subr.bf16.mxu0 %v11098_v29  ;;  %8035 = vmatprep.subr.bf16.mxu1 %v11101_v30  ;;  %v11186_v29 = vld [vmem:[%s14607_s1 + $0x1f8c] ss:$16 sps:$4 sm:$0xff]   ;;  %v11181_v30 = vld [vmem:[%s14607_s1 + $0x1f80] ss:$16 sps:$4 sm:$0xff]  }
 0x3bb   :  { %7220 = vmatpush1.bf16.msra.mxu0 %v11096_v31  ;;  %8036 = vmatpush1.bf16.msra.mxu1 %v11099_v32  ;;  %v11184_v31 = vld [vmem:[%s14607_s1 + $0x1f88] ss:$16 sps:$4 sm:$0xff]   ;;  %v11189_v32 = vld [vmem:[%s14607_s1 + $0x1fa4] ss:$16 sps:$4 sm:$0xff]  }
 0x3bc   :  { %7221 = vmatprep.subr.bf16.mxu0 %v11105_v33  ;;  %8037 = vmatprep.subr.bf16.mxu1 %v11108_v34  ;;  %v11192_v33 = vld [vmem:[%s14607_s1 + $0x1fac] ss:$16 sps:$4 sm:$0xff]   ;;  %v11187_v34 = vld [vmem:[%s14607_s1 + $0x1fa0] ss:$16 sps:$4 sm:$0xff]  }
 0x3bf   :  { %7222 = vmatpush1.bf16.msra.mxu0 %v11103_v35  ;;  %8038 = vmatpush1.bf16.msra.mxu1 %v11106_v36  ;;  %v11190_v35 = vld [vmem:[%s14607_s1 + $0x1fa8] ss:$16 sps:$4 sm:$0xff]   ;;  %v11197_v36 = vld [vmem:[%s14607_s1 + $0x1fc4] ss:$16 sps:$4 sm:$0xff]  }
 0x3c0   :  { %7242 = vmatprep.subr.bf16.mxu0 %v11111_v37  ;;  %8058 = vmatprep.subr.bf16.mxu1 %v11114_v38  ;;  %v11200_v37 = vld [vmem:[%s14607_s1 + $0x1fcc] ss:$16 sps:$4 sm:$0xff]   ;;  %v11195_v38 = vld [vmem:[%s14607_s1 + $0x1fc0] ss:$16 sps:$4 sm:$0xff]  }
 0x3c2   :  { %7224 = vmatmul.mubr.bf16.vlgmr.msra.gmra.mrb[0].mxu0 %v8328_v39  ;;  %8040 = vmatmul.mubr.bf16.vlgmr.msra.gmra.mrb[0].mxu1 %v8328_v39  ;;  %v11198_v39 = vld [vmem:[%s14607_s1 + $0x1fc8] ss:$16 sps:$4 sm:$0xff]  }
 0x3c3   :  { %7243 = vmatpush1.bf16.msra.mxu0 %v11109_v41  ;;  %8059 = vmatpush1.bf16.msra.mxu1 %v11112_v42  ;;  %v11206_v41 = vld [vmem:[%s14607_s1 + $0x1fec] ss:$16 sps:$4 sm:$0xff]   ;;  %v11201_v42 = vld [vmem:[%s14607_s1 + $0x1fe0] ss:$16 sps:$4 sm:$0xff]  }
 0x3c4   :  { %7244 = vmatprep.subr.bf16.mxu0 %v11117_v43  ;;  %8060 = vmatprep.subr.bf16.mxu1 %v11120_v46  ;;  %v11204_v43 = vld [vmem:[%s14607_s1 + $0x1fe8] ss:$16 sps:$4 sm:$0xff]  }
 0x3c5   :  { %7233 = vmatprep.mubr.bf16.mxu0 %v8361_v44  ;;  %8049 = vmatprep.mubr.bf16.mxu1 %v8361_v44  ;;  %v60_v46 = vld [vmem:[%s14608_s0 + $0x178] sm:$0x11]  ;;  %v8330_v44 = vcombine.low %v14390_v53, %v14395_v51 }
 0x3c7   :  { %7245 = vmatpush1.bf16.msra.mxu0 %v11115_v45  ;;  %8061 = vmatpush1.bf16.msra.mxu1 %v11118_v47  ;;  %v8363_v45 = vcombine.high %v60_v46, %v60_v46  ;;  %v8362_v47 = vcombine.low %v60_v46, %v60_v46 }
 0x3c8   :  { %7246 = vmatprep.subr.bf16.mxu0 %v11123_v48  ;;  %8062 = vmatprep.subr.bf16.mxu1 %v11126_v49  ;;  %v8155_v48 = vlaneseq }
 0x3ca   :  { %7234 = vmatmul.mubr.bf16.gmra.mrb[4].mxu0 %v8360_v50  ;;  %8050 = vmatmul.mubr.bf16.gmra.mrb[4].mxu1 %v8360_v50  ;;  %v14566_v49 = vshrl.u32 %v8155_v48, 7 }
 0x3cb   :  { %7247 = vmatpush1.bf16.msra.mxu0 %v11121_v52  ;;  %8063 = vmatpush1.bf16.msra.mxu1 %v11124_v54 }
 0x3cc   :  { %7248 = vmatprep.subr.bf16.mxu0 %v11129_v55  ;;  %8064 = vmatprep.subr.bf16.mxu1 %v11132_v56  ;;  %v8158_v53 = vadd.s32 16, %v14566_v49 }
 0x3cd   :  { %7274 = vmatprep.mubr.bf16.mxu0 %v8331_v57  ;;  %8090 = vmatprep.mubr.bf16.mxu1 %v8331_v57 }
 0x3ce   :  { %vm8166_vm0 = vcmp.lt.s32.totalorder %v8158_v53, 18 }
 0x3cf   :  { %7249 = vmatpush1.bf16.msra.mxu0 %v11127_v60  ;;  %8065 = vmatpush1.bf16.msra.mxu1 %v11130_v58 }
 0x3d0   :  { %7250 = vmatprep.subr.bf16.mxu0 %v11135_v59  ;;  %8066 = vmatprep.subr.bf16.mxu1 %v11138_v61 }
 0x3d3   :  { %7251 = vmatpush1.bf16.msra.mxu0 %v11133_v62  ;;  %8067 = vmatpush1.bf16.msra.mxu1 %v11136_v63 }
 0x3d4   :  { %7252 = vmatprep.subr.bf16.mxu0 %v11141_v0  ;;  %8068 = vmatprep.subr.bf16.mxu1 %v11144_v3 }
 0x3d7   :  { %7253 = vmatpush1.bf16.msra.mxu0 %v11139_v1  ;;  %8069 = vmatpush1.bf16.msra.mxu1 %v11142_v2 }
 0x3d8   :  { %7254 = vmatprep.subr.bf16.mxu0 %v11147_v4  ;;  %8070 = vmatprep.subr.bf16.mxu1 %v11150_v5 }
 0x3db   :  { %7255 = vmatpush1.bf16.msra.mxu0 %v11145_v6  ;;  %8071 = vmatpush1.bf16.msra.mxu1 %v11148_v7 }
 0x3dc   :  { %7256 = vmatprep.subr.bf16.mxu0 %v11153_v8  ;;  %8072 = vmatprep.subr.bf16.mxu1 %v11156_v9 }
 0x3df   :  { %7257 = vmatpush1.bf16.msra.mxu0 %v11151_v10  ;;  %8073 = vmatpush1.bf16.msra.mxu1 %v11154_v11 }
 0x3e0   :  { %7258 = vmatprep.subr.bf16.mxu0 %v11159_v12  ;;  %8074 = vmatprep.subr.bf16.mxu1 %v11162_v13 }
 0x3e3   :  { %7259 = vmatpush1.bf16.msra.mxu0 %v11157_v14  ;;  %8075 = vmatpush1.bf16.msra.mxu1 %v11160_v15 }
 0x3e4   :  { %7260 = vmatprep.subr.bf16.mxu0 %v11165_v16  ;;  %8076 = vmatprep.subr.bf16.mxu1 %v11168_v17 }
 0x3e7   :  { %7261 = vmatpush1.bf16.msra.mxu0 %v11163_v18  ;;  %8077 = vmatpush1.bf16.msra.mxu1 %v11166_v19 }
 0x3e8   :  { %7262 = vmatprep.subr.bf16.mxu0 %v11171_v20  ;;  %8078 = vmatprep.subr.bf16.mxu1 %v11174_v21 }
 0x3eb   :  { %7263 = vmatpush1.bf16.msra.mxu0 %v11169_v22  ;;  %8079 = vmatpush1.bf16.msra.mxu1 %v11172_v23 }
 0x3ec   :  { %7264 = vmatprep.subr.bf16.mxu0 %v11177_v24  ;;  %8080 = vmatprep.subr.bf16.mxu1 %v11180_v25 }
 0x3ef   :  { %7265 = vmatpush1.bf16.msra.mxu0 %v11175_v26  ;;  %8081 = vmatpush1.bf16.msra.mxu1 %v11178_v27 }
 0x3f0   :  { %7266 = vmatprep.subr.bf16.mxu0 %v11183_v28  ;;  %8082 = vmatprep.subr.bf16.mxu1 %v11186_v29 }
 0x3f3   :  { %7267 = vmatpush1.bf16.msra.mxu0 %v11181_v30  ;;  %8083 = vmatpush1.bf16.msra.mxu1 %v11184_v31 }
 0x3f4   :  { %7268 = vmatprep.subr.bf16.mxu0 %v11189_v32  ;;  %8084 = vmatprep.subr.bf16.mxu1 %v11192_v33 }
 0x3f7   :  { %7269 = vmatpush1.bf16.msra.mxu0 %v11187_v34  ;;  %8085 = vmatpush1.bf16.msra.mxu1 %v11190_v35 }
 0x3f8   :  { %7270 = vmatprep.subr.bf16.mxu0 %v11197_v36  ;;  %8086 = vmatprep.subr.bf16.mxu1 %v11200_v37 }
 0x3fb   :  { %7271 = vmatpush1.bf16.msra.mxu0 %v11195_v38  ;;  %8087 = vmatpush1.bf16.msra.mxu1 %v11198_v39 }
 0x3fc   :  { %7272 = vmatprep.subr.bf16.mxu0 %v11203_v40  ;;  %8088 = vmatprep.subr.bf16.mxu1 %v11206_v41 }
 0x3ff   :  { %7273 = vmatpush1.bf16.msra.mxu0 %v11201_v42  ;;  %8089 = vmatpush1.bf16.msra.mxu1 %v11204_v43 }
 0x402   :  { %7275 = vmatmul.mubr.bf16.vlgmr.msra.gmra.mrb[0].mxu0 %v8330_v44  ;;  %8091 = vmatmul.mubr.bf16.vlgmr.msra.gmra.mrb[0].mxu1 %v8330_v44 }
 0x403   :  { %7284 = vmatprep.mubr.bf16.mxu0 %v8363_v45  ;;  %8100 = vmatprep.mubr.bf16.mxu1 %v8363_v45 }
 0x40a   :  { %7285 = vmatmul.mubr.bf16.gmra.mrb[4].mxu0 %v8362_v47  ;;  %8101 = vmatmul.mubr.bf16.gmra.mrb[4].mxu1 %v8362_v47 }
 0x4d5   :  { %v7276_v50 = vpop.f32.mrb[0].mxu0  ;;  %v8092_v52 = vpop.f32.mrb[0].mxu1 }
 0x4d6   :  { %v8216_v54 = vmul.f32 %v7276_v50, %v7276_v50  ;;  %v8218_v55 = vmul.f32 %v8092_v52, %v8092_v52  ;;  %v7278_v56 = vpop.f32.mrb[1].mxu0  ;;  %v8094_v57 = vpop.f32.mrb[1].mxu1 }
 0x4d7   :  { %v9394_v51 = vpack.c.bf16 %v7278_v56, %v7276_v50  ;;  %v8217_v60 = vmul.f32 %v7278_v56, %v7278_v56  ;;  %v9395_v58 = vpack.c.bf16 %v8094_v57, %v8092_v52  ;;  %v8219_v59 = vmul.f32 %v8094_v57, %v8094_v57  ;;  %v7280_v61 = vpop.f32.mrb[2].mxu0  ;;  %v8096_v62 = vpop.f32.mrb[2].mxu1 }
 0x4d8   :  { %v8179_v63 = vadd.f32 %v7280_v61, %v7276_v50  ;;  %v8220_v0 = vmul.f32 %v7280_v61, %v7280_v61  ;;  %v8198_v3 = vadd.f32 %v8096_v62, %v8092_v52  ;;  %v8222_v1 = vmul.f32 %v8096_v62, %v8096_v62  ;;  %v7282_v2 = vpop.f32.mrb[3].mxu0  ;;  %v8098_v4 = vpop.f32.mrb[3].mxu1 }
 0x4d9   :  { %8149 = vst [vmem:[%s14609_s2] sm:$0xff] %v9394_v51  ;;  %8150 = vst [vmem:[%s14609_s2 + $0x8] sm:$0xff] %v9395_v58  ;;  %v9396_v5 = vpack.c.bf16 %v7282_v2, %v7280_v61  ;;  %v8189_v6 = vadd.f32 %v7282_v2, %v7278_v56  ;;  %v8221_v7 = vmul.f32 %v7282_v2, %v7282_v2 }
 0x4da   :  { %v9397_v8 = vpack.c.bf16 %v8098_v4, %v8096_v62  ;;  %v8228_v9 = vadd.f32 %v8220_v0, %v8216_v54  ;;  %v8246_v10 = vadd.f32 %v8222_v1, %v8218_v55  ;;  %v8207_v11 = vadd.f32 %v8098_v4, %v8094_v57 }
 0x4db   :  { %v8223_v12 = vmul.f32 %v8098_v4, %v8098_v4  ;;  %8151 = vst [vmem:[%s14609_s2 + $0x10] sm:$0xff] %v9396_v5  ;;  %v8237_v13 = vadd.f32 %v8221_v7, %v8217_v60 }
 0x4dc   :  { %8152 = vst [vmem:[%s14609_s2 + $0x18] sm:$0xff] %v9397_v8 }
 0x4dd   :  { %v8255_v14 = vadd.f32 %v8223_v12, %v8219_v59  ;;  %v7286_v15 = vpop.f32.mrb[4].mxu0  ;;  %v8102_v16 = vpop.f32.mrb[4].mxu1 }
 0x4de   :  { %v8175_v17 = vsel %vm8166_vm0, %v7286_v15, 0.0  ;;  %v8177_v18 = vsel %vm8166_vm0, %v8102_v16, 0.0  ;;  %v7288_v19 = vpop.f32.mrb[5].mxu0  ;;  %v8104_v20 = vpop.f32.mrb[5].mxu1 }
 0x4df   :  { %v8181_v21 = vsel %vm8180_vm1, %v8175_v17, 0.0  ;;  %v8224_v22 = vmul.f32 %v8175_v17, %v8175_v17  ;;  %v8199_v23 = vsel %vm8180_vm1, %v8177_v18, 0.0  ;;  %v8226_v24 = vmul.f32 %v8177_v18, %v8177_v18  ;;  %v7290_v25 = vpop.f32.mrb[6].mxu0  ;;  %v8106_v26 = vpop.f32.mrb[6].mxu1 }
 0x4e0   :  { %v8182_v27 = vadd.f32 %v8181_v21, %v8179_v63  ;;  %v8200_v28 = vadd.f32 %v8199_v23, %v8198_v3  ;;  %v9398_v29 = vpack.c.bf16 %v7288_v19, %v7286_v15  ;;  %v8176_v30 = vsel %vm8166_vm0, %v7288_v19, 0.0  ;;  %v7291_v31 = vpop.f32.mrb[7].mxu0  ;;  %v8107_v32 = vpop.f32.mrb[7].mxu1 }
 0x4e1   :  { %v8229_v33 = vsel %vm8180_vm1, %v8224_v22, 0.0  ;;  %v8247_v34 = vsel %vm8180_vm1, %v8226_v24, 0.0  ;;  %v8190_v35 = vsel %vm8180_vm1, %v8176_v30, 0.0  ;;  %v8225_v36 = vmul.f32 %v8176_v30, %v8176_v30 }
 0x4e2   :  { %v8183_v37 = vrot.slane %v8182_v27, 4  ;;  %v8230_v38 = vadd.f32 %v8229_v33, %v8228_v9  ;;  %v8201_v39 = vrot.slane %v8200_v28, 4  ;;  %v8248_v40 = vadd.f32 %v8247_v34, %v8246_v10  ;;  %8153 = vst [vmem:[%s14609_s2 + $0x20] sm:$0x11] %v9398_v29 }
 0x4e3   :  { %v8191_v41 = vadd.f32 %v8190_v35, %v8189_v6  ;;  %v8238_v42 = vsel %vm8180_vm1, %v8225_v36, 0.0  ;;  %v9399_v43 = vpack.c.bf16 %v8104_v20, %v8102_v16  ;;  %v8178_v46 = vsel %vm8166_vm0, %v8104_v20, 0.0 }
 0x4e4   :  { %v8184_v44 = vadd.f32 %v8183_v37, %v8182_v27  ;;  %v8231_v45 = vrot.slane %v8230_v38, 4  ;;  %v8202_v47 = vadd.f32 %v8201_v39, %v8200_v28  ;;  %v8249_v48 = vrot.slane %v8248_v40, 4 }
 0x4e5   :  { %v8192_v50 = vrot.slane %v8191_v41, 4  ;;  %v8239_v52 = vadd.f32 %v8238_v42, %v8237_v13  ;;  %8154 = vst [vmem:[%s14609_s2 + $0x28] sm:$0x11] %v9399_v43  ;;  %v8208_v54 = vsel %vm8180_vm1, %v8178_v46, 0.0  ;;  %v8227_v55 = vmul.f32 %v8178_v46, %v8178_v46 }
 0x4e6   :  { %v8185_v56 = vrot.slane %v8184_v44, 2  ;;  %v8232_v57 = vadd.f32 %v8231_v45, %v8230_v38  ;;  %v8203_v51 = vrot.slane %v8202_v47, 2  ;;  %v8250_v60 = vadd.f32 %v8249_v48, %v8248_v40 }
 0x4e7   :  { %v8193_v58 = vadd.f32 %v8192_v50, %v8191_v41  ;;  %v8240_v53 = vrot.slane %v8239_v52, 4  ;;  %v8209_v59 = vadd.f32 %v8208_v54, %v8207_v11  ;;  %v8256_v61 = vsel %vm8180_vm1, %v8227_v55, 0.0 }
 0x4e8   :  { %v8186_v62 = vadd.f32 %v8185_v56, %v8184_v44  ;;  %v8233_v63 = vrot.slane %v8232_v57, 2  ;;  %v8204_v0 = vadd.f32 %v8203_v51, %v8202_v47  ;;  %v8251_v3 = vrot.slane %v8250_v60, 2 }
 0x4e9   :  { %v8194_v1 = vrot.slane %v8193_v58, 2  ;;  %v8241_v2 = vadd.f32 %v8240_v53, %v8239_v52  ;;  %v8210_v4 = vrot.slane %v8209_v59, 4  ;;  %v8257_v5 = vadd.f32 %v8256_v61, %v8255_v14 }
 0x4ea   :  { %v8187_v6 = vrot.slane %v8186_v62, 1  ;;  %v8234_v7 = vadd.f32 %v8233_v63, %v8232_v57  ;;  %v8205_v8 = vrot.slane %v8204_v0, 1  ;;  %v8252_v9 = vadd.f32 %v8251_v3, %v8250_v60 }
 0x4eb   :  { %v8195_v10 = vadd.f32 %v8194_v1, %v8193_v58  ;;  %v8242_v12 = vrot.slane %v8241_v2, 2  ;;  %v8211_v13 = vadd.f32 %v8210_v4, %v8209_v59  ;;  %v8258_v15 = vrot.slane %v8257_v5, 4 }
 0x4ec   :  { %v8235_v16 = vrot.slane %v8234_v7, 1  ;;  %v11209_v11 = vmov 1983009808   ;;  %v8253_v18 = vrot.slane %v8252_v9, 1  ;;  %v8188_v23 = vadd.f32 %v8187_v6, %v8186_v62 }
 0x4ed   :  { %v8276_v17 = vunpack.c.l.s4 %v11209_v11  ;;  %v8196_v19 = vrot.slane %v8195_v10, 1  ;;  %v8243_v20 = vadd.f32 %v8242_v12, %v8241_v2  ;;  %v8212_v21 = vrot.slane %v8211_v13, 2 }
 0x4ee   :  { %v8259_v22 = vadd.f32 %v8258_v15, %v8257_v5  ;;  %v8236_v24 = vadd.f32 %v8235_v16, %v8234_v7  ;;  %v8206_v14 = vadd.f32 %v8205_v8, %v8204_v0  ;;  %v8254_v25 = vadd.f32 %v8253_v18, %v8252_v9 }
 0x4ef   :  { %v8244_v26 = vrot.slane %v8243_v20, 1  ;;  %v8213_v27 = vadd.f32 %v8212_v21, %v8211_v13  ;;  %v8277_v30 = vunpack.c.0.s8 %v8276_v17  ;;  %v8197_v32 = vadd.f32 %v8196_v19, %v8195_v10 }
 0x4f0   :  { %v8260_v28 = vrot.slane %v8259_v22, 2  ;;  %v8265_v29 = vsel %vm8264_vm2, %v8188_v23, %v8236_v24  ;;  %v8267_v31 = vsel %vm8264_vm2, %v8206_v14, %v8254_v25 }
 0x4f1   :  { %v8245_v33 = vadd.f32 %v8244_v26, %v8243_v20  ;;  %v8214_v34 = vrot.slane %v8213_v27, 1  ;;  %v8280_v38 = vsub.s32 %v8277_v30, %v14566_v49 }
 0x4f2   :  { %v8261_v35 = vadd.f32 %v8260_v28, %v8259_v22 }
 0x4f3   :  { %v8266_v36 = vsel %vm8264_vm2, %v8197_v32, %v8245_v33  ;;  %v8215_v40 = vadd.f32 %v8214_v34, %v8213_v27 }
 0x4f4   :  { %v8262_v37 = vrot.slane %v8261_v35, 1  ;;  %v8273_v39 = vcombine.low %v8265_v29, %v8266_v36 }
 0x4f6   :  { %v8263_v41 = vadd.f32 %v8262_v37, %v8261_v35  ;;  %v8281_v43 = vrot.slane %v8273_v39, %v8280_v38 }
 0x4f8   :  { %v8268_v42 = vsel %vm8264_vm2, %v8215_v40, %v8263_v41 }
 0x4f9   :  { %v8274_v46 = vcombine.low %v8267_v31, %v8268_v42 }
 0x4fb   :  { %v8288_v44 = vrot.slane %v8274_v46, %v8280_v38 }
 0x4fd   :  { %v8289_v45 = vcombine.low %v8281_v43, %v8288_v44 }
 0x4ff   :  { %8291 = vst [vmem:[%s14610_s3] sm:$0xff] %v8289_v45 }

</bundles_post_ra>
